<compile_context>
chip_gen: v6e
topology: v6e:2x2x1
jax: 0.10.0
libtpu: 0.0.40
codegen_flags: <defaults>
</compile_context>

<pallas_src>
import jax
import jax.numpy as jnp
from jax.experimental import pallas as pl
from jax.experimental.pallas import tpu as pltpu

_EPS = 1e-5
_VMEM_LIMIT = 64 * 1024 * 1024   # <= physical VMEM on v5e/v6e (128MiB) and v7x (64MiB)


# =============================================================================
# Shared helper: depthwise 3x3 conv, stride 1, zero padding 1 (no pad buffer).
# =============================================================================
def _dw3x3(x, wdw):
    """x: (1, H, W, C) f32, wdw: (3, 3, C) f32 -> (1, H, W, C) f32.

    The three W-shifted taps (sublane shifts) are built once and reused across
    the kh loop; kh shifts act on the leading H dim (cheap full-tile copies,
    no masked stores and no (H+2, W+2) scratch buffer)."""
    _, H, W, C = x.shape
    zcol = jnp.zeros((1, H, 1, C), jnp.float32)
    taps_w = (
        jnp.concatenate([zcol, x[:, :, :W - 1, :]], axis=2),   # tap x[.., w-1, .]
        x,                                                     # tap x[.., w  , .]
        jnp.concatenate([x[:, :, 1:, :], zcol], axis=2),       # tap x[.., w+1, .]
    )
    zrow = jnp.zeros((1, 1, W, C), jnp.float32)
    acc = jnp.zeros((1, H, W, C), jnp.float32)
    for kh in range(3):
        for kw in range(3):
            t = taps_w[kw]
            if kh == 0:          # needs x[h-1]
                t = jnp.concatenate([zrow, t[:, :H - 1]], axis=1)
            elif kh == 2:        # needs x[h+1]
                t = jnp.concatenate([t[:, 1:], zrow], axis=1)
            acc = acc + t * wdw[kh, kw]
    return acc


# =============================================================================
# Kernel 1: depthwise convs + per-batch BN partial sums.   grid=(B,), parallel
# =============================================================================
def _dwconv_kernel(x_ref, wdw_ref, wse_ref, wso_ref,
                   yeo_ref, sdw_ref, seo_ref):
    _, H, W, C = x_ref.shape
    sr = wse_ref.shape[0]
    _, Hs, Ws, _ = yeo_ref.shape

    x = x_ref[...].astype(jnp.float32)

    # ---- Dw 3x3: only BN partial sums are emitted; K2 recomputes the
    # (bitwise identical) conv instead of round-tripping it through HBM. ----
    q_raw = _dw3x3(x, wdw_ref[...].astype(jnp.float32))
    sdw_ref[:, 0, :] = jnp.sum(q_raw, axis=(1, 2))
    sdw_ref[:, 1, :] = jnp.sum(q_raw * q_raw, axis=(1, 2))

    # ---- Dw_sr: depthwise k=s=sr, groups=C, 2C outputs as [even | odd]. ----
    # PyTorch's channel interleave + chunk(2) are folded into the host-side
    # 1x1 conv weights, so no lane gathers are needed on activation data.
    wse = wse_ref[...].astype(jnp.float32)
    wso = wso_ref[...].astype(jnp.float32)
    acc_e = jnp.zeros((1, Hs, Ws, C), jnp.float32)
    acc_o = jnp.zeros((1, Hs, Ws, C), jnp.float32)
    for dh in range(sr):
        for dw in range(sr):
            tap = x_ref[:, pl.ds(dh, Hs, sr), pl.ds(dw, Ws, sr), :].astype(jnp.float32)
            acc_e = acc_e + tap * wse[dh, dw]
            acc_o = acc_o + tap * wso[dh, dw]
    eo = jnp.concatenate([acc_e, acc_o], axis=-1)             # (1, Hs, Ws, 2C)
    eo_r = eo.astype(jnp.bfloat16).astype(jnp.float32)        # exactly what K2 reads
    yeo_ref[...] = eo_r.astype(jnp.bfloat16)
    seo_ref[:, 0, :] = jnp.sum(eo_r, axis=(1, 2))
    seo_ref[:, 1, :] = jnp.sum(eo_r * eo_r, axis=(1, 2))


# =============================================================================
# Kernel 2: BN+PReLU fused with the 1x1 convs (single block matmul) + stats.
# grid=(B,), parallel
# =============================================================================
def _pwconv_kernel(x_ref, wdw_ref, yeo_ref,
                   s_dw_ref, t_dw_ref, a_dw_ref,
                   s_eo_ref, t_eo_ref, a_eo_ref,
                   wq_ref, wblk_ref,
                   qcT_ref, kcT_ref, vc_ref, sq_ref, sk_ref, sv_ref):
    _, H, W, C = x_ref.shape
    _, Hs, Ws, C2 = yeo_ref.shape
    N, M = H * W, Hs * Ws

    def bn_prelu(y, s, t, a):
        yh = y * s + t
        return jnp.where(yh >= 0.0, yh, a * yh)

    # Recompute the cheap 9-tap depthwise conv instead of reloading y_dw
    # (trades ~18 VPU flops/element for a full-res HBM write+read).
    q_raw = _dw3x3(x_ref[...].astype(jnp.float32), wdw_ref[...].astype(jnp.float32))
    q_act = bn_prelu(q_raw.reshape(N, C), s_dw_ref[...], t_dw_ref[...], a_dw_ref[...])
    eo_act = bn_prelu(yeo_ref[...].astype(jnp.float32).reshape(M, C2),
                      s_eo_ref[...], t_eo_ref[...], a_eo_ref[...])

    # 1x1 convs on the MXU: one pass for q, one block matmul for [v | k].
    qc = jnp.dot(q_act.astype(jnp.bfloat16), wq_ref[...],
                 preferred_element_type=jnp.float32)                    # (N, Ck)
    kv = jnp.dot(eo_act.astype(jnp.bfloat16), wblk_ref[...],
                 preferred_element_type=jnp.float32)                    # (M, C+Ck)
    vc = kv[:, :C]
    kc = kv[:, C:]

    # bf16-round once; BN partial sums (fp32) are taken over exactly the
    # values K3 will read back.
    qc_r = qc.astype(jnp.bfloat16).astype(jnp.float32)
    kc_r = kc.astype(jnp.bfloat16).astype(jnp.float32)
    vc_r = vc.astype(jnp.bfloat16).astype(jnp.float32)

    # q / k are stored channel-major so HBM stores (and K3 loads) are lane
    # dense (Ck << 128 would otherwise give masked vst.msk stores).
    qcT_ref[0] = jnp.transpose(qc_r, (1, 0)).astype(jnp.bfloat16)       # (Ck, N)
    kcT_ref[0] = jnp.transpose(kc_r, (1, 0)).astype(jnp.bfloat16)       # (Ck, M)
    vc_ref[0] = vc_r.astype(jnp.bfloat16)                               # (M, C)

    sq_ref[:, 0, :] = jnp.sum(qc_r, axis=0, keepdims=True)
    sq_ref[:, 1, :] = jnp.sum(qc_r * qc_r, axis=0, keepdims=True)
    sk_ref[:, 0, :] = jnp.sum(kc_r, axis=0, keepdims=True)
    sk_ref[:, 1, :] = jnp.sum(kc_r * kc_r, axis=0, keepdims=True)
    sv_ref[:, 0, :] = jnp.sum(vc_r, axis=0, keepdims=True)
    sv_ref[:, 1, :] = jnp.sum(vc_r * vc_r, axis=0, keepdims=True)


# =============================================================================
# Kernel 3: BN+PReLU of q/k/v fused with attention + output projection.
# grid=(B, N//TQ): b "parallel", query-tile axis "arbitrary" (VMEM cache of
# per-batch k / v_proj written at t==0).  Output is channel-major.
# =============================================================================
def _attn_kernel(qcT_ref, kcT_ref, vc_ref,
                 s_q_ref, t_q_ref, a_q_ref,
                 s_k_ref, t_k_ref, a_k_ref,
                 s_v_ref, t_v_ref, a_v_ref,
                 wp_ref, bp_ref,
                 o_ref,
                 k_scr, vp_scr):
    t = pl.program_id(1)

    def bn_prelu(y, s, sh, a):
        yh = y * s + sh
        return jnp.where(yh >= 0.0, yh, a * yh)

    # k activation and v_proj = PReLU(BN(v)) @ Wproj are query-tile
    # independent: compute once per batch item and cache in VMEM scratch.
    @pl.when(t == 0)
    def _():
        k_act = bn_prelu(kcT_ref[0].astype(jnp.float32),
                         s_k_ref[...], t_k_ref[...], a_k_ref[...])       # (Ck, M)
        k_scr[...] = k_act.astype(jnp.bfloat16)
        v_act = bn_prelu(vc_ref[0].astype(jnp.float32),
                         s_v_ref[...], t_v_ref[...], a_v_ref[...])       # (M, C)
        vp = jnp.dot(v_act.astype(jnp.bfloat16), wp_ref[...],
                     preferred_element_type=jnp.float32)                 # (M, C)
        vp_scr[...] = vp.astype(jnp.bfloat16)

    # q tile.  The softmax scale C**-0.5 is folded into s_q / t_q on the host
    # (exact, since PReLU is positively homogeneous).
    q_act = bn_prelu(qcT_ref[0].astype(jnp.float32),
                     s_q_ref[...], t_q_ref[...], a_q_ref[...])           # (Ck, TQ)
    qt = jnp.transpose(q_act, (1, 0)).astype(jnp.bfloat16)               # (TQ, Ck)

    # TODO(synk): flash-style online softmax over M (tile k/v) for large images
    # so the working set stays bounded on v7x's 64 MiB VMEM.
    logits = jnp.dot(qt, k_scr[...], preferred_element_type=jnp.float32)  # (TQ, M)
    m = jnp.max(logits, axis=-1, keepdims=True)
    p = jnp.exp(logits - m)                          # unnormalized softmax
    denom = jnp.sum(p, axis=-1, keepdims=True)       # (TQ, 1)

    out = jnp.dot(p.astype(jnp.bfloat16), vp_scr[...],
                  preferred_element_type=jnp.float32)                     # (TQ, C)
    out = out * pl.reciprocal(denom, approx=True) + bp_ref[...]
    o_ref[0] = jnp.transpose(out, (1, 0))                                 # (C, TQ)


# =============================================================================
# Host-side helpers (parameter preparation + tiny BN reductions)
# =============================================================================
def _bn_affine(stats, count, gamma, beta):
    """stats: (B, 2, Cc) per-batch [sum, sumsq] fp32 -> BN scale/shift (1, Cc)."""
    tot = jnp.sum(stats, axis=0)
    mean = tot[0] / count
    var = jnp.maximum(tot[1] / count - mean * mean, 0.0)   # biased (training-mode)
    s = gamma * jax.lax.rsqrt(var + _EPS)
    t = beta - mean * s
    return s.reshape(1, -1), t.reshape(1, -1)


def _prepare_weights(params, C, Ck):
    half = C // 2
    wdw = jnp.transpose(params["dw_w"][:, 0], (1, 2, 0)).astype(jnp.float32)      # (3,3,C)
    wse = jnp.transpose(params["dwsr_w"][0::2, 0], (1, 2, 0)).astype(jnp.float32)  # even
    wso = jnp.transpose(params["dwsr_w"][1::2, 0], (1, 2, 0)).astype(jnp.float32)  # odd
    pw = params["pw_w"].reshape(C, C)                          # (out, in) over torch v channels
    pwk = params["pwk_w"].reshape(Ck, C)
    pwq = params["pwq_w"].reshape(Ck, C)
    # Fold the grouped-conv channel interleave + chunk(2) into the 1x1 weights:
    #   even-stream channel i == Dw_sr output channel 2i ; odd -> 2i+1
    #   v = output channels [0, C)  -> stream channels [0, C/2)
    #   k = output channels [C, 2C) -> stream channels [C/2, C)
    wve = jnp.zeros((C, C), jnp.float32).at[:half].set(pw[:, 0::2].T)
    wvo = jnp.zeros((C, C), jnp.float32).at[:half].set(pw[:, 1::2].T)
    wke = jnp.zeros((C, Ck), jnp.float32).at[half:].set(pwk[:, 0::2].T)
    wko = jnp.zeros((C, Ck), jnp.float32).at[half:].set(pwk[:, 1::2].T)
    wblk = jnp.block([[wve, wke], [wvo, wko]]).astype(jnp.bfloat16)   # (2C, C+Ck): [v | k]
    wq = pwq.T.astype(jnp.bfloat16)                                   # (C, Ck)
    wp = params["proj_w"].T.astype(jnp.bfloat16)                      # (C, C)
    bp = params["proj_b"].reshape(1, C).astype(jnp.float32)
    return wdw, wse, wso, wq, wblk, wp, bp


# =============================================================================
# HSSM forward
# =============================================================================
def hssm_forward(x_nchw, params):
    B, C, H, W = x_nchw.shape
    sr = params["dwsr_w"].shape[-1]
    Ck = params["pwq_w"].shape[0]
    C2 = 2 * C
    Hs, Ws = H // sr, W // sr
    N, M = H * W, Hs * Ws

    # TODO(synk): accept NHWC upstream (or read NCHW blocks + in-kernel XLU
    # relayout) to drop this extra full-resolution HBM pass before K1/K2.
    x = jnp.transpose(x_nchw, (0, 2, 3, 1)).astype(jnp.float32)   # NHWC (C on lanes)
    wdw, wse, wso, wq, wblk, wp, bp = _prepare_weights(params, C, Ck)

    cparams_b = pltpu.CompilerParams(dimension_semantics=("parallel",),
                                     vmem_limit_bytes=_VMEM_LIMIT)

    # ----------------------------- K1 -----------------------------
    # TODO(synk): add a "parallel" spatial (row-tile) grid axis for v7x (2 TCs)
    # and very large H*W; whole-image blocks are fine at these sizes.
    y_eo, st_dw, st_eo = pl.pallas_call(
        _dwconv_kernel,
        grid=(B,),
        in_specs=[
            pl.BlockSpec((1, H, W, C), lambda b: (b, 0, 0, 0)),
            pl.BlockSpec((3, 3, C), lambda b: (0, 0, 0)),
            pl.BlockSpec((sr, sr, C), lambda b: (0, 0, 0)),
            pl.BlockSpec((sr, sr, C), lambda b: (0, 0, 0)),
        ],
        out_specs=(
            pl.BlockSpec((1, Hs, Ws, C2), lambda b: (b, 0, 0, 0)),
            pl.BlockSpec((1, 2, C), lambda b: (b, 0, 0)),
            pl.BlockSpec((1, 2, C2), lambda b: (b, 0, 0)),
        ),
        out_shape=(
            jax.ShapeDtypeStruct((B, Hs, Ws, C2), jnp.bfloat16),
            jax.ShapeDtypeStruct((B, 2, C), jnp.float32),
            jax.ShapeDtypeStruct((B, 2, C2), jnp.float32),
        ),
        compiler_params=cparams_b,
    )(x, wdw, wse, wso)

    # training-mode BN scale/shift (tiny per-channel reductions in plain JAX)
    g_eo = jnp.concatenate([params["dwsr_g"][0::2], params["dwsr_g"][1::2]])
    b_eo = jnp.concatenate([params["dwsr_b"][0::2], params["dwsr_b"][1::2]])
    a_eo = jnp.concatenate([params["dwsr_a"][0::2], params["dwsr_a"][1::2]])
    s_dw, t_dw = _bn_affine(st_dw, B * N, params["dw_g"], params["dw_b"])
    s_eo, t_eo = _bn_affine(st_eo, B * M, g_eo, b_eo)
    a_dw2 = params["dw_a"].reshape(1, C)
    a_eo2 = a_eo.reshape(1, C2)

    # ----------------------------- K2 -----------------------------
    def vec(c):
        return pl.BlockSpec((1, c), lambda b: (0, 0))

    qcT, kcT, vc, st_q, st_k, st_v = pl.pallas_call(
        _pwconv_kernel,
        grid=(B,),
        in_specs=[
            pl.BlockSpec((1, H, W, C), lambda b: (b, 0, 0, 0)),
            pl.BlockSpec((3, 3, C), lambda b: (0, 0, 0)),
            pl.BlockSpec((1, Hs, Ws, C2), lambda b: (b, 0, 0, 0)),
            vec(C), vec(C), vec(C),
            vec(C2), vec(C2), vec(C2),
            pl.BlockSpec((C, Ck), lambda b: (0, 0)),
            pl.BlockSpec((C2, C + Ck), lambda b: (0, 0)),
        ],
        out_specs=(
            pl.BlockSpec((1, Ck, N), lambda b: (b, 0, 0)),
            pl.BlockSpec((1, Ck, M), lambda b: (b, 0, 0)),
            pl.BlockSpec((1, M, C), lambda b: (b, 0, 0)),
            pl.BlockSpec((1, 2, Ck), lambda b: (b, 0, 0)),
            pl.BlockSpec((1, 2, Ck), lambda b: (b, 0, 0)),
            pl.BlockSpec((1, 2, C), lambda b: (b, 0, 0)),
        ),
        out_shape=(
            jax.ShapeDtypeStruct((B, Ck, N), jnp.bfloat16),
            jax.ShapeDtypeStruct((B, Ck, M), jnp.bfloat16),
            jax.ShapeDtypeStruct((B, M, C), jnp.bfloat16),
            jax.ShapeDtypeStruct((B, 2, Ck), jnp.float32),
            jax.ShapeDtypeStruct((B, 2, Ck), jnp.float32),
            jax.ShapeDtypeStruct((B, 2, C), jnp.float32),
        ),
        compiler_params=cparams_b,
    )(x, wdw, y_eo,
      s_dw, t_dw, a_dw2,
      s_eo, t_eo, a_eo2,
      wq, wblk)

    scale = float(C) ** -0.5
    s_q, t_q = _bn_affine(st_q, B * N, params["pwq_g"], params["pwq_b"])
    s_k, t_k = _bn_affine(st_k, B * M, params["pwk_g"], params["pwk_b"])
    s_v, t_v = _bn_affine(st_v, B * M, params["pw_g"], params["pw_b"])
    # fold the attention scale into q's BN affine (PReLU is positively homogeneous)
    s_qc = (s_q * scale).reshape(Ck, 1)
    t_qc = (t_q * scale).reshape(Ck, 1)
    a_qc = params["pwq_a"].reshape(Ck, 1)
    s_kc = s_k.reshape(Ck, 1)
    t_kc = t_k.reshape(Ck, 1)
    a_kc = params["pwk_a"].reshape(Ck, 1)
    a_v2 = params["pw_a"].reshape(1, C)

    # ----------------------------- K3 -----------------------------
    tq = 128  # TODO(synk): raise to 256-512 on 128 MiB-VMEM parts when tq*M*4B allows
    n_pad = pl.cdiv(N, tq) * tq
    qcT_p = qcT if n_pad == N else jnp.pad(qcT, ((0, 0), (0, 0), (0, n_pad - N)))
    nqt = n_pad // tq

    def fixed(shape):
        return pl.BlockSpec(shape, lambda b, t: (0, 0))

    out_bcn = pl.pallas_call(
        _attn_kernel,
        grid=(B, nqt),
        in_specs=[
            pl.BlockSpec((1, Ck, tq), lambda b, t: (b, 0, t)),
            pl.BlockSpec((1, Ck, M), lambda b, t: (b, 0, 0)),
            pl.BlockSpec((1, M, C), lambda b, t: (b, 0, 0)),
            fixed((Ck, 1)), fixed((Ck, 1)), fixed((Ck, 1)),
            fixed((Ck, 1)), fixed((Ck, 1)), fixed((Ck, 1)),
            fixed((1, C)), fixed((1, C)), fixed((1, C)),
            fixed((C, C)),
            fixed((1, C)),
        ],
        out_specs=pl.BlockSpec((1, C, tq), lambda b, t: (b, 0, t)),
        out_shape=jax.ShapeDtypeStruct((B, C, n_pad), jnp.float32),
        scratch_shapes=[pltpu.VMEM((Ck, M), jnp.bfloat16),
                        pltpu.VMEM((M, C), jnp.bfloat16)],
        compiler_params=pltpu.CompilerParams(
            dimension_semantics=("parallel", "arbitrary"),
            vmem_limit_bytes=_VMEM_LIMIT),
    )(qcT_p, kcT, vc,
      s_qc, t_qc, a_qc,
      s_kc, t_kc, a_kc,
      s_v, t_v, a_v2,
      wp, bp)

    if n_pad != N:
        out_bcn = out_bcn[:, :, :N]
    return out_bcn.reshape(B, C, H, W)     # channel-major output: free reshape to NCHW


# =============================================================================
# Pure-JAX reference (mirrors the torch module) for a correctness check.
# =============================================================================
def hssm_reference(x, params, pw_cr):
    B, C, H, W = x.shape
    sr = params["dwsr_w"].shape[-1]
    Ck = C // pw_cr
    hp = jax.lax.Precision.HIGHEST

    def conv(y, w, stride, pad, groups):
        return jax.lax.conv_general_dilated(
            y, w, window_strides=(stride, stride),
            padding=[(pad, pad), (pad, pad)],
            dimension_numbers=("NCHW", "OIHW", "NCHW"),
            feature_group_count=groups, precision=hp)

    def bn_prelu(y, g, b, a):
        mean = jnp.mean(y, axis=(0, 2, 3), keepdims=True)
        var = jnp.mean((y - mean) ** 2, axis=(0, 2, 3), keepdims=True)
        yh = (y - mean) * jax.lax.rsqrt(var + _EPS)
        yh = yh * g[None, :, None, None] + b[None, :, None, None]
        return jnp.where(yh >= 0.0, yh, a[None, :, None, None] * yh)

    y_sr = bn_prelu(conv(x, params["dwsr_w"], sr, 0, C),
                    params["dwsr_g"], params["dwsr_b"], params["dwsr_a"])
    v, k = jnp.split(y_sr, 2, axis=1)
    q = bn_prelu(conv(x, params["dw_w"], 1, 1, C),
                 params["dw_g"], params["dw_b"], params["dw_a"])
    q = bn_prelu(conv(q, params["pwq_w"], 1, 0, 1),
                 params["pwq_g"], params["pwq_b"], params["pwq_a"])
    k = bn_prelu(conv(k, params["pwk_w"], 1, 0, 1),
                 params["pwk_g"], params["pwk_b"], params["pwk_a"])
    v = bn_prelu(conv(v, params["pw_w"], 1, 0, 1),
                 params["pw_g"], params["pw_b"], params["pw_a"])
    q = q.reshape(B, Ck, -1).transpose(0, 2, 1)
    k = k.reshape(B, Ck, -1).transpose(0, 2, 1)
    v = v.reshape(B, C, -1).transpose(0, 2, 1)
    attn = jnp.einsum("bnc,bmc->bnm", q, k, precision=hp) * (float(C) ** -0.5)
    attn = jax.nn.softmax(attn, axis=-1)
    out = jnp.einsum("bnm,bmc->bnc", attn, v, precision=hp)
    out = jnp.einsum("bnc,oc->bno", out, params["proj_w"], precision=hp) + params["proj_b"]
    return out.transpose(0, 2, 1).reshape(B, C, H, W)


# =============================================================================
# Example / smoke test
# =============================================================================
if __name__ == "__main__":
    B, C, H, W = 2, 32, 16, 16          # HSSM(dim_in=32, dw_sr=2, pw_cr=4)
    dw_sr, pw_cr = 2, 4
    Ck = C // pw_cr

    ks = jax.random.split(jax.random.PRNGKey(0), 24)

    def nrm(k, shape, s=0.3):
        return s * jax.random.normal(k, shape, jnp.float32)

    params = {
        # Dw_sr: Conv2d(C, 2C, k=sr, s=sr, p=0, groups=C, bias=False) + BN(2C) + PReLU(2C)
        "dwsr_w": nrm(ks[0], (2 * C, 1, dw_sr, dw_sr)),
        "dwsr_g": 1.0 + nrm(ks[1], (2 * C,)),
        "dwsr_b": nrm(ks[2], (2 * C,)),
        "dwsr_a": 0.25 + nrm(ks[3], (2 * C,), 0.2),
        # Dw: Conv2d(C, C, k=3, s=1, p=1, groups=C) + BN + PReLU
        "dw_w": nrm(ks[4], (C, 1, 3, 3)),
        "dw_g": 1.0 + nrm(ks[5], (C,)),
        "dw_b": nrm(ks[6], (C,)),
        "dw_a": 0.25 + nrm(ks[7], (C,), 0.2),
        # Pw_cr_q: Conv2d(C, C//pw_cr, 1) + BN + PReLU
        "pwq_w": nrm(ks[8], (Ck, C, 1, 1)),
        "pwq_g": 1.0 + nrm(ks[9], (Ck,)),
        "pwq_b": nrm(ks[10], (Ck,)),
        "pwq_a": 0.25 + nrm(ks[11], (Ck,), 0.2),
        # Pw_cr_k: Conv2d(C, C//pw_cr, 1) + BN + PReLU
        "pwk_w": nrm(ks[12], (Ck, C, 1, 1)),
        "pwk_g": 1.0 + nrm(ks[13], (Ck,)),
        "pwk_b": nrm(ks[14], (Ck,)),
        "pwk_a": 0.25 + nrm(ks[15], (Ck,), 0.2),
        # Pw: Conv2d(C, C, 1) + BN + PReLU
        "pw_w": nrm(ks[16], (C, C, 1, 1)),
        "pw_g": 1.0 + nrm(ks[17], (C,)),
        "pw_b": nrm(ks[18], (C,)),
        "pw_a": 0.25 + nrm(ks[19], (C,), 0.2),
        # proj: Linear(C, C)
        "proj_w": nrm(ks[20], (C, C), 0.2),
        "proj_b": nrm(ks[21], (C,), 0.1),
    }
    x = jax.random.normal(ks[22], (B, C, H, W), jnp.float32)

    out = jax.jit(hssm_forward)(x, params)
    jax.block_until_ready(out)

    assert out.shape == (B, C, H, W), out.shape
    assert bool(jnp.all(jnp.isfinite(out)))

    # correctness check against a pure-JAX fp32 (XLA) reference of the torch
    # module; bf16 intermediates / bf16 MXU operands bound the achievable
    # accuracy, hence the tolerances below.
    ref = hssm_reference(x, params, pw_cr)
    err_max = float(jnp.max(jnp.abs(out - ref)))
    err_mean = float(jnp.mean(jnp.abs(out - ref)))
    assert err_max < 0.12 and err_mean < 0.03, (err_max, err_mean)

    print("KERNEL_OK")
</pallas_src>

<mosaic_0001>
module attributes {stable_mosaic.version = 11 : i64} {
  func.func @_dwconv_kernel(%arg0: i32, %arg1: memref<1x16x16x32xf32, #tpu.memory_space<vmem>>, %arg2: memref<3x3x32xf32, #tpu.memory_space<vmem>>, %arg3: memref<2x2x32xf32, #tpu.memory_space<vmem>>, %arg4: memref<2x2x32xf32, #tpu.memory_space<vmem>>, %arg5: memref<1x8x8x64xbf16, #tpu.memory_space<vmem>>, %arg6: memref<1x2x32xf32, #tpu.memory_space<vmem>>, %arg7: memref<1x2x64xf32, #tpu.memory_space<vmem>>) attributes {dimension_semantics = [#tpu.dimension_semantics<parallel>], iteration_bounds = array<i64: 2>, scalar_prefetch = 0 : i64, scratch_operands = 0 : i64, tpu.core_type = #tpu.core_type<tc>, window_params = [{transform_indices = @transform_0, window_bounds = array<i64: 1, 16, 16, 32>}, {pipeline_mode = #tpu.pipeline_mode<synchronous>, transform_indices = @transform_1, window_bounds = array<i64: 3, 3, 32>}, {pipeline_mode = #tpu.pipeline_mode<synchronous>, transform_indices = @transform_2, window_bounds = array<i64: 2, 2, 32>}, {pipeline_mode = #tpu.pipeline_mode<synchronous>, transform_indices = @transform_3, window_bounds = array<i64: 2, 2, 32>}, {transform_indices = @transform_4, window_bounds = array<i64: 1, 8, 8, 64>}, {transform_indices = @transform_5, window_bounds = array<i64: 1, 2, 32>}, {transform_indices = @transform_6, window_bounds = array<i64: 1, 2, 64>}]} {
    %c0 = arith.constant 0 : index
    %c0_0 = arith.constant 0 : index
    %c0_1 = arith.constant 0 : index
    %c0_2 = arith.constant 0 : index
    %0 = vector.load %arg1[%c0, %c0_0, %c0_1, %c0_2] : memref<1x16x16x32xf32, #tpu.memory_space<vmem>>, vector<1x16x16x32xf32>
    %c0_3 = arith.constant 0 : index
    %c0_4 = arith.constant 0 : index
    %c0_5 = arith.constant 0 : index
    %1 = vector.load %arg2[%c0_3, %c0_4, %c0_5] : memref<3x3x32xf32, #tpu.memory_space<vmem>>, vector<3x3x32xf32>
    %cst = arith.constant 0.000000e+00 : f32
    %2 = vector.broadcast %cst : f32 to vector<1x16x1x32xf32>
    %3 = vector.extract_strided_slice %0 {offsets = [0, 0, 0, 0], sizes = [1, 16, 15, 32], strides = [1, 1, 1, 1]} : vector<1x16x16x32xf32> to vector<1x16x15x32xf32>
    %4 = tpu.concatenate %2, %3 in 2 : vector<1x16x1x32xf32>, vector<1x16x15x32xf32> -> vector<1x16x16x32xf32>
    %5 = vector.extract_strided_slice %0 {offsets = [0, 0, 1, 0], sizes = [1, 16, 15, 32], strides = [1, 1, 1, 1]} : vector<1x16x16x32xf32> to vector<1x16x15x32xf32>
    %6 = tpu.concatenate %5, %2 in 2 : vector<1x16x15x32xf32>, vector<1x16x1x32xf32> -> vector<1x16x16x32xf32>
    %cst_6 = arith.constant 0.000000e+00 : f32
    %7 = vector.broadcast %cst_6 : f32 to vector<1x1x16x32xf32>
    %cst_7 = arith.constant 0.000000e+00 : f32
    %8 = vector.broadcast %cst_7 : f32 to vector<1x16x16x32xf32>
    %9 = vector.extract_strided_slice %4 {offsets = [0, 0, 0, 0], sizes = [1, 15, 16, 32], strides = [1, 1, 1, 1]} : vector<1x16x16x32xf32> to vector<1x15x16x32xf32>
    %10 = tpu.concatenate %7, %9 in 1 : vector<1x1x16x32xf32>, vector<1x15x16x32xf32> -> vector<1x16x16x32xf32>
    %11 = vector.extract_strided_slice %1 {offsets = [0, 0, 0], sizes = [1, 1, 32], strides = [1, 1, 1]} : vector<3x3x32xf32> to vector<1x1x32xf32>
    %12 = vector.shape_cast %11 : vector<1x1x32xf32> to vector<32xf32>
    %13 = vector.shape_cast %12 : vector<32xf32> to vector<1x1x1x32xf32>
    %14 = vector.broadcast %13 : vector<1x1x1x32xf32> to vector<1x16x16x32xf32>
    %15 = arith.mulf %10, %14 : vector<1x16x16x32xf32>
    %16 = arith.addf %8, %15 : vector<1x16x16x32xf32>
    %17 = vector.extract_strided_slice %0 {offsets = [0, 0, 0, 0], sizes = [1, 15, 16, 32], strides = [1, 1, 1, 1]} : vector<1x16x16x32xf32> to vector<1x15x16x32xf32>
    %18 = tpu.concatenate %7, %17 in 1 : vector<1x1x16x32xf32>, vector<1x15x16x32xf32> -> vector<1x16x16x32xf32>
    %19 = vector.extract_strided_slice %1 {offsets = [0, 1, 0], sizes = [1, 1, 32], strides = [1, 1, 1]} : vector<3x3x32xf32> to vector<1x1x32xf32>
    %20 = vector.shape_cast %19 : vector<1x1x32xf32> to vector<32xf32>
    %21 = vector.shape_cast %20 : vector<32xf32> to vector<1x1x1x32xf32>
    %22 = vector.broadcast %21 : vector<1x1x1x32xf32> to vector<1x16x16x32xf32>
    %23 = arith.mulf %18, %22 : vector<1x16x16x32xf32>
    %24 = arith.addf %16, %23 : vector<1x16x16x32xf32>
    %25 = vector.extract_strided_slice %6 {offsets = [0, 0, 0, 0], sizes = [1, 15, 16, 32], strides = [1, 1, 1, 1]} : vector<1x16x16x32xf32> to vector<1x15x16x32xf32>
    %26 = tpu.concatenate %7, %25 in 1 : vector<1x1x16x32xf32>, vector<1x15x16x32xf32> -> vector<1x16x16x32xf32>
    %27 = vector.extract_strided_slice %1 {offsets = [0, 2, 0], sizes = [1, 1, 32], strides = [1, 1, 1]} : vector<3x3x32xf32> to vector<1x1x32xf32>
    %28 = vector.shape_cast %27 : vector<1x1x32xf32> to vector<32xf32>
    %29 = vector.shape_cast %28 : vector<32xf32> to vector<1x1x1x32xf32>
    %30 = vector.broadcast %29 : vector<1x1x1x32xf32> to vector<1x16x16x32xf32>
    %31 = arith.mulf %26, %30 : vector<1x16x16x32xf32>
    %32 = arith.addf %24, %31 : vector<1x16x16x32xf32>
    %33 = vector.extract_strided_slice %1 {offsets = [1, 0, 0], sizes = [1, 1, 32], strides = [1, 1, 1]} : vector<3x3x32xf32> to vector<1x1x32xf32>
    %34 = vector.shape_cast %33 : vector<1x1x32xf32> to vector<32xf32>
    %35 = vector.shape_cast %34 : vector<32xf32> to vector<1x1x1x32xf32>
    %36 = vector.broadcast %35 : vector<1x1x1x32xf32> to vector<1x16x16x32xf32>
    %37 = arith.mulf %4, %36 : vector<1x16x16x32xf32>
    %38 = arith.addf %32, %37 : vector<1x16x16x32xf32>
    %39 = vector.extract_strided_slice %1 {offsets = [1, 1, 0], sizes = [1, 1, 32], strides = [1, 1, 1]} : vector<3x3x32xf32> to vector<1x1x32xf32>
    %40 = vector.shape_cast %39 : vector<1x1x32xf32> to vector<32xf32>
    %41 = vector.shape_cast %40 : vector<32xf32> to vector<1x1x1x32xf32>
    %42 = vector.broadcast %41 : vector<1x1x1x32xf32> to vector<1x16x16x32xf32>
    %43 = arith.mulf %0, %42 : vector<1x16x16x32xf32>
    %44 = arith.addf %38, %43 : vector<1x16x16x32xf32>
    %45 = vector.extract_strided_slice %1 {offsets = [1, 2, 0], sizes = [1, 1, 32], strides = [1, 1, 1]} : vector<3x3x32xf32> to vector<1x1x32xf32>
    %46 = vector.shape_cast %45 : vector<1x1x32xf32> to vector<32xf32>
    %47 = vector.shape_cast %46 : vector<32xf32> to vector<1x1x1x32xf32>
    %48 = vector.broadcast %47 : vector<1x1x1x32xf32> to vector<1x16x16x32xf32>
    %49 = arith.mulf %6, %48 : vector<1x16x16x32xf32>
    %50 = arith.addf %44, %49 : vector<1x16x16x32xf32>
    %51 = vector.extract_strided_slice %4 {offsets = [0, 1, 0, 0], sizes = [1, 15, 16, 32], strides = [1, 1, 1, 1]} : vector<1x16x16x32xf32> to vector<1x15x16x32xf32>
    %52 = tpu.concatenate %51, %7 in 1 : vector<1x15x16x32xf32>, vector<1x1x16x32xf32> -> vector<1x16x16x32xf32>
    %53 = vector.extract_strided_slice %1 {offsets = [2, 0, 0], sizes = [1, 1, 32], strides = [1, 1, 1]} : vector<3x3x32xf32> to vector<1x1x32xf32>
    %54 = vector.shape_cast %53 : vector<1x1x32xf32> to vector<32xf32>
    %55 = vector.shape_cast %54 : vector<32xf32> to vector<1x1x1x32xf32>
    %56 = vector.broadcast %55 : vector<1x1x1x32xf32> to vector<1x16x16x32xf32>
    %57 = arith.mulf %52, %56 : vector<1x16x16x32xf32>
    %58 = arith.addf %50, %57 : vector<1x16x16x32xf32>
    %59 = vector.extract_strided_slice %0 {offsets = [0, 1, 0, 0], sizes = [1, 15, 16, 32], strides = [1, 1, 1, 1]} : vector<1x16x16x32xf32> to vector<1x15x16x32xf32>
    %60 = tpu.concatenate %59, %7 in 1 : vector<1x15x16x32xf32>, vector<1x1x16x32xf32> -> vector<1x16x16x32xf32>
    %61 = vector.extract_strided_slice %1 {offsets = [2, 1, 0], sizes = [1, 1, 32], strides = [1, 1, 1]} : vector<3x3x32xf32> to vector<1x1x32xf32>
    %62 = vector.shape_cast %61 : vector<1x1x32xf32> to vector<32xf32>
    %63 = vector.shape_cast %62 : vector<32xf32> to vector<1x1x1x32xf32>
    %64 = vector.broadcast %63 : vector<1x1x1x32xf32> to vector<1x16x16x32xf32>
    %65 = arith.mulf %60, %64 : vector<1x16x16x32xf32>
    %66 = arith.addf %58, %65 : vector<1x16x16x32xf32>
    %67 = vector.extract_strided_slice %6 {offsets = [0, 1, 0, 0], sizes = [1, 15, 16, 32], strides = [1, 1, 1, 1]} : vector<1x16x16x32xf32> to vector<1x15x16x32xf32>
    %68 = tpu.concatenate %67, %7 in 1 : vector<1x15x16x32xf32>, vector<1x1x16x32xf32> -> vector<1x16x16x32xf32>
    %69 = vector.extract_strided_slice %1 {offsets = [2, 2, 0], sizes = [1, 1, 32], strides = [1, 1, 1]} : vector<3x3x32xf32> to vector<1x1x32xf32>
    %70 = vector.shape_cast %69 : vector<1x1x32xf32> to vector<32xf32>
    %71 = vector.shape_cast %70 : vector<32xf32> to vector<1x1x1x32xf32>
    %72 = vector.broadcast %71 : vector<1x1x1x32xf32> to vector<1x16x16x32xf32>
    %73 = arith.mulf %68, %72 : vector<1x16x16x32xf32>
    %74 = arith.addf %66, %73 : vector<1x16x16x32xf32>
    %cst_8 = arith.constant dense<0.000000e+00> : vector<1x32xf32>
    %75 = vector.multi_reduction <add>, %74, %cst_8 [1, 2] : vector<1x16x16x32xf32> to vector<1x32xf32>
    %c0_9 = arith.constant 0 : index
    %c0_10 = arith.constant 0 : index
    %c0_11 = arith.constant 0 : index
    %76 = vector.load %arg6[%c0_9, %c0_10, %c0_11] : memref<1x2x32xf32, #tpu.memory_space<vmem>>, vector<1x1x32xf32>
    %77 = vector.shape_cast %76 : vector<1x1x32xf32> to vector<1x32xf32>
    %78 = vector.shape_cast %75 : vector<1x32xf32> to vector<1x1x32xf32>
    tpu.vector_store %arg6[%c0_9, %c0_10, %c0_11], %78 {strides = array<i32>} : memref<1x2x32xf32, #tpu.memory_space<vmem>>, vector<1x1x32xf32>,
    %79 = arith.mulf %74, %74 : vector<1x16x16x32xf32>
    %cst_12 = arith.constant dense<0.000000e+00> : vector<1x32xf32>
    %80 = vector.multi_reduction <add>, %79, %cst_12 [1, 2] : vector<1x16x16x32xf32> to vector<1x32xf32>
    %c0_13 = arith.constant 0 : index
    %c1 = arith.constant 1 : index
    %c0_14 = arith.constant 0 : index
    %81 = vector.load %arg6[%c0_13, %c1, %c0_14] : memref<1x2x32xf32, #tpu.memory_space<vmem>>, vector<1x1x32xf32>
    %82 = vector.shape_cast %81 : vector<1x1x32xf32> to vector<1x32xf32>
    %83 = vector.shape_cast %80 : vector<1x32xf32> to vector<1x1x32xf32>
    tpu.vector_store %arg6[%c0_13, %c1, %c0_14], %83 {strides = array<i32>} : memref<1x2x32xf32, #tpu.memory_space<vmem>>, vector<1x1x32xf32>,
    %c0_15 = arith.constant 0 : index
    %c0_16 = arith.constant 0 : index
    %c0_17 = arith.constant 0 : index
    %84 = vector.load %arg3[%c0_15, %c0_16, %c0_17] : memref<2x2x32xf32, #tpu.memory_space<vmem>>, vector<2x2x32xf32>
    %c0_18 = arith.constant 0 : index
    %c0_19 = arith.constant 0 : index
    %c0_20 = arith.constant 0 : index
    %85 = vector.load %arg4[%c0_18, %c0_19, %c0_20] : memref<2x2x32xf32, #tpu.memory_space<vmem>>, vector<2x2x32xf32>
    %cst_21 = arith.constant 0.000000e+00 : f32
    %86 = vector.broadcast %cst_21 : f32 to vector<1x8x8x32xf32>
    %cst_22 = arith.constant 0.000000e+00 : f32
    %87 = vector.broadcast %cst_22 : f32 to vector<1x8x8x32xf32>
    %c0_23 = arith.constant 0 : index
    %c0_24 = arith.constant 0 : index
    %c0_25 = arith.constant 0 : index
    %c0_26 = arith.constant 0 : index
    %88 = tpu.strided_load %arg1[%c0_23, %c0_24, %c0_25, %c0_26] {strides = array<i32: 1, 2, 2, 1>} : memref<1x16x16x32xf32, #tpu.memory_space<vmem>>, vector<1x8x8x32xf32>
    %89 = vector.extract_strided_slice %84 {offsets = [0, 0, 0], sizes = [1, 1, 32], strides = [1, 1, 1]} : vector<2x2x32xf32> to vector<1x1x32xf32>
    %90 = vector.shape_cast %89 : vector<1x1x32xf32> to vector<32xf32>
    %91 = vector.shape_cast %90 : vector<32xf32> to vector<1x1x1x32xf32>
    %92 = vector.broadcast %91 : vector<1x1x1x32xf32> to vector<1x8x8x32xf32>
    %93 = arith.mulf %88, %92 : vector<1x8x8x32xf32>
    %94 = arith.addf %86, %93 : vector<1x8x8x32xf32>
    %95 = vector.extract_strided_slice %85 {offsets = [0, 0, 0], sizes = [1, 1, 32], strides = [1, 1, 1]} : vector<2x2x32xf32> to vector<1x1x32xf32>
    %96 = vector.shape_cast %95 : vector<1x1x32xf32> to vector<32xf32>
    %97 = vector.shape_cast %96 : vector<32xf32> to vector<1x1x1x32xf32>
    %98 = vector.broadcast %97 : vector<1x1x1x32xf32> to vector<1x8x8x32xf32>
    %99 = arith.mulf %88, %98 : vector<1x8x8x32xf32>
    %100 = arith.addf %87, %99 : vector<1x8x8x32xf32>
    %c0_27 = arith.constant 0 : index
    %c0_28 = arith.constant 0 : index
    %c1_29 = arith.constant 1 : index
    %c0_30 = arith.constant 0 : index
    %101 = tpu.strided_load %arg1[%c0_27, %c0_28, %c1_29, %c0_30] {strides = array<i32: 1, 2, 2, 1>} : memref<1x16x16x32xf32, #tpu.memory_space<vmem>>, vector<1x8x8x32xf32>
    %102 = vector.extract_strided_slice %84 {offsets = [0, 1, 0], sizes = [1, 1, 32], strides = [1, 1, 1]} : vector<2x2x32xf32> to vector<1x1x32xf32>
    %103 = vector.shape_cast %102 : vector<1x1x32xf32> to vector<32xf32>
    %104 = vector.shape_cast %103 : vector<32xf32> to vector<1x1x1x32xf32>
    %105 = vector.broadcast %104 : vector<1x1x1x32xf32> to vector<1x8x8x32xf32>
    %106 = arith.mulf %101, %105 : vector<1x8x8x32xf32>
    %107 = arith.addf %94, %106 : vector<1x8x8x32xf32>
    %108 = vector.extract_strided_slice %85 {offsets = [0, 1, 0], sizes = [1, 1, 32], strides = [1, 1, 1]} : vector<2x2x32xf32> to vector<1x1x32xf32>
    %109 = vector.shape_cast %108 : vector<1x1x32xf32> to vector<32xf32>
    %110 = vector.shape_cast %109 : vector<32xf32> to vector<1x1x1x32xf32>
    %111 = vector.broadcast %110 : vector<1x1x1x32xf32> to vector<1x8x8x32xf32>
    %112 = arith.mulf %101, %111 : vector<1x8x8x32xf32>
    %113 = arith.addf %100, %112 : vector<1x8x8x32xf32>
    %c0_31 = arith.constant 0 : index
    %c1_32 = arith.constant 1 : index
    %c0_33 = arith.constant 0 : index
    %c0_34 = arith.constant 0 : index
    %114 = tpu.strided_load %arg1[%c0_31, %c1_32, %c0_33, %c0_34] {strides = array<i32: 1, 2, 2, 1>} : memref<1x16x16x32xf32, #tpu.memory_space<vmem>>, vector<1x8x8x32xf32>
    %115 = vector.extract_strided_slice %84 {offsets = [1, 0, 0], sizes = [1, 1, 32], strides = [1, 1, 1]} : vector<2x2x32xf32> to vector<1x1x32xf32>
    %116 = vector.shape_cast %115 : vector<1x1x32xf32> to vector<32xf32>
    %117 = vector.shape_cast %116 : vector<32xf32> to vector<1x1x1x32xf32>
    %118 = vector.broadcast %117 : vector<1x1x1x32xf32> to vector<1x8x8x32xf32>
    %119 = arith.mulf %114, %118 : vector<1x8x8x32xf32>
    %120 = arith.addf %107, %119 : vector<1x8x8x32xf32>
    %121 = vector.extract_strided_slice %85 {offsets = [1, 0, 0], sizes = [1, 1, 32], strides = [1, 1, 1]} : vector<2x2x32xf32> to vector<1x1x32xf32>
    %122 = vector.shape_cast %121 : vector<1x1x32xf32> to vector<32xf32>
    %123 = vector.shape_cast %122 : vector<32xf32> to vector<1x1x1x32xf32>
    %124 = vector.broadcast %123 : vector<1x1x1x32xf32> to vector<1x8x8x32xf32>
    %125 = arith.mulf %114, %124 : vector<1x8x8x32xf32>
    %126 = arith.addf %113, %125 : vector<1x8x8x32xf32>
    %c0_35 = arith.constant 0 : index
    %c1_36 = arith.constant 1 : index
    %c1_37 = arith.constant 1 : index
    %c0_38 = arith.constant 0 : index
    %127 = tpu.strided_load %arg1[%c0_35, %c1_36, %c1_37, %c0_38] {strides = array<i32: 1, 2, 2, 1>} : memref<1x16x16x32xf32, #tpu.memory_space<vmem>>, vector<1x8x8x32xf32>
    %128 = vector.extract_strided_slice %84 {offsets = [1, 1, 0], sizes = [1, 1, 32], strides = [1, 1, 1]} : vector<2x2x32xf32> to vector<1x1x32xf32>
    %129 = vector.shape_cast %128 : vector<1x1x32xf32> to vector<32xf32>
    %130 = vector.shape_cast %129 : vector<32xf32> to vector<1x1x1x32xf32>
    %131 = vector.broadcast %130 : vector<1x1x1x32xf32> to vector<1x8x8x32xf32>
    %132 = arith.mulf %127, %131 : vector<1x8x8x32xf32>
    %133 = arith.addf %120, %132 : vector<1x8x8x32xf32>
    %134 = vector.extract_strided_slice %85 {offsets = [1, 1, 0], sizes = [1, 1, 32], strides = [1, 1, 1]} : vector<2x2x32xf32> to vector<1x1x32xf32>
    %135 = vector.shape_cast %134 : vector<1x1x32xf32> to vector<32xf32>
    %136 = vector.shape_cast %135 : vector<32xf32> to vector<1x1x1x32xf32>
    %137 = vector.broadcast %136 : vector<1x1x1x32xf32> to vector<1x8x8x32xf32>
    %138 = arith.mulf %127, %137 : vector<1x8x8x32xf32>
    %139 = arith.addf %126, %138 : vector<1x8x8x32xf32>
    %140 = tpu.concatenate %133, %139 in 3 : vector<1x8x8x32xf32>, vector<1x8x8x32xf32> -> vector<1x8x8x64xf32>
    %141 = arith.truncf %140 : vector<1x8x8x64xf32> to vector<1x8x8x64xbf16>
    %142 = arith.extf %141 : vector<1x8x8x64xbf16> to vector<1x8x8x64xf32>
    %143 = arith.truncf %142 : vector<1x8x8x64xf32> to vector<1x8x8x64xbf16>
    %c0_39 = arith.constant 0 : index
    %c0_40 = arith.constant 0 : index
    %c0_41 = arith.constant 0 : index
    %c0_42 = arith.constant 0 : index
    %144 = vector.load %arg5[%c0_39, %c0_40, %c0_41, %c0_42] : memref<1x8x8x64xbf16, #tpu.memory_space<vmem>>, vector<1x8x8x64xbf16>
    tpu.vector_store %arg5[%c0_39, %c0_40, %c0_41, %c0_42], %143 {strides = array<i32>} : memref<1x8x8x64xbf16, #tpu.memory_space<vmem>>, vector<1x8x8x64xbf16>,
    %cst_43 = arith.constant dense<0.000000e+00> : vector<1x64xf32>
    %145 = vector.multi_reduction <add>, %142, %cst_43 [1, 2] : vector<1x8x8x64xf32> to vector<1x64xf32>
    %c0_44 = arith.constant 0 : index
    %c0_45 = arith.constant 0 : index
    %c0_46 = arith.constant 0 : index
    %146 = vector.load %arg7[%c0_44, %c0_45, %c0_46] : memref<1x2x64xf32, #tpu.memory_space<vmem>>, vector<1x1x64xf32>
    %147 = vector.shape_cast %146 : vector<1x1x64xf32> to vector<1x64xf32>
    %148 = vector.shape_cast %145 : vector<1x64xf32> to vector<1x1x64xf32>
    tpu.vector_store %arg7[%c0_44, %c0_45, %c0_46], %148 {strides = array<i32>} : memref<1x2x64xf32, #tpu.memory_space<vmem>>, vector<1x1x64xf32>,
    %149 = arith.mulf %142, %142 : vector<1x8x8x64xf32>
    %cst_47 = arith.constant dense<0.000000e+00> : vector<1x64xf32>
    %150 = vector.multi_reduction <add>, %149, %cst_47 [1, 2] : vector<1x8x8x64xf32> to vector<1x64xf32>
    %c0_48 = arith.constant 0 : index
    %c1_49 = arith.constant 1 : index
    %c0_50 = arith.constant 0 : index
    %151 = vector.load %arg7[%c0_48, %c1_49, %c0_50] : memref<1x2x64xf32, #tpu.memory_space<vmem>>, vector<1x1x64xf32>
    %152 = vector.shape_cast %151 : vector<1x1x64xf32> to vector<1x64xf32>
    %153 = vector.shape_cast %150 : vector<1x64xf32> to vector<1x1x64xf32>
    tpu.vector_store %arg7[%c0_48, %c1_49, %c0_50], %153 {strides = array<i32>} : memref<1x2x64xf32, #tpu.memory_space<vmem>>, vector<1x1x64xf32>,
    return
  }
  func.func @transform_0(%arg0: i32) -> (i32, i32, i32, i32) {
    %c0_i32 = arith.constant 0 : i32
    %c0_i32_0 = arith.constant 0 : i32
    %c0_i32_1 = arith.constant 0 : i32
    %c0_i32_2 = arith.constant 0 : i32
    return %arg0, %c0_i32, %c0_i32_0, %c0_i32_1 : i32, i32, i32, i32
  }
  func.func @transform_1(%arg0: i32) -> (i32, i32, i32) {
    %c0_i32 = arith.constant 0 : i32
    %c0_i32_0 = arith.constant 0 : i32
    %c0_i32_1 = arith.constant 0 : i32
    %c0_i32_2 = arith.constant 0 : i32
    return %c0_i32, %c0_i32_0, %c0_i32_1 : i32, i32, i32
  }
  func.func @transform_2(%arg0: i32) -> (i32, i32, i32) {
    %c0_i32 = arith.constant 0 : i32
    %c0_i32_0 = arith.constant 0 : i32
    %c0_i32_1 = arith.constant 0 : i32
    %c0_i32_2 = arith.constant 0 : i32
    return %c0_i32, %c0_i32_0, %c0_i32_1 : i32, i32, i32
  }
  func.func @transform_3(%arg0: i32) -> (i32, i32, i32) {
    %c0_i32 = arith.constant 0 : i32
    %c0_i32_0 = arith.constant 0 : i32
    %c0_i32_1 = arith.constant 0 : i32
    %c0_i32_2 = arith.constant 0 : i32
    return %c0_i32, %c0_i32_0, %c0_i32_1 : i32, i32, i32
  }
  func.func @transform_4(%arg0: i32) -> (i32, i32, i32, i32) {
    %c0_i32 = arith.constant 0 : i32
    %c0_i32_0 = arith.constant 0 : i32
    %c0_i32_1 = arith.constant 0 : i32
    %c0_i32_2 = arith.constant 0 : i32
    return %arg0, %c0_i32, %c0_i32_0, %c0_i32_1 : i32, i32, i32, i32
  }
  func.func @transform_5(%arg0: i32) -> (i32, i32, i32) {
    %c0_i32 = arith.constant 0 : i32
    %c0_i32_0 = arith.constant 0 : i32
    %c0_i32_1 = arith.constant 0 : i32
    return %arg0, %c0_i32, %c0_i32_0 : i32, i32, i32
  }
  func.func @transform_6(%arg0: i32) -> (i32, i32, i32) {
    %c0_i32 = arith.constant 0 : i32
    %c0_i32_0 = arith.constant 0 : i32
    %c0_i32_1 = arith.constant 0 : i32
    return %arg0, %c0_i32, %c0_i32_0 : i32, i32, i32
  }
}

module attributes {stable_mosaic.version = 11 : i64} {
  func.func @_pwconv_kernel(%arg0: i32, %arg1: memref<1x16x16x32xf32, #tpu.memory_space<vmem>>, %arg2: memref<3x3x32xf32, #tpu.memory_space<vmem>>, %arg3: memref<1x8x8x64xbf16, #tpu.memory_space<vmem>>, %arg4: memref<1x32xf32, #tpu.memory_space<vmem>>, %arg5: memref<1x32xf32, #tpu.memory_space<vmem>>, %arg6: memref<1x32xf32, #tpu.memory_space<vmem>>, %arg7: memref<1x64xf32, #tpu.memory_space<vmem>>, %arg8: memref<1x64xf32, #tpu.memory_space<vmem>>, %arg9: memref<1x64xf32, #tpu.memory_space<vmem>>, %arg10: memref<32x8xbf16, #tpu.memory_space<vmem>>, %arg11: memref<64x40xbf16, #tpu.memory_space<vmem>>, %arg12: memref<1x8x256xbf16, #tpu.memory_space<vmem>>, %arg13: memref<1x8x64xbf16, #tpu.memory_space<vmem>>, %arg14: memref<1x64x32xbf16, #tpu.memory_space<vmem>>, %arg15: memref<1x2x8xf32, #tpu.memory_space<vmem>>, %arg16: memref<1x2x8xf32, #tpu.memory_space<vmem>>, %arg17: memref<1x2x32xf32, #tpu.memory_space<vmem>>) attributes {dimension_semantics = [#tpu.dimension_semantics<parallel>], iteration_bounds = array<i64: 2>, scalar_prefetch = 0 : i64, scratch_operands = 0 : i64, tpu.core_type = #tpu.core_type<tc>, window_params = [{transform_indices = @transform_0, window_bounds = array<i64: 1, 16, 16, 32>}, {pipeline_mode = #tpu.pipeline_mode<synchronous>, transform_indices = @transform_1, window_bounds = array<i64: 3, 3, 32>}, {transform_indices = @transform_2, window_bounds = array<i64: 1, 8, 8, 64>}, {pipeline_mode = #tpu.pipeline_mode<synchronous>, transform_indices = @transform_3, window_bounds = array<i64: 1, 32>}, {pipeline_mode = #tpu.pipeline_mode<synchronous>, transform_indices = @transform_4, window_bounds = array<i64: 1, 32>}, {pipeline_mode = #tpu.pipeline_mode<synchronous>, transform_indices = @transform_5, window_bounds = array<i64: 1, 32>}, {pipeline_mode = #tpu.pipeline_mode<synchronous>, transform_indices = @transform_6, window_bounds = array<i64: 1, 64>}, {pipeline_mode = #tpu.pipeline_mode<synchronous>, transform_indices = @transform_7, window_bounds = array<i64: 1, 64>}, {pipeline_mode = #tpu.pipeline_mode<synchronous>, transform_indices = @transform_8, window_bounds = array<i64: 1, 64>}, {pipeline_mode = #tpu.pipeline_mode<synchronous>, transform_indices = @transform_9, window_bounds = array<i64: 32, 8>}, {pipeline_mode = #tpu.pipeline_mode<synchronous>, transform_indices = @transform_10, window_bounds = array<i64: 64, 40>}, {transform_indices = @transform_11, window_bounds = array<i64: 1, 8, 256>}, {transform_indices = @transform_12, window_bounds = array<i64: 1, 8, 64>}, {transform_indices = @transform_13, window_bounds = array<i64: 1, 64, 32>}, {transform_indices = @transform_14, window_bounds = array<i64: 1, 2, 8>}, {transform_indices = @transform_15, window_bounds = array<i64: 1, 2, 8>}, {transform_indices = @transform_16, window_bounds = array<i64: 1, 2, 32>}]} {
    %c0 = arith.constant 0 : index
    %c0_0 = arith.constant 0 : index
    %c0_1 = arith.constant 0 : index
    %c0_2 = arith.constant 0 : index
    %0 = vector.load %arg1[%c0, %c0_0, %c0_1, %c0_2] : memref<1x16x16x32xf32, #tpu.memory_space<vmem>>, vector<1x16x16x32xf32>
    %c0_3 = arith.constant 0 : index
    %c0_4 = arith.constant 0 : index
    %c0_5 = arith.constant 0 : index
    %1 = vector.load %arg2[%c0_3, %c0_4, %c0_5] : memref<3x3x32xf32, #tpu.memory_space<vmem>>, vector<3x3x32xf32>
    %cst = arith.constant 0.000000e+00 : f32
    %2 = vector.broadcast %cst : f32 to vector<1x16x1x32xf32>
    %3 = vector.extract_strided_slice %0 {offsets = [0, 0, 0, 0], sizes = [1, 16, 15, 32], strides = [1, 1, 1, 1]} : vector<1x16x16x32xf32> to vector<1x16x15x32xf32>
    %4 = tpu.concatenate %2, %3 in 2 : vector<1x16x1x32xf32>, vector<1x16x15x32xf32> -> vector<1x16x16x32xf32>
    %5 = vector.extract_strided_slice %0 {offsets = [0, 0, 1, 0], sizes = [1, 16, 15, 32], strides = [1, 1, 1, 1]} : vector<1x16x16x32xf32> to vector<1x16x15x32xf32>
    %6 = tpu.concatenate %5, %2 in 2 : vector<1x16x15x32xf32>, vector<1x16x1x32xf32> -> vector<1x16x16x32xf32>
    %cst_6 = arith.constant 0.000000e+00 : f32
    %7 = vector.broadcast %cst_6 : f32 to vector<1x1x16x32xf32>
    %cst_7 = arith.constant 0.000000e+00 : f32
    %8 = vector.broadcast %cst_7 : f32 to vector<1x16x16x32xf32>
    %9 = vector.extract_strided_slice %4 {offsets = [0, 0, 0, 0], sizes = [1, 15, 16, 32], strides = [1, 1, 1, 1]} : vector<1x16x16x32xf32> to vector<1x15x16x32xf32>
    %10 = tpu.concatenate %7, %9 in 1 : vector<1x1x16x32xf32>, vector<1x15x16x32xf32> -> vector<1x16x16x32xf32>
    %11 = vector.extract_strided_slice %1 {offsets = [0, 0, 0], sizes = [1, 1, 32], strides = [1, 1, 1]} : vector<3x3x32xf32> to vector<1x1x32xf32>
    %12 = vector.shape_cast %11 : vector<1x1x32xf32> to vector<32xf32>
    %13 = vector.shape_cast %12 : vector<32xf32> to vector<1x1x1x32xf32>
    %14 = vector.broadcast %13 : vector<1x1x1x32xf32> to vector<1x16x16x32xf32>
    %15 = arith.mulf %10, %14 : vector<1x16x16x32xf32>
    %16 = arith.addf %8, %15 : vector<1x16x16x32xf32>
    %17 = vector.extract_strided_slice %0 {offsets = [0, 0, 0, 0], sizes = [1, 15, 16, 32], strides = [1, 1, 1, 1]} : vector<1x16x16x32xf32> to vector<1x15x16x32xf32>
    %18 = tpu.concatenate %7, %17 in 1 : vector<1x1x16x32xf32>, vector<1x15x16x32xf32> -> vector<1x16x16x32xf32>
    %19 = vector.extract_strided_slice %1 {offsets = [0, 1, 0], sizes = [1, 1, 32], strides = [1, 1, 1]} : vector<3x3x32xf32> to vector<1x1x32xf32>
    %20 = vector.shape_cast %19 : vector<1x1x32xf32> to vector<32xf32>
    %21 = vector.shape_cast %20 : vector<32xf32> to vector<1x1x1x32xf32>
    %22 = vector.broadcast %21 : vector<1x1x1x32xf32> to vector<1x16x16x32xf32>
    %23 = arith.mulf %18, %22 : vector<1x16x16x32xf32>
    %24 = arith.addf %16, %23 : vector<1x16x16x32xf32>
    %25 = vector.extract_strided_slice %6 {offsets = [0, 0, 0, 0], sizes = [1, 15, 16, 32], strides = [1, 1, 1, 1]} : vector<1x16x16x32xf32> to vector<1x15x16x32xf32>
    %26 = tpu.concatenate %7, %25 in 1 : vector<1x1x16x32xf32>, vector<1x15x16x32xf32> -> vector<1x16x16x32xf32>
    %27 = vector.extract_strided_slice %1 {offsets = [0, 2, 0], sizes = [1, 1, 32], strides = [1, 1, 1]} : vector<3x3x32xf32> to vector<1x1x32xf32>
    %28 = vector.shape_cast %27 : vector<1x1x32xf32> to vector<32xf32>
    %29 = vector.shape_cast %28 : vector<32xf32> to vector<1x1x1x32xf32>
    %30 = vector.broadcast %29 : vector<1x1x1x32xf32> to vector<1x16x16x32xf32>
    %31 = arith.mulf %26, %30 : vector<1x16x16x32xf32>
    %32 = arith.addf %24, %31 : vector<1x16x16x32xf32>
    %33 = vector.extract_strided_slice %1 {offsets = [1, 0, 0], sizes = [1, 1, 32], strides = [1, 1, 1]} : vector<3x3x32xf32> to vector<1x1x32xf32>
    %34 = vector.shape_cast %33 : vector<1x1x32xf32> to vector<32xf32>
    %35 = vector.shape_cast %34 : vector<32xf32> to vector<1x1x1x32xf32>
    %36 = vector.broadcast %35 : vector<1x1x1x32xf32> to vector<1x16x16x32xf32>
    %37 = arith.mulf %4, %36 : vector<1x16x16x32xf32>
    %38 = arith.addf %32, %37 : vector<1x16x16x32xf32>
    %39 = vector.extract_strided_slice %1 {offsets = [1, 1, 0], sizes = [1, 1, 32], strides = [1, 1, 1]} : vector<3x3x32xf32> to vector<1x1x32xf32>
    %40 = vector.shape_cast %39 : vector<1x1x32xf32> to vector<32xf32>
    %41 = vector.shape_cast %40 : vector<32xf32> to vector<1x1x1x32xf32>
    %42 = vector.broadcast %41 : vector<1x1x1x32xf32> to vector<1x16x16x32xf32>
    %43 = arith.mulf %0, %42 : vector<1x16x16x32xf32>
    %44 = arith.addf %38, %43 : vector<1x16x16x32xf32>
    %45 = vector.extract_strided_slice %1 {offsets = [1, 2, 0], sizes = [1, 1, 32], strides = [1, 1, 1]} : vector<3x3x32xf32> to vector<1x1x32xf32>
    %46 = vector.shape_cast %45 : vector<1x1x32xf32> to vector<32xf32>
    %47 = vector.shape_cast %46 : vector<32xf32> to vector<1x1x1x32xf32>
    %48 = vector.broadcast %47 : vector<1x1x1x32xf32> to vector<1x16x16x32xf32>
    %49 = arith.mulf %6, %48 : vector<1x16x16x32xf32>
    %50 = arith.addf %44, %49 : vector<1x16x16x32xf32>
    %51 = vector.extract_strided_slice %4 {offsets = [0, 1, 0, 0], sizes = [1, 15, 16, 32], strides = [1, 1, 1, 1]} : vector<1x16x16x32xf32> to vector<1x15x16x32xf32>
    %52 = tpu.concatenate %51, %7 in 1 : vector<1x15x16x32xf32>, vector<1x1x16x32xf32> -> vector<1x16x16x32xf32>
    %53 = vector.extract_strided_slice %1 {offsets = [2, 0, 0], sizes = [1, 1, 32], strides = [1, 1, 1]} : vector<3x3x32xf32> to vector<1x1x32xf32>
    %54 = vector.shape_cast %53 : vector<1x1x32xf32> to vector<32xf32>
    %55 = vector.shape_cast %54 : vector<32xf32> to vector<1x1x1x32xf32>
    %56 = vector.broadcast %55 : vector<1x1x1x32xf32> to vector<1x16x16x32xf32>
    %57 = arith.mulf %52, %56 : vector<1x16x16x32xf32>
    %58 = arith.addf %50, %57 : vector<1x16x16x32xf32>
    %59 = vector.extract_strided_slice %0 {offsets = [0, 1, 0, 0], sizes = [1, 15, 16, 32], strides = [1, 1, 1, 1]} : vector<1x16x16x32xf32> to vector<1x15x16x32xf32>
    %60 = tpu.concatenate %59, %7 in 1 : vector<1x15x16x32xf32>, vector<1x1x16x32xf32> -> vector<1x16x16x32xf32>
    %61 = vector.extract_strided_slice %1 {offsets = [2, 1, 0], sizes = [1, 1, 32], strides = [1, 1, 1]} : vector<3x3x32xf32> to vector<1x1x32xf32>
    %62 = vector.shape_cast %61 : vector<1x1x32xf32> to vector<32xf32>
    %63 = vector.shape_cast %62 : vector<32xf32> to vector<1x1x1x32xf32>
    %64 = vector.broadcast %63 : vector<1x1x1x32xf32> to vector<1x16x16x32xf32>
    %65 = arith.mulf %60, %64 : vector<1x16x16x32xf32>
    %66 = arith.addf %58, %65 : vector<1x16x16x32xf32>
    %67 = vector.extract_strided_slice %6 {offsets = [0, 1, 0, 0], sizes = [1, 15, 16, 32], strides = [1, 1, 1, 1]} : vector<1x16x16x32xf32> to vector<1x15x16x32xf32>
    %68 = tpu.concatenate %67, %7 in 1 : vector<1x15x16x32xf32>, vector<1x1x16x32xf32> -> vector<1x16x16x32xf32>
    %69 = vector.extract_strided_slice %1 {offsets = [2, 2, 0], sizes = [1, 1, 32], strides = [1, 1, 1]} : vector<3x3x32xf32> to vector<1x1x32xf32>
    %70 = vector.shape_cast %69 : vector<1x1x32xf32> to vector<32xf32>
    %71 = vector.shape_cast %70 : vector<32xf32> to vector<1x1x1x32xf32>
    %72 = vector.broadcast %71 : vector<1x1x1x32xf32> to vector<1x16x16x32xf32>
    %73 = arith.mulf %68, %72 : vector<1x16x16x32xf32>
    %74 = arith.addf %66, %73 : vector<1x16x16x32xf32>
    %75 = vector.shape_cast %74 : vector<1x16x16x32xf32> to vector<256x32xf32>
    %c0_8 = arith.constant 0 : index
    %c0_9 = arith.constant 0 : index
    %76 = vector.load %arg4[%c0_8, %c0_9] : memref<1x32xf32, #tpu.memory_space<vmem>>, vector<1x32xf32>
    %c0_10 = arith.constant 0 : index
    %c0_11 = arith.constant 0 : index
    %77 = vector.load %arg5[%c0_10, %c0_11] : memref<1x32xf32, #tpu.memory_space<vmem>>, vector<1x32xf32>
    %c0_12 = arith.constant 0 : index
    %c0_13 = arith.constant 0 : index
    %78 = vector.load %arg6[%c0_12, %c0_13] : memref<1x32xf32, #tpu.memory_space<vmem>>, vector<1x32xf32>
    %79 = vector.broadcast %76 : vector<1x32xf32> to vector<256x32xf32>
    %80 = arith.mulf %75, %79 : vector<256x32xf32>
    %81 = vector.broadcast %77 : vector<1x32xf32> to vector<256x32xf32>
    %82 = arith.addf %80, %81 : vector<256x32xf32>
    %cst_14 = arith.constant 0.000000e+00 : f32
    %83 = vector.broadcast %cst_14 : f32 to vector<256x32xf32>
    %84 = arith.cmpf oge, %82, %83 : vector<256x32xf32>
    %85 = vector.broadcast %78 : vector<1x32xf32> to vector<256x32xf32>
    %86 = arith.mulf %85, %82 : vector<256x32xf32>
    %87 = arith.select %84, %82, %86 : vector<256x32xi1>, vector<256x32xf32>
    %c0_15 = arith.constant 0 : index
    %c0_16 = arith.constant 0 : index
    %c0_17 = arith.constant 0 : index
    %c0_18 = arith.constant 0 : index
    %88 = vector.load %arg3[%c0_15, %c0_16, %c0_17, %c0_18] : memref<1x8x8x64xbf16, #tpu.memory_space<vmem>>, vector<1x8x8x64xbf16>
    %89 = arith.extf %88 : vector<1x8x8x64xbf16> to vector<1x8x8x64xf32>
    %90 = vector.shape_cast %89 : vector<1x8x8x64xf32> to vector<64x64xf32>
    %c0_19 = arith.constant 0 : index
    %c0_20 = arith.constant 0 : index
    %91 = vector.load %arg7[%c0_19, %c0_20] : memref<1x64xf32, #tpu.memory_space<vmem>>, vector<1x64xf32>
    %c0_21 = arith.constant 0 : index
    %c0_22 = arith.constant 0 : index
    %92 = vector.load %arg8[%c0_21, %c0_22] : memref<1x64xf32, #tpu.memory_space<vmem>>, vector<1x64xf32>
    %c0_23 = arith.constant 0 : index
    %c0_24 = arith.constant 0 : index
    %93 = vector.load %arg9[%c0_23, %c0_24] : memref<1x64xf32, #tpu.memory_space<vmem>>, vector<1x64xf32>
    %94 = vector.broadcast %91 : vector<1x64xf32> to vector<64x64xf32>
    %95 = arith.mulf %90, %94 : vector<64x64xf32>
    %96 = vector.broadcast %92 : vector<1x64xf32> to vector<64x64xf32>
    %97 = arith.addf %95, %96 : vector<64x64xf32>
    %cst_25 = arith.constant 0.000000e+00 : f32
    %98 = vector.broadcast %cst_25 : f32 to vector<64x64xf32>
    %99 = arith.cmpf oge, %97, %98 : vector<64x64xf32>
    %100 = vector.broadcast %93 : vector<1x64xf32> to vector<64x64xf32>
    %101 = arith.mulf %100, %97 : vector<64x64xf32>
    %102 = arith.select %99, %97, %101 : vector<64x64xi1>, vector<64x64xf32>
    %103 = arith.truncf %87 : vector<256x32xf32> to vector<256x32xbf16>
    %c0_26 = arith.constant 0 : index
    %c0_27 = arith.constant 0 : index
    %104 = vector.load %arg10[%c0_26, %c0_27] : memref<32x8xbf16, #tpu.memory_space<vmem>>, vector<32x8xbf16>
    %cst_28 = arith.constant dense<0.000000e+00> : vector<256x8xf32>
    %105 = tpu.matmul %103, %104, %cst_28 {dimension_numbers = #tpu.dot_dimension_numbers<[1], [0], [0], [1], [0, 0, 1, 1], [], []>} : vector<256x32xbf16>, vector<32x8xbf16>, vector<256x8xf32> -> vector<256x8xf32>
    %106 = arith.truncf %102 : vector<64x64xf32> to vector<64x64xbf16>
    %c0_29 = arith.constant 0 : index
    %c0_30 = arith.constant 0 : index
    %107 = vector.load %arg11[%c0_29, %c0_30] : memref<64x40xbf16, #tpu.memory_space<vmem>>, vector<64x40xbf16>
    %cst_31 = arith.constant dense<0.000000e+00> : vector<64x40xf32>
    %108 = tpu.matmul %106, %107, %cst_31 {dimension_numbers = #tpu.dot_dimension_numbers<[1], [0], [0], [1], [0, 0, 1, 1], [], []>} : vector<64x64xbf16>, vector<64x40xbf16>, vector<64x40xf32> -> vector<64x40xf32>
    %109 = vector.extract_strided_slice %108 {offsets = [0, 0], sizes = [64, 32], strides = [1, 1]} : vector<64x40xf32> to vector<64x32xf32>
    %110 = vector.extract_strided_slice %108 {offsets = [0, 32], sizes = [64, 8], strides = [1, 1]} : vector<64x40xf32> to vector<64x8xf32>
    %111 = arith.truncf %105 : vector<256x8xf32> to vector<256x8xbf16>
    %112 = arith.extf %111 : vector<256x8xbf16> to vector<256x8xf32>
    %113 = arith.truncf %110 : vector<64x8xf32> to vector<64x8xbf16>
    %114 = arith.extf %113 : vector<64x8xbf16> to vector<64x8xf32>
    %115 = arith.truncf %109 : vector<64x32xf32> to vector<64x32xbf16>
    %116 = arith.extf %115 : vector<64x32xbf16> to vector<64x32xf32>
    %117 = tpu.transpose %112, [1, 0] : vector<256x8xf32> -> vector<8x256xf32>
    %118 = arith.truncf %117 : vector<8x256xf32> to vector<8x256xbf16>
    %c0_32 = arith.constant 0 : index
    %c0_33 = arith.constant 0 : index
    %c0_34 = arith.constant 0 : index
    %119 = vector.load %arg12[%c0_32, %c0_33, %c0_34] : memref<1x8x256xbf16, #tpu.memory_space<vmem>>, vector<1x8x256xbf16>
    %120 = vector.shape_cast %119 : vector<1x8x256xbf16> to vector<8x256xbf16>
    %121 = vector.shape_cast %118 : vector<8x256xbf16> to vector<1x8x256xbf16>
    tpu.vector_store %arg12[%c0_32, %c0_33, %c0_34], %121 {strides = array<i32>} : memref<1x8x256xbf16, #tpu.memory_space<vmem>>, vector<1x8x256xbf16>,
    %122 = tpu.transpose %114, [1, 0] : vector<64x8xf32> -> vector<8x64xf32>
    %123 = arith.truncf %122 : vector<8x64xf32> to vector<8x64xbf16>
    %c0_35 = arith.constant 0 : index
    %c0_36 = arith.constant 0 : index
    %c0_37 = arith.constant 0 : index
    %124 = vector.load %arg13[%c0_35, %c0_36, %c0_37] : memref<1x8x64xbf16, #tpu.memory_space<vmem>>, vector<1x8x64xbf16>
    %125 = vector.shape_cast %124 : vector<1x8x64xbf16> to vector<8x64xbf16>
    %126 = vector.shape_cast %123 : vector<8x64xbf16> to vector<1x8x64xbf16>
    tpu.vector_store %arg13[%c0_35, %c0_36, %c0_37], %126 {strides = array<i32>} : memref<1x8x64xbf16, #tpu.memory_space<vmem>>, vector<1x8x64xbf16>,
    %127 = arith.truncf %116 : vector<64x32xf32> to vector<64x32xbf16>
    %c0_38 = arith.constant 0 : index
    %c0_39 = arith.constant 0 : index
    %c0_40 = arith.constant 0 : index
    %128 = vector.load %arg14[%c0_38, %c0_39, %c0_40] : memref<1x64x32xbf16, #tpu.memory_space<vmem>>, vector<1x64x32xbf16>
    %129 = vector.shape_cast %128 : vector<1x64x32xbf16> to vector<64x32xbf16>
    %130 = vector.shape_cast %127 : vector<64x32xbf16> to vector<1x64x32xbf16>
    tpu.vector_store %arg14[%c0_38, %c0_39, %c0_40], %130 {strides = array<i32>} : memref<1x64x32xbf16, #tpu.memory_space<vmem>>, vector<1x64x32xbf16>,
    %cst_41 = arith.constant dense<0.000000e+00> : vector<8xf32>
    %131 = vector.multi_reduction <add>, %112, %cst_41 [0] : vector<256x8xf32> to vector<8xf32>
    %132 = vector.shape_cast %131 : vector<8xf32> to vector<1x8xf32>
    %c0_42 = arith.constant 0 : index
    %c0_43 = arith.constant 0 : index
    %c0_44 = arith.constant 0 : index
    %133 = vector.load %arg15[%c0_42, %c0_43, %c0_44] : memref<1x2x8xf32, #tpu.memory_space<vmem>>, vector<1x1x8xf32>
    %134 = vector.shape_cast %133 : vector<1x1x8xf32> to vector<1x8xf32>
    %135 = vector.shape_cast %132 : vector<1x8xf32> to vector<1x1x8xf32>
    tpu.vector_store %arg15[%c0_42, %c0_43, %c0_44], %135 {strides = array<i32>} : memref<1x2x8xf32, #tpu.memory_space<vmem>>, vector<1x1x8xf32>,
    %136 = arith.mulf %112, %112 : vector<256x8xf32>
    %cst_45 = arith.constant dense<0.000000e+00> : vector<8xf32>
    %137 = vector.multi_reduction <add>, %136, %cst_45 [0] : vector<256x8xf32> to vector<8xf32>
    %138 = vector.shape_cast %137 : vector<8xf32> to vector<1x8xf32>
    %c0_46 = arith.constant 0 : index
    %c1 = arith.constant 1 : index
    %c0_47 = arith.constant 0 : index
    %139 = vector.load %arg15[%c0_46, %c1, %c0_47] : memref<1x2x8xf32, #tpu.memory_space<vmem>>, vector<1x1x8xf32>
    %140 = vector.shape_cast %139 : vector<1x1x8xf32> to vector<1x8xf32>
    %141 = vector.shape_cast %138 : vector<1x8xf32> to vector<1x1x8xf32>
    tpu.vector_store %arg15[%c0_46, %c1, %c0_47], %141 {strides = array<i32>} : memref<1x2x8xf32, #tpu.memory_space<vmem>>, vector<1x1x8xf32>,
    %cst_48 = arith.constant dense<0.000000e+00> : vector<8xf32>
    %142 = vector.multi_reduction <add>, %114, %cst_48 [0] : vector<64x8xf32> to vector<8xf32>
    %143 = vector.shape_cast %142 : vector<8xf32> to vector<1x8xf32>
    %c0_49 = arith.constant 0 : index
    %c0_50 = arith.constant 0 : index
    %c0_51 = arith.constant 0 : index
    %144 = vector.load %arg16[%c0_49, %c0_50, %c0_51] : memref<1x2x8xf32, #tpu.memory_space<vmem>>, vector<1x1x8xf32>
    %145 = vector.shape_cast %144 : vector<1x1x8xf32> to vector<1x8xf32>
    %146 = vector.shape_cast %143 : vector<1x8xf32> to vector<1x1x8xf32>
    tpu.vector_store %arg16[%c0_49, %c0_50, %c0_51], %146 {strides = array<i32>} : memref<1x2x8xf32, #tpu.memory_space<vmem>>, vector<1x1x8xf32>,
    %147 = arith.mulf %114, %114 : vector<64x8xf32>
    %cst_52 = arith.constant dense<0.000000e+00> : vector<8xf32>
    %148 = vector.multi_reduction <add>, %147, %cst_52 [0] : vector<64x8xf32> to vector<8xf32>
    %149 = vector.shape_cast %148 : vector<8xf32> to vector<1x8xf32>
    %c0_53 = arith.constant 0 : index
    %c1_54 = arith.constant 1 : index
    %c0_55 = arith.constant 0 : index
    %150 = vector.load %arg16[%c0_53, %c1_54, %c0_55] : memref<1x2x8xf32, #tpu.memory_space<vmem>>, vector<1x1x8xf32>
    %151 = vector.shape_cast %150 : vector<1x1x8xf32> to vector<1x8xf32>
    %152 = vector.shape_cast %149 : vector<1x8xf32> to vector<1x1x8xf32>
    tpu.vector_store %arg16[%c0_53, %c1_54, %c0_55], %152 {strides = array<i32>} : memref<1x2x8xf32, #tpu.memory_space<vmem>>, vector<1x1x8xf32>,
    %cst_56 = arith.constant dense<0.000000e+00> : vector<32xf32>
    %153 = vector.multi_reduction <add>, %116, %cst_56 [0] : vector<64x32xf32> to vector<32xf32>
    %154 = vector.shape_cast %153 : vector<32xf32> to vector<1x32xf32>
    %c0_57 = arith.constant 0 : index
    %c0_58 = arith.constant 0 : index
    %c0_59 = arith.constant 0 : index
    %155 = vector.load %arg17[%c0_57, %c0_58, %c0_59] : memref<1x2x32xf32, #tpu.memory_space<vmem>>, vector<1x1x32xf32>
    %156 = vector.shape_cast %155 : vector<1x1x32xf32> to vector<1x32xf32>
    %157 = vector.shape_cast %154 : vector<1x32xf32> to vector<1x1x32xf32>
    tpu.vector_store %arg17[%c0_57, %c0_58, %c0_59], %157 {strides = array<i32>} : memref<1x2x32xf32, #tpu.memory_space<vmem>>, vector<1x1x32xf32>,
    %158 = arith.mulf %116, %116 : vector<64x32xf32>
    %cst_60 = arith.constant dense<0.000000e+00> : vector<32xf32>
    %159 = vector.multi_reduction <add>, %158, %cst_60 [0] : vector<64x32xf32> to vector<32xf32>
    %160 = vector.shape_cast %159 : vector<32xf32> to vector<1x32xf32>
    %c0_61 = arith.constant 0 : index
    %c1_62 = arith.constant 1 : index
    %c0_63 = arith.constant 0 : index
    %161 = vector.load %arg17[%c0_61, %c1_62, %c0_63] : memref<1x2x32xf32, #tpu.memory_space<vmem>>, vector<1x1x32xf32>
    %162 = vector.shape_cast %161 : vector<1x1x32xf32> to vector<1x32xf32>
    %163 = vector.shape_cast %160 : vector<1x32xf32> to vector<1x1x32xf32>
    tpu.vector_store %arg17[%c0_61, %c1_62, %c0_63], %163 {strides = array<i32>} : memref<1x2x32xf32, #tpu.memory_space<vmem>>, vector<1x1x32xf32>,
    return
  }
  func.func @transform_0(%arg0: i32) -> (i32, i32, i32, i32) {
    %c0_i32 = arith.constant 0 : i32
    %c0_i32_0 = arith.constant 0 : i32
    %c0_i32_1 = arith.constant 0 : i32
    %c0_i32_2 = arith.constant 0 : i32
    return %arg0, %c0_i32, %c0_i32_0, %c0_i32_1 : i32, i32, i32, i32
  }
  func.func @transform_1(%arg0: i32) -> (i32, i32, i32) {
    %c0_i32 = arith.constant 0 : i32
    %c0_i32_0 = arith.constant 0 : i32
    %c0_i32_1 = arith.constant 0 : i32
    %c0_i32_2 = arith.constant 0 : i32
    return %c0_i32, %c0_i32_0, %c0_i32_1 : i32, i32, i32
  }
  func.func @transform_2(%arg0: i32) -> (i32, i32, i32, i32) {
    %c0_i32 = arith.constant 0 : i32
    %c0_i32_0 = arith.constant 0 : i32
    %c0_i32_1 = arith.constant 0 : i32
    %c0_i32_2 = arith.constant 0 : i32
    return %arg0, %c0_i32, %c0_i32_0, %c0_i32_1 : i32, i32, i32, i32
  }
  func.func @transform_3(%arg0: i32) -> (i32, i32) {
    %c0_i32 = arith.constant 0 : i32
    %c0_i32_0 = arith.constant 0 : i32
    %c0_i32_1 = arith.constant 0 : i32
    return %c0_i32, %c0_i32_0 : i32, i32
  }
  func.func @transform_4(%arg0: i32) -> (i32, i32) {
    %c0_i32 = arith.constant 0 : i32
    %c0_i32_0 = arith.constant 0 : i32
    %c0_i32_1 = arith.constant 0 : i32
    return %c0_i32, %c0_i32_0 : i32, i32
  }
  func.func @transform_5(%arg0: i32) -> (i32, i32) {
    %c0_i32 = arith.constant 0 : i32
    %c0_i32_0 = arith.constant 0 : i32
    %c0_i32_1 = arith.constant 0 : i32
    return %c0_i32, %c0_i32_0 : i32, i32
  }
  func.func @transform_6(%arg0: i32) -> (i32, i32) {
    %c0_i32 = arith.constant 0 : i32
    %c0_i32_0 = arith.constant 0 : i32
    %c0_i32_1 = arith.constant 0 : i32
    return %c0_i32, %c0_i32_0 : i32, i32
  }
  func.func @transform_7(%arg0: i32) -> (i32, i32) {
    %c0_i32 = arith.constant 0 : i32
    %c0_i32_0 = arith.constant 0 : i32
    %c0_i32_1 = arith.constant 0 : i32
    return %c0_i32, %c0_i32_0 : i32, i32
  }
  func.func @transform_8(%arg0: i32) -> (i32, i32) {
    %c0_i32 = arith.constant 0 : i32
    %c0_i32_0 = arith.constant 0 : i32
    %c0_i32_1 = arith.constant 0 : i32
    return %c0_i32, %c0_i32_0 : i32, i32
  }
  func.func @transform_9(%arg0: i32) -> (i32, i32) {
    %c0_i32 = arith.constant 0 : i32
    %c0_i32_0 = arith.constant 0 : i32
    %c0_i32_1 = arith.constant 0 : i32
    return %c0_i32, %c0_i32_0 : i32, i32
  }
  func.func @transform_10(%arg0: i32) -> (i32, i32) {
    %c0_i32 = arith.constant 0 : i32
    %c0_i32_0 = arith.constant 0 : i32
    %c0_i32_1 = arith.constant 0 : i32
    return %c0_i32, %c0_i32_0 : i32, i32
  }
  func.func @transform_11(%arg0: i32) -> (i32, i32, i32) {
    %c0_i32 = arith.constant 0 : i32
    %c0_i32_0 = arith.constant 0 : i32
    %c0_i32_1 = arith.constant 0 : i32
    return %arg0, %c0_i32, %c0_i32_0 : i32, i32, i32
  }
  func.func @transform_12(%arg0: i32) -> (i32, i32, i32) {
    %c0_i32 = arith.constant 0 : i32
    %c0_i32_0 = arith.constant 0 : i32
    %c0_i32_1 = arith.constant 0 : i32
    return %arg0, %c0_i32, %c0_i32_0 : i32, i32, i32
  }
  func.func @transform_13(%arg0: i32) -> (i32, i32, i32) {
    %c0_i32 = arith.constant 0 : i32
    %c0_i32_0 = arith.constant 0 : i32
    %c0_i32_1 = arith.constant 0 : i32
    return %arg0, %c0_i32, %c0_i32_0 : i32, i32, i32
  }
  func.func @transform_14(%arg0: i32) -> (i32, i32, i32) {
    %c0_i32 = arith.constant 0 : i32
    %c0_i32_0 = arith.constant 0 : i32
    %c0_i32_1 = arith.constant 0 : i32
    return %arg0, %c0_i32, %c0_i32_0 : i32, i32, i32
  }
  func.func @transform_15(%arg0: i32) -> (i32, i32, i32) {
    %c0_i32 = arith.constant 0 : i32
    %c0_i32_0 = arith.constant 0 : i32
    %c0_i32_1 = arith.constant 0 : i32
    return %arg0, %c0_i32, %c0_i32_0 : i32, i32, i32
  }
  func.func @transform_16(%arg0: i32) -> (i32, i32, i32) {
    %c0_i32 = arith.constant 0 : i32
    %c0_i32_0 = arith.constant 0 : i32
    %c0_i32_1 = arith.constant 0 : i32
    return %arg0, %c0_i32, %c0_i32_0 : i32, i32, i32
  }
}

module attributes {stable_mosaic.version = 11 : i64} {
  func.func @_attn_kernel(%arg0: i32, %arg1: i32, %arg2: memref<1x8x128xbf16, #tpu.memory_space<vmem>>, %arg3: memref<1x8x64xbf16, #tpu.memory_space<vmem>>, %arg4: memref<1x64x32xbf16, #tpu.memory_space<vmem>>, %arg5: memref<8x1xf32, #tpu.memory_space<vmem>>, %arg6: memref<8x1xf32, #tpu.memory_space<vmem>>, %arg7: memref<8x1xf32, #tpu.memory_space<vmem>>, %arg8: memref<8x1xf32, #tpu.memory_space<vmem>>, %arg9: memref<8x1xf32, #tpu.memory_space<vmem>>, %arg10: memref<8x1xf32, #tpu.memory_space<vmem>>, %arg11: memref<1x32xf32, #tpu.memory_space<vmem>>, %arg12: memref<1x32xf32, #tpu.memory_space<vmem>>, %arg13: memref<1x32xf32, #tpu.memory_space<vmem>>, %arg14: memref<32x32xbf16, #tpu.memory_space<vmem>>, %arg15: memref<1x32xf32, #tpu.memory_space<vmem>>, %arg16: memref<1x32x128xf32, #tpu.memory_space<vmem>>, %arg17: memref<8x64xbf16, #tpu.memory_space<vmem>>, %arg18: memref<64x32xbf16, #tpu.memory_space<vmem>>) attributes {dimension_semantics = [#tpu.dimension_semantics<parallel>, #tpu.dimension_semantics<arbitrary>], iteration_bounds = array<i64: 2, 2>, scalar_prefetch = 0 : i64, scratch_operands = 2 : i64, tpu.core_type = #tpu.core_type<tc>, window_params = [{transform_indices = @transform_0, window_bounds = array<i64: 1, 8, 128>}, {transform_indices = @transform_1, window_bounds = array<i64: 1, 8, 64>}, {transform_indices = @transform_2, window_bounds = array<i64: 1, 64, 32>}, {pipeline_mode = #tpu.pipeline_mode<synchronous>, transform_indices = @transform_3, window_bounds = array<i64: 8, 1>}, {pipeline_mode = #tpu.pipeline_mode<synchronous>, transform_indices = @transform_4, window_bounds = array<i64: 8, 1>}, {pipeline_mode = #tpu.pipeline_mode<synchronous>, transform_indices = @transform_5, window_bounds = array<i64: 8, 1>}, {pipeline_mode = #tpu.pipeline_mode<synchronous>, transform_indices = @transform_6, window_bounds = array<i64: 8, 1>}, {pipeline_mode = #tpu.pipeline_mode<synchronous>, transform_indices = @transform_7, window_bounds = array<i64: 8, 1>}, {pipeline_mode = #tpu.pipeline_mode<synchronous>, transform_indices = @transform_8, window_bounds = array<i64: 8, 1>}, {pipeline_mode = #tpu.pipeline_mode<synchronous>, transform_indices = @transform_9, window_bounds = array<i64: 1, 32>}, {pipeline_mode = #tpu.pipeline_mode<synchronous>, transform_indices = @transform_10, window_bounds = array<i64: 1, 32>}, {pipeline_mode = #tpu.pipeline_mode<synchronous>, transform_indices = @transform_11, window_bounds = array<i64: 1, 32>}, {pipeline_mode = #tpu.pipeline_mode<synchronous>, transform_indices = @transform_12, window_bounds = array<i64: 32, 32>}, {pipeline_mode = #tpu.pipeline_mode<synchronous>, transform_indices = @transform_13, window_bounds = array<i64: 1, 32>}, {transform_indices = @transform_14, window_bounds = array<i64: 1, 32, 128>}]} {
    %c0_i32 = arith.constant 0 : i32
    %0 = arith.cmpi eq, %arg1, %c0_i32 : i32
    %1 = arith.extui %0 : i1 to i32
    %c0_i32_0 = arith.constant 0 : i32
    %2 = arith.cmpi ne, %1, %c0_i32_0 : i32
    scf.if %2 {
      %c0_22 = arith.constant 0 : index
      %c0_23 = arith.constant 0 : index
      %c0_24 = arith.constant 0 : index
      %42 = vector.load %arg3[%c0_22, %c0_23, %c0_24] : memref<1x8x64xbf16, #tpu.memory_space<vmem>>, vector<1x8x64xbf16>
      %43 = vector.shape_cast %42 : vector<1x8x64xbf16> to vector<8x64xbf16>
      %44 = arith.extf %43 : vector<8x64xbf16> to vector<8x64xf32>
      %c0_25 = arith.constant 0 : index
      %c0_26 = arith.constant 0 : index
      %45 = vector.load %arg8[%c0_25, %c0_26] : memref<8x1xf32, #tpu.memory_space<vmem>>, vector<8x1xf32>
      %c0_27 = arith.constant 0 : index
      %c0_28 = arith.constant 0 : index
      %46 = vector.load %arg9[%c0_27, %c0_28] : memref<8x1xf32, #tpu.memory_space<vmem>>, vector<8x1xf32>
      %c0_29 = arith.constant 0 : index
      %c0_30 = arith.constant 0 : index
      %47 = vector.load %arg10[%c0_29, %c0_30] : memref<8x1xf32, #tpu.memory_space<vmem>>, vector<8x1xf32>
      %48 = vector.broadcast %45 : vector<8x1xf32> to vector<8x64xf32>
      %49 = arith.mulf %44, %48 : vector<8x64xf32>
      %50 = vector.broadcast %46 : vector<8x1xf32> to vector<8x64xf32>
      %51 = arith.addf %49, %50 : vector<8x64xf32>
      %cst_31 = arith.constant 0.000000e+00 : f32
      %52 = vector.broadcast %cst_31 : f32 to vector<8x64xf32>
      %53 = arith.cmpf oge, %51, %52 : vector<8x64xf32>
      %54 = vector.broadcast %47 : vector<8x1xf32> to vector<8x64xf32>
      %55 = arith.mulf %54, %51 : vector<8x64xf32>
      %56 = arith.select %53, %51, %55 : vector<8x64xi1>, vector<8x64xf32>
      %57 = arith.truncf %56 : vector<8x64xf32> to vector<8x64xbf16>
      %c0_32 = arith.constant 0 : index
      %c0_33 = arith.constant 0 : index
      %58 = vector.load %arg17[%c0_32, %c0_33] : memref<8x64xbf16, #tpu.memory_space<vmem>>, vector<8x64xbf16>
      tpu.vector_store %arg17[%c0_32, %c0_33], %57 {strides = array<i32>} : memref<8x64xbf16, #tpu.memory_space<vmem>>, vector<8x64xbf16>,
      %c0_34 = arith.constant 0 : index
      %c0_35 = arith.constant 0 : index
      %c0_36 = arith.constant 0 : index
      %59 = vector.load %arg4[%c0_34, %c0_35, %c0_36] : memref<1x64x32xbf16, #tpu.memory_space<vmem>>, vector<1x64x32xbf16>
      %60 = vector.shape_cast %59 : vector<1x64x32xbf16> to vector<64x32xbf16>
      %61 = arith.extf %60 : vector<64x32xbf16> to vector<64x32xf32>
      %c0_37 = arith.constant 0 : index
      %c0_38 = arith.constant 0 : index
      %62 = vector.load %arg11[%c0_37, %c0_38] : memref<1x32xf32, #tpu.memory_space<vmem>>, vector<1x32xf32>
      %c0_39 = arith.constant 0 : index
      %c0_40 = arith.constant 0 : index
      %63 = vector.load %arg12[%c0_39, %c0_40] : memref<1x32xf32, #tpu.memory_space<vmem>>, vector<1x32xf32>
      %c0_41 = arith.constant 0 : index
      %c0_42 = arith.constant 0 : index
      %64 = vector.load %arg13[%c0_41, %c0_42] : memref<1x32xf32, #tpu.memory_space<vmem>>, vector<1x32xf32>
      %65 = vector.broadcast %62 : vector<1x32xf32> to vector<64x32xf32>
      %66 = arith.mulf %61, %65 : vector<64x32xf32>
      %67 = vector.broadcast %63 : vector<1x32xf32> to vector<64x32xf32>
      %68 = arith.addf %66, %67 : vector<64x32xf32>
      %cst_43 = arith.constant 0.000000e+00 : f32
      %69 = vector.broadcast %cst_43 : f32 to vector<64x32xf32>
      %70 = arith.cmpf oge, %68, %69 : vector<64x32xf32>
      %71 = vector.broadcast %64 : vector<1x32xf32> to vector<64x32xf32>
      %72 = arith.mulf %71, %68 : vector<64x32xf32>
      %73 = arith.select %70, %68, %72 : vector<64x32xi1>, vector<64x32xf32>
      %74 = arith.truncf %73 : vector<64x32xf32> to vector<64x32xbf16>
      %c0_44 = arith.constant 0 : index
      %c0_45 = arith.constant 0 : index
      %75 = vector.load %arg14[%c0_44, %c0_45] : memref<32x32xbf16, #tpu.memory_space<vmem>>, vector<32x32xbf16>
      %cst_46 = arith.constant dense<0.000000e+00> : vector<64x32xf32>
      %76 = tpu.matmul %74, %75, %cst_46 {dimension_numbers = #tpu.dot_dimension_numbers<[1], [0], [0], [1], [0, 0, 1, 1], [], []>} : vector<64x32xbf16>, vector<32x32xbf16>, vector<64x32xf32> -> vector<64x32xf32>
      %77 = arith.truncf %76 : vector<64x32xf32> to vector<64x32xbf16>
      %c0_47 = arith.constant 0 : index
      %c0_48 = arith.constant 0 : index
      %78 = vector.load %arg18[%c0_47, %c0_48] : memref<64x32xbf16, #tpu.memory_space<vmem>>, vector<64x32xbf16>
      tpu.vector_store %arg18[%c0_47, %c0_48], %77 {strides = array<i32>} : memref<64x32xbf16, #tpu.memory_space<vmem>>, vector<64x32xbf16>,
    } else {
    }
    %c0 = arith.constant 0 : index
    %c0_1 = arith.constant 0 : index
    %c0_2 = arith.constant 0 : index
    %3 = vector.load %arg2[%c0, %c0_1, %c0_2] : memref<1x8x128xbf16, #tpu.memory_space<vmem>>, vector<1x8x128xbf16>
    %4 = vector.shape_cast %3 : vector<1x8x128xbf16> to vector<8x128xbf16>
    %5 = arith.extf %4 : vector<8x128xbf16> to vector<8x128xf32>
    %c0_3 = arith.constant 0 : index
    %c0_4 = arith.constant 0 : index
    %6 = vector.load %arg5[%c0_3, %c0_4] : memref<8x1xf32, #tpu.memory_space<vmem>>, vector<8x1xf32>
    %c0_5 = arith.constant 0 : index
    %c0_6 = arith.constant 0 : index
    %7 = vector.load %arg6[%c0_5, %c0_6] : memref<8x1xf32, #tpu.memory_space<vmem>>, vector<8x1xf32>
    %c0_7 = arith.constant 0 : index
    %c0_8 = arith.constant 0 : index
    %8 = vector.load %arg7[%c0_7, %c0_8] : memref<8x1xf32, #tpu.memory_space<vmem>>, vector<8x1xf32>
    %9 = vector.broadcast %6 : vector<8x1xf32> to vector<8x128xf32>
    %10 = arith.mulf %5, %9 : vector<8x128xf32>
    %11 = vector.broadcast %7 : vector<8x1xf32> to vector<8x128xf32>
    %12 = arith.addf %10, %11 : vector<8x128xf32>
    %cst = arith.constant 0.000000e+00 : f32
    %13 = vector.broadcast %cst : f32 to vector<8x128xf32>
    %14 = arith.cmpf oge, %12, %13 : vector<8x128xf32>
    %15 = vector.broadcast %8 : vector<8x1xf32> to vector<8x128xf32>
    %16 = arith.mulf %15, %12 : vector<8x128xf32>
    %17 = arith.select %14, %12, %16 : vector<8x128xi1>, vector<8x128xf32>
    %18 = tpu.transpose %17, [1, 0] : vector<8x128xf32> -> vector<128x8xf32>
    %19 = arith.truncf %18 : vector<128x8xf32> to vector<128x8xbf16>
    %c0_9 = arith.constant 0 : index
    %c0_10 = arith.constant 0 : index
    %20 = vector.load %arg17[%c0_9, %c0_10] : memref<8x64xbf16, #tpu.memory_space<vmem>>, vector<8x64xbf16>
    %cst_11 = arith.constant dense<0.000000e+00> : vector<128x64xf32>
    %21 = tpu.matmul %19, %20, %cst_11 {dimension_numbers = #tpu.dot_dimension_numbers<[1], [0], [0], [1], [0, 0, 1, 1], [], []>} : vector<128x8xbf16>, vector<8x64xbf16>, vector<128x64xf32> -> vector<128x64xf32>
    %cst_12 = arith.constant dense<0xFF800000> : vector<128xf32>
    %22 = vector.multi_reduction <maximumf>, %21, %cst_12 [1] : vector<128x64xf32> to vector<128xf32>
    %23 = vector.shape_cast %22 : vector<128xf32> to vector<128x1xf32>
    %24 = vector.broadcast %23 : vector<128x1xf32> to vector<128x64xf32>
    %25 = arith.subf %21, %24 : vector<128x64xf32>
    %26 = math.exp %25 : vector<128x64xf32>
    %cst_13 = arith.constant dense<0.000000e+00> : vector<128xf32>
    %27 = vector.multi_reduction <add>, %26, %cst_13 [1] : vector<128x64xf32> to vector<128xf32>
    %28 = vector.shape_cast %27 : vector<128xf32> to vector<128x1xf32>
    %29 = arith.truncf %26 : vector<128x64xf32> to vector<128x64xbf16>
    %c0_14 = arith.constant 0 : index
    %c0_15 = arith.constant 0 : index
    %30 = vector.load %arg18[%c0_14, %c0_15] : memref<64x32xbf16, #tpu.memory_space<vmem>>, vector<64x32xbf16>
    %cst_16 = arith.constant dense<0.000000e+00> : vector<128x32xf32>
    %31 = tpu.matmul %29, %30, %cst_16 {dimension_numbers = #tpu.dot_dimension_numbers<[1], [0], [0], [1], [0, 0, 1, 1], [], []>} : vector<128x64xbf16>, vector<64x32xbf16>, vector<128x32xf32> -> vector<128x32xf32>
    %32 = tpu.reciprocal %28 {approx = true} : vector<128x1xf32> -> vector<128x1xf32>
    %33 = vector.broadcast %32 : vector<128x1xf32> to vector<128x32xf32>
    %34 = arith.mulf %31, %33 : vector<128x32xf32>
    %c0_17 = arith.constant 0 : index
    %c0_18 = arith.constant 0 : index
    %35 = vector.load %arg15[%c0_17, %c0_18] : memref<1x32xf32, #tpu.memory_space<vmem>>, vector<1x32xf32>
    %36 = vector.broadcast %35 : vector<1x32xf32> to vector<128x32xf32>
    %37 = arith.addf %34, %36 : vector<128x32xf32>
    %38 = tpu.transpose %37, [1, 0] : vector<128x32xf32> -> vector<32x128xf32>
    %c0_19 = arith.constant 0 : index
    %c0_20 = arith.constant 0 : index
    %c0_21 = arith.constant 0 : index
    %39 = vector.load %arg16[%c0_19, %c0_20, %c0_21] : memref<1x32x128xf32, #tpu.memory_space<vmem>>, vector<1x32x128xf32>
    %40 = vector.shape_cast %39 : vector<1x32x128xf32> to vector<32x128xf32>
    %41 = vector.shape_cast %38 : vector<32x128xf32> to vector<1x32x128xf32>
    tpu.vector_store %arg16[%c0_19, %c0_20, %c0_21], %41 {strides = array<i32>} : memref<1x32x128xf32, #tpu.memory_space<vmem>>, vector<1x32x128xf32>,
    return
  }
  func.func @transform_0(%arg0: i32, %arg1: i32) -> (i32, i32, i32) {
    %c0_i32 = arith.constant 0 : i32
    %c0_i32_0 = arith.constant 0 : i32
    return %arg0, %c0_i32, %arg1 : i32, i32, i32
  }
  func.func @transform_1(%arg0: i32, %arg1: i32) -> (i32, i32, i32) {
    %c0_i32 = arith.constant 0 : i32
    %c0_i32_0 = arith.constant 0 : i32
    %c0_i32_1 = arith.constant 0 : i32
    return %arg0, %c0_i32, %c0_i32_0 : i32, i32, i32
  }
  func.func @transform_2(%arg0: i32, %arg1: i32) -> (i32, i32, i32) {
    %c0_i32 = arith.constant 0 : i32
    %c0_i32_0 = arith.constant 0 : i32
    %c0_i32_1 = arith.constant 0 : i32
    return %arg0, %c0_i32, %c0_i32_0 : i32, i32, i32
  }
  func.func @transform_3(%arg0: i32, %arg1: i32) -> (i32, i32) {
    %c0_i32 = arith.constant 0 : i32
    %c0_i32_0 = arith.constant 0 : i32
    %c0_i32_1 = arith.constant 0 : i32
    return %c0_i32, %c0_i32_0 : i32, i32
  }
  func.func @transform_4(%arg0: i32, %arg1: i32) -> (i32, i32) {
    %c0_i32 = arith.constant 0 : i32
    %c0_i32_0 = arith.constant 0 : i32
    %c0_i32_1 = arith.constant 0 : i32
    return %c0_i32, %c0_i32_0 : i32, i32
  }
  func.func @transform_5(%arg0: i32, %arg1: i32) -> (i32, i32) {
    %c0_i32 = arith.constant 0 : i32
    %c0_i32_0 = arith.constant 0 : i32
    %c0_i32_1 = arith.constant 0 : i32
    return %c0_i32, %c0_i32_0 : i32, i32
  }
  func.func @transform_6(%arg0: i32, %arg1: i32) -> (i32, i32) {
    %c0_i32 = arith.constant 0 : i32
    %c0_i32_0 = arith.constant 0 : i32
    %c0_i32_1 = arith.constant 0 : i32
    return %c0_i32, %c0_i32_0 : i32, i32
  }
  func.func @transform_7(%arg0: i32, %arg1: i32) -> (i32, i32) {
    %c0_i32 = arith.constant 0 : i32
    %c0_i32_0 = arith.constant 0 : i32
    %c0_i32_1 = arith.constant 0 : i32
    return %c0_i32, %c0_i32_0 : i32, i32
  }
  func.func @transform_8(%arg0: i32, %arg1: i32) -> (i32, i32) {
    %c0_i32 = arith.constant 0 : i32
    %c0_i32_0 = arith.constant 0 : i32
    %c0_i32_1 = arith.constant 0 : i32
    return %c0_i32, %c0_i32_0 : i32, i32
  }
  func.func @transform_9(%arg0: i32, %arg1: i32) -> (i32, i32) {
    %c0_i32 = arith.constant 0 : i32
    %c0_i32_0 = arith.constant 0 : i32
    %c0_i32_1 = arith.constant 0 : i32
    return %c0_i32, %c0_i32_0 : i32, i32
  }
  func.func @transform_10(%arg0: i32, %arg1: i32) -> (i32, i32) {
    %c0_i32 = arith.constant 0 : i32
    %c0_i32_0 = arith.constant 0 : i32
    %c0_i32_1 = arith.constant 0 : i32
    return %c0_i32, %c0_i32_0 : i32, i32
  }
  func.func @transform_11(%arg0: i32, %arg1: i32) -> (i32, i32) {
    %c0_i32 = arith.constant 0 : i32
    %c0_i32_0 = arith.constant 0 : i32
    %c0_i32_1 = arith.constant 0 : i32
    return %c0_i32, %c0_i32_0 : i32, i32
  }
  func.func @transform_12(%arg0: i32, %arg1: i32) -> (i32, i32) {
    %c0_i32 = arith.constant 0 : i32
    %c0_i32_0 = arith.constant 0 : i32
    %c0_i32_1 = arith.constant 0 : i32
    return %c0_i32, %c0_i32_0 : i32, i32
  }
  func.func @transform_13(%arg0: i32, %arg1: i32) -> (i32, i32) {
    %c0_i32 = arith.constant 0 : i32
    %c0_i32_0 = arith.constant 0 : i32
    %c0_i32_1 = arith.constant 0 : i32
    return %c0_i32, %c0_i32_0 : i32, i32
  }
  func.func @transform_14(%arg0: i32, %arg1: i32) -> (i32, i32, i32) {
    %c0_i32 = arith.constant 0 : i32
    %c0_i32_0 = arith.constant 0 : i32
    return %arg0, %c0_i32, %arg1 : i32, i32, i32
  }
}

</mosaic_0001>

<bundles_post_ra>
// kernel: hssm_forward.5
= control target key start
LH: loop header
LB: loop body
LE: loop exit
PB: predicated region body
PF: predicated region fallthrough
CT: control target
= control target key end

     0   :  { %s2239_s0 = inlined_call_operand.vmem [shape: bf16[2,8,256], index: 0, kind: input, shape index: {}]   ;;  %s2240_s1 = inlined_call_operand.vmem [shape: bf16[2,8,64], index: 1, kind: input, shape index: {}]   ;;  %s2241_s2 = inlined_call_operand.vmem [shape: bf16[2,64,32], index: 2, kind: input, shape index: {}]   ;;  %s2242_s3 = inlined_call_operand.vmem [shape: f32[8,1], index: 3, kind: input, shape index: {}]   ;;  %s2243_s4 = inlined_call_operand.vmem [shape: f32[8,1], index: 4, kind: input, shape index: {}]   ;;  %s2244_s5 = inlined_call_operand.vmem [shape: f32[8,1], index: 5, kind: input, shape index: {}]   ;;  %s2245_s6 = inlined_call_operand.vmem [shape: f32[8,1], index: 6, kind: input, shape index: {}]   ;;  %s2246_s7 = inlined_call_operand.vmem [shape: f32[8,1], index: 7, kind: input, shape index: {}]   ;;  %s2247_s8 = inlined_call_operand.vmem [shape: f32[8,1], index: 8, kind: input, shape index: {}]   ;;  %s2248_s9 = inlined_call_operand.vmem [shape: f32[1,32], index: 9, kind: input, shape index: {}]   ;;  %s2249_s10 = inlined_call_operand.vmem [shape: f32[1,32], index: 10, kind: input, shape index: {}]   ;;  %s2250_s11 = inlined_call_operand.vmem [shape: f32[1,32], index: 11, kind: input, shape index: {}]   ;;  %s2251_s12 = inlined_call_operand.vmem [shape: bf16[32,32], index: 12, kind: input, shape index: {}]   ;;  %s2252_s13 = inlined_call_operand.vmem [shape: f32[1,32], index: 13, kind: input, shape index: {}]   ;;  %s2253_s14 = inlined_call_operand.vmem [shape: f32[2,32,256], index: 14, kind: output, shape index: {}]  }
   0x1   :  { %2262 = sst [smem:[#allocation14_spill]] %s2243_s4 }
   0x2   :  { %2263 = sst [smem:[#allocation15_spill]] %s2252_s13 }
   0x3   :  { %2264 = sst [smem:[#allocation16_spill]] %s2253_s14 }
   0x4   :  { %s1947_s29 = smov 0   ;;  %s1949_s30 = smov 0  }
   0x5   :  { %s1951_s15 = smov 0   ;;  %s1953_s16 = smov 0  }
   0x6   :  { %s1955_s17 = smov 0   ;;  %s1957_s18 = smov 0  }
   0x7   :  { %s1959_s19 = smov 0  }
   0x8 LB: > { %2265 = sst [smem:[#allocation5_spill]] %s1848_s30  ;;  %s33_s20 = sadd.s32 1, %s1860_s17  ;;  %s1868_s19 = sphi %s1959_s19, %s24_s19   ;;  %s1864_s18 = sphi %s1957_s18, %s2286_s18   ;;  %s1860_s17 = sphi %s1955_s17, %s2285_s17   ;;  %s1856_s16 = sphi %s1953_s16, %s2284_s16   ;;  %s1852_s15 = sphi %s1951_s15, %s2283_s15   ;;  %s1848_s30 = sphi %s1949_s30, %s2282_s30   ;;  %s1844_s29 = sphi %s1947_s29, %s2281_s29  }
   0x9   : > { %2266 = sst [smem:[#allocation6_spill]] %s1856_s16  ;;  %p34_p0 = scmp.ge.s32.totalorder %s33_s20, 2 }
   0xa   : > { %2267 = sst [smem:[#allocation7_spill]] %s1860_s17  ;;  %s36_s21 = sadd.s32 1, %s1864_s18 }
   0xb   : > { %2268 = sst [smem:[#allocation8_spill]] %s1864_s18  ;;  %s1512_s22 = sadd.s32 4294967295, %s1868_s19  }
   0xc   : > { %2269 = sst [smem:[#allocation9_spill]] %s1868_s19  ;;  %p366_p1 = scmp.ne.s32.totalorder %s1848_s30, %s1844_s29 }
   0xd   : > { %s2288_s20 = smov (%p34_p0, %s33_s20), 0  ;;  %s2290_s21 = smov (!%p34_p0, %s36_s21), %s1864_s18 }
   0xe   : > { %2270 = sst [smem:[#allocation10_spill]] %s2288_s20  ;;  %s352_s23 = ssub.s32 %s1860_s17, %s2288_s20 }
   0xf   : > { %p367_p2 = scmp.eq.s32.totalorder %s1512_s22, 3  ;;  %p38_p3 = scmp.ge.s32.totalorder %s2290_s21, 2 }
  0x10   : > { %p1516_p4 = scmp.ge.s32.totalorder %s1868_s19, 1  ;;  %p450_p6 = scmp.lt.s32.totalorder %s1868_s19, 5 }
  0x11   : > { %p1993_p5 = por %p367_p2, %p366_p1  ;;  %s2292_s21 = smov (%p38_p3, %s2290_s21), 0 }
  0x12   : > { %2273 = sst [smem:[#allocation12_spill]] %s2292_s21  ;;  %p451_p7 = pnand %p1516_p4, %p450_p6 }
  0x13   : > { %s2271_s24 = scalar_select %p1993_p5, 1, 0 }
  0x14   : > { %s351_s25 = ssub.s32 %s1864_s18, %s2292_s21  ;;  %s356_s27 = sadd.s32 1, %s1848_s30 }
  0x15   : > { %2272 = sst [smem:[#allocation11_spill]] %s2271_s24  ;;  %s353_s26 = sor.u32 %s352_s23, %s351_s25 }
  0x16   : > { %p354_p8 = scmp.eq.s32.totalorder %s353_s26, 0  ;;  %454 = sbr.rel (%p451_p7) target bundleno = 1247 (0x4df), region = 76 }
  0x17   : > { %s504_s22 = sand.u32 (!%p451_p7), 1, %s1844_s29   ;;  %p507_p9 = scmp.lt.s32.totalorder (!%p451_p7), %s1856_s16, 1 }
  0x18   : > { %s2004_s28 = scalar_select %p354_p8, %s1848_s30, %s356_s27  }
  0x19   : > { %s1517_s20 = sshll.u32 (!%p451_p7), %s504_s22, 5  ;;  %p509_p10 = scmp.lt.s32.totalorder (!%p451_p7), %s1852_s15, 1 }
  0x1a   : > { %2274 = sst [smem:[#allocation13_spill]] %s2004_s28  ;;  %s2024_s4 = scalar_lea.vmem (!%p451_p7), [#allocation4], %s1517_s20 }
  0x1b   : > { %s508_s17 = scalar_select %p507_p9, %s1856_s16, 1 }
  0x1c   : > { %s510_s19 = scalar_select %p509_p10, %s1852_s15, 1 }
  0x1d   : > { %s1518_s14 = sshll.u32 %s508_s17, 1  ;;  %s1520_s24 = sshll.u32 %s508_s17, 2 }
  0x1e   : > { %s512_s21 = sadd.s32 %s1518_s14, %s510_s19  ;;  %s2014_s26 = scalar_lea.vmem %s2240_s1, %s1520_s24 }
  0x1f   : > { %s1519_s27 = sshll.u32 %s512_s21, 2  ;;  %s1567_s18 = sshll.u32 %s508_s17, 5 }
  0x20   : > { %s2019_s13 = scalar_lea.vmem %s2239_s0, %s1519_s27  ;;  %s523_s16 = scalar_lea.vmem %s2241_s2, %s1567_s18 }
  0x21   : > { %p1523_p11 = scmp.ne.s32.totalorder %s1852_s15, 0 }
  0x23   : > { %528 = sbr.rel (%p1523_p11) target bundleno = 262 (0x106), region = 80 }
  0x28   : > { %v1742_v0 = vld [vmem:[%s2251_s12 + $0x8] sm:$0xff]   ;;  %v1743_v1 = vld [vmem:[%s2251_s12] sm:$0xff]   ;;  %v1593_v6 = vld [vmem:[%s523_s16 + $0x10] sm:$0xff]   ;;  %vm654_vm0 = vcmask 261120   ;;  %v1870_v18 = vmov 0   ;;  %vm555_vm10 = vcmask 519168  }
  0x29   : > { %1622 = vmatprep.subr.bf16.mxu0 %v1742_v0  ;;  %1676 = vmatprep.subr.bf16.mxu1 %v1742_v0  ;;  %v1577_v2 = vld [vmem:[%s523_s16] sm:$0xff]   ;;  %v1592_v7 = vld [vmem:[%s523_s16 + $0x8] sm:$0xff]   ;;  %v1586_v9 = vunpack.c.l.bf16 %v1593_v6  ;;  %v1587_v10 = vunpack.c.h.bf16 %v1593_v6  ;;  %v1594_v13 = vld [vmem:[%s523_s16 + $0x18] sm:$0xff]   ;;  %vm764_vm11 = vcmask 257024  }
  0x2a   : > { %v1524_v3 = vld [vmem:[%s2248_s9] ss:$0 sm:$0xff]  ;;  %1623 = vmatpush3.bf16.msra.mxu0 %v1742_v0  ;;  %1678 = vmatpush3.bf16.msra.mxu1 %v1742_v0  ;;  %v1578_v4 = vunpack.c.l.bf16 %v1577_v2  ;;  %v1579_v5 = vunpack.c.h.bf16 %v1577_v2  ;;  %v1582_v11 = vunpack.c.l.bf16 %v1592_v7  ;;  %v1583_v12 = vunpack.c.h.bf16 %v1592_v7 }
  0x2b   : > { %1624 = vmatprep.subr.bf16.mxu0 %v1743_v1  ;;  %1677 = vmatprep.subr.bf16.mxu1 %v1743_v1  ;;  %v1525_v8 = vld [vmem:[%s2249_s10] ss:$0 sm:$0xff]  ;;  %v1590_v17 = vunpack.c.l.bf16 %v1594_v13  ;;  %v586_v21 = vmul.f32 %v1586_v9, %v1524_v3  ;;  %v587_v22 = vmul.f32 %v1587_v10, %v1524_v3  ;;  %v1591_v27 = vunpack.c.h.bf16 %v1594_v13 }
  0x2c   : > { %v531_v14 = vld [vmem:[%s2245_s6] sm:$0xff]  ;;  %v582_v15 = vmul.f32 %v1578_v4, %v1524_v3  ;;  %v583_v16 = vmul.f32 %v1579_v5, %v1524_v3  ;;  %1740 = vset.pattern.permute.xlu0 %v1870_v18  ;;  %1741 = vset.pattern.permute.xlu1 %v1870_v18  ;;  %v584_v23 = vmul.f32 %v1582_v11, %v1524_v3 }
  0x2d   : > { %v533_v19 = vld [vmem:[%s2247_s8] sm:$0xff]  ;;  %v585_v24 = vmul.f32 %v1583_v12, %v1524_v3  ;;  %536 = vperm.xlu0 %1740, %v531_v14   ;;  %v588_v28 = vmul.f32 %v1590_v17, %v1524_v3  ;;  %v600_v30 = vadd.f32 %v1525_v8, %v586_v21  ;;  %v601_v31 = vadd.f32 %v1525_v8, %v587_v22 }
  0x2e   : > { %v1526_v20 = vld [vmem:[%s2250_s11] ss:$0 sm:$0xff]  ;;  %1625 = vmatpush3.bf16.msra.mxu0 %v1743_v1  ;;  %1679 = vmatpush3.bf16.msra.mxu1 %v1743_v1  ;;  %v596_v25 = vadd.f32 %v1525_v8, %v582_v15  ;;  %v597_v26 = vadd.f32 %v1525_v8, %v583_v16  ;;  %v598_v32 = vadd.f32 %v1525_v8, %v584_v23 }
  0x2f   : > { %v532_v29 = vld [vmem:[%s2246_s7] sm:$0xff]  ;;  %v599_v33 = vadd.f32 %v1525_v8, %v585_v24  ;;  %549 = vperm.xlu1 %1741, %v533_v19   ;;  %vm608_vm3 = vcmp.ge.f32.partialorder %v600_v30, 0.0  ;;  %vm609_vm4 = vcmp.ge.f32.partialorder %v601_v31, 0.0  ;;  %v622_v36 = vmul.f32 %v1526_v20, %v600_v30 }
  0x30   : > { %vm604_vm1 = vcmp.ge.f32.partialorder %v596_v25, 0.0  ;;  %vm605_vm2 = vcmp.ge.f32.partialorder %v597_v26, 0.0  ;;  %v618_v34 = vmul.f32 %v1526_v20, %v596_v25  ;;  %v619_v35 = vmul.f32 %v1526_v20, %v597_v26  ;;  %v529_v57 = vld [vmem:[%s2014_s26] sm:$0xf] }
  0x31   : > { %v623_v37 = vmul.f32 %v1526_v20, %v601_v31  ;;  %542 = vperm.xlu0 %1740, %v532_v29   ;;  %vm606_vm5 = vcmp.ge.f32.partialorder %v598_v32, 0.0  ;;  %vm607_vm6 = vcmp.ge.f32.partialorder %v599_v33, 0.0  ;;  %v630_v41 = vsel %vm608_vm3, %v600_v30, %v622_v36 }
  0x32   : > { %v626_v38 = vsel %vm604_vm1, %v596_v25, %v618_v34  ;;  %v627_v39 = vsel %vm605_vm2, %v597_v26, %v619_v35  ;;  %v620_v43 = vmul.f32 %v1526_v20, %v598_v32  ;;  %v621_v45 = vmul.f32 %v1526_v20, %v599_v33 }
  0x33   : > { %v634_v40 = vpack.c.bf16 %v627_v39, %v626_v38  ;;  %v631_v42 = vsel %vm609_vm4, %v601_v31, %v623_v37  ;;  %v589_v46 = vmul.f32 %v1591_v27, %v1524_v3  ;;  %v602_v47 = vadd.f32 %v1525_v8, %v588_v28 }
  0x34   : > { %v636_v44 = vpack.c.bf16 %v631_v42, %v630_v41  ;;  %v628_v48 = vsel %vm606_vm5, %v598_v32, %v620_v43  ;;  %v629_v49 = vsel %vm607_vm6, %v599_v33, %v621_v45  ;;  %v530_v58 = vunpack.c.l.bf16 %v529_v57 }
  0x35   : > { %1626 = vmatprep.mubr.msk.bf16.mxu0 %vm654_vm0, %v634_v40  ;;  %v603_v50 = vadd.f32 %v1525_v8, %v589_v46  ;;  %vm610_vm7 = vcmp.ge.f32.partialorder %v602_v47, 0.0  ;;  %v624_v51 = vmul.f32 %v1526_v20, %v602_v47  ;;  %v635_v52 = vpack.c.bf16 %v629_v49, %v628_v48 }
  0x36   : > { %1630 = vmatprep.mubr.msk.bf16.mxu1 %vm654_vm0, %v636_v44 }
  0x37   : > { %vm611_vm8 = vcmp.ge.f32.partialorder %v603_v50, 0.0  ;;  %v625_v53 = vmul.f32 %v1526_v20, %v603_v50  ;;  %v632_v54 = vsel %vm610_vm7, %v602_v47, %v624_v51  ;;  %1627 = vmatmul.mubr.msk.bf16.vlgmr.msra.gmra.mxu0 %vm654_vm0, %v635_v52 }
  0x39   : > { %v633_v55 = vsel %vm611_vm8, %v603_v50, %v625_v53 }
  0x3a   : > { %v637_v56 = vpack.c.bf16 %v633_v55, %v632_v54 }
  0x3c   : > { %1631 = vmatmul.mubr.msk.bf16.vlgmr.msra.gmra.mxu1 %vm654_vm0, %v637_v56 }
  0xa8   : > { %v537_v59 = vpop.permute.xlu0 %536 }
  0xa9   : > { %v539_v60 = vmul.f32 %v537_v59, %v530_v58 }
  0xaa   : > { %v550_v62 = vpop.permute.xlu1 %549 }
  0xac   : > { %v543_v61 = vpop.permute.xlu0 %542 }
  0xad   : > { %v545_v63 = vadd.f32 %v543_v61, %v539_v60 }
  0xaf   : > { %vm546_vm9 = vcmp.ge.f32.partialorder %v545_v63, 0.0  ;;  %v552_v0 = vmul.f32 %v550_v62, %v545_v63 }
  0xb1   : > { %v553_v1 = vsel %vm546_vm9, %v545_v63, %v552_v0 }
  0xb2   : > { %v554_v2 = vpack.c.bf16 %v553_v1, %v553_v1 }
  0xb4   : > { %556 = vst.msk [vmem:[#allocation2] sm:$0xf] %vm555_vm10, %v554_v2 }
  0xf7   : > { %v1628_v3 = vpop.f32.mrf.mxu0 }
  0xf8   : > { %v1570_v4 = vpack.c.bf16 %v1628_v3, %v1628_v3 }
  0xf9   : > { %v701_v5 = vpop.f32.mrf.mxu0 }
  0xfa   : > { %767 = vst.msk [vmem:[#allocation3 + $0x8] sm:$0xf] %vm764_vm11, %v1570_v4  ;;  %v1568_v6 = vpack.c.bf16 %v701_v5, %v701_v5 }
  0xfb   : > { %v1629_v8 = vpop.f32.mrf.mxu0 }
  0xfc   : > { %v1632_v7 = vpop.f32.mrf.mxu1  ;;  %765 = vst.msk [vmem:[#allocation3] sm:$0xf] %vm764_vm11, %v1568_v6  ;;  %v1571_v10 = vpack.c.bf16 %v1629_v8, %v1629_v8 }
  0xfd   : > { %v1574_v9 = vpack.c.bf16 %v1632_v7, %v1632_v7  ;;  %v704_v12 = vpop.f32.mrf.mxu0 }
  0xfe   : > { %v717_v11 = vpop.f32.mrf.mxu1  ;;  %768 = vst.msk [vmem:[#allocation3 + $0xc] sm:$0xf] %vm764_vm11, %v1571_v10  ;;  %v1569_v14 = vpack.c.bf16 %v704_v12, %v704_v12 }
  0xff   : > { %771 = vst.msk [vmem:[#allocation3 + $0x18] sm:$0xf] %vm764_vm11, %v1574_v9  ;;  %v1572_v13 = vpack.c.bf16 %v717_v11, %v717_v11 }
 0x100   : > { %v1633_v15 = vpop.f32.mrf.mxu1  ;;  %766 = vst.msk [vmem:[#allocation3 + $0x4] sm:$0xf] %vm764_vm11, %v1569_v14 }
 0x101   : > { %769 = vst.msk [vmem:[#allocation3 + $0x10] sm:$0xf] %vm764_vm11, %v1572_v13  ;;  %v1575_v16 = vpack.c.bf16 %v1633_v15, %v1633_v15 }
 0x102   : > { %v720_v17 = vpop.f32.mrf.mxu1 }
 0x103   : > { %772 = vst.msk [vmem:[#allocation3 + $0x1c] sm:$0xf] %vm764_vm11, %v1575_v16  ;;  %v1573_v18 = vpack.c.bf16 %v720_v17, %v720_v17 }
 0x105   : > { %770 = vst.msk [vmem:[#allocation3 + $0x14] sm:$0xf] %vm764_vm11, %v1573_v18 }
 0x106 PF: > { %v775_v19 = vld [vmem:[%s2242_s3] sm:$0xff]  ;;  %v1871_v21 = vmov 0   ;;  %s2275_s18 = sld [smem:[#allocation14_spill]]  ;;  %vm864_vm13 = vcmask 1043456   ;;  %vm839_vm14 = vcmask 64512   ;;  %vm965_vm15 = vcmask 523264  }
 0x107   : > { %v777_v20 = vld [vmem:[%s2244_s5] sm:$0xff]  ;;  %1744 = vset.pattern.permute.xlu0 %v1871_v21  ;;  %1745 = vset.pattern.permute.xlu1 %v1871_v21  ;;  %v1748_v13 = vld [vmem:[#allocation3 + $0x8] sm:$0xff]   ;;  %s2276_s28 = sld [smem:[#allocation15_spill]] }
 0x108   : > { %780 = vperm.xlu0 %1744, %v775_v19   ;;  %793 = vperm.xlu1 %1745, %v777_v20   ;;  %v773_v23 = vld [vmem:[%s2019_s13] sm:$0xf]  ;;  %v1749_v16 = vld [vmem:[#allocation3] sm:$0xff]   ;;  %s2278_s25 = sld [smem:[#allocation6_spill]] (%p1993_p5) }
 0x109   : > { %v774_v24 = vunpack.c.l.bf16 %v773_v23  ;;  %v838_v32 = vld [vmem:[#allocation2] sm:$0xf]  ;;  %s2279_s26 = sld [smem:[#allocation16_spill]] (%p1993_p5) }
 0x10a   : > { %1680 = vmatprep.subr.msk.bf16.mxu0 %vm864_vm13, %v838_v32  ;;  %v866_v33 = vsel %vm864_vm13, %v838_v32, 0  ;;  %v1746_v7 = vld [vmem:[#allocation3 + $0x18] sm:$0xff]  }
 0x10b   : > { %1635 = vmatpush3.bf16.msra.mxu0 %v866_v33  ;;  %1652 = vmatprep.subr.bf16.mxu1 %v1746_v7 }
 0x10c   : > { %v776_v22 = vld [vmem:[%s2275_s18] sm:$0xff]  ;;  %1653 = vmatpush3.bf16.msra.mxu1 %v1746_v7  ;;  %v1747_v10 = vld [vmem:[#allocation3 + $0x10] sm:$0xff]  }
 0x10d   : > { %786 = vperm.xlu0 %1744, %v776_v22   ;;  %1654 = vmatprep.subr.bf16.mxu1 %v1747_v10 }
 0x10e   : > { %s1563_s27 = sshll.u32 (%p1993_p5), %s2278_s25, 3 }
 0x10f   : > { %s1370_s29 = sadd.s32 (%p1993_p5), %s1852_s15, %s1563_s27 }
 0x110   : > { %1655 = vmatpush3.bf16.msra.mxu1 %v1747_v10  ;;  %s1564_s22 = sshll.u32 (%p1993_p5), %s1370_s29, 3 }
 0x111   : > { %1656 = vmatprep.subr.bf16.mxu1 %v1748_v13  ;;  %s1372_s19 = scalar_lea.vmem (%p1993_p5), %s2279_s26, %s1564_s22 }
 0x114   : > { %1657 = vmatpush3.bf16.msra.mxu1 %v1748_v13 }
 0x115   : > { %1658 = vmatprep.subr.bf16.mxu1 %v1749_v16 }
 0x118   : > { %1659 = vmatpush3.bf16.msra.mxu1 %v1749_v16 }
 0x183   : > { %v781_v25 = vpop.permute.xlu0 %780  ;;  %v794_v28 = vpop.permute.xlu1 %793 }
 0x184   : > { %v783_v26 = vmul.f32 %v781_v25, %v774_v24 }
 0x188   : > { %v787_v27 = vpop.permute.xlu0 %786 }
 0x189   : > { %v789_v29 = vadd.f32 %v787_v27, %v783_v26 }
 0x18b   : > { %v796_v30 = vmul.f32 %v794_v28, %v789_v29  ;;  %vm790_vm12 = vcmp.ge.f32.partialorder %v789_v29, 0.0 }
 0x18d   : > { %v797_v31 = vsel %vm790_vm12, %v789_v29, %v796_v30 }
 0x18e   : > { %798 = vxpose.xlu1.b32.start.end [1/1] (short) %v797_v31, 128 }
 0x20a   : > { %v814_v34 = vpop.trf.xlu1 }
 0x20e   : > { %v815_v35 = vpop.trf.xlu1 }
 0x20f   : > { %v830_v36 = vpack.c.bf16 %v815_v35, %v814_v34 }
 0x211   : > { %1636 = vmatprep.mubr.msk.bf16.mxu0 %vm839_vm14, %v830_v36 }
 0x212   : > { %v816_v37 = vpop.trf.xlu1 }
 0x216   : > { %v817_v38 = vpop.trf.xlu1 }
 0x217   : > { %v831_v39 = vpack.c.bf16 %v817_v38, %v816_v37 }
 0x219   : > { %1637 = vmatmul.mubr.msk.bf16.vlgmr.msra.gmra.mxu0 %vm839_vm14, %v831_v39 }
 0x21a   : > { %v818_v40 = vpop.trf.xlu1 }
 0x21e   : > { %v819_v41 = vpop.trf.xlu1 }
 0x21f   : > { %v832_v42 = vpack.c.bf16 %v819_v41, %v818_v40 }
 0x221   : > { %1640 = vmatprep.mubr.msk.bf16.mxu0 %vm839_vm14, %v832_v42 }
 0x222   : > { %v820_v43 = vpop.trf.xlu1 }
 0x226   : > { %v821_v44 = vpop.trf.xlu1 }
 0x227   : > { %v833_v45 = vpack.c.bf16 %v821_v44, %v820_v43 }
 0x229   : > { %1641 = vmatmul.mubr.msk.bf16.gmra.mxu0 %vm839_vm14, %v833_v45 }
 0x22a   : > { %v822_v46 = vpop.trf.xlu1 }
 0x22e   : > { %v823_v47 = vpop.trf.xlu1 }
 0x22f   : > { %v834_v48 = vpack.c.bf16 %v823_v47, %v822_v46 }
 0x231   : > { %1644 = vmatprep.mubr.msk.bf16.mxu0 %vm839_vm14, %v834_v48 }
 0x232   : > { %v824_v49 = vpop.trf.xlu1 }
 0x236   : > { %v825_v50 = vpop.trf.xlu1 }
 0x237   : > { %v835_v51 = vpack.c.bf16 %v825_v50, %v824_v49 }
 0x239   : > { %1645 = vmatmul.mubr.msk.bf16.gmra.mxu0 %vm839_vm14, %v835_v51 }
 0x23a   : > { %v826_v52 = vpop.trf.xlu1 }
 0x23e   : > { %v827_v53 = vpop.trf.xlu1 }
 0x23f   : > { %v836_v54 = vpack.c.bf16 %v827_v53, %v826_v52 }
 0x241   : > { %1648 = vmatprep.mubr.msk.bf16.mxu0 %vm839_vm14, %v836_v54 }
 0x242   : > { %v828_v55 = vpop.trf.xlu1 }
 0x246   : > { %v829_v56 = vpop.trf.xlu1 }
 0x247   : > { %v837_v57 = vpack.c.bf16 %v829_v56, %v828_v55 }
 0x249   : > { %1649 = vmatmul.mubr.msk.bf16.gmra.mxu0 %vm839_vm14, %v837_v57 }
 0x2d9   : > { %v1638_v58 = vpop.f32.mrf.mxu0 }
 0x2da   : > { %v972_v59 = vsel %vm965_vm15, %v1638_v58, -inf }
 0x2db   : > { %973 = vmax.xlane.f32.xlu0 %v972_v59  ;;  %v2083_v60 = vpop.f32.mrf.mxu0 }
 0x2dc   : > { %v966_v62 = vsel %vm965_vm15, %v2083_v60, -inf }
 0x2dd   : > { %v2085_v61 = vpop.f32.mrf.mxu0 }
 0x2de   : > { %v975_v63 = vsel %vm965_vm15, %v2085_v61, -inf }
 0x2df   : > { %967 = vmax.xlane.f32.xlu0 %v966_v62  ;;  %976 = vmax.xlane.f32.xlu1 %v975_v63  ;;  %v2091_v0 = vpop.f32.mrf.mxu0 }
 0x2e0   : > { %v969_v1 = vsel %vm965_vm15, %v2091_v0, -inf }
 0x2e3   : > { %970 = vmax.xlane.f32.xlu0 %v969_v1 }
 0x2e9   : > { %v2095_v2 = vpop.f32.mrf.mxu0 }
 0x2ea   : > { %v984_v3 = vsel %vm965_vm15, %v2095_v2, -inf }
 0x2eb   : > { %985 = vmax.xlane.f32.xlu0 %v984_v3  ;;  %v2099_v4 = vpop.f32.mrf.mxu0 }
 0x2ec   : > { %v978_v5 = vsel %vm965_vm15, %v2099_v4, -inf }
 0x2ed   : > { %v2103_v6 = vpop.f32.mrf.mxu0 }
 0x2ee   : > { %v987_v8 = vsel %vm965_vm15, %v2103_v6, -inf }
 0x2ef   : > { %979 = vmax.xlane.f32.xlu0 %v978_v5  ;;  %v2107_v9 = vpop.f32.mrf.mxu0 }
 0x2f0   : > { %v981_v11 = vsel %vm965_vm15, %v2107_v9, -inf }
 0x2f3   : > { %988 = vmax.xlane.f32.xlu0 %v987_v8 }
 0x2f7   : > { %982 = vmax.xlane.f32.xlu0 %v981_v11 }
 0x2f9   : > { %v2111_v12 = vpop.f32.mrf.mxu0 }
 0x2fa   : > { %v996_v14 = vsel %vm965_vm15, %v2111_v12, -inf }
 0x2fb   : > { %997 = vmax.xlane.f32.xlu0 %v996_v14  ;;  %v2115_v15 = vpop.f32.mrf.mxu0 }
 0x2fc   : > { %v990_v17 = vsel %vm965_vm15, %v2115_v15, -inf }
 0x2fd   : > { %v2119_v18 = vpop.f32.mrf.mxu0 }
 0x2fe   : > { %v999_v19 = vsel %vm965_vm15, %v2119_v18, -inf }
 0x2ff   : > { %991 = vmax.xlane.f32.xlu0 %v990_v17  ;;  %v2123_v20 = vpop.f32.mrf.mxu0 }
 0x300   : > { %v993_v21 = vsel %vm965_vm15, %v2123_v20, -inf }
 0x303   : > { %1000 = vmax.xlane.f32.xlu0 %v999_v19 }
 0x307   : > { %994 = vmax.xlane.f32.xlu0 %v993_v21 }
 0x309   : > { %v2127_v22 = vpop.f32.mrf.mxu0 }
 0x30a   : > { %v1008_v23 = vsel %vm965_vm15, %v2127_v22, -inf }
 0x30b   : > { %1009 = vmax.xlane.f32.xlu0 %v1008_v23  ;;  %v2131_v24 = vpop.f32.mrf.mxu0 }
 0x30c   : > { %v1002_v26 = vsel %vm965_vm15, %v2131_v24, -inf }
 0x30d   : > { %v2133_v25 = vpop.f32.mrf.mxu0 }
 0x30e   : > { %v1011_v29 = vsel %vm965_vm15, %v2133_v25, -inf }
 0x30f   : > { %1003 = vmax.xlane.f32.xlu0 %v1002_v26  ;;  %v2137_v27 = vpop.f32.mrf.mxu0 }
 0x310   : > { %v1005_v28 = vsel %vm965_vm15, %v2137_v27, -inf }
 0x313   : > { %1006 = vmax.xlane.f32.xlu0 %v1005_v28 }
 0x317   : > { %1012 = vmax.xlane.f32.xlu0 %v1011_v29 }
 0x364   : > { %v974_v30 = vpop.xlane.xlu0 %973 }
 0x365   : > { %v1016_v31 = vsub.f32 %v1638_v58, %v974_v30 }
 0x367   : > { %v1034_v32 = vmul.f32 1.442695, %v1016_v31 }
 0x368   : > { %v968_v33 = vpop.xlane.xlu0 %967  ;;  %v977_v34 = vpop.xlane.xlu1 %976 }
 0x369   : > { %1750 = vpow2.f32 %v1034_v32  ;;  %v1014_v35 = vsub.f32 %v2083_v60, %v968_v33  ;;  %v1017_v36 = vsub.f32 %v2085_v61, %v977_v34 }
 0x36b   : > { %v1030_v37 = vmul.f32 1.442695, %v1014_v35  ;;  %v1036_v38 = vmul.f32 1.442695, %v1017_v36 }
 0x36c   : > { %v971_v39 = vpop.xlane.xlu0 %970 }
 0x36d   : > { %1752 = vpow2.f32 %v1030_v37  ;;  %v1015_v40 = vsub.f32 %v2091_v0, %v971_v39 }
 0x36e   : > { %1754 = vpow2.f32 %v1036_v38 }
 0x36f   : > { %v1032_v41 = vmul.f32 1.442695, %v1015_v40 }
 0x371   : > { %1756 = vpow2.f32 %v1032_v41 }
 0x374   : > { %v986_v42 = vpop.xlane.xlu0 %985 }
 0x375   : > { %v1020_v43 = vsub.f32 %v2095_v2, %v986_v42 }
 0x376   : > { %v1751_v44 = vpop.eup %1750 }
 0x377   : > { %v1042_v45 = vmul.f32 1.442695, %v1020_v43  ;;  %v1068_v46 = vsel %vm965_vm15, %v1751_v44, 0.0 }
 0x378   : > { %v980_v47 = vpop.xlane.xlu0 %979  ;;  %1069 = vadd.xlane.f32.xlu0 %v1068_v46 }
 0x379   : > { %1758 = vpow2.f32 %v1042_v45  ;;  %v1018_v48 = vsub.f32 %v2099_v4, %v980_v47 }
 0x37a   : > { %v1753_v49 = vpop.eup %1752 }
 0x37b   : > { %v1038_v50 = vmul.f32 1.442695, %v1018_v48  ;;  %v1062_v51 = vsel %vm965_vm15, %v1753_v49, 0.0  ;;  %v1755_v52 = vpop.eup %1754 }
 0x37c   : > { %v989_v53 = vpop.xlane.xlu0 %988  ;;  %1063 = vadd.xlane.f32.xlu0 %v1062_v51  ;;  %v1071_v57 = vsel %vm965_vm15, %v1755_v52, 0.0  ;;  %v1111_v60 = vpack.c.bf16 %v1755_v52, %v1751_v44 }
 0x37d   : > { %1760 = vpow2.f32 %v1038_v50  ;;  %v1021_v54 = vsub.f32 %v2103_v6, %v989_v53 }
 0x37e   : > { %v1757_v55 = vpop.eup %1756 }
 0x37f   : > { %v1044_v56 = vmul.f32 1.442695, %v1021_v54  ;;  %v1110_v58 = vpack.c.bf16 %v1757_v55, %v1753_v49  ;;  %v1065_v63 = vsel %vm965_vm15, %v1757_v55, 0.0 }
 0x380   : > { %v983_v59 = vpop.xlane.xlu0 %982  ;;  %1072 = vadd.xlane.f32.xlu0 %v1071_v57 }
 0x381   : > { %1762 = vpow2.f32 %v1044_v56  ;;  %v1019_v61 = vsub.f32 %v2107_v9, %v983_v59  ;;  %1660 = vmatprep.mubr.msk.bf16.mxu1 %vm965_vm15, %v1110_v58 }
 0x382   : > { %1661 = vmatmul.mubr.msk.bf16.vlgmr.msra.gmra.mxu1 %vm965_vm15, %v1111_v60 }
 0x383   : > { %v1040_v62 = vmul.f32 1.442695, %v1019_v61 }
 0x384   : > { %v998_v0 = vpop.xlane.xlu0 %997  ;;  %1066 = vadd.xlane.f32.xlu0 %v1065_v63 }
 0x385   : > { %1764 = vpow2.f32 %v1040_v62  ;;  %v1024_v1 = vsub.f32 %v2111_v12, %v998_v0 }
 0x386   : > { %v1759_v2 = vpop.eup %1758 }
 0x387   : > { %v1050_v3 = vmul.f32 1.442695, %v1024_v1  ;;  %v1080_v4 = vsel %vm965_vm15, %v1759_v2, 0.0 }
 0x388   : > { %v992_v5 = vpop.xlane.xlu0 %991  ;;  %1081 = vadd.xlane.f32.xlu0 %v1080_v4 }
 0x389   : > { %1766 = vpow2.f32 %v1050_v3  ;;  %v1022_v6 = vsub.f32 %v2115_v15, %v992_v5 }
 0x38a   : > { %v1761_v7 = vpop.eup %1760 }
 0x38b   : > { %v1046_v8 = vmul.f32 1.442695, %v1022_v6  ;;  %v1074_v9 = vsel %vm965_vm15, %v1761_v7, 0.0 }
 0x38c   : > { %v1001_v10 = vpop.xlane.xlu0 %1000  ;;  %1075 = vadd.xlane.f32.xlu0 %v1074_v9 }
 0x38d   : > { %1768 = vpow2.f32 %v1046_v8  ;;  %v1025_v11 = vsub.f32 %v2119_v18, %v1001_v10 }
 0x38e   : > { %v1763_v13 = vpop.eup %1762 }
 0x38f   : > { %v1052_v12 = vmul.f32 1.442695, %v1025_v11  ;;  %v1083_v14 = vsel %vm965_vm15, %v1763_v13, 0.0  ;;  %v1113_v28 = vpack.c.bf16 %v1763_v13, %v1759_v2  ;;  %v2185_v2 = vld [vmem:[%s2276_s28] ss:$0 sm:$0xff] }
 0x390   : > { %v995_v16 = vpop.xlane.xlu0 %994  ;;  %1084 = vadd.xlane.f32.xlu0 %v1083_v14 }
 0x391   : > { %1770 = vpow2.f32 %v1052_v12  ;;  %v1023_v17 = vsub.f32 %v2123_v20, %v995_v16 }
 0x392   : > { %v1765_v19 = vpop.eup %1764 }
 0x393   : > { %v1048_v15 = vmul.f32 1.442695, %v1023_v17  ;;  %v1077_v21 = vsel %vm965_vm15, %v1765_v19, 0.0  ;;  %v1112_v23 = vpack.c.bf16 %v1765_v19, %v1761_v7 }
 0x394   : > { %v1010_v26 = vpop.xlane.xlu0 %1009  ;;  %1078 = vadd.xlane.f32.xlu0 %v1077_v21 }
 0x395   : > { %1772 = vpow2.f32 %v1048_v15  ;;  %v1028_v18 = vsub.f32 %v2127_v22, %v1010_v26  ;;  %1664 = vmatprep.mubr.msk.bf16.mxu1 %vm965_vm15, %v1112_v23 }
 0x396   : > { %v1767_v29 = vpop.eup %1766  ;;  %1665 = vmatmul.mubr.msk.bf16.gmra.mxu1 %vm965_vm15, %v1113_v28 }
 0x397   : > { %v1058_v30 = vmul.f32 1.442695, %v1028_v18  ;;  %v1092_v31 = vsel %vm965_vm15, %v1767_v29, 0.0 }
 0x398   : > { %v1004_v20 = vpop.xlane.xlu0 %1003  ;;  %1093 = vadd.xlane.f32.xlu0 %v1092_v31 }
 0x399   : > { %1774 = vpow2.f32 %v1058_v30  ;;  %v1026_v32 = vsub.f32 %v2131_v24, %v1004_v20 }
 0x39a   : > { %v1769_v33 = vpop.eup %1768 }
 0x39b   : > { %v1054_v34 = vmul.f32 1.442695, %v1026_v32  ;;  %v1086_v35 = vsel %vm965_vm15, %v1769_v33, 0.0 }
 0x39c   : > { %v1007_v36 = vpop.xlane.xlu0 %1006  ;;  %1087 = vadd.xlane.f32.xlu0 %v1086_v35 }
 0x39d   : > { %1776 = vpow2.f32 %v1054_v34  ;;  %v1027_v22 = vsub.f32 %v2137_v27, %v1007_v36 }
 0x39e   : > { %v1771_v37 = vpop.eup %1770 }
 0x39f   : > { %v1056_v38 = vmul.f32 1.442695, %v1027_v22  ;;  %v1095_v39 = vsel %vm965_vm15, %v1771_v37, 0.0  ;;  %v1115_v45 = vpack.c.bf16 %v1771_v37, %v1767_v29 }
 0x3a0   : > { %v1013_v40 = vpop.xlane.xlu0 %1012  ;;  %1096 = vadd.xlane.f32.xlu0 %v1095_v39 }
 0x3a1   : > { %1778 = vpow2.f32 %v1056_v38  ;;  %v1029_v41 = vsub.f32 %v2133_v25, %v1013_v40 }
 0x3a2   : > { %v1773_v42 = vpop.eup %1772 }
 0x3a3   : > { %v1060_v24 = vmul.f32 1.442695, %v1029_v41  ;;  %v1089_v43 = vsel %vm965_vm15, %v1773_v42, 0.0  ;;  %v1114_v44 = vpack.c.bf16 %v1773_v42, %v1769_v33 }
 0x3a4   : > { %1090 = vadd.xlane.f32.xlu0 %v1089_v43 }
 0x3a5   : > { %1780 = vpow2.f32 %v1060_v24  ;;  %1668 = vmatprep.mubr.msk.bf16.mxu1 %vm965_vm15, %v1114_v44 }
 0x3a6   : > { %v1775_v27 = vpop.eup %1774  ;;  %1669 = vmatmul.mubr.msk.bf16.gmra.mxu1 %vm965_vm15, %v1115_v45 }
 0x3a7   : > { %v1104_v46 = vsel %vm965_vm15, %v1775_v27, 0.0 }
 0x3a8   : > { %1105 = vadd.xlane.f32.xlu0 %v1104_v46 }
 0x3aa   : > { %v1777_v47 = vpop.eup %1776 }
 0x3ab   : > { %v1098_v48 = vsel %vm965_vm15, %v1777_v47, 0.0 }
 0x3ac   : > { %1099 = vadd.xlane.f32.xlu0 %v1098_v48 }
 0x3ae   : > { %v1779_v25 = vpop.eup %1778 }
 0x3af   : > { %v1101_v49 = vsel %vm965_vm15, %v1779_v25, 0.0  ;;  %v1116_v50 = vpack.c.bf16 %v1779_v25, %v1777_v47 }
 0x3b0   : > { %1102 = vadd.xlane.f32.xlu1 %v1101_v49 }
 0x3b1   : > { %1672 = vmatprep.mubr.msk.bf16.mxu1 %vm965_vm15, %v1116_v50 }
 0x3b2   : > { %v1781_v51 = vpop.eup %1780 }
 0x3b3   : > { %v1107_v52 = vsel %vm965_vm15, %v1781_v51, 0.0  ;;  %v1117_v53 = vpack.c.bf16 %v1781_v51, %v1775_v27 }
 0x3b4   : > { %1108 = vadd.xlane.f32.xlu1 %v1107_v52 }
 0x3b5   : > { %1673 = vmatmul.mubr.msk.bf16.gmra.mxu1 %vm965_vm15, %v1117_v53 }
 0x401   : > { %v1070_v54 = vpop.xlane.xlu0 %1069 }
 0x405   : > { %v1064_v55 = vpop.xlane.xlu0 %1063 }
 0x406   : > { %1782 = vrcp.f32 %v1064_v55 }
 0x409   : > { %v1073_v56 = vpop.xlane.xlu0 %1072 }
 0x40d   : > { %v1067_v57 = vpop.xlane.xlu0 %1066 }
 0x40e   : > { %1784 = vrcp.f32 %v1067_v57 }
 0x40f   : > { %1786 = vrcp.f32 %v1070_v54 }
 0x410   : > { %1788 = vrcp.f32 %v1073_v56 }
 0x411   : > { %v1082_v58 = vpop.xlane.xlu0 %1081 }
 0x413   : > { %v1783_v63 = vpop.eup %1782 }
 0x415   : > { %v1076_v59 = vpop.xlane.xlu0 %1075 }
 0x416   : > { %1790 = vrcp.f32 %v1076_v59 }
 0x419   : > { %v1085_v60 = vpop.xlane.xlu0 %1084 }
 0x41b   : > { %v1785_v5 = vpop.eup %1784 }
 0x41c   : > { %v1787_v9 = vpop.eup %1786 }
 0x41d   : > { %v1079_v62 = vpop.xlane.xlu0 %1078  ;;  %v1789_v13 = vpop.eup %1788 }
 0x41e   : > { %1792 = vrcp.f32 %v1079_v62 }
 0x41f   : > { %1794 = vrcp.f32 %v1082_v58 }
 0x420   : > { %1796 = vrcp.f32 %v1085_v60 }
 0x421   : > { %v1094_v7 = vpop.xlane.xlu0 %1093 }
 0x423   : > { %v1791_v21 = vpop.eup %1790 }
 0x425   : > { %v1088_v12 = vpop.xlane.xlu0 %1087 }
 0x426   : > { %1798 = vrcp.f32 %v1088_v12 }
 0x429   : > { %v1097_v19 = vpop.xlane.xlu0 %1096 }
 0x42b   : > { %v1793_v30 = vpop.eup %1792 }
 0x42c   : > { %v1795_v32 = vpop.eup %1794 }
 0x42d   : > { %v1091_v18 = vpop.xlane.xlu0 %1090  ;;  %v1797_v36 = vpop.eup %1796 }
 0x42e   : > { %1800 = vrcp.f32 %v1091_v18 }
 0x42f   : > { %1802 = vrcp.f32 %v1094_v7 }
 0x430   : > { %1804 = vrcp.f32 %v1097_v19 }
 0x431   : > { %v1106_v35 = vpop.xlane.xlu0 %1105 }
 0x433   : > { %v1799_v41 = vpop.eup %1798 }
 0x435   : > { %v1100_v39 = vpop.xlane.xlu0 %1099 }
 0x436   : > { %1806 = vrcp.f32 %v1100_v39 }
 0x439   : > { %v1103_v44 = vpop.xlane.xlu1 %1102 }
 0x43a   : > { %1808 = vrcp.f32 %v1103_v44 }
 0x43b   : > { %v1801_v27 = vpop.eup %1800  ;;  %1810 = vrcp.f32 %v1106_v35 }
 0x43c   : > { %v1803_v48 = vpop.eup %1802 }
 0x43d   : > { %v1805_v50 = vpop.eup %1804  ;;  %v1109_v51 = vpop.xlane.xlu1 %1108 }
 0x43e   : > { %1812 = vrcp.f32 %v1109_v51 }
 0x442   : > { %v1662_v61 = vpop.f32.mrf.mxu1 }
 0x443   : > { %v1289_v10 = vmul.f32 %v1787_v9, %v1662_v61  ;;  %v1807_v55 = vpop.eup %1806 }
 0x444   : > { %v1208_v0 = vpop.f32.mrf.mxu1 }
 0x445   : > { %v1287_v1 = vmul.f32 %v1783_v63, %v1208_v0  ;;  %v1312_v14 = vadd.f32 %v2185_v2, %v1289_v10 }
 0x446   : > { %v1663_v3 = vpop.f32.mrf.mxu1 }
 0x447   : > { %v1310_v4 = vadd.f32 %v2185_v2, %v1287_v1  ;;  %v1290_v16 = vmul.f32 %v1789_v13, %v1663_v3  ;;  %v1809_v61 = vpop.eup %1808 }
 0x448   : > { %v1211_v6 = vpop.f32.mrf.mxu1  ;;  %v1811_v0 = vpop.eup %1810 }
 0x449   : > { %v1288_v8 = vmul.f32 %v1785_v5, %v1211_v6  ;;  %1326 = vxpose.xlu0.b32.start [1/16] (narrow) %v1310_v4, 32  ;;  %v1313_v17 = vadd.f32 %v2185_v2, %v1290_v16 }
 0x44b   : > { %v1311_v11 = vadd.f32 %v2185_v2, %v1288_v8  ;;  %v1813_v4 = vpop.eup %1812 }
 0x44d   : > { %1327 = vxpose.xlu0.b32.cont [2/16] (narrow) %v1311_v11, 32 }
 0x451   : > { %1328 = vxpose.xlu0.b32.cont [3/16] (narrow) %v1312_v14, 32 }
 0x455   : > { %1329 = vxpose.xlu0.b32.cont [4/16] (narrow) %v1313_v17, 32 }
 0x456   : > { %v1666_v15 = vpop.f32.mrf.mxu1 }
 0x457   : > { %v1293_v33 = vmul.f32 %v1795_v32, %v1666_v15 }
 0x458   : > { %v1224_v23 = vpop.f32.mrf.mxu1 }
 0x459   : > { %v1291_v26 = vmul.f32 %v1791_v21, %v1224_v23  ;;  %v1316_v22 = vadd.f32 %v2185_v2, %v1293_v33 }
 0x45a   : > { %v1667_v28 = vpop.f32.mrf.mxu1 }
 0x45b   : > { %v1314_v29 = vadd.f32 %v2185_v2, %v1291_v26  ;;  %v1294_v37 = vmul.f32 %v1797_v36, %v1667_v28 }
 0x45c   : > { %v1227_v31 = vpop.f32.mrf.mxu1 }
 0x45d   : > { %v1292_v20 = vmul.f32 %v1793_v30, %v1227_v31  ;;  %1330 = vxpose.xlu0.b32.cont [5/16] (narrow) %v1314_v29, 32  ;;  %v1317_v40 = vadd.f32 %v2185_v2, %v1294_v37 }
 0x45f   : > { %v1315_v34 = vadd.f32 %v2185_v2, %v1292_v20 }
 0x461   : > { %1331 = vxpose.xlu0.b32.cont [6/16] (narrow) %v1315_v34, 32 }
 0x465   : > { %1332 = vxpose.xlu0.b32.cont [7/16] (narrow) %v1316_v22, 32 }
 0x466   : > { %v1670_v38 = vpop.f32.mrf.mxu1 }
 0x467   : > { %v1297_v25 = vmul.f32 %v1803_v48, %v1670_v38 }
 0x468   : > { %v1240_v42 = vpop.f32.mrf.mxu1 }
 0x469   : > { %v1295_v24 = vmul.f32 %v1799_v41, %v1240_v42  ;;  %1333 = vxpose.xlu0.b32.cont [8/16] (narrow) %v1317_v40, 32  ;;  %v1320_v52 = vadd.f32 %v2185_v2, %v1297_v25 }
 0x46a   : > { %v1671_v43 = vpop.f32.mrf.mxu1 }
 0x46b   : > { %v1318_v45 = vadd.f32 %v2185_v2, %v1295_v24  ;;  %v1298_v53 = vmul.f32 %v1805_v50, %v1671_v43 }
 0x46c   : > { %v1243_v46 = vpop.f32.mrf.mxu1 }
 0x46d   : > { %v1296_v47 = vmul.f32 %v1801_v27, %v1243_v46  ;;  %1334 = vxpose.xlu0.b32.cont [9/16] (narrow) %v1318_v45, 32  ;;  %v1321_v56 = vadd.f32 %v2185_v2, %v1298_v53 }
 0x46f   : > { %v1319_v49 = vadd.f32 %v2185_v2, %v1296_v47 }
 0x471   : > { %1335 = vxpose.xlu0.b32.cont [10/16] (narrow) %v1319_v49, 32 }
 0x475   : > { %v1674_v54 = vpop.f32.mrf.mxu1  ;;  %1336 = vxpose.xlu0.b32.cont [11/16] (narrow) %v1320_v52, 32 }
 0x476   : > { %v1301_v3 = vmul.f32 %v1811_v0, %v1674_v54 }
 0x477   : > { %v1256_v57 = vpop.f32.mrf.mxu1 }
 0x478   : > { %v1299_v58 = vmul.f32 %v1807_v55, %v1256_v57  ;;  %v1324_v5 = vadd.f32 %v2185_v2, %v1301_v3 }
 0x479   : > { %v1675_v59 = vpop.f32.mrf.mxu1  ;;  %1337 = vxpose.xlu0.b32.cont [12/16] (narrow) %v1321_v56, 32 }
 0x47a   : > { %v1322_v60 = vadd.f32 %v2185_v2, %v1299_v58  ;;  %v1302_v6 = vmul.f32 %v1813_v4, %v1675_v59 }
 0x47b   : > { %v1259_v62 = vpop.f32.mrf.mxu1 }
 0x47c   : > { %v1300_v63 = vmul.f32 %v1809_v61, %v1259_v62  ;;  %v1325_v7 = vadd.f32 %v2185_v2, %v1302_v6 }
 0x47d   : > { %1338 = vxpose.xlu0.b32.cont [13/16] (narrow) %v1322_v60, 32 }
 0x47e   : > { %v1323_v1 = vadd.f32 %v2185_v2, %v1300_v63 }
 0x481   : > { %1339 = vxpose.xlu0.b32.cont [14/16] (narrow) %v1323_v1, 32 }
 0x485   : > { %1340 = vxpose.xlu0.b32.cont [15/16] (narrow) %v1324_v5, 32 }
 0x489   : > { %1341 = vxpose.xlu0.b32.end [16/16] (narrow) %v1325_v7, 32 }
 0x4c9   : > { %v1342_v8 = vpop.trf.xlu0 }
 0x4ca   : > { %1358 = vst [vmem:[%s2024_s4] sm:$0xff] %v1342_v8 }
 0x4cd   : > { %v1343_v9 = vpop.trf.xlu0 }
 0x4ce   : > { %1359 = vst [vmem:[%s2024_s4 + $0x8] sm:$0xff] %v1343_v9 }
 0x4d1   : > { %v1344_v10 = vpop.trf.xlu0  ;;  %v1407_v2 = vld [vmem:[%s2024_s4] sm:$0xff] (%p1993_p5) }
 0x4d2   : > { %1360 = vst [vmem:[%s2024_s4 + $0x10] sm:$0xff] %v1344_v10  ;;  %1368 = sbr.rel (!%p1993_p5) target bundleno = 1247 (0x4df), region = 84  ;;  %1408 = vst [vmem:[%s1372_s19] sm:$0xff] (%p1993_p5), %v1407_v2 }
 0x4d5   : > { %v1345_v11 = vpop.trf.xlu0  ;;  %v1409_v13 = vld [vmem:[%s2024_s4 + $0x8] sm:$0xff] (%p1993_p5) }
 0x4d6   : > { %1361 = vst [vmem:[%s2024_s4 + $0x18] sm:$0xff] %v1345_v11  ;;  %1410 = vst [vmem:[%s1372_s19 + $0x10] sm:$0xff] (%p1993_p5), %v1409_v13 }
 0x4d9   : > { %v1411_v12 = vld [vmem:[%s2024_s4 + $0x10] sm:$0xff] }
 0x4da   : > { %1412 = vst [vmem:[%s1372_s19 + $0x20] sm:$0xff] %v1411_v12 }
 0x4dd   : > { %v1413_v14 = vld [vmem:[%s2024_s4 + $0x18] sm:$0xff] }
 0x4de   : > { %1414 = vst [vmem:[%s1372_s19 + $0x30] sm:$0xff] %v1413_v14 }
 0x4df PF: > { %s2280_s21 = sld [smem:[#allocation9_spill]] }
 0x4e0   : > { %s2281_s29 = sld [smem:[#allocation5_spill]] }
 0x4e1   : > { %s2282_s30 = sld [smem:[#allocation13_spill]] }
 0x4e2   : > { %s2283_s15 = sld [smem:[#allocation7_spill]] }
 0x4e3   : > { %s2284_s16 = sld [smem:[#allocation8_spill]] }
 0x4e4   : > { %s2285_s17 = sld [smem:[#allocation10_spill]] }
 0x4e5   : > { %s24_s19 = sadd.s32 1, %s2280_s21   ;;  %s2286_s18 = sld [smem:[#allocation12_spill]] }
 0x4e6   : > { %p21_p12 = scmp.ge.s32.totalorder %s24_s19, 6  }
 0x4e8   :  { %23 = sbr.rel (!%p21_p12) target bundleno = 8 (0x8), region = 154 }

// kernel: hssm_forward.3
= control target key start
LH: loop header
LB: loop body
LE: loop exit
PB: predicated region body
PF: predicated region fallthrough
CT: control target
= control target key end

     0   :  { %12 = vsyncpa [#allocation3], 0  ;;  %s4211_s0 = inlined_call_operand.hbm [shape: f32[2,16,16,32], index: 0, kind: input, shape index: {}]   ;;  %s4212_s1 = inlined_call_operand.vmem [shape: f32[3,3,32], index: 1, kind: input, shape index: {}]   ;;  %s4213_s2 = inlined_call_operand.vmem [shape: f32[2,2,32], index: 2, kind: input, shape index: {}]   ;;  %s4214_s3 = inlined_call_operand.vmem [shape: f32[2,2,32], index: 3, kind: input, shape index: {}]   ;;  %s4215_s4 = inlined_call_operand.vmem [shape: bf16[2,8,8,64], index: 4, kind: output, shape index: {0}]   ;;  %s4216_s5 = inlined_call_operand.vmem [shape: f32[2,2,32], index: 5, kind: output, shape index: {1}]   ;;  %s4217_s6 = inlined_call_operand.vmem [shape: f32[2,2,64], index: 6, kind: output, shape index: {2}]  }
   0x1   :  { %14 = vsyncpa [#allocation3 + $0x1], 0  ;;  %s2080_s21 = smov 0   ;;  %s2082_s22 = smov 0  }
   0x2   :  { %s2084_s23 = smov 0   ;;  %s2086_s24 = smov 0  }
   0x3 LB: > { %s2099_s25 = sadd.s32 4294967295, %s2039_s24   ;;  %s2102_s26 = sadd.s32 1, %s2039_s24   ;;  %s2039_s24 = sphi %s2086_s24, %s4847_s24   ;;  %s2035_s23 = sphi %s2084_s23, %s4846_s23   ;;  %s2031_s22 = sphi %s2082_s22, %s4845_s22   ;;  %s2027_s21 = sphi %s2080_s21, %s4844_s21  }
   0x4   : > { %s24_s27 = ssub.s32 %s2039_s24, %s2102_s26  ;;  %s27_s28 = sadd.s32 1, %s2035_s23 }
   0x5   : > { %p25_p0 = scmp.eq.s32.totalorder %s24_s27, 0  ;;  %p34_p1 = scmp.ne.s32.totalorder %s2035_s23, %s2031_s22 }
   0x6   : > { %p35_p2 = scmp.eq.s32.totalorder %s2039_s24, 0  ;;  %p40_p3 = scmp.ne.s32.totalorder %s2031_s22, %s2027_s21 }
   0x7   : > { %s2112_s29 = scalar_select %p25_p0, %s2035_s23, %s27_s28  }
   0x8   : > { %p36_p4 = por %p35_p2, %p34_p1  ;;  %p41_p5 = scmp.eq.s32.totalorder %s2099_s25, 0 }
   0x9   : > { %p1874_p6 = scmp.lt.s32.totalorder %s2039_s24, 2  ;;  %s214_s7 = sand.u32 1, %s2035_s23  }
   0xa   : > { %p2116_p7 = por %p41_p5, %p40_p3  ;;  %s1824_s8 = sshll.u32 %s214_s7, 8 }
   0xb   : > { %s1866_s9 = sshll.u32 %s2039_s24, 12  ;;  %s218_s13 = scalar_lea.vmem [#allocation2], %s1824_s8 }
   0xc   : > { %s4378_s30 = scalar_select %p2116_p7, 1, 0 }
   0xd   : > { %s2125_s12 = scalar_lea.hbm %s4211_s0, %s1866_s9  ;;  %s225_s14 = sshll.u32 %s218_s13, 4  ;;  %s2127_s14 = int_to_ptr.vmem [resolvable:$true] %s225_s14 }
   0xe   : > { %p2129_p8 = pnand %p1874_p6, %p36_p4  ;;  %s2134_s16 = scalar_lea.sflag [#allocation3], %s214_s7 }
   0xf   : > { %s1977_s17 = scalar_lea.hbm %s2125_s12, 4096  ;;  %s1982_s20 = scalar_lea.hbm %s4211_s0, 8192 }
  0x10   : > { %p1978_p10 = scmp.ne.s32.totalorder %s2125_s12, %s1977_s17  ;;  %p1979_p11 = pneg %p2129_p8 }
  0x11   : > { %p1983_p0 = scmp.lt.s32.totalorder %s2125_s12, %s4211_s0  ;;  %p1984_p1 = scmp.lt.s32.totalorder %s1982_s20, %s1977_s17 }
  0x12   : > { %p1980_p12 = pnand %p1979_p11, %p1978_p10 }
  0x13   : > { %p1985_p2 = por %p1984_p1, %p1983_p0 }
  0x14   : > { %p1981_p13 = pneg %p1980_p12 }
  0x16   : > { %p1986_p3 = pnand %p1985_p2, %p1981_p13 }
  0x18   : > { %1989 = shalt.err (!%p1986_p3)
}
  0x19   : > { %s1990_s28 = scalar_lea.vmem %s2127_s14, 4096  ;;  %s2041_s7 = smov [#allocation2]  }
  0x1a   : > { %p1991_p4 = scmp.ne.s32.totalorder %s2127_s14, %s1990_s28  ;;  %s1995_s8 = sshll.u32 %s2041_s7, 4  ;;  %s1996_s8 = int_to_ptr.vmem [resolvable:$false] %s1995_s8 }
  0x1b   : > { %s1997_s9 = scalar_lea.vmem %s1996_s8, 8192  ;;  %p1998_p10 = scmp.lt.s32.totalorder %s2127_s14, %s1996_s8 }
  0x1c   : > { %p1993_p5 = pnand %p1991_p4, %p1979_p11  ;;  %p1999_p12 = scmp.lt.s32.totalorder %s1997_s9, %s1990_s28 }
  0x1e   : > { %p1994_p6 = pneg %p1993_p5  ;;  %p2000_p9 = por %p1999_p12, %p1998_p10 }
  0x20   : > { %p2001_p7 = pnand %p2000_p9, %p1994_p6 }
  0x22   : > { %2004 = shalt.err (!%p2001_p7)
}
  0x23   : > { %s2042_s10 = smov 128   ;;  %s2043_s11 = smov 8  }
  0x24   : > { %1873 = dma.hbm_to_vmem [thread:$0]  (!%p2129_p8), %s2125_s12, 4096, %s2127_s14, %s2134_s16, %s2042_s10, %s2042_s10, %s2043_s11  }
  0x25   : > { %p233_p11 = scmp.lt.s32.totalorder %s2039_s24, 3  ;;  %p4380_p13 = scmp.ge.s32.totalorder %s2039_s24, 1 }
  0x27   : > { %p234_p0 = pnand %p4380_p13, %p233_p11 }
  0x29   : > { %237 = sbr.rel (%p234_p0) target bundleno = 349 (0x15d), region = 36 }
  0x2e   : > { %s239_s13 = sand.u32 1, %s2031_s22   ;;  %p4381_p7 = scmp.ne.s32.totalorder %s4378_s30, 0 }
  0x2f   : > { %s1828_s17 = sshll.u32 %s239_s13, 8  ;;  %s240_s18 = scalar_lea.sflag [#allocation3], %s239_s13 }
  0x30   : > { %s2159_s19 = scalar_lea.vmem [#allocation2], %s1828_s17 }
  0x31   : > { %2022 = dma.done.wait (%p4381_p7), %s240_s18, 4096  }
  0x32   : > { %2024 = vsyncadd (%p4381_p7), %s240_s18, 4294963200  ;;  %v554_v0 = vlaneseq  ;;  %v1333_v4 = vld [vmem:[%s4214_s3] sm:$0x3]  ;;  %v1334_v5 = vld [vmem:[%s4214_s3 + $0x2] sm:$0x3]  ;;  %s2044_s15 = smov 32  }
  0x33   : > { %v1335_v6 = vld [vmem:[%s2159_s19] ss:$2 sm:$0xff]  ;;  %v1840_v9 = vld [vmem:[%s2159_s19 + $0x1] ss:$2 sm:$0xff]  ;;  %v1848_v14 = vld [vmem:[%s2159_s19 + $0x10] ss:$2 sm:$0xff] }
  0x34   : > { %v2165_v1 = vshrl.u32 %v554_v0, 7  ;;  %v1833_v7 = vld [vmem:[%s2159_s19 + $0x20] ss:$2 sm:$0xff]  ;;  %v1841_v10 = vld [vmem:[%s2159_s19 + $0x21] ss:$2 sm:$0xff]  ;;  %vm360_vm0 = vcmask 1040384  }
  0x35   : > { %v1849_v15 = vld [vmem:[%s2159_s19 + $0x30] ss:$2 sm:$0xff]  ;;  %v1856_v16 = vld [vmem:[%s2159_s19 + $0x11] ss:$2 sm:$0xff]  ;;  %v1835_v22 = vld [vmem:[%s2159_s19 + $0x60] ss:$2 sm:$0xff] }
  0x36   : > { %v2168_v2 = vsub.s32 0, %v2165_v1  ;;  %v2171_v3 = vsub.s32 1, %v2165_v1  ;;  %v1857_v21 = vld [vmem:[%s2159_s19 + $0x31] ss:$2 sm:$0xff]  ;;  %v1843_v23 = vld [vmem:[%s2159_s19 + $0x61] ss:$2 sm:$0xff] }
  0x37   : > { %v1851_v28 = vld [vmem:[%s2159_s19 + $0x70] ss:$2 sm:$0xff]  ;;  %v1859_v29 = vld [vmem:[%s2159_s19 + $0x71] ss:$2 sm:$0xff]  ;;  %v1834_v30 = vld [vmem:[%s2159_s19 + $0x40] ss:$2 sm:$0xff] }
  0x38   : > { %4382 = vst [vmem:[#allocation5_spill] sm:$0xff] %v2168_v2  ;;  %4383 = vst [vmem:[#allocation6_spill] sm:$0xff] %v2171_v3  ;;  %v2182_v8 = vrot.slane %v1333_v4, %v2168_v2  ;;  %v2187_v11 = vrot.slane %v1333_v4, %v2171_v3  ;;  %v2190_v12 = vrot.slane %v1334_v5, %v2168_v2  ;;  %v1842_v35 = vld [vmem:[%s2159_s19 + $0x41] ss:$2 sm:$0xff]  ;;  %v1850_v36 = vld [vmem:[%s2159_s19 + $0x50] ss:$2 sm:$0xff] }
  0x39   : > { %v2193_v13 = vrot.slane %v1334_v5, %v2171_v3  ;;  %v1858_v37 = vld [vmem:[%s2159_s19 + $0x51] ss:$2 sm:$0xff]  ;;  %v1836_v42 = vld [vmem:[%s2159_s19 + $0x80] ss:$2 sm:$0xff]  ;;  %v1844_v43 = vld [vmem:[%s2159_s19 + $0x81] ss:$2 sm:$0xff] }
  0x3a   : > { %v1374_v17 = vmul.f32 %v2182_v8, %v1335_v6  ;;  %v1375_v18 = vmul.f32 %v1833_v7, %v2182_v8  ;;  %v1430_v19 = vmul.f32 %v1840_v9, %v2187_v11  ;;  %v1431_v20 = vmul.f32 %v1841_v10, %v2187_v11  ;;  %v1852_v44 = vld [vmem:[%s2159_s19 + $0x90] ss:$2 sm:$0xff]  ;;  %v1860_v49 = vld [vmem:[%s2159_s19 + $0x91] ss:$2 sm:$0xff]  ;;  %v1837_v50 = vld [vmem:[%s2159_s19 + $0xa0] ss:$2 sm:$0xff] }
  0x3b   : > { %v1486_v24 = vmul.f32 %v1848_v14, %v2190_v12  ;;  %v1487_v25 = vmul.f32 %v1849_v15, %v2190_v12  ;;  %v1542_v26 = vmul.f32 %v1856_v16, %v2193_v13  ;;  %v1543_v27 = vmul.f32 %v1857_v21, %v2193_v13  ;;  %v1845_v55 = vld [vmem:[%s2159_s19 + $0xa1] ss:$2 sm:$0xff]  ;;  %v1853_v56 = vld [vmem:[%s2159_s19 + $0xb0] ss:$2 sm:$0xff]  ;;  %v1861_v61 = vld [vmem:[%s2159_s19 + $0xb1] ss:$2 sm:$0xff] }
  0x3c   : > { %v1438_v31 = vadd.f32 %v1430_v19, %v1374_v17  ;;  %v1439_v32 = vadd.f32 %v1431_v20, %v1375_v18  ;;  %v1377_v33 = vmul.f32 %v1835_v22, %v2182_v8  ;;  %v1433_v34 = vmul.f32 %v1843_v23, %v2187_v11  ;;  %v1838_v62 = vld [vmem:[%s2159_s19 + $0xc0] ss:$2 sm:$0xff]  ;;  %v1846_v6 = vld [vmem:[%s2159_s19 + $0xc1] ss:$2 sm:$0xff]  ;;  %v1854_v7 = vld [vmem:[%s2159_s19 + $0xd0] ss:$2 sm:$0xff] }
  0x3d   : > { %v1489_v38 = vmul.f32 %v1851_v28, %v2190_v12  ;;  %v1545_v39 = vmul.f32 %v1859_v29, %v2193_v13  ;;  %v1376_v40 = vmul.f32 %v1834_v30, %v2182_v8  ;;  %v1432_v41 = vmul.f32 %v1842_v35, %v2187_v11  ;;  %v1839_v16 = vld [vmem:[%s2159_s19 + $0xe0] ss:$2 sm:$0xff]  ;;  %v1847_v17 = vld [vmem:[%s2159_s19 + $0xe1] ss:$2 sm:$0xff]  ;;  %v1862_v22 = vld [vmem:[%s2159_s19 + $0xd1] ss:$2 sm:$0xff] }
  0x3e   : > { %v1494_v45 = vadd.f32 %v1486_v24, %v1438_v31  ;;  %v1495_v46 = vadd.f32 %v1487_v25, %v1439_v32  ;;  %v1441_v47 = vadd.f32 %v1433_v34, %v1377_v33  ;;  %v1488_v48 = vmul.f32 %v1850_v36, %v2190_v12  ;;  %v1855_v23 = vld [vmem:[%s2159_s19 + $0xf0] ss:$2 sm:$0xff]  ;;  %v1863_v30 = vld [vmem:[%s2159_s19 + $0xf1] ss:$2 sm:$0xff]  ;;  %v2257_v36 = vld [vmem:[%s2159_s19 + $0x8] sm:$0xff]  ;;  %p280_p8 = scmp.lt.s32.totalorder %s2099_s25, 1 }
  0x3f   : > { %v1440_v51 = vadd.f32 %v1432_v41, %v1376_v40  ;;  %v1544_v52 = vmul.f32 %v1858_v37, %v2193_v13  ;;  %v1378_v53 = vmul.f32 %v1836_v42, %v2182_v8  ;;  %v1434_v54 = vmul.f32 %v1844_v43, %v2187_v11  ;;  %4384 = vst [vmem:[#allocation7_spill] sm:$0xff] %v2257_v36  ;;  %v2269_v40 = vld [vmem:[%s2159_s19] sm:$0xff]  ;;  %v2272_v41 = vld [vmem:[%s2159_s19 + $0x38] sm:$0xff]  ;;  %v2275_v42 = vld [vmem:[%s2159_s19 + $0x48] sm:$0xff] }
  0x40   : > { %v1550_v57 = vadd.f32 %v1542_v26, %v1494_v45  ;;  %v1551_v58 = vadd.f32 %v1543_v27, %v1495_v46  ;;  %v1497_v59 = vadd.f32 %v1489_v38, %v1441_v47  ;;  %v1490_v60 = vmul.f32 %v1852_v44, %v2190_v12  ;;  %v2263_v38 = vld [vmem:[%s2159_s19 + $0x18] sm:$0xff]  ;;  %4387 = vst [vmem:[#allocation10_spill] sm:$0xff] %v2269_v40  ;;  %v2278_v44 = vld [vmem:[%s2159_s19 + $0x10] sm:$0xff]  ;;  %v2281_v45 = vld [vmem:[%s2159_s19 + $0x20] sm:$0xff]  ;;  %s4849_s25 = smov (!%p280_p8, %s2099_s25), 1 }
  0x41   : > { %v1496_v63 = vadd.f32 %v1488_v48, %v1440_v51  ;;  %v1442_v0 = vadd.f32 %v1434_v54, %v1378_v53  ;;  %v1546_v4 = vmul.f32 %v1860_v49, %v2193_v13  ;;  %v1379_v5 = vmul.f32 %v1837_v50, %v2182_v8  ;;  %4385 = vst [vmem:[#allocation8_spill] sm:$0xff] %v2263_v38  ;;  %v2291_v48 = vld [vmem:[%s2159_s19 + $0x30] sm:$0xff]  ;;  %v2294_v49 = vld [vmem:[%s2159_s19 + $0x40] sm:$0xff]  ;;  %v2297_v50 = vld [vmem:[%s2159_s19 + $0x68] sm:$0xff]  ;;  %s1867_s13 = sshll.u32 %s4849_s25, 5  ;;  %s1831_s24 = sshll.u32 %s4849_s25, 1 }
  0x42   : > { %v1910_v9 = vpack.i.bf16 %v1551_v58, %v1550_v57  ;;  %v1553_v10 = vadd.f32 %v1545_v39, %v1497_v59  ;;  %v1435_v14 = vmul.f32 %v1845_v55, %v2187_v11  ;;  %v1491_v15 = vmul.f32 %v1853_v56, %v2190_v12  ;;  %4388 = vst [vmem:[#allocation11_spill] sm:$0xff] %v2272_v41  ;;  %v2304_v53 = vld [vmem:[%s2159_s19 + $0x50] sm:$0xff]  ;;  %v2307_v54 = vld [vmem:[%s2159_s19 + $0x78] sm:$0xff]  ;;  %v2313_v58 = vld [vmem:[%s2159_s19 + $0x60] sm:$0xff]  ;;  %s4183_s14 = scalar_lea.vmem %s4216_s5, %s1831_s24  ;;  %s292_s16 = scalar_lea.vmem %s4217_s6, %s1831_s24 }
  0x43   : > { %v1552_v18 = vadd.f32 %v1544_v52, %v1496_v63  ;;  %v1498_v19 = vadd.f32 %v1490_v60, %v1442_v0  ;;  %v1547_v20 = vmul.f32 %v1861_v61, %v2193_v13  ;;  %v1380_v21 = vmul.f32 %v1838_v62, %v2182_v8  ;;  %4389 = vst [vmem:[#allocation12_spill] sm:$0xff] %v2275_v42  ;;  %v2316_v59 = vld [vmem:[%s2159_s19 + $0x70] sm:$0xff]  ;;  %v2319_v60 = vld [vmem:[%s2159_s19 + $0x80] sm:$0xff]  ;;  %v2325_v0 = vld [vmem:[%s2159_s19 + $0x88] sm:$0xff] }
  0x44   : > { %1911 = vrot.lane.b32.xlu0 %v1910_v9, %s2044_s15  ;;  %1572 = vrot.lane.b32.xlu1 %v1553_v10, %s2044_s15  ;;  %v1443_v24 = vadd.f32 %v1435_v14, %v1379_v5  ;;  %v1436_v25 = vmul.f32 %v1846_v6, %v2187_v11  ;;  %v1492_v26 = vmul.f32 %v1854_v7, %v2190_v12  ;;  %v362_v46 = vrot.slane %v2257_v36, 7  ;;  %v2331_v5 = vld [vmem:[%s2159_s19 + $0xa8] sm:$0xff]  ;;  %v2342_v14 = vld [vmem:[%s2159_s19 + $0x90] sm:$0xff] }
  0x45   : > { %v1554_v27 = vadd.f32 %v1546_v4, %v1498_v19  ;;  %v1381_v28 = vmul.f32 %v1839_v16, %v2182_v8  ;;  %v1437_v29 = vmul.f32 %v1847_v17, %v2187_v11  ;;  %v1548_v33 = vmul.f32 %v1862_v22, %v2193_v13  ;;  %4390 = vst [vmem:[#allocation13_spill] sm:$0xff] %v2278_v44  ;;  %v2328_v4 = vld [vmem:[%s2159_s19 + $0x98] sm:$0xff]  ;;  %v2348_v16 = vld [vmem:[%s2159_s19 + $0xc8] sm:$0xff]  ;;  %v2363_v22 = vld [vmem:[%s2159_s19 + $0xb0] sm:$0xff] }
  0x46   : > { %v1499_v31 = vadd.f32 %v1491_v15, %v1443_v24  ;;  %v1444_v32 = vadd.f32 %v1436_v25, %v1380_v21  ;;  %v1493_v34 = vmul.f32 %v1855_v23, %v2190_v12  ;;  %v1549_v37 = vmul.f32 %v1863_v30, %v2193_v13  ;;  %v2266_v12 = vld [vmem:[%s2159_s19 + $0x28] sm:$0xff]  ;;  %4391 = vst [vmem:[#allocation14_spill] sm:$0xff] %v2281_v45  ;;  %v2284_v13 = vld [vmem:[%s2159_s19 + $0x58] sm:$0xff]  ;;  %v2360_v21 = vld [vmem:[%s2159_s19 + $0xa0] sm:$0xff] }
  0x47   : > { %v1445_v35 = vadd.f32 %v1437_v29, %v1381_v28  ;;  %4386 = vst [vmem:[#allocation9_spill] sm:$0xff] %v2266_v12  ;;  %4392 = vst [vmem:[#allocation15_spill] sm:$0xff] %v2284_v13  ;;  %v2288_v47 = vsub.s32 2, %v2165_v1  ;;  %v365_v51 = vrot.slane %v2263_v38, 7  ;;  %v368_v52 = vrot.slane %v2266_v12, 7  ;;  %v2345_v15 = vld [vmem:[%s2159_s19 + $0xb8] sm:$0xff] }
  0x48   : > { %1570 = vrot.lane.b32.xlu0 %v1552_v18, %s2044_s15  ;;  %1574 = vrot.lane.b32.xlu1 %v1554_v27, %s2044_s15  ;;  %v1555_v8 = vadd.f32 %v1547_v20, %v1499_v31  ;;  %v1500_v11 = vadd.f32 %v1492_v26, %v1444_v32  ;;  %4394 = vst [vmem:[#allocation17_spill] sm:$0xff] %v2291_v48  ;;  %4395 = vst [vmem:[#allocation18_spill] sm:$0xff] %v2294_v49  ;;  %v4219_v55 = vrot.slane %v2269_v40, 7  ;;  %v2366_v23 = vld [vmem:[%s2159_s19 + $0xd8] sm:$0xff]  ;;  %v2377_v28 = vld [vmem:[%s2159_s19 + $0xc0] sm:$0xff]  ;;  %vm457_vm1 = vcmask 1046528  }
  0x49   : > { %v1501_v39 = vadd.f32 %v1493_v34, %v1445_v35  ;;  %4393 = vst [vmem:[#allocation16_spill] sm:$0xff] %v2288_v47  ;;  %4396 = vst [vmem:[#allocation19_spill] sm:$0xff] %v2297_v50  ;;  %v371_v56 = vrot.slane %v2272_v41, 7  ;;  %v374_v57 = vrot.slane %v2275_v42, 7  ;;  %v364_v61 = vrot.slane %v2278_v44, 7  ;;  %v2380_v29 = vld [vmem:[%s2159_s19 + $0xe8] sm:$0xff] }
  0x4a   : > { %v1556_v43 = vadd.f32 %v1548_v33, %v1500_v11  ;;  %4397 = vst [vmem:[#allocation20_spill] sm:$0xff] %v2304_v53  ;;  %4398 = vst [vmem:[#allocation21_spill] sm:$0xff] %v2307_v54  ;;  %v367_v62 = vrot.slane %v2281_v45, 7  ;;  %v377_v63 = vrot.slane %v2284_v13, 7  ;;  %v2336_v6 = vsel %vm360_vm0, %v4219_v55, %v362_v46  ;;  %v2383_v30 = vld [vmem:[%s2159_s19 + $0xf8] sm:$0xff]  ;;  %v2392_v35 = vld [vmem:[%s2159_s19 + $0xd0] sm:$0xff] }
  0x4b   : > { %v1557_v1 = vadd.f32 %v1549_v37, %v1501_v39  ;;  %4399 = vst [vmem:[#allocation22_spill] sm:$0xff] %v2313_v58  ;;  %4400 = vst [vmem:[#allocation23_spill] sm:$0xff] %v2316_v59  ;;  %v370_v7 = vrot.slane %v2291_v48, 7  ;;  %v373_v9 = vrot.slane %v2294_v49, 7  ;;  %v380_v10 = vrot.slane %v2297_v50, 7  ;;  %v2404_v46 = vld [vmem:[%s2159_s19 + $0xf0] sm:$0xff] }
  0x4c   : > { %1576 = vrot.lane.b32.xlu0 %v1555_v8, %s2044_s15  ;;  %1578 = vrot.lane.b32.xlu1 %v1556_v43, %s2044_s15  ;;  %4401 = vst [vmem:[#allocation24_spill] sm:$0xff] %v2319_v60  ;;  %4402 = vst [vmem:[#allocation25_spill] sm:$0xff] %v2325_v0  ;;  %v2351_v17 = vsel %vm360_vm0, %v364_v61, %v365_v51  ;;  %v2354_v18 = vsel %vm360_vm0, %v367_v62, %v368_v52  ;;  %v376_v19 = vrot.slane %v2304_v53, 7  ;;  %v2401_v43 = vld [vmem:[%s2159_s19 + $0xe0] sm:$0xff]  ;;  %vm1157_vm2 = vcmask 261120  }
  0x4d   : > { %4403 = vst [vmem:[#allocation26_spill] sm:$0xff] %v2328_v4  ;;  %4404 = vst [vmem:[#allocation27_spill] sm:$0xff] %v2331_v5  ;;  %v383_v20 = vrot.slane %v2307_v54, 7  ;;  %v2369_v24 = vsel %vm360_vm0, %v370_v7, %v371_v56  ;;  %v2372_v25 = vsel %vm360_vm0, %v373_v9, %v374_v57  ;;  %v379_v26 = vrot.slane %v2313_v58, 7 }
  0x4e   : > { %4405 = vst [vmem:[#allocation28_spill] sm:$0xff] %v2336_v6  ;;  %4406 = vst [vmem:[#allocation29_spill] sm:$0xff] %v2342_v14  ;;  %v382_v27 = vrot.slane %v2316_v59, 7  ;;  %v2386_v31 = vsel %vm360_vm0, %v376_v19, %v377_v63  ;;  %v386_v32 = vrot.slane %v2325_v0, 7  ;;  %v389_v33 = vrot.slane %v2328_v4, 7 }
  0x4f   : > { %4407 = vst [vmem:[#allocation30_spill] sm:$0xff] %v2345_v15  ;;  %4408 = vst [vmem:[#allocation31_spill] sm:$0xff] %v2348_v16  ;;  %v392_v34 = vrot.slane %v2331_v5, 7  ;;  %v2395_v8 = vsel %vm360_vm0, %v379_v26, %v380_v10  ;;  %v385_v11 = vrot.slane %v2319_v60, 7  ;;  %v395_v37 = vrot.slane %v2345_v15, 7 }
  0x50   : > { %4409 = vst [vmem:[#allocation32_spill] sm:$0xff] %v2351_v17  ;;  %4410 = vst [vmem:[#allocation33_spill] sm:$0xff] %v2354_v18  ;;  %1580 = vrot.lane.b32.xlu0 %v1557_v1, %s2044_s15  ;;  %v398_v39 = vrot.slane %v2348_v16, 7  ;;  %v2407_v51 = vsel %vm360_vm0, %v382_v27, %v383_v20  ;;  %v388_v52 = vrot.slane %v2342_v14, 7  ;;  %v391_v1 = vrot.slane %v2360_v21, 7 }
  0x51   : > { %4411 = vst [vmem:[#allocation34_spill] sm:$0xff] %v2360_v21  ;;  %4412 = vst [vmem:[#allocation35_spill] sm:$0xff] %v2363_v22  ;;  %v401_v56 = vrot.slane %v2366_v23, 7  ;;  %v394_v57 = vrot.slane %v2363_v22, 7  ;;  %v397_v63 = vrot.slane %v2377_v28, 7  ;;  %v404_v10 = vrot.slane %v2380_v29, 7 }
  0x52   : > { %4413 = vst [vmem:[#allocation36_spill] sm:$0xff] %v2366_v23  ;;  %4414 = vst [vmem:[#allocation37_spill] sm:$0xff] %v2369_v24  ;;  %v407_v55 = vrot.slane %v2383_v30, 7  ;;  %v2420_v20 = vsel %vm360_vm0, %v388_v52, %v389_v33  ;;  %v403_v18 = vrot.slane %v2401_v43, 7  ;;  %v406_v17 = vrot.slane %v2404_v46, 7 }
  0x53   : > { %4415 = vst [vmem:[#allocation38_spill] sm:$0xff] %v2372_v25  ;;  %4416 = vst [vmem:[#allocation39_spill] sm:$0xff] %v2377_v28  ;;  %v2427_v25 = vsel %vm360_vm0, %v394_v57, %v395_v37  ;;  %v2430_v24 = vsel %vm360_vm0, %v397_v63, %v398_v39  ;;  %v4431_v33 = vrot.slane %v2269_v40, 7  ;;  %v2446_v37 = vsel %vm360_vm0, 0.0, %v367_v62 }
  0x54   : > { %4417 = vst [vmem:[#allocation40_spill] sm:$0xff] %v2380_v29  ;;  %4418 = vst [vmem:[#allocation41_spill] sm:$0xff] %v2383_v30  ;;  %v2449_v39 = vsel %vm360_vm0, %v403_v18, %v404_v10  ;;  %v2467_v62 = vsel %vm360_vm0, 0.0, %v382_v27  ;;  %v2470_v10 = vsel %vm360_vm0, 0.0, %v385_v11  ;;  %v464_v27 = vrot.slane %v2281_v45, 1 }
  0x55   : > { %4419 = vst [vmem:[#allocation42_spill] sm:$0xff] %v2386_v31  ;;  %4420 = vst [vmem:[#allocation43_spill] sm:$0xff] %v2392_v35  ;;  %v400_v31 = vrot.slane %v2392_v35, 7  ;;  %v468_v45 = vrot.slane %v2272_v41, 1  ;;  %v477_v41 = vrot.slane %v2297_v50, 1  ;;  %v492_v50 = vrot.slane %v2345_v15, 1 }
  0x56   : > { %4421 = vst [vmem:[#allocation44_spill] sm:$0xff] %v2395_v8  ;;  %4422 = vst [vmem:[#allocation45_spill] sm:$0xff] %v2401_v43  ;;  %v2417_v8 = vsel %vm360_vm0, %v385_v11, %v386_v32  ;;  %v2485_v11 = vsel %vm360_vm0, 0.0, %v394_v57  ;;  %v503_v15 = vrot.slane %v2404_v46, 1  ;;  %vm1614_vm3 = vcmask 519168  }
  0x57   : > { %4423 = vst [vmem:[#allocation46_spill] sm:$0xff] %v2404_v46  ;;  %4424 = vst [vmem:[#allocation47_spill] sm:$0xff] %v2407_v51  ;;  %v2423_v51 = vsel %vm360_vm0, %v391_v1, %v392_v34  ;;  %v2435_v32 = vsel %vm360_vm0, %v400_v31, %v401_v56  ;;  %v2440_v34 = vsel %vm360_vm0, 0.0, %v4431_v33  ;;  %v2455_v56 = vsel %vm360_vm0, 0.0, %v370_v7 }
  0x58   : > { %4425 = vst [vmem:[#allocation48_spill] sm:$0xff] %v2417_v8  ;;  %4426 = vst [vmem:[#allocation49_spill] sm:$0xff] %v2420_v20  ;;  %v2461_v33 = vsel %vm360_vm0, 0.0, %v376_v19  ;;  %v459_v7 = vrot.slane %v2257_v36, 1  ;;  %v2477_v19 = vsel %vm360_vm0, 0.0, %v388_v52  ;;  %v2497_v52 = vsel %vm360_vm0, 0.0, %v406_v17 }
  0x59   : > { %4427 = vst [vmem:[#allocation50_spill] sm:$0xff] %v2423_v51  ;;  %4428 = vst [vmem:[#allocation51_spill] sm:$0xff] %v2427_v25  ;;  %v2443_v51 = vsel %vm360_vm0, 0.0, %v364_v61  ;;  %v2464_v61 = vsel %vm360_vm0, 0.0, %v379_v26  ;;  %v2480_v26 = vsel %vm360_vm0, 0.0, %v391_v1  ;;  %v467_v1 = vrot.slane %v2291_v48, 1 }
  0x5a   : > { %4429 = vst [vmem:[#allocation52_spill] sm:$0xff] %v2430_v24  ;;  %4430 = vst [vmem:[#allocation53_spill] sm:$0xff] %v2435_v32  ;;  %v2452_v24 = vsel %vm360_vm0, %v406_v17, %v407_v55  ;;  %v2458_v32 = vsel %vm360_vm0, 0.0, %v373_v9  ;;  %v458_v55 = vrot.slane %v2269_v40, 1  ;;  %v462_v9 = vrot.slane %v2263_v38, 1 }
  0x5b   : > { %4432 = vst [vmem:[#allocation54_spill] sm:$0xff] %v2440_v34  ;;  %4433 = vst [vmem:[#allocation55_spill] sm:$0xff] %v2443_v51  ;;  %v2488_v40 = vsel %vm360_vm0, 0.0, %v397_v63  ;;  %v2494_v38 = vsel %vm360_vm0, 0.0, %v403_v18  ;;  %v473_v18 = vrot.slane %v2304_v53, 1  ;;  %v474_v17 = vrot.slane %v2284_v13, 1 }
  0x5c   : > { %4434 = vst [vmem:[#allocation56_spill] sm:$0xff] %v2446_v37  ;;  %4435 = vst [vmem:[#allocation57_spill] sm:$0xff] %v2449_v39  ;;  %v465_v39 = vrot.slane %v2266_v12, 1  ;;  %v470_v12 = vrot.slane %v2294_v49, 1  ;;  %v2503_v57 = vsel %vm457_vm1, %v458_v55, %v459_v7  ;;  %v479_v49 = vrot.slane %v2316_v59, 1 }
  0x5d   : > { %4436 = vst [vmem:[#allocation58_spill] sm:$0xff] %v2452_v24  ;;  %4437 = vst [vmem:[#allocation59_spill] sm:$0xff] %v2455_v56  ;;  %v461_v24 = vrot.slane %v2278_v44, 1  ;;  %v2491_v44 = vsel %vm360_vm0, 0.0, %v400_v31  ;;  %v471_v31 = vrot.slane %v2275_v42, 1  ;;  %v480_v55 = vrot.slane %v2307_v54, 1 }
  0x5e   : > { %4438 = vst [vmem:[#allocation60_spill] sm:$0xff] %v2458_v32  ;;  %4439 = vst [vmem:[#allocation61_spill] sm:$0xff] %v2461_v33  ;;  %v2511_v36 = vsel %vm457_vm1, %v464_v27, %v465_v39  ;;  %v486_v53 = vrot.slane %v2328_v4, 1  ;;  %v488_v27 = vrot.slane %v2360_v21, 1  ;;  %v494_v59 = vrot.slane %v2377_v28, 1 }
  0x5f   : > { %4440 = vst [vmem:[#allocation62_spill] sm:$0xff] %v2464_v61  ;;  %4441 = vst [vmem:[#allocation63_spill] sm:$0xff] %v2467_v62  ;;  %v2506_v63 = vsel %vm457_vm1, %v461_v24, %v462_v9  ;;  %v482_v24 = vrot.slane %v2319_v60, 1  ;;  %v495_v54 = vrot.slane %v2348_v16, 1  ;;  %v2529_v60 = vsel %vm457_vm1, %v467_v1, %v468_v45 }
  0x60   : > { %4442 = vst [vmem:[#allocation64_spill] sm:$0xff] %v2470_v10  ;;  %4443 = vst [vmem:[#allocation65_spill] sm:$0xff] %v2477_v19  ;;  %v497_v4 = vrot.slane %v2392_v35, 1  ;;  %v498_v21 = vrot.slane %v2366_v23, 1  ;;  %v504_v28 = vrot.slane %v2383_v30, 1  ;;  %v2541_v16 = vsel %vm457_vm1, %v473_v18, %v474_v17  ;;  %v4515_v23 = vld [vmem:[#allocation35_spill] sm:$0xff] }
  0x61   : > { %4444 = vst [vmem:[#allocation66_spill] sm:$0xff] %v2480_v26  ;;  %4445 = vst [vmem:[#allocation67_spill] sm:$0xff] %v2485_v11  ;;  %v4516_v35 = vld [vmem:[#allocation30_spill] sm:$0xff]  ;;  %vm1623_vm4 = vcmask 523264   ;;  %vm1227_vm5 = vcmask 253952   ;;  %vm1645_vm6 = vcmask 516096  }
  0x62   : > { %4446 = vst [vmem:[#allocation68_spill] sm:$0xff] %v2488_v40  ;;  %4447 = vst [vmem:[#allocation69_spill] sm:$0xff] %v2491_v44 }
  0x63   : > { %4448 = vst [vmem:[#allocation70_spill] sm:$0xff] %v2494_v38  ;;  %4449 = vst [vmem:[#allocation71_spill] sm:$0xff] %v2497_v52  ;;  %v476_v52 = vrot.slane %v2313_v58, 1  ;;  %v491_v58 = vrot.slane %v2363_v22, 1  ;;  %v501_v22 = vrot.slane %v2380_v29, 1  ;;  %v4513_v29 = vld [vmem:[#allocation34_spill] sm:$0xff] }
  0x64   : > { %4450 = vst [vmem:[#allocation72_spill] sm:$0xff] %v2503_v57  ;;  %4451 = vst [vmem:[#allocation73_spill] sm:$0xff] %v2506_v63  ;;  %v483_v63 = vrot.slane %v2325_v0, 1  ;;  %v485_v57 = vrot.slane %v2342_v14, 1  ;;  %v2532_v0 = vsel %vm457_vm1, %v470_v12, %v471_v31  ;;  %v2547_v12 = vsel %vm457_vm1, %v479_v49, %v480_v55 }
  0x65   : > { %4452 = vst [vmem:[#allocation74_spill] sm:$0xff] %v2511_v36  ;;  %v489_v36 = vrot.slane %v2331_v5, 1  ;;  %4453 = vst [vmem:[#allocation75_spill] sm:$0xff] %v2529_v60  ;;  %v500_v5 = vrot.slane %v2401_v43, 1  ;;  %v2544_v1 = vsel %vm457_vm1, %v476_v52, %v477_v41  ;;  %v325_v60 = vld [vmem:[%s4212_s1] sm:$0x7]  ;;  %v2562_v18 = vsel %vm457_vm1, %v491_v58, %v492_v50 }
  0x66   : > { %4454 = vst [vmem:[#allocation76_spill] sm:$0xff] %v2532_v0  ;;  %4455 = vst [vmem:[#allocation77_spill] sm:$0xff] %v2541_v16  ;;  %v2550_v0 = vsel %vm457_vm1, %v482_v24, %v483_v63  ;;  %v2556_v46 = vsel %vm457_vm1, %v485_v57, %v486_v53  ;;  %v2565_v52 = vsel %vm457_vm1, %v494_v59, %v495_v54  ;;  %v2571_v24 = vsel %vm457_vm1, %v459_v7, 0.0  ;;  %v2594_v7 = vld [vmem:[%s4212_s1 + $0x4] sm:$0x7]  ;;  %v4506_v16 = vld [vmem:[#allocation22_spill] sm:$0xff] }
  0x67   : > { %4456 = vst [vmem:[#allocation78_spill] sm:$0xff] %v2544_v1  ;;  %4457 = vst [vmem:[#allocation79_spill] sm:$0xff] %v2547_v12  ;;  %v2559_v30 = vsel %vm457_vm1, %v488_v27, %v489_v36  ;;  %v2568_v49 = vsel %vm457_vm1, %v497_v4, %v498_v21  ;;  %v2577_v57 = vsel %vm457_vm1, %v465_v39, 0.0  ;;  %v2580_v27 = vsel %vm457_vm1, %v500_v5, %v501_v22  ;;  %v4501_v12 = vld [vmem:[#allocation14_spill] sm:$0xff]  ;;  %v4514_v43 = vld [vmem:[#allocation27_spill] sm:$0xff] }
  0x68   : > { %4458 = vst [vmem:[#allocation80_spill] sm:$0xff] %v2550_v0  ;;  %4459 = vst [vmem:[#allocation81_spill] sm:$0xff] %v2556_v46  ;;  %v2574_v0 = vsel %vm457_vm1, %v462_v9, 0.0  ;;  %v2583_v58 = vsel %vm457_vm1, %v503_v15, %v504_v28  ;;  %v2586_v59 = vsel %vm457_vm1, %v468_v45, 0.0  ;;  %v2589_v4 = vsel %vm457_vm1, %v471_v31, 0.0  ;;  %v4496_v46 = vld [vmem:[#allocation57_spill] sm:$0xff] }
  0x69   : > { %4460 = vst [vmem:[#allocation82_spill] sm:$0xff] %v2559_v30  ;;  %4461 = vst [vmem:[#allocation83_spill] sm:$0xff] %v2562_v18  ;;  %v2597_v39 = vsel %vm457_vm1, %v474_v17, 0.0  ;;  %v2600_v5 = vsel %vm457_vm1, %v477_v41, 0.0  ;;  %v2603_v15 = vsel %vm457_vm1, %v480_v55, 0.0  ;;  %v557_v45 = vrot.slane %v325_v60, %v2168_v2  ;;  %v4492_v18 = vld [vmem:[#allocation47_spill] sm:$0xff] }
  0x6a   : > { %4462 = vst [vmem:[#allocation84_spill] sm:$0xff] %v2565_v52  ;;  %4463 = vst [vmem:[#allocation85_spill] sm:$0xff] %v2568_v49  ;;  %v2607_v9 = vsel %vm457_vm1, %v483_v63, 0.0  ;;  %v2610_v31 = vsel %vm457_vm1, %v486_v53, 0.0  ;;  %v2616_v17 = vsel %vm457_vm1, %v492_v50, 0.0  ;;  %v2619_v41 = vsel %vm457_vm1, %v495_v54, 0.0 }
  0x6b   : > { %4464 = vst [vmem:[#allocation86_spill] sm:$0xff] %v2571_v24  ;;  %4465 = vst [vmem:[#allocation87_spill] sm:$0xff] %v2574_v0  ;;  %v2622_v55 = vsel %vm457_vm1, %v498_v21, 0.0  ;;  %v2628_v63 = vsel %vm457_vm1, %v504_v28, 0.0  ;;  %v2631_v53 = vrot.slane %v325_v60, %v2171_v3  ;;  %v2638_v50 = vrot.slane %v2594_v7, %v2168_v2  ;;  %v4490_v52 = vld [vmem:[#allocation42_spill] sm:$0xff]  ;;  %v4494_v30 = vld [vmem:[#allocation52_spill] sm:$0xff] }
  0x6c   : > { %4466 = vst [vmem:[#allocation88_spill] sm:$0xff] %v2577_v57  ;;  %4467 = vst [vmem:[#allocation89_spill] sm:$0xff] %v2580_v27  ;;  %v2625_v27 = vsel %vm457_vm1, %v501_v22, 0.0  ;;  %v2642_v54 = vrot.slane %v2594_v7, %v2171_v3  ;;  %v558_v21 = vmul.f32 0.0, %v557_v45  ;;  %v559_v22 = vmul.f32 %v557_v45, %v2440_v34  ;;  %v4504_v1 = vld [vmem:[#allocation18_spill] sm:$0xff]  ;;  %v4509_v57 = vld [vmem:[#allocation21_spill] sm:$0xff] }
  0x6d   : > { %4468 = vst [vmem:[#allocation90_spill] sm:$0xff] %v2583_v58  ;;  %4469 = vst [vmem:[#allocation91_spill] sm:$0xff] %v2586_v59  ;;  %v2613_v58 = vsel %vm457_vm1, %v489_v36, 0.0  ;;  %v2634_v36 = vrot.slane %v325_v60, %v2288_v47  ;;  %v560_v28 = vmul.f32 %v557_v45, %v2336_v6  ;;  %v563_v60 = vmul.f32 %v557_v45, %v2446_v37  ;;  %v4487_v47 = vld [vmem:[#allocation33_spill] sm:$0xff]  ;;  %v4508_v59 = vld [vmem:[#allocation23_spill] sm:$0xff] }
  0x6e   : > { %4470 = vst [vmem:[#allocation92_spill] sm:$0xff] %v2589_v4  ;;  %4471 = vst [vmem:[#allocation93_spill] sm:$0xff] %v2594_v7  ;;  %v564_v49 = vmul.f32 %v557_v45, %v4487_v47  ;;  %v565_v2 = vmul.f32 %v557_v45, %v2455_v56  ;;  %v567_v3 = vmul.f32 %v557_v45, %v2458_v32  ;;  %v4489_v7 = vld [vmem:[#allocation38_spill] sm:$0xff]  ;;  %v4507_v4 = vld [vmem:[#allocation19_spill] sm:$0xff] }
  0x6f   : > { %4472 = vst [vmem:[#allocation94_spill] sm:$0xff] %v2597_v39  ;;  %4473 = vst [vmem:[#allocation95_spill] sm:$0xff] %v2600_v5  ;;  %v569_v34 = vmul.f32 %v557_v45, %v2461_v33  ;;  %v570_v6 = vmul.f32 %v557_v45, %v4490_v52  ;;  %v573_v37 = vmul.f32 %v557_v45, %v2467_v62  ;;  %v4503_v5 = vld [vmem:[#allocation11_spill] sm:$0xff]  ;;  %v4505_v39 = vld [vmem:[#allocation20_spill] sm:$0xff] }
  0x70   : > { %4474 = vst [vmem:[#allocation96_spill] sm:$0xff] %v2603_v15  ;;  %4475 = vst [vmem:[#allocation97_spill] sm:$0xff] %v2607_v9  ;;  %v574_v47 = vmul.f32 %v557_v45, %v4492_v18  ;;  %v575_v56 = vmul.f32 %v557_v45, %v2470_v10  ;;  %v577_v32 = vmul.f32 %v557_v45, %v2477_v19  ;;  %v4497_v9 = vld [vmem:[#allocation10_spill] sm:$0xff]  ;;  %v4499_v15 = vld [vmem:[#allocation13_spill] sm:$0xff] }
  0x71   : > { %4476 = vst [vmem:[#allocation98_spill] sm:$0xff] %v2610_v31  ;;  %4477 = vst [vmem:[#allocation99_spill] sm:$0xff] %v2613_v58  ;;  %v579_v33 = vmul.f32 %v557_v45, %v2480_v26  ;;  %v4493_v58 = vld [vmem:[#allocation50_spill] sm:$0xff]  ;;  %v583_v62 = vmul.f32 %v557_v45, %v2488_v40  ;;  %v584_v18 = vmul.f32 %v557_v45, %v4494_v30  ;;  %v4495_v31 = vld [vmem:[#allocation53_spill] sm:$0xff]  ;;  %v624_v26 = vmul.f32 0.0, %v2631_v53 }
  0x72   : > { %4478 = vst [vmem:[#allocation100_spill] sm:$0xff] %v2616_v17  ;;  %4479 = vst [vmem:[#allocation101_spill] sm:$0xff] %v2619_v41  ;;  %v4491_v17 = vld [vmem:[#allocation44_spill] sm:$0xff]  ;;  %v580_v52 = vmul.f32 %v557_v45, %v4493_v58  ;;  %v585_v10 = vmul.f32 %v557_v45, %v2491_v44  ;;  %v587_v19 = vmul.f32 %v557_v45, %v2494_v38  ;;  %v4502_v38 = vld [vmem:[#allocation9_spill] sm:$0xff] }
  0x73   : > { %4480 = vst [vmem:[#allocation102_spill] sm:$0xff] %v2622_v55  ;;  %4481 = vst [vmem:[#allocation103_spill] sm:$0xff] %v2625_v27  ;;  %v4486_v27 = vld [vmem:[#allocation32_spill] sm:$0xff]  ;;  %v625_v58 = vmul.f32 %v2631_v53, %v4497_v9  ;;  %v627_v40 = vmul.f32 %v2631_v53, %v4499_v15  ;;  %v632_v9 = vmul.f32 %v2631_v53, %v4503_v5  ;;  %v4511_v24 = vld [vmem:[#allocation25_spill] sm:$0xff] }
  0x74   : > { %4482 = vst [vmem:[#allocation104_spill] sm:$0xff] %v2628_v63  ;;  %4483 = vst [vmem:[#allocation105_spill] sm:$0xff] %v2634_v36  ;;  %v561_v63 = vmul.f32 %v557_v45, %v2443_v51  ;;  %v562_v55 = vmul.f32 %v557_v45, %v4486_v27  ;;  %v571_v51 = vmul.f32 %v557_v45, %v2464_v61  ;;  %v4500_v30 = vld [vmem:[#allocation8_spill] sm:$0xff]  ;;  %v4512_v36 = vld [vmem:[#allocation26_spill] sm:$0xff] }
  0x75   : > { %4484 = vst [vmem:[#allocation106_spill] sm:$0xff] %v2638_v50  ;;  %4485 = vst [vmem:[#allocation107_spill] sm:$0xff] %v2642_v54  ;;  %v4488_v50 = vld [vmem:[#allocation37_spill] sm:$0xff]  ;;  %v568_v54 = vmul.f32 %v557_v45, %v4489_v7  ;;  %v572_v27 = vmul.f32 %v557_v45, %v4491_v17  ;;  %v578_v7 = vmul.f32 %v557_v45, %v2420_v20  ;;  %v4510_v0 = vld [vmem:[#allocation24_spill] sm:$0xff] }
  0x76   : > { %v566_v41 = vmul.f32 %v557_v45, %v4488_v50  ;;  %v576_v50 = vmul.f32 %v557_v45, %v2417_v8  ;;  %v581_v61 = vmul.f32 %v557_v45, %v2485_v11  ;;  %v582_v17 = vmul.f32 %v557_v45, %v2427_v25  ;;  %v4498_v11 = vld [vmem:[#allocation7_spill] sm:$0xff] }
  0x77   : > { %v586_v8 = vmul.f32 %v557_v45, %v4495_v31  ;;  %v588_v20 = vmul.f32 %v557_v45, %v4496_v46  ;;  %v626_v25 = vmul.f32 %v2631_v53, %v4498_v11  ;;  %v628_v44 = vmul.f32 %v2631_v53, %v4500_v30 }
  0x78   : > { %v629_v31 = vmul.f32 %v2631_v53, %v4501_v12  ;;  %v630_v45 = vmul.f32 %v2631_v53, %v4502_v38  ;;  %v631_v46 = vmul.f32 %v2631_v53, %v2291_v48  ;;  %v633_v11 = vmul.f32 %v2631_v53, %v4504_v1 }
  0x79   : > { %v634_v15 = vmul.f32 %v2631_v53, %v2275_v42  ;;  %v635_v30 = vmul.f32 %v2631_v53, %v4505_v39  ;;  %v636_v12 = vmul.f32 %v2631_v53, %v2284_v13  ;;  %v637_v38 = vmul.f32 %v2631_v53, %v4506_v16 }
  0x7a   : > { %v638_v48 = vmul.f32 %v2631_v53, %v4507_v4  ;;  %v639_v5 = vmul.f32 %v2631_v53, %v4508_v59  ;;  %v640_v1 = vmul.f32 %v2631_v53, %v4509_v57  ;;  %v641_v42 = vmul.f32 %v2631_v53, %v4510_v0 }
  0x7b   : > { %v642_v39 = vmul.f32 %v2631_v53, %v4511_v24  ;;  %v643_v13 = vmul.f32 %v2631_v53, %v2342_v14  ;;  %v644_v16 = vmul.f32 %v2631_v53, %v4512_v36  ;;  %v645_v4 = vmul.f32 %v2631_v53, %v4513_v29  ;;  %v4517_v24 = vld [vmem:[#allocation39_spill] sm:$0xff] }
  0x7c   : > { %v646_v59 = vmul.f32 %v2631_v53, %v4514_v43  ;;  %v647_v57 = vmul.f32 %v2631_v53, %v4515_v23  ;;  %v648_v0 = vmul.f32 %v2631_v53, %v4516_v35  ;;  %v649_v14 = vmul.f32 %v2631_v53, %v4517_v24  ;;  %v4518_v36 = vld [vmem:[#allocation31_spill] sm:$0xff]  ;;  %v4520_v35 = vld [vmem:[#allocation36_spill] sm:$0xff] }
  0x7d   : > { %v650_v29 = vmul.f32 %v2631_v53, %v4518_v36  ;;  %v4519_v43 = vld [vmem:[#allocation43_spill] sm:$0xff]  ;;  %v652_v24 = vmul.f32 %v2631_v53, %v4520_v35  ;;  %v4521_v36 = vld [vmem:[#allocation45_spill] sm:$0xff]  ;;  %v4522_v35 = vld [vmem:[#allocation40_spill] sm:$0xff] }
  0x7e   : > { %v651_v23 = vmul.f32 %v2631_v53, %v4519_v43  ;;  %v653_v43 = vmul.f32 %v2631_v53, %v4521_v36  ;;  %v654_v36 = vmul.f32 %v2631_v53, %v4522_v35  ;;  %v655_v35 = vadd.f32 %v624_v26, %v558_v21 }
  0x7f   : > { %v656_v53 = vadd.f32 %v625_v58, %v559_v22  ;;  %v657_v21 = vadd.f32 %v626_v25, %v560_v28  ;;  %v658_v26 = vadd.f32 %v627_v40, %v561_v63  ;;  %v659_v22 = vadd.f32 %v628_v44, %v562_v55 }
  0x80   : > { %v660_v58 = vadd.f32 %v629_v31, %v563_v60  ;;  %v661_v25 = vadd.f32 %v630_v45, %v564_v49  ;;  %v662_v28 = vadd.f32 %v631_v46, %v565_v2  ;;  %v663_v40 = vadd.f32 %v632_v9, %v566_v41 }
  0x81   : > { %v664_v63 = vadd.f32 %v633_v11, %v567_v3  ;;  %v665_v44 = vadd.f32 %v634_v15, %v568_v54  ;;  %v666_v55 = vadd.f32 %v635_v30, %v569_v34  ;;  %v667_v31 = vadd.f32 %v636_v12, %v570_v6 }
  0x82   : > { %v668_v60 = vadd.f32 %v637_v38, %v571_v51  ;;  %v669_v45 = vadd.f32 %v638_v48, %v572_v27  ;;  %v670_v49 = vadd.f32 %v639_v5, %v573_v37  ;;  %v671_v2 = vadd.f32 %v640_v1, %v574_v47  ;;  %v4523_v48 = vld [vmem:[#allocation105_spill] sm:$0xff]  ;;  %v4524_v37 = vld [vmem:[#allocation72_spill] sm:$0xff]  ;;  %v4525_v47 = vld [vmem:[#allocation86_spill] sm:$0xff] }
  0x83   : > { %v672_v46 = vadd.f32 %v641_v42, %v575_v56  ;;  %v673_v9 = vadd.f32 %v642_v39, %v576_v50  ;;  %v674_v41 = vadd.f32 %v643_v13, %v577_v32  ;;  %v675_v3 = vadd.f32 %v644_v16, %v578_v7  ;;  %v4526_v13 = vld [vmem:[#allocation73_spill] sm:$0xff]  ;;  %v4527_v32 = vld [vmem:[#allocation87_spill] sm:$0xff]  ;;  %v4539_v50 = vld [vmem:[#allocation96_spill] sm:$0xff] }
  0x84   : > { %v676_v11 = vadd.f32 %v645_v4, %v579_v33  ;;  %v677_v15 = vadd.f32 %v646_v59, %v580_v52  ;;  %v678_v54 = vadd.f32 %v647_v57, %v581_v61  ;;  %v679_v30 = vadd.f32 %v648_v0, %v582_v17  ;;  %v4531_v56 = vld [vmem:[#allocation91_spill] sm:$0xff]  ;;  %v4532_v61 = vld [vmem:[#allocation76_spill] sm:$0xff]  ;;  %v4536_v59 = vld [vmem:[#allocation78_spill] sm:$0xff] }
  0x85   : > { %v680_v34 = vadd.f32 %v649_v14, %v583_v62  ;;  %v681_v6 = vadd.f32 %v650_v29, %v584_v18  ;;  %v682_v12 = vadd.f32 %v651_v23, %v585_v10  ;;  %v683_v38 = vadd.f32 %v652_v24, %v586_v8  ;;  %v4528_v14 = vld [vmem:[#allocation74_spill] sm:$0xff]  ;;  %v4529_v29 = vld [vmem:[#allocation88_spill] sm:$0xff]  ;;  %v4534_v18 = vld [vmem:[#allocation77_spill] sm:$0xff] }
  0x86   : > { %v684_v51 = vadd.f32 %v653_v43, %v587_v19  ;;  %v685_v27 = vadd.f32 %v654_v36, %v588_v20  ;;  %v690_v5 = vmul.f32 0.0, %v4523_v48  ;;  %v691_v1 = vmul.f32 %v4523_v48, %v4524_v37  ;;  %v4530_v43 = vld [vmem:[#allocation75_spill] sm:$0xff]  ;;  %v4533_v10 = vld [vmem:[#allocation92_spill] sm:$0xff]  ;;  %v4535_v24 = vld [vmem:[#allocation94_spill] sm:$0xff] }
  0x87   : > { %v692_v42 = vmul.f32 %v4523_v48, %v4525_v47  ;;  %v693_v16 = vmul.f32 %v4523_v48, %v4526_v13  ;;  %v694_v0 = vmul.f32 %v4523_v48, %v4527_v32  ;;  %v695_v23 = vmul.f32 %v4523_v48, %v4528_v14  ;;  %v4537_v7 = vld [vmem:[#allocation95_spill] sm:$0xff]  ;;  %v4543_v14 = vld [vmem:[#allocation98_spill] sm:$0xff]  ;;  %v4547_v37 = vld [vmem:[#allocation100_spill] sm:$0xff] }
  0x88   : > { %v696_v8 = vmul.f32 %v4523_v48, %v4529_v29  ;;  %v697_v20 = vmul.f32 %v4523_v48, %v4530_v43  ;;  %v698_v33 = vmul.f32 %v4523_v48, %v4531_v56  ;;  %v699_v62 = vmul.f32 %v4523_v48, %v4532_v61  ;;  %v4538_v17 = vld [vmem:[#allocation79_spill] sm:$0xff]  ;;  %v4540_v56 = vld [vmem:[#allocation80_spill] sm:$0xff]  ;;  %v4541_v43 = vld [vmem:[#allocation97_spill] sm:$0xff] }
  0x89   : > { %v700_v19 = vmul.f32 %v4523_v48, %v4533_v10  ;;  %v701_v52 = vmul.f32 %v4523_v48, %v4534_v18  ;;  %v702_v57 = vmul.f32 %v4523_v48, %v4535_v24  ;;  %v703_v4 = vmul.f32 %v4523_v48, %v4536_v59  ;;  %v4542_v29 = vld [vmem:[#allocation81_spill] sm:$0xff]  ;;  %v4544_v32 = vld [vmem:[#allocation82_spill] sm:$0xff]  ;;  %v4545_v13 = vld [vmem:[#allocation99_spill] sm:$0xff] }
  0x8a   : > { %v704_v39 = vmul.f32 %v4523_v48, %v4537_v7  ;;  %v705_v36 = vmul.f32 %v4523_v48, %v4538_v17  ;;  %v706_v61 = vmul.f32 %v4523_v48, %v4539_v50  ;;  %v707_v10 = vmul.f32 %v4523_v48, %v4540_v56  ;;  %v4546_v47 = vld [vmem:[#allocation83_spill] sm:$0xff] }
  0x8b   : > { %v708_v18 = vmul.f32 %v4523_v48, %v4541_v43  ;;  %v709_v24 = vmul.f32 %v4523_v48, %v4542_v29  ;;  %v710_v59 = vmul.f32 %v4523_v48, %v4543_v14  ;;  %v711_v7 = vmul.f32 %v4523_v48, %v4544_v32  ;;  %v4548_v43 = vld [vmem:[#allocation84_spill] sm:$0xff]  ;;  %v4549_v14 = vld [vmem:[#allocation101_spill] sm:$0xff] }
  0x8c   : > { %v712_v17 = vmul.f32 %v4523_v48, %v4545_v13  ;;  %v713_v50 = vmul.f32 %v4523_v48, %v4546_v47  ;;  %v714_v56 = vmul.f32 %v4523_v48, %v4547_v37  ;;  %v715_v29 = vmul.f32 %v4523_v48, %v4548_v43  ;;  %v4550_v13 = vld [vmem:[#allocation85_spill] sm:$0xff]  ;;  %v4551_v37 = vld [vmem:[#allocation102_spill] sm:$0xff] }
  0x8d   : > { %v716_v32 = vmul.f32 %v4523_v48, %v4549_v14  ;;  %v717_v47 = vmul.f32 %v4523_v48, %v4550_v13  ;;  %v718_v43 = vmul.f32 %v4523_v48, %v4551_v37  ;;  %v4552_v14 = vld [vmem:[#allocation89_spill] sm:$0xff]  ;;  %v4553_v37 = vld [vmem:[#allocation103_spill] sm:$0xff] }
  0x8e   : > { %v719_v13 = vmul.f32 %v4523_v48, %v4552_v14  ;;  %v720_v14 = vmul.f32 %v4523_v48, %v4553_v37  ;;  %v2796_v37 = vadd.f32 %v690_v5, %v655_v35  ;;  %v2798_v48 = vadd.f32 %v691_v1, %v656_v53 }
  0x8f   : > { %v2800_v5 = vadd.f32 %v692_v42, %v657_v21  ;;  %v2802_v35 = vadd.f32 %v693_v16, %v658_v26  ;;  %v2806_v1 = vadd.f32 %v695_v23, %v660_v58  ;;  %v2808_v53 = vadd.f32 %v696_v8, %v661_v25  ;;  %v4567_v23 = vld [vmem:[#allocation28_spill] sm:$0xff] }
  0x90   : > { %4554 = vst [vmem:[#allocation105_spill] sm:$0xff] %v2796_v37  ;;  %4555 = vst [vmem:[#allocation108_spill] sm:$0xff] %v2798_v48  ;;  %v2804_v37 = vadd.f32 %v694_v0, %v659_v22  ;;  %v2810_v48 = vadd.f32 %v697_v20, %v662_v28  ;;  %v2812_v21 = vadd.f32 %v698_v33, %v663_v40  ;;  %v4566_v0 = vld [vmem:[#allocation106_spill] sm:$0xff]  ;;  %v4574_v8 = vld [vmem:[#allocation60_spill] sm:$0xff] }
  0x91   : > { %4556 = vst [vmem:[#allocation109_spill] sm:$0xff] %v2800_v5  ;;  %4557 = vst [vmem:[#allocation110_spill] sm:$0xff] %v2802_v35  ;;  %v2814_v42 = vadd.f32 %v699_v62, %v664_v63  ;;  %v2816_v5 = vadd.f32 %v700_v19, %v665_v44  ;;  %v2818_v16 = vadd.f32 %v701_v52, %v666_v55  ;;  %v4575_v20 = vld [vmem:[#allocation38_spill] sm:$0xff]  ;;  %v4576_v33 = vld [vmem:[#allocation61_spill] sm:$0xff] }
  0x92   : > { %v2820_v26 = vadd.f32 %v702_v57, %v667_v31  ;;  %v2822_v35 = vadd.f32 %v703_v4, %v668_v60  ;;  %v2824_v22 = vadd.f32 %v704_v39, %v669_v45  ;;  %v2826_v58 = vadd.f32 %v705_v36, %v670_v49  ;;  %v4577_v62 = vld [vmem:[#allocation42_spill] sm:$0xff]  ;;  %v4579_v52 = vld [vmem:[#allocation44_spill] sm:$0xff]  ;;  %v4580_v57 = vld [vmem:[#allocation63_spill] sm:$0xff] }
  0x93   : > { %v2828_v25 = vadd.f32 %v706_v61, %v671_v2  ;;  %v2830_v28 = vadd.f32 %v707_v10, %v672_v46  ;;  %v2832_v40 = vadd.f32 %v708_v18, %v673_v9  ;;  %v2834_v63 = vadd.f32 %v709_v24, %v674_v41  ;;  %v4578_v19 = vld [vmem:[#allocation62_spill] sm:$0xff]  ;;  %v4581_v4 = vld [vmem:[#allocation47_spill] sm:$0xff]  ;;  %v4582_v39 = vld [vmem:[#allocation64_spill] sm:$0xff] }
  0x94   : > { %v2836_v44 = vadd.f32 %v710_v59, %v675_v3  ;;  %v2838_v55 = vadd.f32 %v711_v7, %v676_v11  ;;  %v2840_v31 = vadd.f32 %v712_v17, %v677_v15  ;;  %v2842_v60 = vadd.f32 %v713_v50, %v678_v54  ;;  %v4565_v11 = vld [vmem:[#allocation54_spill] sm:$0xff]  ;;  %v4583_v36 = vld [vmem:[#allocation48_spill] sm:$0xff] }
  0x95   : > { %v2844_v45 = vadd.f32 %v714_v56, %v679_v30  ;;  %v2846_v49 = vadd.f32 %v715_v29, %v680_v34  ;;  %v2848_v2 = vadd.f32 %v716_v32, %v681_v6  ;;  %v2850_v46 = vadd.f32 %v717_v47, %v682_v12  ;;  %v4568_v30 = vld [vmem:[#allocation55_spill] sm:$0xff]  ;;  %v4569_v29 = vld [vmem:[#allocation32_spill] sm:$0xff]  ;;  %v4571_v47 = vld [vmem:[#allocation33_spill] sm:$0xff] }
  0x96   : > { %v2852_v9 = vadd.f32 %v718_v43, %v683_v38  ;;  %v2854_v41 = vadd.f32 %v719_v13, %v684_v51  ;;  %v2856_v3 = vadd.f32 %v720_v14, %v685_v27  ;;  %v756_v15 = vmul.f32 %v4566_v0, %v4565_v11  ;;  %v4570_v12 = vld [vmem:[#allocation56_spill] sm:$0xff]  ;;  %v4572_v27 = vld [vmem:[#allocation59_spill] sm:$0xff]  ;;  %v4573_v32 = vld [vmem:[#allocation37_spill] sm:$0xff] }
  0x97   : > { %4558 = vst [vmem:[#allocation111_spill] sm:$0xff] %v2844_v45  ;;  %4559 = vst [vmem:[#allocation112_spill] sm:$0xff] %v2846_v49  ;;  %v757_v54 = vmul.f32 %v4566_v0, %v4567_v23  ;;  %v758_v34 = vmul.f32 %v4566_v0, %v4568_v30  ;;  %v759_v6 = vmul.f32 %v4566_v0, %v4569_v29  ;;  %v4584_v11 = vld [vmem:[#allocation65_spill] sm:$0xff]  ;;  %v4594_v30 = vld [vmem:[#allocation70_spill] sm:$0xff] }
  0x98   : > { %4560 = vst [vmem:[#allocation113_spill] sm:$0xff] %v2848_v2  ;;  %4561 = vst [vmem:[#allocation114_spill] sm:$0xff] %v2850_v46  ;;  %v760_v38 = vmul.f32 %v4566_v0, %v4570_v12  ;;  %v761_v51 = vmul.f32 %v4566_v0, %v4571_v47  ;;  %v762_v13 = vmul.f32 %v4566_v0, %v4572_v27  ;;  %v4590_v27 = vld [vmem:[#allocation68_spill] sm:$0xff]  ;;  %v4592_v12 = vld [vmem:[#allocation69_spill] sm:$0xff] }
  0x99   : > { %4562 = vst [vmem:[#allocation115_spill] sm:$0xff] %v2852_v9  ;;  %4563 = vst [vmem:[#allocation116_spill] sm:$0xff] %v2854_v41  ;;  %v763_v14 = vmul.f32 %v4566_v0, %v4573_v32  ;;  %v764_v43 = vmul.f32 %v4566_v0, %v4574_v8  ;;  %v765_v56 = vmul.f32 %v4566_v0, %v4575_v20  ;;  %v4587_v20 = vld [vmem:[#allocation50_spill] sm:$0xff]  ;;  %v4588_v8 = vld [vmem:[#allocation67_spill] sm:$0xff] }
  0x9a   : > { %4564 = vst [vmem:[#allocation117_spill] sm:$0xff] %v2856_v3  ;;  %v766_v61 = vmul.f32 %v4566_v0, %v4576_v33  ;;  %v767_v10 = vmul.f32 %v4566_v0, %v4577_v62  ;;  %v768_v18 = vmul.f32 %v4566_v0, %v4578_v19  ;;  %v769_v24 = vmul.f32 %v4566_v0, %v4579_v52  ;;  %v4585_v62 = vld [vmem:[#allocation49_spill] sm:$0xff]  ;;  %v4586_v33 = vld [vmem:[#allocation66_spill] sm:$0xff]  ;;  %v4589_v32 = vld [vmem:[#allocation51_spill] sm:$0xff] }
  0x9b   : > { %v770_v59 = vmul.f32 %v4566_v0, %v4580_v57  ;;  %v771_v7 = vmul.f32 %v4566_v0, %v4581_v4  ;;  %v772_v17 = vmul.f32 %v4566_v0, %v4582_v39  ;;  %v773_v50 = vmul.f32 %v4566_v0, %v4583_v36  ;;  %v4591_v47 = vld [vmem:[#allocation52_spill] sm:$0xff]  ;;  %v4593_v29 = vld [vmem:[#allocation53_spill] sm:$0xff]  ;;  %v4596_v41 = vld [vmem:[#allocation71_spill] sm:$0xff] }
  0x9c   : > { %v774_v23 = vmul.f32 %v4566_v0, %v4584_v11  ;;  %v775_v19 = vmul.f32 %v4566_v0, %v4585_v62  ;;  %v776_v52 = vmul.f32 %v4566_v0, %v4586_v33  ;;  %v777_v57 = vmul.f32 %v4566_v0, %v4587_v20  ;;  %v4595_v3 = vld [vmem:[#allocation57_spill] sm:$0xff]  ;;  %v4597_v9 = vld [vmem:[#allocation58_spill] sm:$0xff]  ;;  %v4599_v2 = vld [vmem:[#allocation108_spill] sm:$0xff] }
  0x9d   : > { %v778_v4 = vmul.f32 %v4566_v0, %v4588_v8  ;;  %v779_v39 = vmul.f32 %v4566_v0, %v4589_v32  ;;  %v780_v36 = vmul.f32 %v4566_v0, %v4590_v27  ;;  %v781_v11 = vmul.f32 %v4566_v0, %v4591_v47  ;;  %v4598_v46 = vld [vmem:[#allocation105_spill] sm:$0xff]  ;;  %v4601_v45 = vld [vmem:[#allocation110_spill] sm:$0xff] }
  0x9e   : > { %v782_v62 = vmul.f32 %v4566_v0, %v4592_v12  ;;  %v783_v33 = vmul.f32 %v4566_v0, %v4593_v29  ;;  %v784_v20 = vmul.f32 %v4566_v0, %v4594_v30  ;;  %v785_v8 = vmul.f32 %v4566_v0, %v4595_v3  ;;  %v4600_v49 = vld [vmem:[#allocation109_spill] sm:$0xff] }
  0x9f   : > { %v786_v32 = vmul.f32 %v4566_v0, %v4596_v41  ;;  %v787_v27 = vmul.f32 %v4566_v0, %v4597_v9  ;;  %v2923_v47 = vadd.f32 %v756_v15, %v4598_v46  ;;  %v2926_v12 = vadd.f32 %v757_v54, %v4598_v46  ;;  %v4641_v9 = vld [vmem:[#allocation30_spill] sm:$0xff] }
  0xa0   : > { %v2929_v29 = vadd.f32 %v758_v34, %v4599_v2  ;;  %v2932_v30 = vadd.f32 %v759_v6, %v4600_v49  ;;  %v2935_v3 = vadd.f32 %v760_v38, %v4601_v45  ;;  %v2938_v41 = vadd.f32 %v761_v51, %v2804_v37 }
  0xa1   : > { %v2941_v0 = vadd.f32 %v762_v13, %v2806_v1  ;;  %v2944_v15 = vadd.f32 %v763_v14, %v2808_v53  ;;  %v2947_v46 = vadd.f32 %v764_v43, %v2810_v48  ;;  %v2950_v2 = vadd.f32 %v765_v56, %v2812_v21  ;;  %v4617_v43 = vld [vmem:[#allocation10_spill] sm:$0xff]  ;;  %v4618_v56 = vld [vmem:[#allocation107_spill] sm:$0xff] }
  0xa2   : > { %v2953_v49 = vadd.f32 %v766_v61, %v2814_v42  ;;  %v2956_v45 = vadd.f32 %v767_v10, %v2816_v5  ;;  %v2959_v37 = vadd.f32 %v768_v18, %v2818_v16  ;;  %v2962_v1 = vadd.f32 %v769_v24, %v2820_v26 }
  0xa3   : > { %v2965_v53 = vadd.f32 %v770_v59, %v2822_v35  ;;  %v2968_v48 = vadd.f32 %v771_v7, %v2824_v22  ;;  %v2971_v21 = vadd.f32 %v772_v17, %v2826_v58  ;;  %v2974_v42 = vadd.f32 %v773_v50, %v2828_v25  ;;  %v4625_v59 = vld [vmem:[#allocation11_spill] sm:$0xff]  ;;  %v4626_v7 = vld [vmem:[#allocation18_spill] sm:$0xff]  ;;  %v4627_v17 = vld [vmem:[#allocation12_spill] sm:$0xff] }
  0xa4   : > { %v2977_v5 = vadd.f32 %v774_v23, %v2830_v28  ;;  %v2980_v16 = vadd.f32 %v775_v19, %v2832_v40  ;;  %v2983_v26 = vadd.f32 %v776_v52, %v2834_v63  ;;  %v2986_v35 = vadd.f32 %v777_v57, %v2836_v44  ;;  %v4603_v28 = vld [vmem:[#allocation111_spill] sm:$0xff]  ;;  %v4605_v40 = vld [vmem:[#allocation112_spill] sm:$0xff]  ;;  %v4607_v63 = vld [vmem:[#allocation113_spill] sm:$0xff] }
  0xa5   : > { %v2989_v22 = vadd.f32 %v778_v4, %v2838_v55  ;;  %v2992_v58 = vadd.f32 %v779_v39, %v2840_v31  ;;  %v2995_v25 = vadd.f32 %v780_v36, %v2842_v60  ;;  %v2998_v54 = vadd.f32 %v781_v11, %v4603_v28  ;;  %v4609_v44 = vld [vmem:[#allocation114_spill] sm:$0xff]  ;;  %v4611_v55 = vld [vmem:[#allocation115_spill] sm:$0xff]  ;;  %v4613_v31 = vld [vmem:[#allocation116_spill] sm:$0xff] }
  0xa6   : > { %v3001_v34 = vadd.f32 %v782_v62, %v4605_v40  ;;  %v3004_v6 = vadd.f32 %v783_v33, %v4607_v63  ;;  %v3007_v38 = vadd.f32 %v784_v20, %v4609_v44  ;;  %v3010_v51 = vadd.f32 %v785_v8, %v4611_v55  ;;  %v4615_v60 = vld [vmem:[#allocation117_spill] sm:$0xff]  ;;  %v4619_v62 = vld [vmem:[#allocation7_spill] sm:$0xff]  ;;  %v4621_v20 = vld [vmem:[#allocation8_spill] sm:$0xff] }
  0xa7   : > { %4602 = vst [vmem:[#allocation54_spill] sm:$0xff] %v2995_v25  ;;  %4604 = vst [vmem:[#allocation106_spill] sm:$0xff] %v2998_v54  ;;  %v3013_v13 = vadd.f32 %v786_v32, %v4613_v31  ;;  %v3016_v14 = vadd.f32 %v787_v27, %v4615_v60  ;;  %v824_v61 = vmul.f32 %v4618_v56, %v4617_v43  ;;  %v4620_v33 = vld [vmem:[#allocation13_spill] sm:$0xff]  ;;  %v4622_v8 = vld [vmem:[#allocation14_spill] sm:$0xff] }
  0xa8   : > { %4606 = vst [vmem:[#allocation28_spill] sm:$0xff] %v3001_v34  ;;  %4608 = vst [vmem:[#allocation105_spill] sm:$0xff] %v3004_v6  ;;  %v825_v10 = vmul.f32 %v4618_v56, %v4619_v62  ;;  %v826_v19 = vmul.f32 %v4618_v56, %v4620_v33  ;;  %v827_v18 = vmul.f32 %v4618_v56, %v4621_v20  ;;  %v4623_v32 = vld [vmem:[#allocation9_spill] sm:$0xff]  ;;  %v4628_v50 = vld [vmem:[#allocation20_spill] sm:$0xff] }
  0xa9   : > { %4610 = vst [vmem:[#allocation108_spill] sm:$0xff] %v3007_v38  ;;  %4612 = vst [vmem:[#allocation109_spill] sm:$0xff] %v3010_v51  ;;  %v828_v52 = vmul.f32 %v4618_v56, %v4622_v8  ;;  %v829_v24 = vmul.f32 %v4618_v56, %v4623_v32  ;;  %v4624_v27 = vld [vmem:[#allocation17_spill] sm:$0xff]  ;;  %v831_v4 = vmul.f32 %v4618_v56, %v4625_v59  ;;  %v4629_v23 = vld [vmem:[#allocation15_spill] sm:$0xff] }
  0xaa   : > { %4614 = vst [vmem:[#allocation110_spill] sm:$0xff] %v3013_v13  ;;  %4616 = vst [vmem:[#allocation111_spill] sm:$0xff] %v3016_v14  ;;  %v830_v57 = vmul.f32 %v4618_v56, %v4624_v27  ;;  %v832_v39 = vmul.f32 %v4618_v56, %v4626_v7  ;;  %v833_v36 = vmul.f32 %v4618_v56, %v4627_v17  ;;  %v4630_v40 = vld [vmem:[#allocation22_spill] sm:$0xff]  ;;  %v4631_v44 = vld [vmem:[#allocation19_spill] sm:$0xff] }
  0xab   : > { %v834_v11 = vmul.f32 %v4618_v56, %v4628_v50  ;;  %v835_v28 = vmul.f32 %v4618_v56, %v4629_v23  ;;  %v836_v63 = vmul.f32 %v4618_v56, %v4630_v40  ;;  %v837_v55 = vmul.f32 %v4618_v56, %v4631_v44  ;;  %v4632_v31 = vld [vmem:[#allocation23_spill] sm:$0xff]  ;;  %v4633_v43 = vld [vmem:[#allocation21_spill] sm:$0xff]  ;;  %v4634_v33 = vld [vmem:[#allocation24_spill] sm:$0xff] }
  0xac   : > { %v838_v60 = vmul.f32 %v4618_v56, %v4632_v31  ;;  %v839_v62 = vmul.f32 %v4618_v56, %v4633_v43  ;;  %v840_v20 = vmul.f32 %v4618_v56, %v4634_v33  ;;  %v4635_v8 = vld [vmem:[#allocation25_spill] sm:$0xff]  ;;  %v4637_v7 = vld [vmem:[#allocation26_spill] sm:$0xff]  ;;  %v4639_v40 = vld [vmem:[#allocation27_spill] sm:$0xff]  ;;  %v847_v33 = vmul.f32 %v4618_v56, %v4641_v9 }
  0xad   : > { %v841_v32 = vmul.f32 %v4618_v56, %v4635_v8  ;;  %v4636_v27 = vld [vmem:[#allocation29_spill] sm:$0xff]  ;;  %v843_v17 = vmul.f32 %v4618_v56, %v4637_v7  ;;  %v4638_v50 = vld [vmem:[#allocation34_spill] sm:$0xff]  ;;  %v845_v44 = vmul.f32 %v4618_v56, %v4639_v40  ;;  %v4640_v31 = vld [vmem:[#allocation35_spill] sm:$0xff] }
  0xae   : > { %v842_v59 = vmul.f32 %v4618_v56, %v4636_v27  ;;  %v844_v23 = vmul.f32 %v4618_v56, %v4638_v50  ;;  %v846_v43 = vmul.f32 %v4618_v56, %v4640_v31  ;;  %v4642_v14 = vld [vmem:[#allocation39_spill] sm:$0xff]  ;;  %v4645_v38 = vld [vmem:[#allocation36_spill] sm:$0xff]  ;;  %v4646_v6 = vld [vmem:[#allocation45_spill] sm:$0xff] }
  0xaf   : > { %v848_v8 = vmul.f32 %v4618_v56, %v4642_v14  ;;  %v4643_v13 = vld [vmem:[#allocation31_spill] sm:$0xff]  ;;  %v851_v50 = vmul.f32 %v4618_v56, %v4645_v38  ;;  %v852_v40 = vmul.f32 %v4618_v56, %v4646_v6  ;;  %v4647_v34 = vld [vmem:[#allocation40_spill] sm:$0xff]  ;;  %v4648_v54 = vld [vmem:[#allocation46_spill] sm:$0xff]  ;;  %v3089_v38 = vadd.f32 %v826_v19, %v2929_v29 }
  0xb0   : > { %v849_v27 = vmul.f32 %v4618_v56, %v4643_v13  ;;  %v4644_v51 = vld [vmem:[#allocation43_spill] sm:$0xff]  ;;  %v853_v31 = vmul.f32 %v4618_v56, %v4647_v34  ;;  %v854_v9 = vmul.f32 %v4618_v56, %v4648_v54  ;;  %v4649_v25 = vld [vmem:[#allocation41_spill] sm:$0xff]  ;;  %v3083_v13 = vadd.f32 %v824_v61, %v2923_v47  ;;  %v4656_v61 = vld [vmem:[#allocation54_spill] sm:$0xff] }
  0xb1   : > { %v850_v7 = vmul.f32 %v4618_v56, %v4644_v51  ;;  %v855_v14 = vmul.f32 %v4618_v56, %v4649_v25  ;;  %v3086_v51 = vadd.f32 %v825_v10, %v2926_v12  ;;  %v3092_v6 = vadd.f32 %v827_v18, %v2932_v30  ;;  %v4654_v56 = vld [vmem:[#allocation93_spill] sm:$0xff]  ;;  %v4658_v19 = vld [vmem:[#allocation106_spill] sm:$0xff]  ;;  %v4660_v18 = vld [vmem:[#allocation28_spill] sm:$0xff] }
  0xb2   : > { %v3095_v34 = vadd.f32 %v828_v52, %v2935_v3  ;;  %v3098_v54 = vadd.f32 %v829_v24, %v2938_v41  ;;  %v3101_v25 = vadd.f32 %v830_v57, %v2941_v0  ;;  %v3104_v47 = vadd.f32 %v831_v4, %v2944_v15  ;;  %v4662_v52 = vld [vmem:[#allocation105_spill] sm:$0xff]  ;;  %v4664_v24 = vld [vmem:[#allocation108_spill] sm:$0xff] }
  0xb3   : > { %v3107_v12 = vadd.f32 %v832_v39, %v2947_v46  ;;  %v3110_v29 = vadd.f32 %v833_v36, %v2950_v2  ;;  %v3113_v30 = vadd.f32 %v834_v11, %v2953_v49  ;;  %v3116_v3 = vadd.f32 %v835_v28, %v2956_v45  ;;  %v4666_v4 = vld [vmem:[#allocation109_spill] sm:$0xff]  ;;  %v4668_v36 = vld [vmem:[#allocation110_spill] sm:$0xff]  ;;  %v4670_v28 = vld [vmem:[#allocation111_spill] sm:$0xff] }
  0xb4   : > { %v3119_v41 = vadd.f32 %v836_v63, %v2959_v37  ;;  %v3122_v0 = vadd.f32 %v837_v55, %v2962_v1  ;;  %v3125_v15 = vadd.f32 %v838_v60, %v2965_v53  ;;  %v3128_v46 = vadd.f32 %v839_v62, %v2968_v48  ;;  %v327_v53 = vld [vmem:[%s4212_s1 + $0x8] sm:$0x7]  ;;  %v4672_v55 = vld [vmem:[#allocation5_spill] sm:$0xff] }
  0xb5   : > { %v3131_v2 = vadd.f32 %v840_v20, %v2971_v21  ;;  %v3134_v49 = vadd.f32 %v841_v32, %v2974_v42  ;;  %v3137_v45 = vadd.f32 %v842_v59, %v2977_v5  ;;  %v3140_v37 = vadd.f32 %v843_v17, %v2980_v16  ;;  %v4653_v5 = vld [vmem:[#allocation16_spill] sm:$0xff]  ;;  %v4674_v62 = vld [vmem:[#allocation6_spill] sm:$0xff] }
  0xb6   : > { %v3143_v1 = vadd.f32 %v844_v23, %v2983_v26  ;;  %v3149_v48 = vadd.f32 %v845_v44, %v2986_v35  ;;  %v3152_v21 = vadd.f32 %v846_v43, %v2989_v22  ;;  %v3155_v42 = vadd.f32 %v847_v33, %v2992_v58  ;;  %v3162_v26 = vld [vmem:[%s4213_s2] sm:$0x3]  ;;  %v4678_v17 = vld [vmem:[#allocation72_spill] sm:$0xff]  ;;  %v4679_v44 = vld [vmem:[#allocation86_spill] sm:$0xff] }
  0xb7   : > { %v891_v16 = vrot.slane %v4654_v56, %v4653_v5  ;;  %4655 = vst [vmem:[#allocation115_spill] sm:$0xff] %v3162_v26  ;;  %v3165_v10 = vadd.f32 %v848_v8, %v4656_v61  ;;  %v3168_v35 = vadd.f32 %v849_v27, %v4658_v19  ;;  %v3171_v22 = vadd.f32 %v850_v7, %v4660_v18  ;;  %v4680_v33 = vld [vmem:[#allocation73_spill] sm:$0xff]  ;;  %v4681_v27 = vld [vmem:[#allocation87_spill] sm:$0xff]  ;;  %v4687_v19 = vld [vmem:[#allocation76_spill] sm:$0xff] }
  0xb8   : > { %4650 = vst [vmem:[#allocation112_spill] sm:$0xff] %v3149_v48  ;;  %4651 = vst [vmem:[#allocation113_spill] sm:$0xff] %v3152_v21  ;;  %v3174_v58 = vadd.f32 %v851_v50, %v4662_v52  ;;  %v3177_v57 = vadd.f32 %v852_v40, %v4664_v24  ;;  %v3180_v39 = vadd.f32 %v853_v31, %v4666_v4  ;;  %v3205_v50 = vpop.permute.xlu0 %1911  ;;  %v4683_v40 = vld [vmem:[#allocation74_spill] sm:$0xff]  ;;  %v4686_v56 = vld [vmem:[#allocation91_spill] sm:$0xff] }
  0xb9   : > { %4652 = vst [vmem:[#allocation114_spill] sm:$0xff] %v3155_v42  ;;  %4657 = vst [vmem:[#allocation116_spill] sm:$0xff] %v3165_v10  ;;  %v3183_v11 = vadd.f32 %v854_v9, %v4668_v36  ;;  %v3186_v63 = vadd.f32 %v855_v14, %v4670_v28  ;;  %v3189_v60 = vrot.slane %v327_v53, %v4672_v55  ;;  %v4684_v9 = vld [vmem:[#allocation88_spill] sm:$0xff]  ;;  %v4689_v4 = vld [vmem:[#allocation77_spill] sm:$0xff] }
  0xba   : > { %4659 = vst [vmem:[#allocation117_spill] sm:$0xff] %v3168_v35  ;;  %4661 = vst [vmem:[#allocation10_spill] sm:$0xff] %v3171_v22  ;;  %v3192_v20 = vrot.slane %v327_v53, %v4674_v62  ;;  %v3195_v32 = vrot.slane %v327_v53, %v4653_v5  ;;  %v3199_v59 = vrot.slane %v3162_v26, %v4672_v55  ;;  %v4685_v53 = vld [vmem:[#allocation75_spill] sm:$0xff]  ;;  %v4688_v52 = vld [vmem:[#allocation92_spill] sm:$0xff] }
  0xbb   : > { %4663 = vst [vmem:[#allocation107_spill] sm:$0xff] %v3174_v58  ;;  %4665 = vst [vmem:[#allocation7_spill] sm:$0xff] %v3177_v57  ;;  %v892_v23 = vmul.f32 %v891_v16, %v4678_v17  ;;  %v893_v43 = vmul.f32 %v891_v16, %v4679_v44  ;;  %v894_v8 = vmul.f32 %v891_v16, %v4680_v33  ;;  %v4690_v28 = vld [vmem:[#allocation94_spill] sm:$0xff]  ;;  %v4692_v26 = vld [vmem:[#allocation95_spill] sm:$0xff] }
  0xbc   : > { %4667 = vst [vmem:[#allocation13_spill] sm:$0xff] %v3180_v39  ;;  %4669 = vst [vmem:[#allocation8_spill] sm:$0xff] %v3183_v11  ;;  %v895_v7 = vmul.f32 %v891_v16, %v4681_v27  ;;  %v896_v31 = vmul.f32 %v891_v16, %v4683_v40  ;;  %v897_v14 = vmul.f32 %v891_v16, %v4684_v9  ;;  %v4691_v44 = vld [vmem:[#allocation78_spill] sm:$0xff]  ;;  %v4694_v27 = vld [vmem:[#allocation96_spill] sm:$0xff] }
  0xbd   : > { %4671 = vst [vmem:[#allocation14_spill] sm:$0xff] %v3186_v63  ;;  %4673 = vst [vmem:[#allocation9_spill] sm:$0xff] %v3189_v60  ;;  %v898_v5 = vmul.f32 %v891_v16, %v4685_v53  ;;  %v899_v61 = vmul.f32 %v891_v16, %v4686_v56  ;;  %v900_v18 = vmul.f32 %v891_v16, %v4687_v19  ;;  %v4696_v33 = vld [vmem:[#allocation97_spill] sm:$0xff]  ;;  %v4698_v60 = vld [vmem:[#allocation98_spill] sm:$0xff] }
  0xbe   : > { %4675 = vst [vmem:[#allocation17_spill] sm:$0xff] %v3192_v20  ;;  %4676 = vst [vmem:[#allocation11_spill] sm:$0xff] %v3195_v32  ;;  %v901_v24 = vmul.f32 %v891_v16, %v4688_v52  ;;  %v902_v36 = vmul.f32 %v891_v16, %v4689_v4  ;;  %v903_v17 = vmul.f32 %v891_v16, %v4690_v28  ;;  %v4695_v32 = vld [vmem:[#allocation80_spill] sm:$0xff]  ;;  %v4697_v20 = vld [vmem:[#allocation81_spill] sm:$0xff] }
  0xbf   : > { %4677 = vst [vmem:[#allocation18_spill] sm:$0xff] %v3199_v59  ;;  %4682 = vst [vmem:[#allocation12_spill] sm:$0xff] %v3205_v50  ;;  %v904_v55 = vmul.f32 %v891_v16, %v4691_v44  ;;  %v905_v62 = vmul.f32 %v891_v16, %v4692_v26  ;;  %v4693_v59 = vld [vmem:[#allocation79_spill] sm:$0xff]  ;;  %v907_v9 = vmul.f32 %v891_v16, %v4694_v27  ;;  %v4699_v11 = vld [vmem:[#allocation82_spill] sm:$0xff] }
  0xc0   : > { %v906_v40 = vmul.f32 %v891_v16, %v4693_v59  ;;  %v908_v19 = vmul.f32 %v891_v16, %v4695_v32  ;;  %v909_v52 = vmul.f32 %v891_v16, %v4696_v33  ;;  %v910_v4 = vmul.f32 %v891_v16, %v4697_v20  ;;  %v4700_v39 = vld [vmem:[#allocation99_spill] sm:$0xff]  ;;  %v4702_v58 = vld [vmem:[#allocation100_spill] sm:$0xff]  ;;  %v4705_v50 = vld [vmem:[#allocation101_spill] sm:$0xff] }
  0xc1   : > { %v911_v28 = vmul.f32 %v891_v16, %v4698_v60  ;;  %v912_v44 = vmul.f32 %v891_v16, %v4699_v11  ;;  %v913_v26 = vmul.f32 %v891_v16, %v4700_v39  ;;  %v4701_v57 = vld [vmem:[#allocation83_spill] sm:$0xff]  ;;  %v915_v27 = vmul.f32 %v891_v16, %v4702_v58  ;;  %v4703_v22 = vld [vmem:[#allocation84_spill] sm:$0xff]  ;;  %v4706_v63 = vld [vmem:[#allocation85_spill] sm:$0xff] }
  0xc2   : > { %v914_v59 = vmul.f32 %v891_v16, %v4701_v57  ;;  %v916_v53 = vmul.f32 %v891_v16, %v4703_v22  ;;  %v4704_v35 = vld [vmem:[#allocation104_spill] sm:$0xff]  ;;  %v917_v32 = vmul.f32 %v891_v16, %v4705_v50  ;;  %v918_v33 = vmul.f32 %v891_v16, %v4706_v63  ;;  %v4707_v10 = vld [vmem:[#allocation102_spill] sm:$0xff]  ;;  %v4708_v42 = vld [vmem:[#allocation89_spill] sm:$0xff] }
  0xc3   : > { %v923_v56 = vmul.f32 %v891_v16, %v4704_v35  ;;  %v919_v20 = vmul.f32 %v891_v16, %v4707_v10  ;;  %v920_v60 = vmul.f32 %v891_v16, %v4708_v42  ;;  %v4709_v21 = vld [vmem:[#allocation103_spill] sm:$0xff]  ;;  %v4710_v48 = vld [vmem:[#allocation90_spill] sm:$0xff]  ;;  %v3238_v57 = vadd.f32 %v892_v23, %v3083_v13  ;;  %v4752_v63 = vld [vmem:[#allocation68_spill] sm:$0xff] }
  0xc4   : > { %v921_v11 = vmul.f32 %v891_v16, %v4709_v21  ;;  %v922_v39 = vmul.f32 %v891_v16, %v4710_v48  ;;  %v3241_v58 = vadd.f32 %v893_v43, %v3086_v51  ;;  %v3244_v35 = vadd.f32 %v894_v8, %v3089_v38  ;;  %v4750_v48 = vld [vmem:[#allocation67_spill] sm:$0xff]  ;;  %v4753_v22 = vld [vmem:[#allocation52_spill] sm:$0xff] }
  0xc5   : > { %v3247_v50 = vadd.f32 %v895_v7, %v3092_v6  ;;  %v3250_v10 = vadd.f32 %v896_v31, %v3095_v34  ;;  %v3253_v42 = vadd.f32 %v897_v14, %v3098_v54  ;;  %v3256_v16 = vadd.f32 %v898_v5, %v3101_v25  ;;  %v4725_v31 = vld [vmem:[#allocation107_spill] sm:$0xff]  ;;  %v4727_v5 = vld [vmem:[#allocation13_spill] sm:$0xff] }
  0xc6   : > { %v3259_v13 = vadd.f32 %v899_v61, %v3104_v47  ;;  %v3262_v51 = vadd.f32 %v900_v18, %v3107_v12  ;;  %v3265_v38 = vadd.f32 %v901_v24, %v3110_v29  ;;  %v3268_v6 = vadd.f32 %v902_v36, %v3113_v30  ;;  %v4728_v61 = vld [vmem:[#allocation8_spill] sm:$0xff]  ;;  %v4730_v18 = vld [vmem:[#allocation9_spill] sm:$0xff]  ;;  %v4734_v36 = vld [vmem:[#allocation59_spill] sm:$0xff] }
  0xc7   : > { %v3271_v34 = vadd.f32 %v903_v17, %v3116_v3  ;;  %v3274_v54 = vadd.f32 %v904_v55, %v3119_v41  ;;  %v3277_v25 = vadd.f32 %v905_v62, %v3122_v0  ;;  %v3280_v47 = vadd.f32 %v906_v40, %v3125_v15  ;;  %v4713_v15 = vld [vmem:[#allocation112_spill] sm:$0xff]  ;;  %v4724_v40 = vld [vmem:[#allocation10_spill] sm:$0xff]  ;;  %v4751_v21 = vld [vmem:[#allocation51_spill] sm:$0xff] }
  0xc8   : > { %v3283_v12 = vadd.f32 %v907_v9, %v3128_v46  ;;  %v3286_v29 = vadd.f32 %v908_v19, %v3131_v2  ;;  %v3289_v30 = vadd.f32 %v909_v52, %v3134_v49  ;;  %v3292_v3 = vadd.f32 %v910_v4, %v3137_v45  ;;  %v4715_v46 = vld [vmem:[#allocation113_spill] sm:$0xff]  ;;  %v4717_v2 = vld [vmem:[#allocation114_spill] sm:$0xff]  ;;  %v4719_v49 = vld [vmem:[#allocation116_spill] sm:$0xff] }
  0xc9   : > { %v3295_v41 = vadd.f32 %v911_v28, %v3140_v37  ;;  %v3298_v0 = vadd.f32 %v912_v44, %v3143_v1  ;;  %v3301_v55 = vadd.f32 %v913_v26, %v4713_v15  ;;  %v3304_v62 = vadd.f32 %v914_v59, %v4715_v46  ;;  %v4721_v45 = vld [vmem:[#allocation14_spill] sm:$0xff]  ;;  %v4723_v37 = vld [vmem:[#allocation117_spill] sm:$0xff]  ;;  %v4726_v26 = vld [vmem:[#allocation7_spill] sm:$0xff] }
  0xca   : > { %v3307_v23 = vadd.f32 %v915_v27, %v4717_v2  ;;  %v3310_v43 = vadd.f32 %v916_v53, %v4719_v49  ;;  %v3313_v8 = vadd.f32 %v923_v56, %v4721_v45  ;;  %v949_v7 = vadd.f32 %v917_v32, %v4723_v37  ;;  %v4729_v27 = vld [vmem:[#allocation55_spill] sm:$0xff]  ;;  %v4731_v53 = vld [vmem:[#allocation32_spill] sm:$0xff]  ;;  %v4733_v32 = vld [vmem:[#allocation33_spill] sm:$0xff] }
  0xcb   : > { %4711 = vst [vmem:[#allocation20_spill] sm:$0xff] %v3295_v41  ;;  %4712 = vst [vmem:[#allocation15_spill] sm:$0xff] %v3298_v0  ;;  %v950_v1 = vadd.f32 %v918_v33, %v4724_v40  ;;  %v951_v9 = vadd.f32 %v919_v20, %v4725_v31  ;;  %v952_v14 = vadd.f32 %v920_v60, %v4726_v26  ;;  %v4732_v56 = vld [vmem:[#allocation56_spill] sm:$0xff]  ;;  %v4735_v60 = vld [vmem:[#allocation37_spill] sm:$0xff] }
  0xcc   : > { %4714 = vst [vmem:[#allocation22_spill] sm:$0xff] %v3301_v55  ;;  %4716 = vst [vmem:[#allocation19_spill] sm:$0xff] %v3304_v62  ;;  %v953_v59 = vadd.f32 %v921_v11, %v4727_v5  ;;  %v954_v19 = vadd.f32 %v922_v39, %v4728_v61  ;;  %v960_v52 = vmul.f32 %v4730_v18, %v4729_v27  ;;  %v4736_v28 = vld [vmem:[#allocation60_spill] sm:$0xff]  ;;  %v4737_v17 = vld [vmem:[#allocation38_spill] sm:$0xff] }
  0xcd   : > { %4718 = vst [vmem:[#allocation23_spill] sm:$0xff] %v3307_v23  ;;  %4720 = vst [vmem:[#allocation21_spill] sm:$0xff] %v3310_v43  ;;  %v961_v24 = vmul.f32 %v4730_v18, %v4731_v53  ;;  %v962_v4 = vmul.f32 %v4730_v18, %v4732_v56  ;;  %v963_v33 = vmul.f32 %v4730_v18, %v4733_v32  ;;  %v4738_v15 = vld [vmem:[#allocation61_spill] sm:$0xff]  ;;  %v4739_v2 = vld [vmem:[#allocation42_spill] sm:$0xff] }
  0xce   : > { %4722 = vst [vmem:[#allocation24_spill] sm:$0xff] %v3313_v8  ;;  %v964_v20 = vmul.f32 %v4730_v18, %v4734_v36  ;;  %v965_v11 = vmul.f32 %v4730_v18, %v4735_v60  ;;  %v966_v39 = vmul.f32 %v4730_v18, %v4736_v28  ;;  %v967_v44 = vmul.f32 %v4730_v18, %v4737_v17  ;;  %v4740_v45 = vld [vmem:[#allocation62_spill] sm:$0xff]  ;;  %v4741_v40 = vld [vmem:[#allocation44_spill] sm:$0xff]  ;;  %v4742_v26 = vld [vmem:[#allocation63_spill] sm:$0xff] }
  0xcf   : > { %v968_v46 = vmul.f32 %v4730_v18, %v4738_v15  ;;  %v969_v49 = vmul.f32 %v4730_v18, %v4739_v2  ;;  %v970_v37 = vmul.f32 %v4730_v18, %v4740_v45  ;;  %v971_v31 = vmul.f32 %v4730_v18, %v4741_v40  ;;  %v4743_v61 = vld [vmem:[#allocation47_spill] sm:$0xff]  ;;  %v4744_v53 = vld [vmem:[#allocation64_spill] sm:$0xff]  ;;  %v4746_v60 = vld [vmem:[#allocation65_spill] sm:$0xff] }
  0xd0   : > { %v972_v5 = vmul.f32 %v4730_v18, %v4742_v26  ;;  %v973_v27 = vmul.f32 %v4730_v18, %v4743_v61  ;;  %v974_v56 = vmul.f32 %v4730_v18, %v4744_v53  ;;  %v4745_v32 = vld [vmem:[#allocation48_spill] sm:$0xff]  ;;  %v976_v28 = vmul.f32 %v4730_v18, %v4746_v60  ;;  %v4747_v17 = vld [vmem:[#allocation49_spill] sm:$0xff]  ;;  %v4748_v2 = vld [vmem:[#allocation66_spill] sm:$0xff] }
  0xd1   : > { %v975_v36 = vmul.f32 %v4730_v18, %v4745_v32  ;;  %v977_v15 = vmul.f32 %v4730_v18, %v4747_v17  ;;  %v978_v45 = vmul.f32 %v4730_v18, %v4748_v2  ;;  %v4749_v40 = vld [vmem:[#allocation50_spill] sm:$0xff]  ;;  %v980_v61 = vmul.f32 %v4730_v18, %v4750_v48  ;;  %v4754_v8 = vld [vmem:[#allocation69_spill] sm:$0xff]  ;;  %v4758_v55 = vld [vmem:[#allocation71_spill] sm:$0xff] }
  0xd2   : > { %v979_v26 = vmul.f32 %v4730_v18, %v4749_v40  ;;  %v981_v53 = vmul.f32 %v4730_v18, %v4751_v21  ;;  %v982_v32 = vmul.f32 %v4730_v18, %v4752_v63  ;;  %v983_v60 = vmul.f32 %v4730_v18, %v4753_v22  ;;  %v4755_v43 = vld [vmem:[#allocation53_spill] sm:$0xff]  ;;  %v4756_v23 = vld [vmem:[#allocation70_spill] sm:$0xff] }
  0xd3   : > { %v984_v17 = vmul.f32 %v4730_v18, %v4754_v8  ;;  %v985_v2 = vmul.f32 %v4730_v18, %v4755_v43  ;;  %v986_v40 = vmul.f32 %v4730_v18, %v4756_v23  ;;  %v4757_v62 = vld [vmem:[#allocation57_spill] sm:$0xff]  ;;  %v988_v21 = vmul.f32 %v4730_v18, %v4758_v55  ;;  %v4759_v0 = vld [vmem:[#allocation58_spill] sm:$0xff] }
  0xd4   : > { %v987_v48 = vmul.f32 %v4730_v18, %v4757_v62  ;;  %v989_v63 = vmul.f32 %v4730_v18, %v4759_v0  ;;  %v990_v22 = vmul.f32 0.0, %v4730_v18  ;;  %v3383_v41 = vadd.f32 %v960_v52, %v3238_v57  ;;  %v4761_v18 = vld [vmem:[#allocation15_spill] sm:$0xff]  ;;  %v4762_v52 = vld [vmem:[#allocation22_spill] sm:$0xff] }
  0xd5   : > { %v3386_v8 = vadd.f32 %v961_v24, %v3241_v58  ;;  %v3389_v43 = vadd.f32 %v962_v4, %v3244_v35  ;;  %v3392_v23 = vadd.f32 %v963_v33, %v3247_v50  ;;  %v3395_v62 = vadd.f32 %v964_v20, %v3250_v10  ;;  %v4764_v4 = vld [vmem:[#allocation23_spill] sm:$0xff] }
  0xd6   : > { %v3398_v55 = vadd.f32 %v965_v11, %v3253_v42  ;;  %v3401_v0 = vadd.f32 %v966_v39, %v3256_v16  ;;  %v3404_v57 = vadd.f32 %v967_v44, %v3259_v13  ;;  %v3407_v58 = vadd.f32 %v968_v46, %v3262_v51 }
  0xd7   : > { %v3410_v35 = vadd.f32 %v969_v49, %v3265_v38  ;;  %v3413_v50 = vadd.f32 %v970_v37, %v3268_v6  ;;  %v3416_v10 = vadd.f32 %v971_v31, %v3271_v34  ;;  %v3419_v42 = vadd.f32 %v972_v5, %v3274_v54  ;;  %v4760_v54 = vld [vmem:[#allocation20_spill] sm:$0xff]  ;;  %v1915_v5 = vld [vmem:[%s2159_s19 + $0x10] sm:$0xff] }
  0xd8   : > { %v3422_v16 = vadd.f32 %v973_v27, %v3277_v25  ;;  %v3425_v13 = vadd.f32 %v974_v56, %v3280_v47  ;;  %v3428_v51 = vadd.f32 %v975_v36, %v3283_v12  ;;  %v3431_v38 = vadd.f32 %v976_v28, %v3286_v29  ;;  %v4763_v29 = vld [vmem:[#allocation19_spill] sm:$0xff]  ;;  %v4772_v37 = vld [vmem:[#allocation24_spill] sm:$0xff]  ;;  %v4774_v27 = vld [vmem:[#allocation17_spill] sm:$0xff] }
  0xd9   : > { %v3434_v6 = vadd.f32 %v977_v15, %v3289_v30  ;;  %v3437_v34 = vadd.f32 %v978_v45, %v3292_v3  ;;  %v3440_v25 = vadd.f32 %v979_v26, %v4760_v54  ;;  %v3443_v47 = vadd.f32 %v980_v61, %v4761_v18  ;;  %v4765_v3 = vld [vmem:[#allocation21_spill] sm:$0xff]  ;;  %v1919_v36 = vld [vmem:[%s2159_s19 + $0x30] sm:$0xff]  ;;  %v1920_v15 = vld [vmem:[%s2159_s19 + $0x38] sm:$0xff] }
  0xda   : > { %v3446_v12 = vadd.f32 %v981_v53, %v4762_v52  ;;  %v3449_v24 = vadd.f32 %v982_v32, %v4763_v29  ;;  %v3452_v30 = vadd.f32 %v983_v60, %v4764_v4  ;;  %v3455_v33 = vadd.f32 %v984_v17, %v4765_v3  ;;  %v1917_v56 = vld [vmem:[%s2159_s19 + $0x20] sm:$0xff]  ;;  %v1922_v53 = vld [vmem:[%s2159_s19 + $0x48] sm:$0xff]  ;;  %v1923_v60 = vld [vmem:[%s2159_s19 + $0x50] sm:$0xff] }
  0xdb   : > { %v3457_v20 = vadd.f32 %v985_v2, %v949_v7  ;;  %v3459_v11 = vadd.f32 %v986_v40, %v950_v1  ;;  %v3461_v39 = vadd.f32 %v987_v48, %v951_v9  ;;  %v3463_v44 = vadd.f32 %v988_v21, %v952_v14  ;;  %v1916_v1 = vld [vmem:[%s2159_s19 + $0x18] sm:$0xff]  ;;  %v1921_v26 = vld [vmem:[%s2159_s19 + $0x40] sm:$0xff]  ;;  %v1927_v54 = vld [vmem:[%s2159_s19 + $0x70] sm:$0xff] }
  0xdc   : > { %v3465_v46 = vadd.f32 %v989_v63, %v953_v59  ;;  %v3467_v49 = vadd.f32 %v990_v22, %v954_v19  ;;  %v3470_v31 = vadd.f32 %v990_v22, %v4772_v37  ;;  %v1027_v7 = vmul.f32 %v1915_v5, %v4774_v27  ;;  %v1918_v59 = vld [vmem:[%s2159_s19 + $0x28] sm:$0xff]  ;;  %v1924_v2 = vld [vmem:[%s2159_s19 + $0x58] sm:$0xff]  ;;  %v1925_v48 = vld [vmem:[%s2159_s19 + $0x60] sm:$0xff] }
  0xdd   : > { %4766 = vst [vmem:[#allocation25_spill] sm:$0xff] %v3457_v20  ;;  %4767 = vst [vmem:[#allocation29_spill] sm:$0xff] %v3459_v11  ;;  %v1028_v9 = vmul.f32 %v1916_v1, %v4774_v27  ;;  %v1029_v14 = vmul.f32 %v1917_v56, %v4774_v27  ;;  %v1030_v19 = vmul.f32 %v1918_v59, %v4774_v27  ;;  %v1926_v63 = vld [vmem:[%s2159_s19 + $0x68] sm:$0xff]  ;;  %v1928_v52 = vld [vmem:[%s2159_s19 + $0x78] sm:$0xff] }
  0xde   : > { %4768 = vst [vmem:[#allocation26_spill] sm:$0xff] %v3461_v39  ;;  %4769 = vst [vmem:[#allocation34_spill] sm:$0xff] %v3463_v44  ;;  %v1031_v28 = vmul.f32 %v1919_v36, %v4774_v27  ;;  %v1032_v45 = vmul.f32 %v1920_v15, %v4774_v27  ;;  %v1033_v61 = vmul.f32 %v1921_v26, %v4774_v27  ;;  %v1929_v4 = vld [vmem:[%s2159_s19 + $0x80] sm:$0xff]  ;;  %v1930_v37 = vld [vmem:[%s2159_s19 + $0x88] sm:$0xff] }
  0xdf   : > { %4770 = vst [vmem:[#allocation27_spill] sm:$0xff] %v3465_v46  ;;  %4771 = vst [vmem:[#allocation35_spill] sm:$0xff] %v3467_v49  ;;  %v1034_v32 = vmul.f32 %v1922_v53, %v4774_v27  ;;  %v1035_v17 = vmul.f32 %v1923_v60, %v4774_v27  ;;  %v1036_v40 = vmul.f32 %v1924_v2, %v4774_v27  ;;  %v1931_v1 = vld [vmem:[%s2159_s19 + $0x90] sm:$0xff]  ;;  %v1932_v59 = vld [vmem:[%s2159_s19 + $0x98] sm:$0xff] }
  0xe0   : > { %4773 = vst [vmem:[#allocation30_spill] sm:$0xff] %v3470_v31  ;;  %v1037_v21 = vmul.f32 %v1925_v48, %v4774_v27  ;;  %v1038_v22 = vmul.f32 %v1926_v63, %v4774_v27  ;;  %v1039_v18 = vmul.f32 %v1927_v54, %v4774_v27  ;;  %v1040_v29 = vmul.f32 %v1928_v52, %v4774_v27  ;;  %v1933_v15 = vld [vmem:[%s2159_s19 + $0xa0] sm:$0xff]  ;;  %v1934_v53 = vld [vmem:[%s2159_s19 + $0xa8] sm:$0xff]  ;;  %v1935_v2 = vld [vmem:[%s2159_s19 + $0xb0] sm:$0xff] }
  0xe1   : > { %v1041_v3 = vmul.f32 %v1929_v4, %v4774_v27  ;;  %v1042_v5 = vmul.f32 %v1930_v37, %v4774_v27  ;;  %v1043_v56 = vmul.f32 %v1931_v1, %v4774_v27  ;;  %v1044_v36 = vmul.f32 %v1932_v59, %v4774_v27  ;;  %v1936_v63 = vld [vmem:[%s2159_s19 + $0xb8] sm:$0xff]  ;;  %v1937_v52 = vld [vmem:[%s2159_s19 + $0xc0] sm:$0xff]  ;;  %v1938_v37 = vld [vmem:[%s2159_s19 + $0xc8] sm:$0xff] }
  0xe2   : > { %v1045_v26 = vmul.f32 %v1933_v15, %v4774_v27  ;;  %v1046_v60 = vmul.f32 %v1934_v53, %v4774_v27  ;;  %v1047_v48 = vmul.f32 %v1935_v2, %v4774_v27  ;;  %v1048_v54 = vmul.f32 %v1936_v63, %v4774_v27  ;;  %v1939_v59 = vld [vmem:[%s2159_s19 + $0xd0] sm:$0xff]  ;;  %v1940_v31 = vld [vmem:[%s2159_s19 + $0xd8] sm:$0xff]  ;;  %v1941_v49 = vld [vmem:[%s2159_s19 + $0xe0] sm:$0xff] }
  0xe3   : > { %v1049_v4 = vmul.f32 %v1937_v52, %v4774_v27  ;;  %v1050_v1 = vmul.f32 %v1938_v37, %v4774_v27  ;;  %v1051_v15 = vmul.f32 %v1939_v59, %v4774_v27  ;;  %v1052_v53 = vmul.f32 %v1940_v31, %v4774_v27  ;;  %v1942_v2 = vld [vmem:[%s2159_s19 + $0xe8] sm:$0xff]  ;;  %v1943_v39 = vld [vmem:[%s2159_s19 + $0xf0] sm:$0xff]  ;;  %v1944_v11 = vld [vmem:[%s2159_s19 + $0xf8] sm:$0xff] }
  0xe4   : > { %v1053_v46 = vmul.f32 %v1941_v49, %v4774_v27  ;;  %v1054_v44 = vmul.f32 %v1942_v2, %v4774_v27  ;;  %v1055_v63 = vmul.f32 %v1943_v39, %v4774_v27  ;;  %v1056_v52 = vmul.f32 %v1944_v11, %v4774_v27 }
  0xe5   : > { %v1057_v37 = vmul.f32 0.0, %v4774_v27  ;;  %v3534_v20 = vadd.f32 %v1027_v7, %v3383_v41  ;;  %v3537_v59 = vadd.f32 %v1028_v9, %v3386_v8  ;;  %v3540_v31 = vadd.f32 %v1029_v14, %v3389_v43 }
  0xe6   : > { %v3543_v49 = vadd.f32 %v1030_v19, %v3392_v23  ;;  %v3546_v2 = vadd.f32 %v1031_v28, %v3395_v62  ;;  %v3549_v39 = vadd.f32 %v1032_v45, %v3398_v55  ;;  %v3552_v11 = vadd.f32 %v1033_v61, %v3401_v0  ;;  %v4786_v28 = vld [vmem:[#allocation35_spill] sm:$0xff]  ;;  %v4789_v61 = vld [vmem:[#allocation73_spill] sm:$0xff] }
  0xe7   : > { %v3555_v41 = vadd.f32 %v1034_v32, %v3404_v57  ;;  %v3558_v8 = vadd.f32 %v1035_v17, %v3407_v58  ;;  %v3561_v43 = vadd.f32 %v1036_v40, %v3410_v35  ;;  %v3564_v23 = vadd.f32 %v1037_v21, %v3413_v50  ;;  %v4788_v45 = vld [vmem:[#allocation30_spill] sm:$0xff]  ;;  %v4790_v32 = vld [vmem:[#allocation11_spill] sm:$0xff] }
  0xe8   : > { %v3567_v62 = vadd.f32 %v1038_v22, %v3416_v10  ;;  %v3570_v55 = vadd.f32 %v1039_v18, %v3419_v42  ;;  %v3573_v0 = vadd.f32 %v1040_v29, %v3422_v16  ;;  %v3576_v57 = vadd.f32 %v1041_v3, %v3425_v13  ;;  %v4791_v40 = vld [vmem:[#allocation87_spill] sm:$0xff]  ;;  %v4792_v21 = vld [vmem:[#allocation74_spill] sm:$0xff]  ;;  %v4793_v22 = vld [vmem:[#allocation88_spill] sm:$0xff] }
  0xe9   : > { %v3579_v58 = vadd.f32 %v1042_v5, %v3428_v51  ;;  %v3582_v35 = vadd.f32 %v1043_v56, %v3431_v38  ;;  %v3585_v50 = vadd.f32 %v1044_v36, %v3434_v6  ;;  %v3588_v10 = vadd.f32 %v1045_v26, %v3437_v34  ;;  %v4777_v34 = vld [vmem:[#allocation25_spill] sm:$0xff]  ;;  %v4794_v29 = vld [vmem:[#allocation75_spill] sm:$0xff]  ;;  %v4796_v36 = vld [vmem:[#allocation76_spill] sm:$0xff] }
  0xea   : > { %v3591_v42 = vadd.f32 %v1046_v60, %v3440_v25  ;;  %v3594_v16 = vadd.f32 %v1047_v48, %v3443_v47  ;;  %v3597_v13 = vadd.f32 %v1048_v54, %v3446_v12  ;;  %v3600_v51 = vadd.f32 %v1049_v4, %v3449_v24  ;;  %v4779_v25 = vld [vmem:[#allocation29_spill] sm:$0xff]  ;;  %v4781_v47 = vld [vmem:[#allocation26_spill] sm:$0xff]  ;;  %v4785_v24 = vld [vmem:[#allocation27_spill] sm:$0xff] }
  0xeb   : > { %v3603_v38 = vadd.f32 %v1050_v1, %v3452_v30  ;;  %v3606_v6 = vadd.f32 %v1051_v15, %v3455_v33  ;;  %v3609_v27 = vadd.f32 %v1052_v53, %v4777_v34  ;;  %v3612_v7 = vadd.f32 %v1053_v46, %v4779_v25  ;;  %v4783_v12 = vld [vmem:[#allocation34_spill] sm:$0xff]  ;;  %v4795_v5 = vld [vmem:[#allocation91_spill] sm:$0xff]  ;;  %v4797_v60 = vld [vmem:[#allocation92_spill] sm:$0xff] }
  0xec   : > { %v3615_v9 = vadd.f32 %v1054_v44, %v4781_v47  ;;  %v3618_v14 = vadd.f32 %v1055_v63, %v4783_v12  ;;  %v1087_v19 = vadd.f32 %v1056_v52, %v4785_v24  ;;  %v3622_v30 = vadd.f32 %v1057_v37, %v4786_v28  ;;  %v4798_v54 = vld [vmem:[#allocation77_spill] sm:$0xff]  ;;  %v4799_v1 = vld [vmem:[#allocation94_spill] sm:$0xff]  ;;  %v4801_v52 = vld [vmem:[#allocation95_spill] sm:$0xff] }
  0xed   : > { %4775 = vst [vmem:[#allocation39_spill] sm:$0xff] %v3603_v38  ;;  %4776 = vst [vmem:[#allocation31_spill] sm:$0xff] %v3606_v6  ;;  %v1089_v33 = vadd.f32 %v1057_v37, %v4788_v45  ;;  %v1094_v17 = vmul.f32 %v4790_v32, %v4789_v61  ;;  %v1095_v46 = vmul.f32 %v4790_v32, %v4791_v40  ;;  %v4800_v53 = vld [vmem:[#allocation78_spill] sm:$0xff]  ;;  %v4802_v34 = vld [vmem:[#allocation79_spill] sm:$0xff] }
  0xee   : > { %4778 = vst [vmem:[#allocation43_spill] sm:$0xff] %v3609_v27  ;;  %4780 = vst [vmem:[#allocation36_spill] sm:$0xff] %v3612_v7  ;;  %v1096_v44 = vmul.f32 %v4790_v32, %v4792_v21  ;;  %v1097_v18 = vmul.f32 %v4790_v32, %v4793_v22  ;;  %v1098_v3 = vmul.f32 %v4790_v32, %v4794_v29  ;;  %v4803_v47 = vld [vmem:[#allocation96_spill] sm:$0xff]  ;;  %v4805_v45 = vld [vmem:[#allocation97_spill] sm:$0xff] }
  0xef   : > { %4782 = vst [vmem:[#allocation45_spill] sm:$0xff] %v3615_v9  ;;  %4784 = vst [vmem:[#allocation40_spill] sm:$0xff] %v3618_v14  ;;  %v1099_v56 = vmul.f32 %v4790_v32, %v4795_v5  ;;  %v1100_v26 = vmul.f32 %v4790_v32, %v4796_v36  ;;  %v1101_v48 = vmul.f32 %v4790_v32, %v4797_v60  ;;  %v4804_v24 = vld [vmem:[#allocation80_spill] sm:$0xff]  ;;  %v4806_v40 = vld [vmem:[#allocation81_spill] sm:$0xff] }
  0xf0   : > { %4787 = vst [vmem:[#allocation46_spill] sm:$0xff] %v3622_v30  ;;  %v1102_v4 = vmul.f32 %v4790_v32, %v4798_v54  ;;  %v1103_v15 = vmul.f32 %v4790_v32, %v4799_v1  ;;  %v1104_v63 = vmul.f32 %v4790_v32, %v4800_v53  ;;  %v1105_v37 = vmul.f32 %v4790_v32, %v4801_v52  ;;  %v4807_v22 = vld [vmem:[#allocation98_spill] sm:$0xff]  ;;  %v4809_v60 = vld [vmem:[#allocation99_spill] sm:$0xff]  ;;  %v4811_v52 = vld [vmem:[#allocation100_spill] sm:$0xff] }
  0xf1   : > { %v1106_v25 = vmul.f32 %v4790_v32, %v4802_v34  ;;  %v1107_v12 = vmul.f32 %v4790_v32, %v4803_v47  ;;  %v1108_v28 = vmul.f32 %v4790_v32, %v4804_v24  ;;  %v1109_v61 = vmul.f32 %v4790_v32, %v4805_v45  ;;  %v4808_v5 = vld [vmem:[#allocation82_spill] sm:$0xff]  ;;  %v4810_v1 = vld [vmem:[#allocation83_spill] sm:$0xff]  ;;  %v4812_v47 = vld [vmem:[#allocation84_spill] sm:$0xff] }
  0xf2   : > { %v1110_v21 = vmul.f32 %v4790_v32, %v4806_v40  ;;  %v1111_v29 = vmul.f32 %v4790_v32, %v4807_v22  ;;  %v1112_v36 = vmul.f32 %v4790_v32, %v4808_v5  ;;  %v1113_v54 = vmul.f32 %v4790_v32, %v4809_v60  ;;  %v4813_v45 = vld [vmem:[#allocation104_spill] sm:$0xff]  ;;  %v4814_v30 = vld [vmem:[#allocation101_spill] sm:$0xff]  ;;  %v4816_v9 = vld [vmem:[#allocation102_spill] sm:$0xff] }
  0xf3   : > { %v1114_v53 = vmul.f32 %v4790_v32, %v4810_v1  ;;  %v1115_v34 = vmul.f32 %v4790_v32, %v4811_v52  ;;  %v1116_v24 = vmul.f32 %v4790_v32, %v4812_v47  ;;  %v1123_v40 = vmul.f32 %v4790_v32, %v4813_v45  ;;  %v4815_v14 = vld [vmem:[#allocation85_spill] sm:$0xff]  ;;  %v4818_v27 = vld [vmem:[#allocation103_spill] sm:$0xff]  ;;  %v4819_v6 = vld [vmem:[#allocation90_spill] sm:$0xff] }
  0xf4   : > { %v1117_v22 = vmul.f32 %v4790_v32, %v4814_v30  ;;  %v1118_v5 = vmul.f32 %v4790_v32, %v4815_v14  ;;  %v1119_v60 = vmul.f32 %v4790_v32, %v4816_v9  ;;  %v4817_v7 = vld [vmem:[#allocation89_spill] sm:$0xff]  ;;  %v1121_v52 = vmul.f32 %v4790_v32, %v4818_v27 }
  0xf5   : > { %v1120_v1 = vmul.f32 %v4790_v32, %v4817_v7  ;;  %v1122_v47 = vmul.f32 %v4790_v32, %v4819_v6  ;;  %v1124_v45 = vmul.f32 0.0, %v4790_v32  ;;  %v3687_v38 = vadd.f32 %v1094_v17, %v3534_v20 }
  0xf6   : > { %v3690_v30 = vadd.f32 %v1095_v46, %v3537_v59  ;;  %v3693_v14 = vadd.f32 %v1096_v44, %v3540_v31  ;;  %v3696_v9 = vadd.f32 %v1097_v18, %v3543_v49  ;;  %v3699_v7 = vadd.f32 %v1098_v3, %v3546_v2  ;;  %v4823_v44 = vld [vmem:[#allocation36_spill] sm:$0xff]  ;;  %v4824_v3 = vld [vmem:[#allocation45_spill] sm:$0xff] }
  0xf7   : > { %v3702_v27 = vadd.f32 %v1099_v56, %v3549_v39  ;;  %v3705_v6 = vadd.f32 %v1100_v26, %v3552_v11  ;;  %v3708_v20 = vadd.f32 %v1101_v48, %v3555_v41  ;;  %v3711_v59 = vadd.f32 %v1102_v4, %v3558_v8  ;;  %v4825_v26 = vld [vmem:[#allocation40_spill] sm:$0xff]  ;;  %v4826_v4 = vld [vmem:[#allocation46_spill] sm:$0xff] }
  0xf8   : > { %v3714_v31 = vadd.f32 %v1103_v15, %v3561_v43  ;;  %v3717_v49 = vadd.f32 %v1104_v63, %v3564_v23  ;;  %v3720_v2 = vadd.f32 %v1105_v37, %v3567_v62  ;;  %v3723_v39 = vadd.f32 %v1106_v25, %v3570_v55 }
  0xf9   : > { %v3726_v11 = vadd.f32 %v1107_v12, %v3573_v0  ;;  %v3729_v41 = vadd.f32 %v1108_v28, %v3576_v57  ;;  %v3732_v8 = vadd.f32 %v1109_v61, %v3579_v58  ;;  %v3735_v43 = vadd.f32 %v1110_v21, %v3582_v35 }
  0xfa   : > { %v3738_v23 = vadd.f32 %v1111_v29, %v3585_v50  ;;  %v3741_v62 = vadd.f32 %v1112_v36, %v3588_v10  ;;  %v3744_v55 = vadd.f32 %v1113_v54, %v3591_v42  ;;  %v3747_v0 = vadd.f32 %v1114_v53, %v3594_v16  ;;  %v4820_v10 = vld [vmem:[#allocation39_spill] sm:$0xff] }
  0xfb   : > { %v3750_v57 = vadd.f32 %v1115_v34, %v3597_v13  ;;  %v3752_v58 = vadd.f32 %v1123_v40, %v1087_v19  ;;  %v3754_v32 = vadd.f32 %v1124_v45, %v1089_v33  ;;  %v1158_v35 = vsel %vm1157_vm2, %v3687_v38, 0.0  ;;  %v4821_v13 = vld [vmem:[#allocation31_spill] sm:$0xff] }
  0xfc   : > { %v3759_v50 = vadd.f32 %v1116_v24, %v3600_v51  ;;  %v3762_v17 = vadd.f32 %v1117_v22, %v4820_v10  ;;  %v1159_v42 = vsel %vm1157_vm2, %v3690_v30, 0.0  ;;  %v1161_v16 = vsel %vm1157_vm2, %v3693_v14, 0.0  ;;  %v4822_v33 = vld [vmem:[#allocation43_spill] sm:$0xff] }
  0xfd   : > { %v3769_v19 = vadd.f32 %v1118_v5, %v4821_v13  ;;  %v3772_v46 = vadd.f32 %v1119_v60, %v4822_v33  ;;  %v3775_v18 = vadd.f32 %v1120_v1, %v4823_v44  ;;  %v1160_v51 = vadd.f32 %v1159_v42, %v1158_v35 }
  0xfe   : > { %v3778_v56 = vadd.f32 %v1121_v52, %v4824_v3  ;;  %v3781_v48 = vadd.f32 %v1122_v47, %v4825_v26  ;;  %v3784_v15 = vadd.f32 %v1124_v45, %v4826_v4  ;;  %v1163_v63 = vsel %vm1157_vm2, %v3696_v9, 0.0 }
  0xff   : > { %v1162_v37 = vadd.f32 %v1161_v16, %v1160_v51  ;;  %v1165_v25 = vsel %vm1157_vm2, %v3699_v7, 0.0  ;;  %v1167_v12 = vsel %vm1157_vm2, %v3702_v27, 0.0  ;;  %v1169_v28 = vsel %vm1157_vm2, %v3705_v6, 0.0 }
 0x100   : > { %v1171_v61 = vsel %vm1157_vm2, %v3708_v20, 0.0  ;;  %v1173_v21 = vsel %vm1157_vm2, %v3711_v59, 0.0  ;;  %v1175_v29 = vsel %vm1157_vm2, %v3714_v31, 0.0  ;;  %v1177_v36 = vsel %vm1157_vm2, %v3717_v49, 0.0 }
 0x101   : > { %v1164_v54 = vadd.f32 %v1163_v63, %v1162_v37  ;;  %v3804_v53 = vsel %vm1157_vm2, %v3720_v2, 0.0  ;;  %v3808_v34 = vsel %vm1157_vm2, %v3723_v39, 0.0  ;;  %v3812_v24 = vsel %vm1157_vm2, %v3726_v11, 0.0 }
 0x102   : > { %v3816_v40 = vsel %vm1157_vm2, %v3729_v41, 0.0  ;;  %v3820_v22 = vsel %vm1157_vm2, %v3732_v8, 0.0  ;;  %v3824_v5 = vsel %vm1157_vm2, %v3735_v43, 0.0  ;;  %v3828_v60 = vsel %vm1157_vm2, %v3738_v23, 0.0 }
 0x103   : > { %v1166_v1 = vadd.f32 %v1165_v25, %v1164_v54  ;;  %v3832_v52 = vsel %vm1157_vm2, %v3741_v62, 0.0  ;;  %v3836_v47 = vsel %vm1157_vm2, %v3744_v55, 0.0  ;;  %v3840_v45 = vsel %vm1157_vm2, %v3747_v0, 0.0 }
 0x104   : > { %v3844_v35 = vsel %vm1157_vm2, %v3750_v57, 0.0  ;;  %v3848_v10 = vsel %vm1157_vm2, %v3759_v50, 0.0  ;;  %v3852_v42 = vsel %vm1157_vm2, %v3762_v17, 0.0  ;;  %v3856_v16 = vsel %vm1157_vm2, %v3769_v19, 0.0 }
 0x105   : > { %v1168_v13 = vadd.f32 %v1167_v12, %v1166_v1  ;;  %v3860_v33 = vsel %vm1157_vm2, %v3772_v46, 0.0  ;;  %v3864_v44 = vsel %vm1157_vm2, %v3775_v18, 0.0  ;;  %v3868_v51 = vsel %vm1157_vm2, %v3778_v56, 0.0 }
 0x106   : > { %v3872_v3 = vsel %vm1157_vm2, %v3781_v48, 0.0  ;;  %v3876_v26 = vsel %vm1157_vm2, %v3752_v58, 0.0  ;;  %v3880_v4 = vsel %vm1157_vm2, %v3784_v15, 0.0  ;;  %v1229_v63 = vmul.f32 %v3687_v38, %v3687_v38 }
 0x107   : > { %4827 = vst [vmem:[#allocation41_spill] sm:$0xff] %v3876_v26  ;;  %4828 = vst [vmem:[#allocation16_spill] sm:$0xff] %v3880_v4  ;;  %v1170_v37 = vadd.f32 %v1169_v28, %v1168_v13  ;;  %v1230_v25 = vmul.f32 %v3690_v30, %v3690_v30  ;;  %v1231_v12 = vmul.f32 %v3693_v14, %v3693_v14 }
 0x108   : > { %v1232_v54 = vmul.f32 %v3696_v9, %v3696_v9  ;;  %v1233_v1 = vmul.f32 %v3699_v7, %v3699_v7  ;;  %v1234_v26 = vmul.f32 %v3702_v27, %v3702_v27  ;;  %v1235_v4 = vmul.f32 %v3705_v6, %v3705_v6 }
 0x109   : > { %v1236_v38 = vmul.f32 %v3708_v20, %v3708_v20  ;;  %v1172_v28 = vadd.f32 %v1171_v61, %v1170_v37  ;;  %v1237_v30 = vmul.f32 %v3711_v59, %v3711_v59  ;;  %v1238_v14 = vmul.f32 %v3714_v31, %v3714_v31 }
 0x10a   : > { %v1239_v9 = vmul.f32 %v3717_v49, %v3717_v49  ;;  %v1240_v7 = vmul.f32 %v3720_v2, %v3720_v2  ;;  %v1241_v27 = vmul.f32 %v3723_v39, %v3723_v39  ;;  %v1242_v6 = vmul.f32 %v3726_v11, %v3726_v11 }
 0x10b   : > { %v1243_v20 = vmul.f32 %v3729_v41, %v3729_v41  ;;  %v1174_v61 = vadd.f32 %v1173_v21, %v1172_v28  ;;  %v1244_v59 = vmul.f32 %v3732_v8, %v3732_v8  ;;  %v1245_v31 = vmul.f32 %v3735_v43, %v3735_v43 }
 0x10c   : > { %v1246_v49 = vmul.f32 %v3738_v23, %v3738_v23  ;;  %v1247_v2 = vmul.f32 %v3741_v62, %v3741_v62  ;;  %v1248_v39 = vmul.f32 %v3744_v55, %v3744_v55  ;;  %v1249_v11 = vmul.f32 %v3747_v0, %v3747_v0 }
 0x10d   : > { %v3926_v41 = vmul.f32 %v3750_v57, %v3750_v57  ;;  %v1176_v8 = vadd.f32 %v1175_v29, %v1174_v61  ;;  %v3930_v43 = vmul.f32 %v3759_v50, %v3759_v50  ;;  %v1253_v23 = vmul.f32 %v3769_v19, %v3769_v19 }
 0x10e   : > { %v1254_v62 = vmul.f32 %v3772_v46, %v3772_v46  ;;  %v1255_v55 = vmul.f32 %v3775_v18, %v3775_v18  ;;  %v1261_v0 = vsel %vm1157_vm2, %v1229_v63, 0.0  ;;  %v1262_v21 = vsel %vm1157_vm2, %v1230_v25, 0.0 }
 0x10f   : > { %v1264_v57 = vsel %vm1157_vm2, %v1231_v12, 0.0  ;;  %v1178_v29 = vadd.f32 %v1177_v36, %v1176_v8  ;;  %v1256_v50 = vmul.f32 %v3778_v56, %v3778_v56  ;;  %v1257_v13 = vmul.f32 %v3781_v48, %v3781_v48 }
 0x110   : > { %v1263_v19 = vadd.f32 %v1262_v21, %v1261_v0  ;;  %v1258_v46 = vmul.f32 %v3752_v58, %v3752_v58  ;;  %v1259_v18 = vmul.f32 %v3784_v15, %v3784_v15  ;;  %v1260_v63 = vmul.f32 %v3754_v32, %v3754_v32 }
 0x111   : > { %v1266_v37 = vsel %vm1157_vm2, %v1232_v54, 0.0  ;;  %v1180_v36 = vadd.f32 %v3804_v53, %v1178_v29  ;;  %v1268_v56 = vsel %vm1157_vm2, %v1233_v1, 0.0  ;;  %v1270_v12 = vsel %vm1157_vm2, %v1234_v26, 0.0  ;;  %v4832_v29 = vld [vmem:[#allocation18_spill] sm:$0xff] }
 0x112   : > { %v1265_v25 = vadd.f32 %v1264_v57, %v1263_v19  ;;  %v1272_v48 = vsel %vm1157_vm2, %v1235_v4, 0.0  ;;  %v1274_v28 = vsel %vm1157_vm2, %v1236_v38, 0.0  ;;  %v1276_v58 = vsel %vm1157_vm2, %v1237_v30, 0.0 }
 0x113   : > { %v3959_v15 = vsel %vm1157_vm2, %v1238_v14, 0.0  ;;  %v1182_v61 = vadd.f32 %v3808_v34, %v1180_v36  ;;  %v3963_v54 = vsel %vm1157_vm2, %v1239_v9, 0.0  ;;  %v3966_v53 = vsel %vm1157_vm2, %v1240_v7, 0.0 }
 0x114   : > { %v1267_v8 = vadd.f32 %v1266_v37, %v1265_v25  ;;  %v3969_v26 = vsel %vm1157_vm2, %v1241_v27, 0.0  ;;  %v3972_v4 = vsel %vm1157_vm2, %v1242_v6, 0.0  ;;  %v3975_v1 = vsel %vm1157_vm2, %v1243_v20, 0.0 }
 0x115   : > { %v3978_v38 = vsel %vm1157_vm2, %v1244_v59, 0.0  ;;  %v1184_v34 = vadd.f32 %v3812_v24, %v1182_v61  ;;  %v3982_v14 = vsel %vm1157_vm2, %v1245_v31, 0.0  ;;  %v3985_v9 = vsel %vm1157_vm2, %v1246_v49, 0.0  ;;  %v4834_v61 = vld [vmem:[#allocation115_spill] sm:$0xff] }
 0x116   : > { %v1269_v30 = vadd.f32 %v1268_v56, %v1267_v8  ;;  %v3988_v7 = vsel %vm1157_vm2, %v1253_v23, 0.0  ;;  %v3991_v27 = vsel %vm1157_vm2, %v1254_v62, 0.0  ;;  %v3994_v6 = vsel %vm1157_vm2, %v1255_v55, 0.0  ;;  %v1950_v56 = vld [vmem:[%s2159_s19 + $0xa0] ss:$2 sm:$0xff] }
 0x117   : > { %v3997_v24 = vsel %vm1157_vm2, %v1256_v50, 0.0  ;;  %v1186_v20 = vadd.f32 %v3816_v40, %v1184_v34  ;;  %v4001_v31 = vsel %vm1157_vm2, %v1257_v13, 0.0  ;;  %v4004_v49 = vsel %vm1157_vm2, %v1258_v46, 0.0  ;;  %v1946_v13 = vld [vmem:[%s2159_s19 + $0x20] ss:$2 sm:$0xff] }
 0x118   : > { %v1271_v59 = vadd.f32 %v1270_v12, %v1269_v30  ;;  %4829 = vst [vmem:[#allocation93_spill] sm:$0xff] %v4004_v49  ;;  %v4007_v23 = vsel %vm1157_vm2, %v1247_v2, 0.0  ;;  %v4010_v62 = vsel %vm1157_vm2, %v1248_v39, 0.0  ;;  %v4013_v55 = vsel %vm1157_vm2, %v1259_v18, 0.0  ;;  %v1332_v2 = vld [vmem:[%s4213_s2 + $0x2] sm:$0x3] }
 0x119   : > { %4830 = vst [vmem:[#allocation54_spill] sm:$0xff] %v4013_v55  ;;  %v4016_v40 = vsel %vm1157_vm2, %v1260_v63, 0.0  ;;  %v1188_v0 = vadd.f32 %v3820_v22, %v1186_v20  ;;  %v4020_v57 = vsel %vm1157_vm2, %v1249_v11, 0.0  ;;  %v1945_v39 = vld [vmem:[%s2159_s19] ss:$2 sm:$0xff]  ;;  %v1355_v19 = vmul.f32 %v1946_v13, %v4832_v29 }
 0x11a   : > { %4831 = vst [vmem:[#allocation106_spill] sm:$0xff] %v4016_v40  ;;  %v1273_v21 = vadd.f32 %v1272_v48, %v1271_v59  ;;  %v1354_v50 = vmul.f32 %v1945_v39, %v4832_v29  ;;  %v1947_v46 = vld [vmem:[%s2159_s19 + $0x40] ss:$2 sm:$0xff]  ;;  %v1359_v12 = vmul.f32 %v1950_v56, %v4832_v29  ;;  %v1955_v56 = vld [vmem:[%s2159_s19 + $0x41] ss:$2 sm:$0xff] }
 0x11b   : > { %v1356_v22 = vmul.f32 %v1947_v46, %v4832_v29  ;;  %v1948_v18 = vld [vmem:[%s2159_s19 + $0x60] ss:$2 sm:$0xff]  ;;  %v1190_v36 = vadd.f32 %v3824_v5, %v1188_v0  ;;  %v1957_v55 = vld [vmem:[%s2159_s19 + $0x81] ss:$2 sm:$0xff] }
 0x11c   : > { %v1357_v63 = vmul.f32 %v1948_v18, %v4832_v29  ;;  %v1949_v11 = vld [vmem:[%s2159_s19 + $0x80] ss:$2 sm:$0xff]  ;;  %v1275_v25 = vadd.f32 %v1274_v28, %v1273_v21  ;;  %v1953_v21 = vld [vmem:[%s2159_s19 + $0x1] ss:$2 sm:$0xff] }
 0x11d   : > { %v1358_v37 = vmul.f32 %v1949_v11, %v4832_v29  ;;  %v4833_v48 = vld [vmem:[#allocation6_spill] sm:$0xff]  ;;  %v4835_v39 = vld [vmem:[#allocation5_spill] sm:$0xff]  ;;  %v1192_v28 = vadd.f32 %v3828_v60, %v1190_v36 }
 0x11e   : > { %v1409_v8 = vrot.slane %v4834_v61, %v4833_v48  ;;  %v1951_v34 = vld [vmem:[%s2159_s19 + $0xc0] ss:$2 sm:$0xff]  ;;  %v1465_v13 = vrot.slane %v1332_v2, %v4835_v39  ;;  %v4046_v5 = vrot.slane %v1332_v2, %v4833_v48  ;;  %v1277_v0 = vadd.f32 %v1276_v58, %v1275_v25  ;;  %v1954_v18 = vld [vmem:[%s2159_s19 + $0x21] ss:$2 sm:$0xff] }
 0x11f   : > { %v1360_v30 = vmul.f32 %v1951_v34, %v4832_v29  ;;  %v1952_v20 = vld [vmem:[%s2159_s19 + $0xe0] ss:$2 sm:$0xff]  ;;  %v1956_v34 = vld [vmem:[%s2159_s19 + $0x61] ss:$2 sm:$0xff]  ;;  %v1194_v2 = vadd.f32 %v3832_v52, %v1192_v28 }
 0x120   : > { %v1361_v59 = vmul.f32 %v1952_v20, %v4832_v29  ;;  %v1410_v46 = vmul.f32 %v1953_v21, %v1409_v8  ;;  %v1411_v11 = vmul.f32 %v1954_v18, %v1409_v8  ;;  %v1412_v61 = vmul.f32 %v1955_v56, %v1409_v8  ;;  %v1958_v20 = vld [vmem:[%s2159_s19 + $0xa1] ss:$2 sm:$0xff]  ;;  %v4059_v21 = vpop.permute.xlu1 %1572 }
 0x121   : > { %v1413_v40 = vmul.f32 %v1956_v34, %v1409_v8  ;;  %v1414_v29 = vmul.f32 %v1957_v55, %v1409_v8  ;;  %v1415_v39 = vmul.f32 %v1958_v20, %v1409_v8  ;;  %v1279_v48 = vadd.f32 %v3959_v15, %v1277_v0  ;;  %v1959_v60 = vld [vmem:[%s2159_s19 + $0xc1] ss:$2 sm:$0xff]  ;;  %v4063_v0 = vpop.permute.xlu0 %1570 }
 0x122   : > { %v1416_v58 = vmul.f32 %v1959_v60, %v1409_v8  ;;  %v1960_v36 = vld [vmem:[%s2159_s19 + $0xe1] ss:$2 sm:$0xff]  ;;  %v1418_v18 = vadd.f32 %v1410_v46, %v1354_v50  ;;  %v1419_v56 = vadd.f32 %v1411_v11, %v1355_v19  ;;  %v1420_v34 = vadd.f32 %v1412_v61, %v1356_v22  ;;  %v1961_v50 = vld [vmem:[%s2159_s19 + $0x10] ss:$2 sm:$0xff] }
 0x123   : > { %v1417_v25 = vmul.f32 %v1960_v36, %v1409_v8  ;;  %v1421_v49 = vadd.f32 %v1413_v40, %v1357_v63  ;;  %v1196_v55 = vadd.f32 %v3836_v47, %v1194_v2  ;;  %v1281_v52 = vadd.f32 %v3963_v54, %v1279_v48  ;;  %v1962_v22 = vld [vmem:[%s2159_s19 + $0x30] ss:$2 sm:$0xff] }
 0x124   : > { %v1422_v15 = vadd.f32 %v1414_v29, %v1358_v37  ;;  %v1423_v28 = vadd.f32 %v1415_v39, %v1359_v12  ;;  %v1424_v8 = vadd.f32 %v1416_v58, %v1360_v30  ;;  %v1466_v19 = vmul.f32 %v1961_v50, %v1465_v13  ;;  %v1963_v54 = vld [vmem:[%s2159_s19 + $0x50] ss:$2 sm:$0xff]  ;;  %v1575_v36 = vpop.permute.xlu1 %1574 }
 0x125   : > { %v1425_v20 = vadd.f32 %v1417_v25, %v1361_v59  ;;  %v1467_v40 = vmul.f32 %v1962_v22, %v1465_v13  ;;  %v1198_v63 = vadd.f32 %v3840_v45, %v1196_v55  ;;  %v1283_v47 = vadd.f32 %v3966_v53, %v1281_v52  ;;  %v1964_v37 = vld [vmem:[%s2159_s19 + $0x70] ss:$2 sm:$0xff]  ;;  %v1577_v25 = vpop.permute.xlu0 %1576 }
 0x126   : > { %v1468_v46 = vmul.f32 %v1963_v54, %v1465_v13  ;;  %v1469_v11 = vmul.f32 %v1964_v37, %v1465_v13  ;;  %v1965_v12 = vld [vmem:[%s2159_s19 + $0x90] ss:$2 sm:$0xff]  ;;  %v1474_v53 = vadd.f32 %v1466_v19, %v1418_v18  ;;  %v1969_v18 = vld [vmem:[%s2159_s19 + $0x11] ss:$2 sm:$0xff] }
 0x127   : > { %v1470_v61 = vmul.f32 %v1965_v12, %v1465_v13  ;;  %v1966_v29 = vld [vmem:[%s2159_s19 + $0xb0] ss:$2 sm:$0xff]  ;;  %v1200_v60 = vadd.f32 %v3844_v35, %v1198_v63  ;;  %v1285_v45 = vadd.f32 %v3969_v26, %v1283_v47  ;;  %v1475_v58 = vadd.f32 %v1467_v40, %v1419_v56  ;;  %v1973_v19 = vld [vmem:[%s2159_s19 + $0x91] ss:$2 sm:$0xff] }
 0x128   : > { %v1471_v30 = vmul.f32 %v1966_v29, %v1465_v13  ;;  %v1967_v59 = vld [vmem:[%s2159_s19 + $0xd0] ss:$2 sm:$0xff]  ;;  %v1476_v55 = vadd.f32 %v1468_v46, %v1420_v34  ;;  %v1477_v52 = vadd.f32 %v1469_v11, %v1421_v49  ;;  %v1522_v56 = vmul.f32 %v1969_v18, %v4046_v5  ;;  %v1970_v49 = vld [vmem:[%s2159_s19 + $0x31] ss:$2 sm:$0xff] }
 0x129   : > { %v1472_v39 = vmul.f32 %v1967_v59, %v1465_v13  ;;  %v1968_v2 = vld [vmem:[%s2159_s19 + $0xf0] ss:$2 sm:$0xff]  ;;  %v1478_v50 = vadd.f32 %v1470_v61, %v1422_v15  ;;  %v1287_v35 = vadd.f32 %v3972_v4, %v1285_v45  ;;  %v1523_v34 = vmul.f32 %v1970_v49, %v4046_v5  ;;  %v1971_v15 = vld [vmem:[%s2159_s19 + $0x51] ss:$2 sm:$0xff] }
 0x12a   : > { %v1473_v48 = vmul.f32 %v1968_v2, %v1465_v13  ;;  %v1479_v22 = vadd.f32 %v1471_v30, %v1423_v28  ;;  %v1202_v13 = vadd.f32 %v3848_v10, %v1200_v60  ;;  %v1524_v28 = vmul.f32 %v1971_v15, %v4046_v5  ;;  %v1972_v10 = vld [vmem:[%s2159_s19 + $0x71] ss:$2 sm:$0xff]  ;;  %v1581_v2 = vpop.permute.xlu0 %1580 }
 0x12b   : > { %v1480_v63 = vadd.f32 %v1472_v39, %v1424_v8  ;;  %v1525_v4 = vmul.f32 %v1972_v10, %v4046_v5  ;;  %v1526_v40 = vmul.f32 %v1973_v19, %v4046_v5  ;;  %v1974_v47 = vld [vmem:[%s2159_s19 + $0xb1] ss:$2 sm:$0xff]  ;;  %v1530_v61 = vadd.f32 %v1522_v56, %v1474_v53  ;;  %v1579_v39 = vpop.permute.xlu1 %1578 }
 0x12c   : > { %v1481_v26 = vadd.f32 %v1473_v48, %v1425_v20  ;;  %v1204_v8 = vadd.f32 %v3852_v42, %v1202_v13  ;;  %v1289_v20 = vadd.f32 %v3975_v1, %v1287_v35  ;;  %v1527_v54 = vmul.f32 %v1974_v47, %v4046_v5  ;;  %v1975_v46 = vld [vmem:[%s2159_s19 + $0xd1] ss:$2 sm:$0xff] }
 0x12d   : > { %v1528_v37 = vmul.f32 %v1975_v46, %v4046_v5  ;;  %v1976_v11 = vld [vmem:[%s2159_s19 + $0xf1] ss:$2 sm:$0xff]  ;;  %v1531_v29 = vadd.f32 %v1523_v34, %v1475_v58  ;;  %v1532_v30 = vadd.f32 %v1524_v28, %v1476_v55  ;;  %v1533_v59 = vadd.f32 %v1525_v4, %v1477_v52  ;;  %s4123_s19 = scalar_lea.vmem %s4215_s4, %s1867_s13 }
 0x12e   : > { %v1529_v12 = vmul.f32 %v1976_v11, %v4046_v5  ;;  %v1206_v42 = vadd.f32 %v3856_v16, %v1204_v8  ;;  %v1291_v1 = vadd.f32 %v3978_v38, %v1289_v20  ;;  %v1534_v48 = vadd.f32 %v1526_v40, %v1478_v50  ;;  %v4836_v5 = vld [vmem:[#allocation12_spill] sm:$0xff] }
 0x12f   : > { %v1535_v60 = vadd.f32 %v1527_v54, %v1479_v22  ;;  %v1536_v45 = vadd.f32 %v1528_v37, %v1480_v63  ;;  %v4837_v53 = vunpack.i.l.bf16 %v4836_v5  ;;  %v4838_v16 = vunpack.i.h.bf16 %v4836_v5 }
 0x130   : > { %v1537_v13 = vadd.f32 %v1529_v12, %v1481_v26  ;;  %v1208_v35 = vadd.f32 %v3860_v33, %v1206_v42  ;;  %v1293_v18 = vadd.f32 %v3982_v14, %v1291_v1  ;;  %v1592_v55 = vsel %vm1157_vm2, %v1532_v30, %v4063_v0  ;;  %v4840_v12 = vld [vmem:[#allocation16_spill] sm:$0xff] }
 0x131   : > { %v1590_v58 = vsel %vm1157_vm2, %v1530_v61, %v4837_v53  ;;  %v1591_v38 = vsel %vm1157_vm2, %v1531_v29, %v4838_v16  ;;  %v1593_v52 = vsel %vm1157_vm2, %v1533_v59, %v4059_v21  ;;  %v1594_v50 = vsel %vm1157_vm2, %v1534_v48, %v1575_v36 }
 0x132   : > { %v1595_v33 = vsel %vm1157_vm2, %v1535_v60, %v1577_v25  ;;  %v1210_v14 = vadd.f32 %v3864_v44, %v1208_v35  ;;  %v1295_v22 = vadd.f32 %v3985_v9, %v1293_v18  ;;  %v1596_v0 = vsel %vm1157_vm2, %v1536_v45, %v1579_v39 }
 0x133   : > { %v1597_v21 = vsel %vm1157_vm2, %v1537_v13, %v1581_v2  ;;  %v1598_v36 = vpack.c.bf16 %v1590_v58, %v1590_v58  ;;  %v1599_v63 = vpack.c.bf16 %v1591_v38, %v1591_v38  ;;  %v1600_v25 = vpack.c.bf16 %v1592_v55, %v1592_v55 }
 0x134   : > { %v1601_v26 = vpack.c.bf16 %v1593_v52, %v1593_v52  ;;  %v1212_v56 = vadd.f32 %v3868_v51, %v1210_v14  ;;  %v1297_v49 = vadd.f32 %v4007_v23, %v1295_v22  ;;  %v1602_v44 = vpack.c.bf16 %v1594_v50, %v1594_v50 }
 0x135   : > { %v1603_v34 = vpack.c.bf16 %v1595_v33, %v1595_v33  ;;  %v1604_v9 = vpack.c.bf16 %v1596_v0, %v1596_v0  ;;  %v1605_v15 = vpack.c.bf16 %v1597_v21, %v1597_v21  ;;  %v1606_v28 = vunpack.c.l.bf16 %v1598_v36  ;;  %1615 = vst.msk [vmem:[%s4123_s19] sm:$0xf] %vm1614_vm3, %v1598_v36  ;;  %1616 = vst.msk [vmem:[%s4123_s19 + $0x4] sm:$0xf] %vm1614_vm3, %v1599_v63 }
 0x136   : > { %v1607_v10 = vunpack.c.l.bf16 %v1599_v63  ;;  %1617 = vst.msk [vmem:[%s4123_s19 + $0x8] sm:$0xf] %vm1614_vm3, %v1600_v25  ;;  %1618 = vst.msk [vmem:[%s4123_s19 + $0xc] sm:$0xf] %vm1614_vm3, %v1601_v26  ;;  %v1214_v51 = vadd.f32 %v3872_v3, %v1212_v56  ;;  %v1252_v23 = vmul.f32 %v3762_v17, %v3762_v17  ;;  %v1299_v4 = vadd.f32 %v4010_v62, %v1297_v49  ;;  %v4839_v17 = vld [vmem:[#allocation41_spill] sm:$0xff] }
 0x137   : > { %v1608_v8 = vunpack.c.l.bf16 %v1600_v25  ;;  %1619 = vst.msk [vmem:[%s4123_s19 + $0x10] sm:$0xf] %vm1614_vm3, %v1602_v44  ;;  %1620 = vst.msk [vmem:[%s4123_s19 + $0x14] sm:$0xf] %vm1614_vm3, %v1603_v34  ;;  %v1219_v20 = vsel %vm1157_vm2, %v3754_v32, 0.0  ;;  %v1302_v19 = vsel %vm1157_vm2, %v3926_v41, 0.0  ;;  %v1609_v40 = vunpack.c.l.bf16 %v1601_v26 }
 0x138   : > { %v1610_v47 = vunpack.c.l.bf16 %v1602_v44  ;;  %1621 = vst.msk [vmem:[%s4123_s19 + $0x18] sm:$0xf] %vm1614_vm3, %v1604_v9  ;;  %1622 = vst.msk [vmem:[%s4123_s19 + $0x1c] sm:$0xf] %vm1614_vm3, %v1605_v15  ;;  %v1216_v3 = vadd.f32 %v4839_v17, %v1214_v51  ;;  %v1301_v62 = vadd.f32 %v4020_v57, %v1299_v4  ;;  %v1624_v54 = vsel %vm1623_vm4, %v1606_v28, 0.0 }
 0x139   : > { %v1625_v46 = vsel %vm1623_vm4, %v1607_v10, 0.0  ;;  %v1304_v32 = vsel %vm1157_vm2, %v3930_v43, 0.0  ;;  %v1611_v37 = vunpack.c.l.bf16 %v1603_v34  ;;  %v1627_v41 = vsel %vm1623_vm4, %v1608_v8, 0.0 }
 0x13a   : > { %v1626_v11 = vadd.f32 %v1625_v46, %v1624_v54  ;;  %v1218_v61 = vadd.f32 %v4840_v12, %v1216_v3  ;;  %v1303_v29 = vadd.f32 %v1302_v19, %v1301_v62  ;;  %v1306_v42 = vsel %vm1157_vm2, %v1252_v23, 0.0  ;;  %v4842_v46 = vld [vmem:[#allocation54_spill] sm:$0xff] }
 0x13b   : > { %v1612_v1 = vunpack.c.l.bf16 %v1604_v9  ;;  %v1629_v57 = vsel %vm1623_vm4, %v1609_v40, 0.0  ;;  %v1647_v59 = vmul.f32 %v1606_v28, %v1606_v28  ;;  %v1648_v39 = vmul.f32 %v1607_v10, %v1607_v10 }
 0x13c   : > { %v1628_v30 = vadd.f32 %v1627_v41, %v1626_v11  ;;  %v1220_v2 = vadd.f32 %v1219_v20, %v1218_v61  ;;  %v1305_v48 = vadd.f32 %v1304_v32, %v1303_v29  ;;  %v1631_v60 = vsel %vm1623_vm4, %v1610_v47, 0.0  ;;  %v4843_v41 = vld [vmem:[#allocation106_spill] sm:$0xff] }
 0x13d   : > { %v1649_v43 = vmul.f32 %v1608_v8, %v1608_v8  ;;  %v1613_v45 = vunpack.c.l.bf16 %v1605_v15  ;;  %v1633_v35 = vsel %vm1623_vm4, %v1611_v37, 0.0  ;;  %v1650_v53 = vmul.f32 %v1609_v40, %v1609_v40 }
 0x13e   : > { %v1630_v13 = vadd.f32 %v1629_v57, %v1628_v30  ;;  %v1221_v18 = vrot.slane %v1220_v2, 4  ;;  %v1307_v5 = vadd.f32 %v1306_v42, %v1305_v48  ;;  %v1655_v58 = vsel %vm1623_vm4, %v1647_v59, 0.0 }
 0x13f   : > { %v1651_v38 = vmul.f32 %v1610_v47, %v1610_v47  ;;  %v1656_v55 = vsel %vm1623_vm4, %v1648_v39, 0.0  ;;  %v1658_v52 = vsel %vm1623_vm4, %v1649_v43, 0.0  ;;  %v1635_v14 = vsel %vm1623_vm4, %v1612_v1, 0.0 }
 0x140   : > { %v1632_v16 = vadd.f32 %v1631_v60, %v1630_v13  ;;  %v1222_v50 = vadd.f32 %v1221_v18, %v1220_v2  ;;  %v1309_v33 = vadd.f32 %v3988_v7, %v1307_v5  ;;  %v1657_v22 = vadd.f32 %v1656_v55, %v1655_v58 }
 0x141   : > { %v1652_v21 = vmul.f32 %v1611_v37, %v1611_v37  ;;  %v1637_v25 = vsel %vm1623_vm4, %v1613_v45, 0.0  ;;  %v1653_v49 = vmul.f32 %v1612_v1, %v1612_v1  ;;  %v1660_v44 = vsel %vm1623_vm4, %v1650_v53, 0.0 }
 0x142   : > { %v1634_v0 = vadd.f32 %v1633_v35, %v1632_v16  ;;  %v1223_v36 = vrot.slane %v1222_v50, 2  ;;  %v1311_v63 = vadd.f32 %v3991_v27, %v1309_v33  ;;  %v1659_v26 = vadd.f32 %v1658_v52, %v1657_v22 }
 0x143   : > { %v1662_v34 = vsel %vm1623_vm4, %v1651_v38, 0.0  ;;  %v1654_v10 = vmul.f32 %v1613_v45, %v1613_v45  ;;  %v1664_v51 = vsel %vm1623_vm4, %v1652_v21, 0.0 }
 0x144   : > { %v1636_v56 = vadd.f32 %v1635_v14, %v1634_v0  ;;  %v1224_v9 = vadd.f32 %v1223_v36, %v1222_v50  ;;  %v1313_v7 = vadd.f32 %v3994_v6, %v1311_v63  ;;  %v1661_v15 = vadd.f32 %v1660_v44, %v1659_v26 }
 0x145   : > { %v1666_v6 = vsel %vm1623_vm4, %v1653_v49, 0.0  ;;  %v1668_v17 = vsel %vm1623_vm4, %v1654_v10, 0.0 }
 0x146   : > { %v1638_v28 = vadd.f32 %v1637_v25, %v1636_v56  ;;  %v1225_v23 = vrot.slane %v1224_v9, 1  ;;  %v1315_v27 = vadd.f32 %v3997_v24, %v1313_v7  ;;  %v1663_v4 = vadd.f32 %v1662_v34, %v1661_v15  ;;  %v4841_v24 = vld [vmem:[#allocation93_spill] sm:$0xff] }
 0x148   : > { %v1639_v8 = vrot.slane %v1638_v28, 4  ;;  %v1226_v20 = vadd.f32 %v1225_v23, %v1224_v9  ;;  %v1317_v19 = vadd.f32 %v4001_v31, %v1315_v27  ;;  %v1665_v40 = vadd.f32 %v1664_v51, %v1663_v4 }
 0x14a   : > { %v1640_v47 = vadd.f32 %v1639_v8, %v1638_v28  ;;  %1228 = vst.msk [vmem:[%s4183_s14] sm:$0x1] %vm1227_vm5, %v1226_v20  ;;  %v1319_v3 = vadd.f32 %v4841_v24, %v1317_v19  ;;  %v1667_v62 = vadd.f32 %v1666_v6, %v1665_v40 }
 0x14c   : > { %v1641_v54 = vrot.slane %v1640_v47, 2  ;;  %v1321_v32 = vadd.f32 %v4842_v46, %v1319_v3  ;;  %v1669_v37 = vadd.f32 %v1668_v17, %v1667_v62 }
 0x14e   : > { %v1642_v11 = vadd.f32 %v1641_v54, %v1640_v47  ;;  %v1323_v12 = vadd.f32 %v4843_v41, %v1321_v32  ;;  %v1670_v61 = vrot.slane %v1669_v37, 4 }
 0x150   : > { %v1643_v29 = vrot.slane %v1642_v11, 1  ;;  %v1324_v31 = vrot.slane %v1323_v12, 4  ;;  %v1671_v42 = vadd.f32 %v1670_v61, %v1669_v37 }
 0x152   : > { %v1644_v1 = vadd.f32 %v1643_v29, %v1642_v11  ;;  %v1325_v30 = vadd.f32 %v1324_v31, %v1323_v12  ;;  %v1672_v57 = vrot.slane %v1671_v42, 2 }
 0x154   : > { %1646 = vst.msk [vmem:[%s292_s16] sm:$0x1] %vm1645_vm6, %v1644_v1  ;;  %v1326_v59 = vrot.slane %v1325_v30, 2  ;;  %v1673_v39 = vadd.f32 %v1672_v57, %v1671_v42 }
 0x156   : > { %v1327_v2 = vadd.f32 %v1326_v59, %v1325_v30  ;;  %v1674_v48 = vrot.slane %v1673_v39, 1 }
 0x158   : > { %v1328_v60 = vrot.slane %v1327_v2, 1  ;;  %v1675_v43 = vadd.f32 %v1674_v48, %v1673_v39 }
 0x15a   : > { %v1329_v45 = vadd.f32 %v1328_v60, %v1327_v2  ;;  %1676 = vst.msk [vmem:[%s292_s16 + $0x1] sm:$0x1] %vm1645_vm6, %v1675_v43 }
 0x15c   : > { %1330 = vst.msk [vmem:[%s4183_s14 + $0x1] sm:$0x1] %vm1227_vm5, %v1329_v45 }
 0x15d PF: > { %p17_p9 = scmp.ge.s32.totalorder %s2102_s26, 4   ;;  %s4844_s21 = smov %s2031_s22 }
 0x15e   : > { %s4845_s22 = smov %s2035_s23  ;;  %s4846_s23 = smov %s2112_s29 }
 0x15f   : > { %s4847_s24 = smov %s2102_s26  ;;  %19 = sbr.rel (!%p17_p9) target bundleno = 3 (0x3), region = 131 }
 0x164   :  { %1726 = vsyncpa [#allocation3], 1 }
 0x165   :  { %1728 = vsyncpa [#allocation3 + $0x1], 1 }

// kernel: hssm_forward.4
= control target key start
LH: loop header
LB: loop body
LE: loop exit
PB: predicated region body
PF: predicated region fallthrough
CT: control target
= control target key end

     0   :  { %s3143_s21 = smov 0   ;;  %s4700_s0 = inlined_call_operand.vmem [shape: f32[2,16,16,32], index: 0, kind: input, shape index: {}]   ;;  %s4701_s1 = inlined_call_operand.vmem [shape: f32[3,3,32], index: 1, kind: input, shape index: {}]   ;;  %s4702_s2 = inlined_call_operand.vmem [shape: bf16[2,8,8,64], index: 2, kind: input, shape index: {}]   ;;  %s4703_s3 = inlined_call_operand.vmem [shape: f32[1,32], index: 3, kind: input, shape index: {}]   ;;  %s4704_s4 = inlined_call_operand.vmem [shape: f32[1,32], index: 4, kind: input, shape index: {}]   ;;  %s4705_s5 = inlined_call_operand.vmem [shape: f32[1,32], index: 5, kind: input, shape index: {}]   ;;  %s4706_s6 = inlined_call_operand.vmem [shape: f32[1,64], index: 6, kind: input, shape index: {}]   ;;  %s4707_s7 = inlined_call_operand.vmem [shape: f32[1,64], index: 7, kind: input, shape index: {}]   ;;  %s4708_s8 = inlined_call_operand.vmem [shape: f32[1,64], index: 8, kind: input, shape index: {}]   ;;  %s4709_s9 = inlined_call_operand.vmem [shape: bf16[32,8], index: 9, kind: input, shape index: {}]   ;;  %s4710_s10 = inlined_call_operand.vmem [shape: bf16[64,40], index: 10, kind: input, shape index: {}]   ;;  %s4711_s11 = inlined_call_operand.vmem [shape: bf16[2,8,256], index: 11, kind: output, shape index: {0}]   ;;  %s4712_s12 = inlined_call_operand.vmem [shape: bf16[2,8,64], index: 12, kind: output, shape index: {1}]   ;;  %s4713_s13 = inlined_call_operand.vmem [shape: bf16[2,64,32], index: 13, kind: output, shape index: {2}]   ;;  %s4714_s14 = inlined_call_operand.vmem [shape: f32[2,2,8], index: 14, kind: output, shape index: {3}]   ;;  %s4715_s15 = inlined_call_operand.vmem [shape: f32[2,2,8], index: 15, kind: output, shape index: {4}]   ;;  %s4716_s16 = inlined_call_operand.vmem [shape: f32[2,2,32], index: 16, kind: output, shape index: {5}]  }
   0x1   :  { %4744 = sst [smem:[#allocation22_spill]] %s4700_s0 }
   0x2 LB: > { %s2815_s22 = sadd.s32 4294967295, %s3055_s21   ;;  %p2819_p0 = scmp.ge.s32.totalorder %s3055_s21, 1  ;;  %s3055_s21 = sphi %s3143_s21, %s27_s21  }
   0x3   : > { %p483_p1 = scmp.lt.s32.totalorder %s3055_s21, 3 }
   0x5   : > { %p484_p2 = pnand %p2819_p0, %p483_p1 }
   0x7   : > { %487 = sbr.rel (%p484_p2) target bundleno = 682 (0x2aa), region = 64 }
   0xc   : > { %v3036_v0 = vld [vmem:[%s4709_s9 + $0x8] sm:$0xff]   ;;  %p559_p3 = scmp.lt.s32.totalorder %s2815_s22, 1  ;;  %v857_v1 = vlaneseq  ;;  %v3037_v2 = vld [vmem:[%s4709_s9] sm:$0xff]   ;;  %v3166_v5 = vld [vmem:[%s4710_s10 + $0x18] sm:$0xff]   ;;  %s4745_s19 = sld [smem:[#allocation22_spill]]  ;;  %vm663_vm0 = vcmask 1040384  }
   0xd   : > { %2933 = vmatprep.subr.bf16.mxu0 %v3036_v0  ;;  %2985 = vmatprep.subr.bf16.mxu1 %v3036_v0  ;;  %v628_v4 = vld [vmem:[%s4701_s1] sm:$0x7]  ;;  %vm760_vm1 = vcmask 1046528   ;;  %v629_v26 = vld [vmem:[%s4701_s1 + $0x4] sm:$0x7]  ;;  %vm1750_vm2 = vcmask 261120  }
   0xe   : > { %s4796_s22 = smov (!%p559_p3, %s2815_s22), 1  ;;  %2934 = vmatpush3.bf16.msra.mxu0 %v3036_v0  ;;  %2987 = vmatpush3.bf16.msra.mxu1 %v3036_v0  ;;  %v858_v3 = vshrl.u32 %v857_v1, 7  ;;  %v630_v31 = vld [vmem:[%s4701_s1 + $0x8] sm:$0x7] }
   0xf   : > { %2935 = vmatprep.subr.bf16.mxu0 %v3037_v2  ;;  %2986 = vmatprep.subr.bf16.mxu1 %v3037_v2  ;;  %s2875_s27 = sshll.u32 %s4796_s22, 8  ;;  %s2876_s18 = sshll.u32 %s4796_s22, 5 }
  0x10   : > { %v859_v6 = vsub.s32 0, %v858_v3  ;;  %v925_v10 = vsub.s32 1, %v858_v3  ;;  %v991_v25 = vsub.s32 2, %v858_v3  ;;  %s4108_s24 = scalar_lea.vmem %s4702_s2, %s2876_s18  ;;  %s4341_s17 = scalar_lea.vmem %s4713_s13, %s2876_s18 }
  0x11   : > { %s3057_s18 = smov 96   ;;  %s2877_s29 = sshll.u32 %s4796_s22, 3 }
  0x12   : > { %s3171_s20 = scalar_lea.vmem %s4745_s19, %s2875_s27  ;;  %2936 = vmatpush3.bf16.msra.mxu0 %v3037_v2  ;;  %2988 = vmatpush3.bf16.msra.mxu1 %v3037_v2  ;;  %v3194_v17 = vrot.slane %v628_v4, %v859_v6  ;;  %v3247_v45 = vrot.slane %v628_v4, %v925_v10  ;;  %v3249_v46 = vrot.slane %v628_v4, %v991_v25  ;;  %s4610_s19 = sshll.u32 %s4796_s22, 1 }
  0x13   : > { %v3174_v7 = vld [vmem:[%s3171_s20] sm:$0xff]  ;;  %v3177_v8 = vld [vmem:[%s3171_s20 + $0x8] sm:$0xff]  ;;  %v3180_v9 = vld [vmem:[%s3171_s20 + $0x10] sm:$0xff]  ;;  %2969 = vmatprep.subr.bf16.mxu1 %v3166_v5  ;;  %v3251_v47 = vrot.slane %v629_v26, %v859_v6  ;;  %v3253_v48 = vrot.slane %v629_v26, %v925_v10  ;;  %v3255_v49 = vrot.slane %v629_v26, %v991_v25  ;;  %v3257_v50 = vrot.slane %v630_v31, %v859_v6  ;;  %s594_s25 = scalar_lea.vmem %s4716_s16, %s4610_s19  ;;  %s586_s28 = scalar_lea.vmem %s4714_s14, %s4610_s19 }
  0x14   : > { %v3183_v11 = vld [vmem:[%s3171_s20 + $0x18] sm:$0xff]  ;;  %v3186_v12 = vld [vmem:[%s3171_s20 + $0x20] sm:$0xff]  ;;  %v3189_v13 = vld [vmem:[%s3171_s20 + $0x28] sm:$0xff]  ;;  %v664_v14 = vrot.slane %v3174_v7, 7  ;;  %v665_v15 = vrot.slane %v3177_v8, 7  ;;  %v667_v16 = vrot.slane %v3180_v9, 7  ;;  %v3259_v51 = vrot.slane %v630_v31, %v925_v10  ;;  %s573_s0 = scalar_lea.vmem %s4711_s11, %s2877_s29  ;;  %s590_s23 = scalar_lea.vmem %s4715_s15, %s4610_s19 }
  0x15   : > { %v668_v18 = vrot.slane %v3183_v11, 7  ;;  %v670_v19 = vrot.slane %v3186_v12, 7  ;;  %v671_v20 = vrot.slane %v3189_v13, 7  ;;  %v761_v21 = vrot.slane %v3174_v7, 1 }
  0x16   : > { %v666_v22 = vsel %vm663_vm0, %v664_v14, %v665_v15  ;;  %v744_v23 = vsel %vm663_vm0, 0.0, %v664_v14  ;;  %v762_v24 = vrot.slane %v3177_v8, 1  ;;  %v3211_v28 = vsel %vm663_vm0, 0.0, %v667_v16 }
  0x17   : > { %v3208_v27 = vsel %vm663_vm0, %v667_v16, %v668_v18  ;;  %v3214_v29 = vsel %vm663_vm0, 0.0, %v670_v19  ;;  %v764_v30 = vrot.slane %v3180_v9, 1  ;;  %v3221_v32 = vsel %vm663_vm0, %v670_v19, %v671_v20 }
  0x18   : > { %v763_v33 = vsel %vm760_vm1, %v761_v21, %v762_v24  ;;  %v765_v34 = vrot.slane %v3183_v11, 1  ;;  %v841_v35 = vsel %vm760_vm1, %v762_v24, 0.0  ;;  %v861_v36 = vmul.f32 0.0, %v3194_v17 }
  0x19   : > { %v862_v37 = vmul.f32 %v3194_v17, %v744_v23  ;;  %v863_v38 = vmul.f32 %v3194_v17, %v666_v22  ;;  %v864_v39 = vmul.f32 %v3194_v17, %v3211_v28  ;;  %v865_v42 = vmul.f32 %v3194_v17, %v3208_v27 }
  0x1a   : > { %v3232_v40 = vsel %vm760_vm1, %v764_v30, %v765_v34  ;;  %v3235_v41 = vsel %vm760_vm1, %v765_v34, 0.0  ;;  %v3241_v43 = vmul.f32 %v3194_v17, %v3214_v29  ;;  %v3245_v44 = vmul.f32 %v3194_v17, %v3221_v32 }
  0x1b   : > { %v927_v52 = vmul.f32 0.0, %v3247_v45  ;;  %v928_v53 = vmul.f32 %v3247_v45, %v3174_v7  ;;  %v929_v54 = vmul.f32 %v3247_v45, %v3177_v8  ;;  %v930_v55 = vmul.f32 %v3247_v45, %v3180_v9 }
  0x1c   : > { %v931_v56 = vmul.f32 %v3247_v45, %v3183_v11  ;;  %v993_v57 = vmul.f32 0.0, %v3249_v46  ;;  %v994_v58 = vmul.f32 %v3249_v46, %v763_v33  ;;  %v995_v59 = vmul.f32 %v3249_v46, %v841_v35 }
  0x1d   : > { %v958_v60 = vadd.f32 %v927_v52, %v861_v36  ;;  %v959_v61 = vadd.f32 %v928_v53, %v862_v37  ;;  %v960_v62 = vadd.f32 %v929_v54, %v863_v38  ;;  %v961_v63 = vadd.f32 %v930_v55, %v864_v39 }
  0x1e   : > { %v962_v0 = vadd.f32 %v931_v56, %v865_v42  ;;  %v996_v1 = vmul.f32 %v3249_v46, %v3232_v40  ;;  %v997_v2 = vmul.f32 %v3249_v46, %v3235_v41  ;;  %v1059_v3 = vmul.f32 %v3251_v47, %v744_v23 }
  0x1f   : > { %v1024_v4 = vadd.f32 %v993_v57, %v958_v60  ;;  %v1025_v6 = vadd.f32 %v994_v58, %v959_v61  ;;  %v1026_v10 = vadd.f32 %v995_v59, %v960_v62  ;;  %v1060_v14 = vmul.f32 %v3251_v47, %v666_v22 }
  0x20   : > { %v1027_v15 = vadd.f32 %v996_v1, %v961_v63  ;;  %v1028_v16 = vadd.f32 %v997_v2, %v962_v0  ;;  %v1061_v18 = vmul.f32 %v3251_v47, %v3211_v28  ;;  %v1062_v19 = vmul.f32 %v3251_v47, %v3208_v27 }
  0x21   : > { %v1063_v20 = vmul.f32 %v3251_v47, %v3214_v29  ;;  %v1064_v21 = vmul.f32 %v3251_v47, %v3221_v32  ;;  %v1091_v23 = vadd.f32 %v1059_v3, %v1024_v4  ;;  %v1092_v24 = vadd.f32 %v1060_v14, %v1024_v4 }
  0x22   : > { %v1093_v26 = vadd.f32 %v1061_v18, %v1025_v6  ;;  %v1094_v30 = vadd.f32 %v1062_v19, %v1026_v10  ;;  %v1127_v22 = vmul.f32 %v3253_v48, %v3174_v7  ;;  %v1128_v34 = vmul.f32 %v3253_v48, %v3177_v8 }
  0x23   : > { %v1095_v36 = vadd.f32 %v1063_v20, %v1027_v15  ;;  %v1129_v37 = vmul.f32 %v3253_v48, %v3180_v9  ;;  %v1130_v38 = vmul.f32 %v3253_v48, %v3183_v11  ;;  %v3295_v39 = vrot.slane %v630_v31, %v991_v25  ;;  %v3336_v15 = vld [vmem:[%s4703_s3] ss:$0 sm:$0xff] }
  0x24   : > { %v1096_v42 = vadd.f32 %v1064_v21, %v1028_v16  ;;  %v1131_v52 = vmul.f32 %v3253_v48, %v3186_v12  ;;  %v1159_v53 = vadd.f32 %v1127_v22, %v1091_v23  ;;  %v1160_v54 = vadd.f32 %v1128_v34, %v1092_v24  ;;  %v3346_v23 = vld [vmem:[%s4704_s4] ss:$0 sm:$0xff]  ;;  %v3353_v22 = vld [vmem:[%s3171_s20 + $0x90] sm:$0xff]  ;;  %v3356_v34 = vld [vmem:[%s3171_s20 + $0x98] sm:$0xff] }
  0x25   : > { %v1161_v55 = vadd.f32 %v1129_v37, %v1093_v26  ;;  %v1162_v7 = vadd.f32 %v1130_v38, %v1094_v30  ;;  %v1195_v56 = vmul.f32 %v3255_v49, %v763_v33  ;;  %v1196_v8 = vmul.f32 %v3255_v49, %v841_v35 }
  0x26   : > { %v1132_v57 = vmul.f32 %v3253_v48, %v3189_v13  ;;  %v3303_v58 = vadd.f32 %v1131_v52, %v1095_v36  ;;  %v1197_v25 = vmul.f32 %v3255_v49, %v3232_v40  ;;  %v1198_v31 = vmul.f32 %v3255_v49, %v3235_v41  ;;  %v3369_v52 = vld [vmem:[%s3171_s20 + $0xa8] sm:$0xff] }
  0x27   : > { %v1227_v59 = vadd.f32 %v1195_v56, %v1159_v53  ;;  %v1228_v60 = vadd.f32 %v1196_v8, %v1160_v54  ;;  %v1263_v61 = vmul.f32 %v3257_v50, %v3211_v28  ;;  %v1264_v33 = vmul.f32 %v3257_v50, %v3208_v27  ;;  %v3374_v53 = vld [vmem:[%s4705_s5] ss:$0 sm:$0xff] }
  0x28   : > { %v1229_v35 = vadd.f32 %v1197_v25, %v1161_v55  ;;  %v1230_v62 = vadd.f32 %v1198_v31, %v1162_v7  ;;  %v1330_v63 = vmul.f32 %v3259_v51, %v3180_v9  ;;  %v1331_v0 = vmul.f32 %v3259_v51, %v3183_v11 }
  0x29   : > { %v1294_v1 = vadd.f32 %v1263_v61, %v1227_v59  ;;  %v1295_v2 = vadd.f32 %v1264_v33, %v1228_v60  ;;  %v1397_v3 = vmul.f32 %v3295_v39, %v3232_v40  ;;  %v1398_v4 = vmul.f32 %v3295_v39, %v3235_v41  ;;  %v3390_v61 = vld [vmem:[%s3171_s20 + $0xb8] sm:$0xff] }
  0x2a   : > { %v767_v28 = vrot.slane %v3186_v12, 1  ;;  %v768_v27 = vrot.slane %v3189_v13, 1  ;;  %v932_v6 = vmul.f32 %v3247_v45, %v3186_v12  ;;  %v933_v9 = vmul.f32 %v3247_v45, %v3189_v13 }
  0x2b   : > { %v1361_v10 = vadd.f32 %v1330_v63, %v1294_v1  ;;  %v1362_v11 = vadd.f32 %v1331_v0, %v1295_v2  ;;  %v1265_v14 = vmul.f32 %v3257_v50, %v3214_v29  ;;  %v1266_v40 = vmul.f32 %v3257_v50, %v3221_v32  ;;  %v3397_v63 = vld [vmem:[%s3171_s20 + $0xc0] sm:$0xff] }
  0x2c   : > { %v3331_v41 = vadd.f32 %v1132_v57, %v1096_v42  ;;  %v769_v16 = vsel %vm760_vm1, %v767_v28, %v768_v27  ;;  %v843_v18 = vsel %vm760_vm1, %v768_v27, 0.0  ;;  %v963_v19 = vadd.f32 %v932_v6, %v3241_v43  ;;  %v3366_v42 = vld [vmem:[%s3171_s20 + $0xa0] sm:$0xff] }
  0x2d   : > { %v1428_v20 = vadd.f32 %v1397_v3, %v1361_v10  ;;  %v1429_v29 = vadd.f32 %v1398_v4, %v1362_v11  ;;  %v964_v32 = vadd.f32 %v933_v9, %v3245_v44  ;;  %v998_v21 = vmul.f32 %v3249_v46, %v769_v16  ;;  %v3402_v3 = vld [vmem:[%s3171_s20 + $0xc8] sm:$0xff] }
  0x2e   : > { %v999_v24 = vmul.f32 %v3249_v46, %v843_v18  ;;  %v3350_v26 = vmul.f32 %v3255_v49, %v769_v16  ;;  %v1296_v43 = vadd.f32 %v1265_v14, %v1229_v35  ;;  %v1297_v30 = vadd.f32 %v1266_v40, %v1230_v62 }
  0x2f   : > { %v1469_v44 = vmul.f32 %v3336_v15, %v1428_v20  ;;  %v1470_v36 = vmul.f32 %v3336_v15, %v1429_v29  ;;  %v3360_v37 = vadd.f32 %v998_v21, %v963_v19  ;;  %v3363_v38 = vmul.f32 %v3255_v49, %v843_v18 }
  0x30   : > { %v1332_v54 = vmul.f32 %v3259_v51, %v3186_v12  ;;  %v1333_v55 = vmul.f32 %v3259_v51, %v3189_v13  ;;  %v1399_v7 = vmul.f32 %v3295_v39, %v769_v16  ;;  %v1400_v56 = vmul.f32 %v3295_v39, %v843_v18  ;;  %v3387_v12 = vld [vmem:[%s3171_s20 + $0xb0] sm:$0xff] }
  0x31   : > { %v1507_v8 = vadd.f32 %v3346_v23, %v1469_v44  ;;  %v1508_v57 = vadd.f32 %v3346_v23, %v1470_v36  ;;  %v691_v25 = vrot.slane %v3353_v22, 7  ;;  %v692_v31 = vrot.slane %v3356_v34, 7 }
  0x32   : > { %v1363_v59 = vadd.f32 %v1332_v54, %v1296_v43  ;;  %v1364_v60 = vadd.f32 %v1333_v55, %v1297_v30  ;;  %v694_v13 = vrot.slane %v3366_v42, 7  ;;  %v695_v33 = vrot.slane %v3369_v52, 7 }
  0x33   : > { %vm1539_vm3 = vcmp.ge.f32.partialorder %v1507_v8, 0.0  ;;  %vm1540_vm4 = vcmp.ge.f32.partialorder %v1508_v57, 0.0  ;;  %v1577_v35 = vmul.f32 %v3374_v53, %v1507_v8  ;;  %v1578_v62 = vmul.f32 %v3374_v53, %v1508_v57 }
  0x34   : > { %v3399_v0 = vadd.f32 %v999_v24, %v964_v32  ;;  %v1430_v1 = vadd.f32 %v1399_v7, %v1363_v59  ;;  %v1431_v2 = vadd.f32 %v1400_v56, %v1364_v60  ;;  %v3405_v4 = vsel %vm663_vm0, %v691_v25, %v692_v31 }
  0x35   : > { %v1609_v28 = vsel %vm1539_vm3, %v1507_v8, %v1577_v35  ;;  %v1610_v27 = vsel %vm1540_vm4, %v1508_v57, %v1578_v62  ;;  %v697_v6 = vrot.slane %v3387_v12, 7  ;;  %v698_v9 = vrot.slane %v3390_v61, 7 }
  0x36   : > { %v1718_v10 = vpack.c.bf16 %v1610_v27, %v1609_v28  ;;  %v1471_v11 = vmul.f32 %v3336_v15, %v1430_v1  ;;  %v1472_v14 = vmul.f32 %v3336_v15, %v1431_v2  ;;  %v700_v40 = vrot.slane %v3397_v63, 7 }
  0x37   : > { %v3413_v16 = vsel %vm663_vm0, %v694_v13, %v695_v33  ;;  %v3416_v18 = vsel %vm663_vm0, %v697_v6, %v698_v9  ;;  %v701_v19 = vrot.slane %v3402_v3, 7  ;;  %v3420_v20 = vsel %vm663_vm0, 0.0, %v691_v25 }
  0x38   : > { %2937 = vmatprep.mubr.msk.bf16.mxu0 %vm1750_vm2, %v1718_v10  ;;  %v1509_v29 = vadd.f32 %v3346_v23, %v1471_v11  ;;  %v1510_v32 = vadd.f32 %v3346_v23, %v1472_v14  ;;  %v3426_v21 = vsel %vm663_vm0, 0.0, %v694_v13  ;;  %v3429_v24 = vsel %vm663_vm0, 0.0, %v697_v6 }
  0x39   : > { %v3432_v43 = vsel %vm663_vm0, 0.0, %v700_v40  ;;  %v788_v30 = vrot.slane %v3353_v22, 1  ;;  %v789_v44 = vrot.slane %v3356_v34, 1  ;;  %v791_v36 = vrot.slane %v3366_v42, 1 }
  0x3a   : > { %vm1541_vm5 = vcmp.ge.f32.partialorder %v1509_v29, 0.0  ;;  %vm1542_vm6 = vcmp.ge.f32.partialorder %v1510_v32, 0.0  ;;  %v1579_v54 = vmul.f32 %v3374_v53, %v1509_v29  ;;  %v1580_v55 = vmul.f32 %v3374_v53, %v1510_v32 }
  0x3b   : > { %v3440_v7 = vsel %vm663_vm0, %v700_v40, %v701_v19  ;;  %v792_v56 = vrot.slane %v3369_v52, 1  ;;  %v794_v8 = vrot.slane %v3387_v12, 1  ;;  %v795_v57 = vrot.slane %v3390_v61, 1 }
  0x3c   : > { %v1611_v25 = vsel %vm1541_vm5, %v1509_v29, %v1579_v54  ;;  %v1612_v31 = vsel %vm1542_vm6, %v1510_v32, %v1580_v55  ;;  %v3446_v59 = vsel %vm760_vm1, %v788_v30, %v789_v44  ;;  %v3449_v60 = vsel %vm760_vm1, %v789_v44, 0.0 }
  0x3d   : > { %4746 = vst [vmem:[#allocation2_spill] sm:$0xff] %v3446_v59  ;;  %4747 = vst [vmem:[#allocation3_spill] sm:$0xff] %v3449_v60  ;;  %v1719_v13 = vpack.c.bf16 %v1612_v31, %v1611_v25  ;;  %v3452_v33 = vsel %vm760_vm1, %v791_v36, %v792_v56  ;;  %v3455_v35 = vsel %vm760_vm1, %v794_v8, %v795_v57  ;;  %v3460_v1 = vsel %vm760_vm1, %v792_v56, 0.0 }
  0x3e   : > { %v880_v62 = vmul.f32 %v3194_v17, %v3420_v20  ;;  %4748 = vst [vmem:[#allocation4_spill] sm:$0xff] %v3460_v1  ;;  %v881_v2 = vmul.f32 %v3194_v17, %v3405_v4  ;;  %v882_v28 = vmul.f32 %v3194_v17, %v3426_v21  ;;  %v883_v27 = vmul.f32 %v3194_v17, %v3413_v16 }
  0x3f   : > { %2938 = vmatmul.mubr.msk.bf16.vlgmr.msra.gmra.mxu0 %vm1750_vm2, %v1719_v13  ;;  %v3470_v6 = vsel %vm760_vm1, %v795_v57, 0.0  ;;  %v884_v9 = vmul.f32 %v3194_v17, %v3429_v24  ;;  %v885_v10 = vmul.f32 %v3194_v17, %v3416_v18  ;;  %v3478_v11 = vmul.f32 %v3194_v17, %v3432_v43 }
  0x40   : > { %v946_v14 = vmul.f32 %v3247_v45, %v3353_v22  ;;  %v947_v40 = vmul.f32 %v3247_v45, %v3356_v34  ;;  %v948_v19 = vmul.f32 %v3247_v45, %v3366_v42  ;;  %v949_v29 = vmul.f32 %v3247_v45, %v3369_v52 }
  0x41   : > { %v950_v32 = vmul.f32 %v3247_v45, %v3387_v12  ;;  %v951_v30 = vmul.f32 %v3247_v45, %v3390_v61  ;;  %v1012_v44 = vmul.f32 %v3249_v46, %v3446_v59  ;;  %v1013_v22 = vmul.f32 %v3249_v46, %v3449_v60 }
  0x42   : > { %v977_v36 = vadd.f32 %v946_v14, %v880_v62  ;;  %v978_v34 = vadd.f32 %v947_v40, %v881_v2  ;;  %v979_v54 = vadd.f32 %v948_v19, %v882_v28  ;;  %v980_v55 = vadd.f32 %v949_v29, %v883_v27 }
  0x43   : > { %v981_v56 = vadd.f32 %v950_v32, %v884_v9  ;;  %v982_v8 = vadd.f32 %v951_v30, %v885_v10  ;;  %v1014_v57 = vmul.f32 %v3249_v46, %v3452_v33  ;;  %v1015_v25 = vmul.f32 %v3249_v46, %v3460_v1 }
  0x44   : > { %v1016_v31 = vmul.f32 %v3249_v46, %v3455_v35  ;;  %v1017_v13 = vmul.f32 %v3249_v46, %v3470_v6  ;;  %v1043_v59 = vadd.f32 %v1012_v44, %v977_v36  ;;  %v1044_v60 = vadd.f32 %v1013_v22, %v978_v34 }
  0x45   : > { %v1045_v62 = vadd.f32 %v1014_v57, %v979_v54  ;;  %v1046_v2 = vadd.f32 %v1015_v25, %v980_v55  ;;  %v1079_v28 = vmul.f32 %v3251_v47, %v3426_v21  ;;  %v1080_v27 = vmul.f32 %v3251_v47, %v3413_v16 }
  0x46   : > { %v1047_v9 = vadd.f32 %v1016_v31, %v981_v56  ;;  %v1048_v10 = vadd.f32 %v1017_v13, %v982_v8  ;;  %v1081_v14 = vmul.f32 %v3251_v47, %v3429_v24  ;;  %v1082_v40 = vmul.f32 %v3251_v47, %v3416_v18 }
  0x47   : > { %v1083_v19 = vmul.f32 %v3251_v47, %v3432_v43  ;;  %v1084_v29 = vmul.f32 %v3251_v47, %v3440_v7  ;;  %v1111_v32 = vadd.f32 %v1079_v28, %v1043_v59  ;;  %v1112_v30 = vadd.f32 %v1080_v27, %v1044_v60 }
  0x48   : > { %v1113_v44 = vadd.f32 %v1081_v14, %v1045_v62  ;;  %v1114_v22 = vadd.f32 %v1082_v40, %v1046_v2  ;;  %v1147_v36 = vmul.f32 %v3253_v48, %v3366_v42  ;;  %v1148_v34 = vmul.f32 %v3253_v48, %v3369_v52 }
  0x49   : > { %v887_v54 = vmul.f32 %v3194_v17, %v3440_v7  ;;  %v1115_v55 = vadd.f32 %v1083_v19, %v1047_v9  ;;  %v1149_v56 = vmul.f32 %v3253_v48, %v3387_v12  ;;  %v1150_v8 = vmul.f32 %v3253_v48, %v3390_v61 }
  0x4a   : > { %v1116_v59 = vadd.f32 %v1084_v29, %v1048_v10  ;;  %v1151_v60 = vmul.f32 %v3253_v48, %v3397_v63  ;;  %v1179_v57 = vadd.f32 %v1147_v36, %v1111_v32  ;;  %v1180_v25 = vadd.f32 %v1148_v34, %v1112_v30 }
  0x4b   : > { %v1181_v42 = vadd.f32 %v1149_v56, %v1113_v44  ;;  %v1182_v31 = vadd.f32 %v1150_v8, %v1114_v22  ;;  %v1215_v52 = vmul.f32 %v3255_v49, %v3452_v33  ;;  %v1216_v13 = vmul.f32 %v3255_v49, %v3460_v1 }
  0x4c   : > { %v1152_v62 = vmul.f32 %v3253_v48, %v3402_v3  ;;  %v3534_v2 = vadd.f32 %v1151_v60, %v1115_v55  ;;  %v1217_v28 = vmul.f32 %v3255_v49, %v3455_v35  ;;  %v1218_v27 = vmul.f32 %v3255_v49, %v3470_v6 }
  0x4d   : > { %v1247_v9 = vadd.f32 %v1215_v52, %v1179_v57  ;;  %v1248_v10 = vadd.f32 %v1216_v13, %v1180_v25  ;;  %v1283_v14 = vmul.f32 %v3257_v50, %v3429_v24  ;;  %v1284_v40 = vmul.f32 %v3257_v50, %v3416_v18 }
  0x4e   : > { %v1249_v19 = vadd.f32 %v1217_v28, %v1181_v42  ;;  %v1250_v29 = vadd.f32 %v1218_v27, %v1182_v31  ;;  %v1350_v32 = vmul.f32 %v3259_v51, %v3387_v12  ;;  %v1351_v30 = vmul.f32 %v3259_v51, %v3390_v61 }
  0x4f   : > { %v1314_v44 = vadd.f32 %v1283_v14, %v1247_v9  ;;  %v1315_v22 = vadd.f32 %v1284_v40, %v1248_v10  ;;  %v1417_v36 = vmul.f32 %v3295_v39, %v3455_v35  ;;  %v1418_v34 = vmul.f32 %v3295_v39, %v3470_v6 }
  0x50   : > { %v797_v24 = vrot.slane %v3397_v63, 1  ;;  %v798_v18 = vrot.slane %v3402_v3, 1  ;;  %v952_v55 = vmul.f32 %v3247_v45, %v3397_v63  ;;  %v953_v12 = vmul.f32 %v3247_v45, %v3402_v3 }
  0x51   : > { %v1381_v56 = vadd.f32 %v1350_v32, %v1314_v44  ;;  %v1382_v61 = vadd.f32 %v1351_v30, %v1315_v22  ;;  %v1285_v35 = vmul.f32 %v3257_v50, %v3432_v43  ;;  %v1286_v6 = vmul.f32 %v3257_v50, %v3440_v7 }
  0x52   : > { %v3562_v8 = vadd.f32 %v1152_v62, %v1116_v59  ;;  %v799_v60 = vsel %vm760_vm1, %v797_v24, %v798_v18  ;;  %v853_v57 = vsel %vm760_vm1, %v798_v18, 0.0  ;;  %v983_v25 = vadd.f32 %v952_v55, %v3478_v11  ;;  %v3573_v59 = vld [vmem:[%s3171_s20 + $0x30] sm:$0xff]  ;;  %v3576_v62 = vld [vmem:[%s3171_s20 + $0x38] sm:$0xff] }
  0x53   : > { %v1448_v42 = vadd.f32 %v1417_v36, %v1381_v56  ;;  %v1449_v31 = vadd.f32 %v1418_v34, %v1382_v61  ;;  %v984_v52 = vadd.f32 %v953_v12, %v887_v54  ;;  %v1018_v13 = vmul.f32 %v3249_v46, %v799_v60 }
  0x54   : > { %v1019_v28 = vmul.f32 %v3249_v46, %v853_v57  ;;  %v3570_v43 = vmul.f32 %v3255_v49, %v799_v60  ;;  %v1316_v27 = vadd.f32 %v1285_v35, %v1249_v19  ;;  %v1317_v7 = vadd.f32 %v1286_v6, %v1250_v29 }
  0x55   : > { %v1489_v9 = vmul.f32 %v3336_v15, %v1448_v42  ;;  %v1490_v11 = vmul.f32 %v3336_v15, %v1449_v31  ;;  %v3580_v10 = vadd.f32 %v1018_v13, %v983_v25  ;;  %v3583_v54 = vmul.f32 %v3255_v49, %v853_v57 }
  0x56   : > { %v1352_v14 = vmul.f32 %v3259_v51, %v3397_v63  ;;  %v1353_v40 = vmul.f32 %v3259_v51, %v3402_v3  ;;  %v1419_v19 = vmul.f32 %v3295_v39, %v799_v60  ;;  %v1420_v29 = vmul.f32 %v3295_v39, %v853_v57 }
  0x57   : > { %v1527_v32 = vadd.f32 %v3346_v23, %v1489_v9  ;;  %v1528_v30 = vadd.f32 %v3346_v23, %v1490_v11  ;;  %v673_v44 = vrot.slane %v3573_v59, 7  ;;  %v674_v22 = vrot.slane %v3576_v62, 7 }
  0x58   : > { %v1383_v36 = vadd.f32 %v1352_v14, %v1316_v27  ;;  %v1384_v34 = vadd.f32 %v1353_v40, %v1317_v7  ;;  %v770_v24 = vrot.slane %v3573_v59, 1  ;;  %v771_v63 = vrot.slane %v3576_v62, 1 }
  0x59   : > { %vm1559_vm7 = vcmp.ge.f32.partialorder %v1527_v32, 0.0  ;;  %vm1560_vm8 = vcmp.ge.f32.partialorder %v1528_v30, 0.0  ;;  %v1597_v3 = vmul.f32 %v3374_v53, %v1527_v32  ;;  %v1598_v18 = vmul.f32 %v3374_v53, %v1528_v30 }
  0x5a   : > { %v1450_v55 = vadd.f32 %v1419_v19, %v1383_v36  ;;  %v1451_v12 = vadd.f32 %v1420_v29, %v1384_v34  ;;  %v675_v56 = vsel %vm663_vm0, %v673_v44, %v674_v22  ;;  %v747_v61 = vsel %vm663_vm0, 0.0, %v673_v44 }
  0x5b   : > { %v1629_v35 = vsel %vm1559_vm7, %v1527_v32, %v1597_v3  ;;  %v1630_v6 = vsel %vm1560_vm8, %v1528_v30, %v1598_v18  ;;  %v772_v60 = vsel %vm760_vm1, %v770_v24, %v771_v63  ;;  %v844_v57 = vsel %vm760_vm1, %v771_v63, 0.0  ;;  %v3632_v3 = vld [vmem:[%s3171_s20 + $0x40] sm:$0xff] }
  0x5c   : > { %v1728_v25 = vpack.c.bf16 %v1630_v6, %v1629_v35  ;;  %v1491_v42 = vmul.f32 %v3336_v15, %v1450_v55  ;;  %v1492_v31 = vmul.f32 %v3336_v15, %v1451_v12  ;;  %v868_v13 = vmul.f32 %v3194_v17, %v747_v61  ;;  %v3638_v6 = vld [vmem:[%s3171_s20 + $0x48] sm:$0xff] }
  0x5d   : > { %v869_v27 = vmul.f32 %v3194_v17, %v675_v56  ;;  %v934_v7 = vmul.f32 %v3247_v45, %v3573_v59  ;;  %v935_v9 = vmul.f32 %v3247_v45, %v3576_v62  ;;  %v1000_v11 = vmul.f32 %v3249_v46, %v772_v60 }
  0x5e   : > { %2957 = vmatprep.mubr.msk.bf16.mxu1 %vm1750_vm2, %v1728_v25  ;;  %v3613_v14 = vadd.f32 %v1019_v28, %v984_v52  ;;  %v1529_v40 = vadd.f32 %v3346_v23, %v1491_v42  ;;  %v1530_v19 = vadd.f32 %v3346_v23, %v1492_v31  ;;  %v1001_v29 = vmul.f32 %v3249_v46, %v844_v57  ;;  %v3039_v42 = vld [vmem:[%s4710_s10 + $0x10] sm:$0xff]  }
  0x5f   : > { %v965_v32 = vadd.f32 %v934_v7, %v868_v13  ;;  %v966_v30 = vadd.f32 %v935_v9, %v869_v27  ;;  %v1065_v44 = vmul.f32 %v3251_v47, %v747_v61  ;;  %v1066_v22 = vmul.f32 %v3251_v47, %v675_v56 }
  0x60   : > { %vm1561_vm9 = vcmp.ge.f32.partialorder %v1529_v40, 0.0  ;;  %vm1562_vm10 = vcmp.ge.f32.partialorder %v1530_v19, 0.0  ;;  %v1599_v36 = vmul.f32 %v3374_v53, %v1529_v40  ;;  %v1600_v52 = vmul.f32 %v3374_v53, %v1530_v19 }
  0x61   : > { %v3622_v28 = vadd.f32 %v1000_v11, %v965_v32  ;;  %v3624_v34 = vadd.f32 %v1001_v29, %v966_v30  ;;  %v3627_v24 = vmul.f32 %v3255_v49, %v772_v60  ;;  %v1231_v63 = vadd.f32 %v3350_v26, %v3303_v58 }
  0x62   : > { %v1631_v18 = vsel %vm1561_vm9, %v1529_v40, %v1599_v36  ;;  %v1632_v55 = vsel %vm1562_vm10, %v1530_v19, %v1600_v52  ;;  %v1232_v12 = vadd.f32 %v3363_v38, %v3331_v41  ;;  %v1267_v35 = vmul.f32 %v3257_v50, %v747_v61 }
  0x63   : > { %v1729_v25 = vpack.c.bf16 %v1632_v55, %v1631_v18  ;;  %v1268_v31 = vmul.f32 %v3257_v50, %v675_v56  ;;  %v1334_v58 = vmul.f32 %v3259_v51, %v3573_v59  ;;  %v1335_v26 = vmul.f32 %v3259_v51, %v3576_v62 }
  0x64   : > { %v1298_v13 = vadd.f32 %v1267_v35, %v1231_v63  ;;  %v1401_v41 = vmul.f32 %v3295_v39, %v772_v60  ;;  %v1402_v38 = vmul.f32 %v3295_v39, %v844_v57  ;;  %v676_v61 = vrot.slane %v3632_v3, 7 }
  0x65   : > { %2958 = vmatmul.mubr.msk.bf16.vlgmr.msra.gmra.mxu1 %vm1750_vm2, %v1729_v25  ;;  %v1299_v27 = vadd.f32 %v1268_v31, %v1232_v12  ;;  %v677_v7 = vrot.slane %v3638_v6, 7  ;;  %v773_v56 = vrot.slane %v3632_v3, 1  ;;  %v774_v9 = vrot.slane %v3638_v6, 1 }
  0x66   : > { %2970 = vmatpush3.bf16.msra.mxu1 %v3166_v5  ;;  %v1365_v11 = vadd.f32 %v1334_v58, %v1298_v13  ;;  %v748_v40 = vsel %vm663_vm0, 0.0, %v676_v61  ;;  %v936_v60 = vmul.f32 %v3247_v45, %v3632_v3  ;;  %v937_v19 = vmul.f32 %v3247_v45, %v3638_v6  ;;  %v3040_v5 = vld [vmem:[%s4710_s10 + $0x8] sm:$0xff]  }
  0x67   : > { %2971 = vmatprep.subr.bf16.mxu1 %v3039_v42  ;;  %v1366_v29 = vadd.f32 %v1335_v26, %v1299_v27  ;;  %v678_v32 = vsel %vm663_vm0, %v676_v61, %v677_v7  ;;  %v775_v30 = vsel %vm760_vm1, %v773_v56, %v774_v9  ;;  %v845_v36 = vsel %vm760_vm1, %v774_v9, 0.0  ;;  %v3041_v7 = vld [vmem:[%s4710_s10] sm:$0xff]  }
  0x68   : > { %v1432_v52 = vadd.f32 %v1401_v41, %v1365_v11  ;;  %v870_v63 = vmul.f32 %v3194_v17, %v748_v40  ;;  %v871_v18 = vmul.f32 %v3194_v17, %v678_v32  ;;  %v1002_v55 = vmul.f32 %v3249_v46, %v775_v30 }
  0x69   : > { %v1202_v12 = vmul.f32 %v3255_v49, %v844_v57  ;;  %v1433_v35 = vadd.f32 %v1402_v38, %v1366_v29  ;;  %v1003_v25 = vmul.f32 %v3249_v46, %v845_v36  ;;  %v3673_v31 = vmul.f32 %v3251_v47, %v748_v40 }
  0x6a   : > { %v1473_v58 = vmul.f32 %v3336_v15, %v1432_v52  ;;  %2972 = vmatpush3.bf16.msra.mxu1 %v3039_v42  ;;  %v967_v26 = vadd.f32 %v936_v60, %v870_v63  ;;  %v968_v13 = vadd.f32 %v937_v19, %v871_v18  ;;  %v1097_v41 = vadd.f32 %v1065_v44, %v3360_v37  ;;  %v3704_v63 = vld [vmem:[%s3171_s20 + $0xd0] sm:$0xff]  ;;  %v3707_v18 = vld [vmem:[%s3171_s20 + $0xd8] sm:$0xff] }
  0x6b   : > { %v1474_v61 = vmul.f32 %v3336_v15, %v1433_v35  ;;  %v1098_v27 = vadd.f32 %v1066_v22, %v3399_v0  ;;  %v1133_v57 = vmul.f32 %v3253_v48, %v3573_v59  ;;  %v1134_v38 = vmul.f32 %v3253_v48, %v3576_v62  ;;  %2973 = vmatprep.subr.bf16.mxu1 %v3040_v5 }
  0x6c   : > { %v1511_v42 = vadd.f32 %v3346_v23, %v1473_v58  ;;  %v3687_v56 = vadd.f32 %v1002_v55, %v967_v26  ;;  %v3689_v37 = vadd.f32 %v1003_v25, %v968_v13  ;;  %v3692_v0 = vmul.f32 %v3251_v47, %v678_v32 }
  0x6d   : > { %v1512_v59 = vadd.f32 %v3346_v23, %v1474_v61  ;;  %v1165_v44 = vadd.f32 %v1133_v57, %v1097_v41  ;;  %v1166_v62 = vadd.f32 %v1134_v38, %v1098_v27  ;;  %v3696_v22 = vmul.f32 %v3255_v49, %v775_v30 }
  0x6e   : > { %vm1543_vm11 = vcmp.ge.f32.partialorder %v1511_v42, 0.0  ;;  %v1581_v9 = vmul.f32 %v3374_v53, %v1511_v42  ;;  %v1269_v11 = vmul.f32 %v3257_v50, %v748_v40  ;;  %v1270_v60 = vmul.f32 %v3257_v50, %v678_v32  ;;  %2974 = vmatpush3.bf16.msra.mxu1 %v3040_v5 }
  0x6f   : > { %vm1544_vm12 = vcmp.ge.f32.partialorder %v1512_v59, 0.0  ;;  %v1582_v19 = vmul.f32 %v3374_v53, %v1512_v59  ;;  %v1233_v29 = vadd.f32 %v3627_v24, %v1165_v44  ;;  %v1234_v52 = vadd.f32 %v1202_v12, %v1166_v62  ;;  %2975 = vmatprep.subr.bf16.mxu1 %v3041_v7 }
  0x70   : > { %v1613_v55 = vsel %vm1543_vm11, %v1511_v42, %v1581_v9  ;;  %v1336_v35 = vmul.f32 %v3259_v51, %v3632_v3  ;;  %v1337_v40 = vmul.f32 %v3259_v51, %v3638_v6  ;;  %v1403_v32 = vmul.f32 %v3295_v39, %v775_v30 }
  0x71   : > { %v1614_v5 = vsel %vm1544_vm12, %v1512_v59, %v1582_v19  ;;  %v1300_v25 = vadd.f32 %v1269_v11, %v1233_v29  ;;  %v1301_v58 = vadd.f32 %v1270_v60, %v1234_v52  ;;  %v1404_v24 = vmul.f32 %v3295_v39, %v845_v36 }
  0x72   : > { %v1720_v12 = vpack.c.bf16 %v1614_v5, %v1613_v55  ;;  %v703_v26 = vrot.slane %v3704_v63, 7  ;;  %v704_v13 = vrot.slane %v3707_v18, 7  ;;  %v800_v41 = vrot.slane %v3704_v63, 1  ;;  %2976 = vmatpush3.bf16.msra.mxu1 %v3041_v7 }
  0x73   : > { %v3719_v61 = vmul.f32 %v3255_v49, %v845_v36  ;;  %v1367_v27 = vadd.f32 %v1336_v35, %v1300_v25  ;;  %v1368_v57 = vadd.f32 %v1337_v40, %v1301_v58  ;;  %v801_v30 = vrot.slane %v3707_v18, 1 }
  0x74   : > { %2941 = vmatprep.mubr.msk.bf16.mxu0 %vm1750_vm2, %v1720_v12  ;;  %v705_v38 = vsel %vm663_vm0, %v703_v26, %v704_v13  ;;  %v757_v42 = vsel %vm663_vm0, 0.0, %v703_v26  ;;  %v954_v59 = vmul.f32 %v3247_v45, %v3704_v63  ;;  %v955_v44 = vmul.f32 %v3247_v45, %v3707_v18 }
  0x75   : > { %v1434_v7 = vadd.f32 %v1403_v32, %v1367_v27  ;;  %v1435_v62 = vadd.f32 %v1404_v24, %v1368_v57  ;;  %v802_v36 = vsel %vm760_vm1, %v800_v41, %v801_v30  ;;  %v854_v9 = vsel %vm760_vm1, %v801_v30, 0.0  ;;  %v3758_v57 = vld [vmem:[%s3171_s20 + $0xe0] sm:$0xff] }
  0x76   : > { %v888_v11 = vmul.f32 %v3194_v17, %v757_v42  ;;  %v889_v60 = vmul.f32 %v3194_v17, %v705_v38  ;;  %v1020_v19 = vmul.f32 %v3249_v46, %v802_v36  ;;  %v1251_v29 = vadd.f32 %v3570_v43, %v3534_v2 }
  0x77   : > { %v1475_v52 = vmul.f32 %v3336_v15, %v1434_v7  ;;  %v1476_v55 = vmul.f32 %v3336_v15, %v1435_v62  ;;  %v1021_v35 = vmul.f32 %v3249_v46, %v854_v9  ;;  %v1085_v40 = vmul.f32 %v3251_v47, %v757_v42 }
  0x78   : > { %v985_v32 = vadd.f32 %v954_v59, %v888_v11  ;;  %v986_v5 = vadd.f32 %v955_v44, %v889_v60  ;;  %v1086_v25 = vmul.f32 %v3251_v47, %v705_v38  ;;  %v3742_v58 = vmul.f32 %v3255_v49, %v802_v36 }
  0x79   : > { %v1513_v24 = vadd.f32 %v3346_v23, %v1475_v52  ;;  %v1514_v2 = vadd.f32 %v3346_v23, %v1476_v55  ;;  %v1252_v43 = vadd.f32 %v3583_v54, %v3562_v8  ;;  %v1287_v12 = vmul.f32 %v3257_v50, %v757_v42  ;;  %v3763_v54 = vld [vmem:[%s3171_s20 + $0xe8] sm:$0xff] }
  0x7a   : > { %v3749_v26 = vadd.f32 %v1020_v19, %v985_v32  ;;  %v3752_v13 = vmul.f32 %v3255_v49, %v854_v9  ;;  %v1288_v41 = vmul.f32 %v3257_v50, %v705_v38  ;;  %v1354_v27 = vmul.f32 %v3259_v51, %v3704_v63 }
  0x7b   : > { %vm1545_vm13 = vcmp.ge.f32.partialorder %v1513_v24, 0.0  ;;  %vm1546_vm14 = vcmp.ge.f32.partialorder %v1514_v2, 0.0  ;;  %v1583_v30 = vmul.f32 %v3374_v53, %v1513_v24  ;;  %v1584_v8 = vmul.f32 %v3374_v53, %v1514_v2 }
  0x7c   : > { %v1318_v42 = vadd.f32 %v1287_v12, %v1251_v29  ;;  %v1319_v59 = vadd.f32 %v1288_v41, %v1252_v43  ;;  %v1355_v44 = vmul.f32 %v3259_v51, %v3707_v18  ;;  %v1421_v38 = vmul.f32 %v3295_v39, %v802_v36 }
  0x7d   : > { %v1615_v7 = vsel %vm1545_vm13, %v1513_v24, %v1583_v30  ;;  %v1616_v62 = vsel %vm1546_vm14, %v1514_v2, %v1584_v8  ;;  %v1422_v11 = vmul.f32 %v3295_v39, %v854_v9  ;;  %v706_v60 = vrot.slane %v3758_v57, 7 }
  0x7e   : > { %v1721_v19 = vpack.c.bf16 %v1616_v62, %v1615_v7  ;;  %v1385_v52 = vadd.f32 %v1354_v27, %v1318_v42  ;;  %v1386_v55 = vadd.f32 %v1355_v44, %v1319_v59  ;;  %v707_v32 = vrot.slane %v3763_v54, 7 }
  0x7f   : > { %v758_v1 = vsel %vm663_vm0, 0.0, %v706_v60  ;;  %v803_v29 = vrot.slane %v3758_v57, 1  ;;  %v804_v43 = vrot.slane %v3763_v54, 1  ;;  %v956_v36 = vmul.f32 %v3247_v45, %v3758_v57 }
  0x80   : > { %2942 = vmatmul.mubr.msk.bf16.gmra.mxu0 %vm1750_vm2, %v1721_v19  ;;  %v1452_v24 = vadd.f32 %v1421_v38, %v1385_v52  ;;  %v1453_v9 = vadd.f32 %v1422_v11, %v1386_v55  ;;  %v708_v2 = vsel %vm663_vm0, %v706_v60, %v707_v32  ;;  %v890_v12 = vmul.f32 %v3194_v17, %v758_v1 }
  0x81   : > { %v805_v41 = vsel %vm760_vm1, %v803_v29, %v804_v43  ;;  %v855_v27 = vsel %vm760_vm1, %v804_v43, 0.0  ;;  %v891_v30 = vmul.f32 %v3194_v17, %v708_v2  ;;  %v957_v8 = vmul.f32 %v3247_v45, %v3763_v54 }
  0x82   : > { %v1493_v42 = vmul.f32 %v3336_v15, %v1452_v24  ;;  %v1494_v59 = vmul.f32 %v3336_v15, %v1453_v9  ;;  %v987_v44 = vadd.f32 %v956_v36, %v890_v12  ;;  %v1022_v38 = vmul.f32 %v3249_v46, %v805_v41 }
  0x83   : > { %v3787_v7 = vadd.f32 %v1021_v35, %v986_v5  ;;  %v988_v62 = vadd.f32 %v957_v8, %v891_v30  ;;  %v1023_v11 = vmul.f32 %v3249_v46, %v855_v27  ;;  %v3791_v60 = vmul.f32 %v3251_v47, %v758_v1  ;;  %v3819_v8 = vld [vmem:[%s3171_s20 + $0x58] sm:$0xff] }
  0x84   : > { %v1531_v19 = vadd.f32 %v3346_v23, %v1493_v42  ;;  %v1532_v52 = vadd.f32 %v3346_v23, %v1494_v59  ;;  %v3796_v55 = vmul.f32 %v3251_v47, %v708_v2  ;;  %v1117_v32 = vadd.f32 %v1085_v40, %v3580_v10 }
  0x85   : > { %v3799_v29 = vadd.f32 %v1022_v38, %v987_v44  ;;  %v1118_v35 = vadd.f32 %v1086_v25, %v3613_v14  ;;  %v1153_v5 = vmul.f32 %v3253_v48, %v3704_v63  ;;  %v1154_v43 = vmul.f32 %v3253_v48, %v3707_v18  ;;  %v3814_v14 = vld [vmem:[%s3171_s20 + $0x50] sm:$0xff] }
  0x86   : > { %vm1563_vm15 = vcmp.ge.f32.partialorder %v1531_v19, 0.0  ;;  %vm1564_vm3 = vcmp.ge.f32.partialorder %v1532_v52, 0.0  ;;  %v1601_v36 = vmul.f32 %v3374_v53, %v1531_v19  ;;  %v1602_v24 = vmul.f32 %v3374_v53, %v1532_v52 }
  0x87   : > { %v3808_v9 = vadd.f32 %v1023_v11, %v988_v62  ;;  %v1185_v10 = vadd.f32 %v1153_v5, %v1117_v32  ;;  %v1186_v40 = vadd.f32 %v1154_v43, %v1118_v35  ;;  %v3811_v12 = vmul.f32 %v3255_v49, %v805_v41 }
  0x88   : > { %v1633_v25 = vsel %vm1563_vm15, %v1531_v19, %v1601_v36  ;;  %v1634_v63 = vsel %vm1564_vm3, %v1532_v52, %v1602_v24  ;;  %v1289_v30 = vmul.f32 %v3257_v50, %v758_v1  ;;  %v1290_v18 = vmul.f32 %v3257_v50, %v708_v2 }
  0x89   : > { %v1730_v42 = vpack.c.bf16 %v1634_v63, %v1633_v25  ;;  %v1253_v59 = vadd.f32 %v3742_v58, %v1185_v10  ;;  %v1254_v44 = vadd.f32 %v3752_v13, %v1186_v40  ;;  %v1356_v38 = vmul.f32 %v3259_v51, %v3758_v57 }
  0x8a   : > { %v1357_v62 = vmul.f32 %v3259_v51, %v3763_v54  ;;  %v1423_v11 = vmul.f32 %v3295_v39, %v805_v41  ;;  %v1424_v19 = vmul.f32 %v3295_v39, %v855_v27  ;;  %v679_v1 = vrot.slane %v3814_v14, 7 }
  0x8b   : > { %2961 = vmatprep.mubr.msk.bf16.mxu1 %vm1750_vm2, %v1730_v42  ;;  %v1320_v2 = vadd.f32 %v1289_v30, %v1253_v59  ;;  %v1321_v52 = vadd.f32 %v1290_v18, %v1254_v44  ;;  %v680_v58 = vrot.slane %v3819_v8, 7  ;;  %v776_v13 = vrot.slane %v3814_v14, 1 }
  0x8c   : > { %v749_v32 = vsel %vm663_vm0, 0.0, %v679_v1  ;;  %v777_v35 = vrot.slane %v3819_v8, 1  ;;  %v938_v5 = vmul.f32 %v3247_v45, %v3814_v14  ;;  %v939_v41 = vmul.f32 %v3247_v45, %v3819_v8 }
  0x8d   : > { %v1387_v43 = vadd.f32 %v1356_v38, %v1320_v2  ;;  %v1388_v36 = vadd.f32 %v1357_v62, %v1321_v52  ;;  %v681_v24 = vsel %vm663_vm0, %v679_v1, %v680_v58  ;;  %v872_v10 = vmul.f32 %v3194_v17, %v749_v32 }
  0x8e   : > { %v3842_v40 = vmul.f32 %v3255_v49, %v855_v27  ;;  %v778_v25 = vsel %vm760_vm1, %v776_v13, %v777_v35  ;;  %v846_v63 = vsel %vm760_vm1, %v777_v35, 0.0  ;;  %v873_v30 = vmul.f32 %v3194_v17, %v681_v24 }
  0x8f   : > { %v1454_v18 = vadd.f32 %v1423_v11, %v1387_v43  ;;  %v1455_v42 = vadd.f32 %v1424_v19, %v1388_v36  ;;  %v969_v59 = vadd.f32 %v938_v5, %v872_v10  ;;  %v1004_v44 = vmul.f32 %v3249_v46, %v778_v25 }
  0x90   : > { %v970_v38 = vadd.f32 %v939_v41, %v873_v30  ;;  %v1005_v62 = vmul.f32 %v3249_v46, %v846_v63  ;;  %v1069_v1 = vmul.f32 %v3251_v47, %v749_v32  ;;  %v1099_v27 = vadd.f32 %v3673_v31, %v3622_v28 }
  0x91   : > { %v1495_v2 = vmul.f32 %v3336_v15, %v1454_v18  ;;  %v1496_v52 = vmul.f32 %v3336_v15, %v1455_v42  ;;  %v1070_v58 = vmul.f32 %v3251_v47, %v681_v24  ;;  %v1100_v11 = vadd.f32 %v3692_v0, %v3624_v34  ;;  %v3880_v18 = vld [vmem:[%s3171_s20 + $0x68] sm:$0xff] }
  0x92   : > { %v3857_v19 = vadd.f32 %v1004_v44, %v969_v59  ;;  %v3859_v13 = vadd.f32 %v1005_v62, %v970_v38  ;;  %v1135_v35 = vmul.f32 %v3253_v48, %v3632_v3  ;;  %v1136_v28 = vmul.f32 %v3253_v48, %v3638_v6  ;;  %v3875_v3 = vld [vmem:[%s3171_s20 + $0x60] sm:$0xff] }
  0x93   : > { %v1533_v31 = vadd.f32 %v3346_v23, %v1495_v2  ;;  %v1534_v5 = vadd.f32 %v3346_v23, %v1496_v52  ;;  %v3868_v41 = vmul.f32 %v3255_v49, %v778_v25  ;;  %v1271_v34 = vmul.f32 %v3257_v50, %v749_v32 }
  0x94   : > { %v1167_v0 = vadd.f32 %v1135_v35, %v1099_v27  ;;  %v1168_v43 = vadd.f32 %v1136_v28, %v1100_v11  ;;  %v1272_v36 = vmul.f32 %v3257_v50, %v681_v24  ;;  %v1338_v10 = vmul.f32 %v3259_v51, %v3814_v14 }
  0x95   : > { %vm1565_vm4 = vcmp.ge.f32.partialorder %v1533_v31, 0.0  ;;  %vm1566_vm5 = vcmp.ge.f32.partialorder %v1534_v5, 0.0  ;;  %v1603_v6 = vmul.f32 %v3374_v53, %v1533_v31  ;;  %v1604_v30 = vmul.f32 %v3374_v53, %v1534_v5 }
  0x96   : > { %v1235_v42 = vadd.f32 %v3696_v22, %v1167_v0  ;;  %v1236_v32 = vadd.f32 %v3719_v61, %v1168_v43  ;;  %v1339_v24 = vmul.f32 %v3259_v51, %v3819_v8  ;;  %v1405_v59 = vmul.f32 %v3295_v39, %v778_v25 }
  0x97   : > { %v1635_v44 = vsel %vm1565_vm4, %v1533_v31, %v1603_v6  ;;  %v1636_v38 = vsel %vm1566_vm5, %v1534_v5, %v1604_v30  ;;  %v1406_v62 = vmul.f32 %v3295_v39, %v846_v63  ;;  %v682_v27 = vrot.slane %v3875_v3, 7 }
  0x98   : > { %v1731_v2 = vpack.c.bf16 %v1636_v38, %v1635_v44  ;;  %v1302_v52 = vadd.f32 %v1271_v34, %v1235_v42  ;;  %v1303_v11 = vadd.f32 %v1272_v36, %v1236_v32  ;;  %v683_v35 = vrot.slane %v3880_v18, 7 }
  0x99   : > { %v750_v22 = vsel %vm663_vm0, 0.0, %v682_v27  ;;  %v779_v61 = vrot.slane %v3875_v3, 1  ;;  %v780_v28 = vrot.slane %v3880_v18, 1  ;;  %v940_v25 = vmul.f32 %v3247_v45, %v3875_v3 }
  0x9a   : > { %2962 = vmatmul.mubr.msk.bf16.gmra.mxu1 %vm1750_vm2, %v1731_v2  ;;  %v1369_v31 = vadd.f32 %v1338_v10, %v1302_v52  ;;  %v1370_v5 = vadd.f32 %v1339_v24, %v1303_v11  ;;  %v684_v0 = vsel %vm663_vm0, %v682_v27, %v683_v35  ;;  %v874_v34 = vmul.f32 %v3194_v17, %v750_v22 }
  0x9b   : > { %v781_v43 = vsel %vm760_vm1, %v779_v61, %v780_v28  ;;  %v3900_v36 = vsel %vm760_vm1, %v780_v28, 0.0  ;;  %v875_v6 = vmul.f32 %v3194_v17, %v684_v0  ;;  %v941_v30 = vmul.f32 %v3247_v45, %v3880_v18 }
  0x9c   : > { %v1436_v42 = vadd.f32 %v1405_v59, %v1369_v31  ;;  %v1437_v32 = vadd.f32 %v1406_v62, %v1370_v5  ;;  %v971_v44 = vadd.f32 %v940_v25, %v874_v34  ;;  %v1006_v10 = vmul.f32 %v3249_v46, %v781_v43  ;;  %v626_v34 = vld [vmem:[%s3171_s20 + $0xf0] sm:$0xff] }
  0x9d   : > { %v1206_v24 = vmul.f32 %v3255_v49, %v846_v63  ;;  %v972_v38 = vadd.f32 %v941_v30, %v875_v6  ;;  %v1007_v27 = vmul.f32 %v3249_v46, %v3900_v36  ;;  %v3910_v2 = vmul.f32 %v3251_v47, %v750_v22 }
  0x9e   : > { %v1477_v52 = vmul.f32 %v3336_v15, %v1436_v42  ;;  %v1478_v11 = vmul.f32 %v3336_v15, %v1437_v32  ;;  %v3915_v35 = vmul.f32 %v3251_v47, %v684_v0  ;;  %v1101_v59 = vadd.f32 %v1069_v1, %v3687_v56  ;;  %v627_v32 = vld [vmem:[%s3171_s20 + $0xf8] sm:$0xff] }
  0x9f   : > { %v3918_v62 = vadd.f32 %v1006_v10, %v971_v44  ;;  %v1102_v63 = vadd.f32 %v1070_v58, %v3689_v37  ;;  %v1137_v61 = vmul.f32 %v3253_v48, %v3814_v14  ;;  %v1138_v28 = vmul.f32 %v3253_v48, %v3819_v8 }
  0xa0   : > { %v1515_v25 = vadd.f32 %v3346_v23, %v1477_v52  ;;  %v1516_v15 = vadd.f32 %v3346_v23, %v1478_v11  ;;  %v3927_v31 = vadd.f32 %v1007_v27, %v972_v38  ;;  %v3930_v56 = vmul.f32 %v3255_v49, %v781_v43 }
  0xa1   : > { %v1169_v1 = vadd.f32 %v1137_v61, %v1101_v59  ;;  %v1170_v5 = vadd.f32 %v1138_v28, %v1102_v63  ;;  %v1273_v37 = vmul.f32 %v3257_v50, %v750_v22  ;;  %v1274_v58 = vmul.f32 %v3257_v50, %v684_v0 }
  0xa2   : > { %vm1547_vm6 = vcmp.ge.f32.partialorder %v1515_v25, 0.0  ;;  %vm1548_vm7 = vcmp.ge.f32.partialorder %v1516_v15, 0.0  ;;  %v1585_v14 = vmul.f32 %v3374_v53, %v1515_v25  ;;  %v1586_v8 = vmul.f32 %v3374_v53, %v1516_v15 }
  0xa3   : > { %v1237_v23 = vadd.f32 %v3868_v41, %v1169_v1  ;;  %v1238_v6 = vadd.f32 %v1206_v24, %v1170_v5  ;;  %v1340_v30 = vmul.f32 %v3259_v51, %v3875_v3  ;;  %v1341_v42 = vmul.f32 %v3259_v51, %v3880_v18 }
  0xa4   : > { %v1617_v22 = vsel %vm1547_vm6, %v1515_v25, %v1585_v14  ;;  %v1618_v44 = vsel %vm1548_vm7, %v1516_v15, %v1586_v8  ;;  %v1407_v0 = vmul.f32 %v3295_v39, %v781_v43  ;;  %v1408_v10 = vmul.f32 %v3295_v39, %v3900_v36 }
  0xa5   : > { %v1722_v38 = vpack.c.bf16 %v1618_v44, %v1617_v22  ;;  %v1304_v53 = vadd.f32 %v1273_v37, %v1237_v23  ;;  %v1305_v27 = vadd.f32 %v1274_v58, %v1238_v6  ;;  %v709_v52 = vrot.slane %v626_v34, 7  ;;  %v3967_v23 = vld [vmem:[%s4703_s3] ss:$0 sm:$0xff] }
  0xa6   : > { %v710_v41 = vrot.slane %v627_v32, 7  ;;  %v806_v24 = vrot.slane %v626_v34, 1  ;;  %v807_v11 = vrot.slane %v627_v32, 1  ;;  %v1119_v59 = vadd.f32 %v3791_v60, %v3749_v26 }
  0xa7   : > { %2945 = vmatprep.mubr.msk.bf16.mxu0 %vm1750_vm2, %v1722_v38  ;;  %v1371_v63 = vadd.f32 %v1340_v30, %v1304_v53  ;;  %v1372_v61 = vadd.f32 %v1341_v42, %v1305_v27  ;;  %v759_v28 = vsel %vm663_vm0, 0.0, %v709_v52  ;;  %v1120_v43 = vadd.f32 %v3796_v55, %v3787_v7 }
  0xa8   : > { %v711_v25 = vsel %vm663_vm0, %v709_v52, %v710_v41  ;;  %v808_v15 = vsel %vm760_vm1, %v806_v24, %v807_v11  ;;  %v856_v1 = vsel %vm760_vm1, %v807_v11, 0.0  ;;  %v1089_v5 = vmul.f32 %v3251_v47, %v759_v28 }
  0xa9   : > { %v1438_v37 = vadd.f32 %v1407_v0, %v1371_v63  ;;  %v1439_v58 = vadd.f32 %v1408_v10, %v1372_v61  ;;  %v1090_v26 = vmul.f32 %v3251_v47, %v711_v25  ;;  %v1155_v60 = vmul.f32 %v3253_v48, %v3758_v57  ;;  %v3978_v10 = vld [vmem:[%s4704_s4] ss:$0 sm:$0xff] }
  0xaa   : > { %v1156_v14 = vmul.f32 %v3253_v48, %v3763_v54  ;;  %v1225_v7 = vmul.f32 %v3255_v49, %v808_v15  ;;  %v1226_v55 = vmul.f32 %v3255_v49, %v856_v1  ;;  %v1291_v8 = vmul.f32 %v3257_v50, %v759_v28  ;;  %v3991_v63 = vld [vmem:[%s4705_s5] ss:$0 sm:$0xff] }
  0xab   : > { %v1479_v6 = vmul.f32 %v3967_v23, %v1438_v37  ;;  %v1480_v30 = vmul.f32 %v3967_v23, %v1439_v58  ;;  %v1187_v42 = vadd.f32 %v1155_v60, %v1119_v59  ;;  %v1292_v57 = vmul.f32 %v3257_v50, %v711_v25  ;;  %v3997_v25 = vld [vmem:[%s3171_s20 + $0x70] sm:$0xff] }
  0xac   : > { %v1188_v22 = vadd.f32 %v1156_v14, %v1120_v43  ;;  %v1358_v54 = vmul.f32 %v3259_v51, %v626_v34  ;;  %v1359_v44 = vmul.f32 %v3259_v51, %v627_v32  ;;  %v1425_v0 = vmul.f32 %v3295_v39, %v808_v15 }
  0xad   : > { %v1517_v38 = vadd.f32 %v3978_v10, %v1479_v6  ;;  %v1518_v53 = vadd.f32 %v3978_v10, %v1480_v30  ;;  %v1255_v27 = vadd.f32 %v3811_v12, %v1187_v42  ;;  %v1426_v52 = vmul.f32 %v3295_v39, %v856_v1 }
  0xae   : > { %v1256_v41 = vadd.f32 %v3842_v40, %v1188_v22  ;;  %v1121_v24 = vadd.f32 %v1089_v5, %v3799_v29  ;;  %v1122_v11 = vadd.f32 %v1090_v26, %v3808_v9  ;;  %v1157_v59 = vmul.f32 %v3253_v48, %v626_v34  ;;  %v4000_v9 = vld [vmem:[%s3171_s20 + $0x78] sm:$0xff] }
  0xaf   : > { %vm1549_vm8 = vcmp.ge.f32.partialorder %v1517_v38, 0.0  ;;  %vm1550_vm9 = vcmp.ge.f32.partialorder %v1518_v53, 0.0  ;;  %v1587_v12 = vmul.f32 %v3991_v63, %v1517_v38  ;;  %v1588_v61 = vmul.f32 %v3991_v63, %v1518_v53 }
  0xb0   : > { %v1322_v28 = vadd.f32 %v1291_v8, %v1255_v27  ;;  %v1323_v43 = vadd.f32 %v1292_v57, %v1256_v41  ;;  %v1158_v40 = vmul.f32 %v3253_v48, %v627_v32  ;;  %v1189_v29 = vadd.f32 %v1157_v59, %v1121_v24 }
  0xb1   : > { %v1619_v34 = vsel %vm1549_vm8, %v1517_v38, %v1587_v12  ;;  %v1620_v15 = vsel %vm1550_vm9, %v1518_v53, %v1588_v61  ;;  %v1293_v1 = vmul.f32 0.0, %v3257_v50  ;;  %v1360_v5 = vmul.f32 0.0, %v3259_v51 }
  0xb2   : > { %v1723_v37 = vpack.c.bf16 %v1620_v15, %v1619_v34  ;;  %v1389_v58 = vadd.f32 %v1358_v54, %v1322_v28  ;;  %v1390_v26 = vadd.f32 %v1359_v44, %v1323_v43  ;;  %v1190_v60 = vadd.f32 %v1158_v40, %v1122_v11 }
  0xb3   : > { %v1257_v14 = vadd.f32 %v1225_v7, %v1189_v29  ;;  %v1427_v8 = vmul.f32 0.0, %v3295_v39  ;;  %v685_v32 = vrot.slane %v3997_v25, 7  ;;  %v686_v6 = vrot.slane %v4000_v9, 7 }
  0xb4   : > { %2946 = vmatmul.mubr.msk.bf16.gmra.mxu0 %vm1750_vm2, %v1723_v37  ;;  %v1456_v30 = vadd.f32 %v1425_v0, %v1389_v58  ;;  %v1457_v42 = vadd.f32 %v1426_v52, %v1390_v26  ;;  %v1258_v57 = vadd.f32 %v1226_v55, %v1190_v60  ;;  %v782_v22 = vrot.slane %v3997_v25, 1 }
  0xb5   : > { %v1324_v38 = vadd.f32 %v1293_v1, %v1257_v14  ;;  %v687_v53 = vsel %vm663_vm0, %v685_v32, %v686_v6  ;;  %v751_v54 = vsel %vm663_vm0, 0.0, %v685_v32  ;;  %v783_v7 = vrot.slane %v4000_v9, 1 }
  0xb6   : > { %v1497_v44 = vmul.f32 %v3967_v23, %v1456_v30  ;;  %v1498_v27 = vmul.f32 %v3967_v23, %v1457_v42  ;;  %v1325_v41 = vadd.f32 %v1293_v1, %v1258_v57  ;;  %v876_v24 = vmul.f32 %v3194_v17, %v751_v54 }
  0xb7   : > { %v1391_v11 = vadd.f32 %v1360_v5, %v1324_v38  ;;  %v784_v0 = vsel %vm760_vm1, %v782_v22, %v783_v7  ;;  %v4017_v55 = vsel %vm760_vm1, %v783_v7, 0.0  ;;  %v877_v52 = vmul.f32 %v3194_v17, %v687_v53 }
  0xb8   : > { %v1535_v59 = vadd.f32 %v3978_v10, %v1497_v44  ;;  %v1536_v12 = vadd.f32 %v3978_v10, %v1498_v27  ;;  %v1392_v61 = vadd.f32 %v1360_v5, %v1325_v41  ;;  %v942_v28 = vmul.f32 %v3247_v45, %v3997_v25 }
  0xb9   : > { %v1208_v43 = vmul.f32 %v3255_v49, %v3900_v36  ;;  %v1458_v40 = vadd.f32 %v1427_v8, %v1391_v11  ;;  %v943_v29 = vmul.f32 %v3247_v45, %v4000_v9  ;;  %v1008_v34 = vmul.f32 %v3249_v46, %v784_v0 }
  0xba   : > { %vm1567_vm10 = vcmp.ge.f32.partialorder %v1535_v59, 0.0  ;;  %vm1568_vm11 = vcmp.ge.f32.partialorder %v1536_v12, 0.0  ;;  %v1605_v15 = vmul.f32 %v3991_v63, %v1535_v59  ;;  %v1606_v1 = vmul.f32 %v3991_v63, %v1536_v12 }
  0xbb   : > { %v1459_v37 = vadd.f32 %v1427_v8, %v1392_v61  ;;  %v1499_v5 = vmul.f32 %v3967_v23, %v1458_v40  ;;  %v973_v58 = vadd.f32 %v942_v28, %v876_v24  ;;  %v1009_v26 = vmul.f32 %v3249_v46, %v4017_v55 }
  0xbc   : > { %v1637_v36 = vsel %vm1567_vm10, %v1535_v59, %v1605_v15  ;;  %v1638_v60 = vsel %vm1568_vm11, %v1536_v12, %v1606_v1  ;;  %v974_v14 = vadd.f32 %v943_v29, %v877_v52  ;;  %v1073_v32 = vmul.f32 %v3251_v47, %v751_v54  ;;  %v4059_v52 = vld [vmem:[%s3171_s20 + $0x80] sm:$0xff]  ;;  %v4062_v59 = vld [vmem:[%s3171_s20 + $0x88] sm:$0xff] }
  0xbd   : > { %v1732_v6 = vpack.c.bf16 %v1638_v60, %v1637_v36  ;;  %v1500_v30 = vmul.f32 %v3967_v23, %v1459_v37  ;;  %v1537_v42 = vadd.f32 %v3978_v10, %v1499_v5  ;;  %v1074_v57 = vmul.f32 %v3251_v47, %v687_v53 }
  0xbe   : > { %v4038_v22 = vadd.f32 %v1008_v34, %v973_v58  ;;  %v1103_v8 = vadd.f32 %v3910_v2, %v3857_v19  ;;  %v1104_v38 = vadd.f32 %v3915_v35, %v3859_v13  ;;  %v1139_v7 = vmul.f32 %v3253_v48, %v3875_v3 }
  0xbf   : > { %2965 = vmatprep.mubr.msk.bf16.mxu1 %vm1750_vm2, %v1732_v6  ;;  %v1538_v44 = vadd.f32 %v3978_v10, %v1500_v30  ;;  %vm1569_vm12 = vcmp.ge.f32.partialorder %v1537_v42, 0.0  ;;  %v1607_v27 = vmul.f32 %v3991_v63, %v1537_v42  ;;  %v1140_v41 = vmul.f32 %v3253_v48, %v3880_v18 }
  0xc0   : > { %v4051_v24 = vadd.f32 %v1009_v26, %v974_v14  ;;  %v1171_v19 = vadd.f32 %v1139_v7, %v1103_v8  ;;  %v4054_v2 = vmul.f32 %v3255_v49, %v784_v0  ;;  %v1275_v13 = vmul.f32 %v3257_v50, %v751_v54 }
  0xc1   : > { %vm1570_vm13 = vcmp.ge.f32.partialorder %v1538_v44, 0.0  ;;  %v1608_v3 = vmul.f32 %v3991_v63, %v1538_v44  ;;  %v1639_v35 = vsel %vm1569_vm12, %v1537_v42, %v1607_v27  ;;  %v1172_v11 = vadd.f32 %v1140_v41, %v1104_v38 }
  0xc2   : > { %v1239_v12 = vadd.f32 %v3930_v56, %v1171_v19  ;;  %v1276_v18 = vmul.f32 %v3257_v50, %v687_v53  ;;  %v1342_v61 = vmul.f32 %v3259_v51, %v3997_v25  ;;  %v1343_v28 = vmul.f32 %v3259_v51, %v4000_v9 }
  0xc3   : > { %v1640_v54 = vsel %vm1570_vm13, %v1538_v44, %v1608_v3  ;;  %v1240_v40 = vadd.f32 %v1208_v43, %v1172_v11  ;;  %v1409_v29 = vmul.f32 %v3295_v39, %v784_v0  ;;  %v1410_v34 = vmul.f32 %v3295_v39, %v4017_v55 }
  0xc4   : > { %v1733_v15 = vpack.c.bf16 %v1640_v54, %v1639_v35  ;;  %v1306_v1 = vadd.f32 %v1275_v13, %v1239_v12  ;;  %v688_v37 = vrot.slane %v4059_v52, 7  ;;  %v689_v56 = vrot.slane %v4062_v59, 7 }
  0xc5   : > { %v1307_v53 = vadd.f32 %v1276_v18, %v1240_v40  ;;  %v785_v5 = vrot.slane %v4059_v52, 1  ;;  %v786_v58 = vrot.slane %v4062_v59, 1  ;;  %v944_v43 = vmul.f32 %v3247_v45, %v4059_v52 }
  0xc6   : > { %2966 = vmatmul.mubr.msk.bf16.gmra.mxu1 %vm1750_vm2, %v1733_v15  ;;  %v1373_v0 = vadd.f32 %v1342_v61, %v1306_v1  ;;  %v690_v26 = vsel %vm663_vm0, %v688_v37, %v689_v56  ;;  %v752_v36 = vsel %vm663_vm0, 0.0, %v688_v37  ;;  %v945_v60 = vmul.f32 %v3247_v45, %v4062_v59  ;;  %v2904_v37 = vld [vmem:[%s4108_s24 + $0x8] sm:$0xff]  }
  0xc7   : > { %v1374_v14 = vadd.f32 %v1343_v28, %v1307_v53  ;;  %v787_v6 = vsel %vm760_vm1, %v785_v5, %v786_v58  ;;  %v849_v30 = vsel %vm760_vm1, %v786_v58, 0.0  ;;  %v878_v42 = vmul.f32 %v3194_v17, %v752_v36 }
  0xc8   : > { %v1440_v8 = vadd.f32 %v1409_v29, %v1373_v0  ;;  %v879_v38 = vmul.f32 %v3194_v17, %v690_v26  ;;  %v1010_v7 = vmul.f32 %v3249_v46, %v787_v6  ;;  %v1011_v44 = vmul.f32 %v3249_v46, %v849_v30  ;;  %v2889_v29 = vld [vmem:[%s4108_s24] sm:$0xff]  }
  0xc9   : > { %v1210_v27 = vmul.f32 %v3255_v49, %v4017_v55  ;;  %v1441_v45 = vadd.f32 %v1410_v34, %v1374_v14  ;;  %v975_v41 = vadd.f32 %v944_v43, %v878_v42  ;;  %v1075_v19 = vmul.f32 %v3251_v47, %v752_v36  ;;  %v4135_v43 = vld [vmem:[%s4706_s6] ss:$0 sm:$0xff] }
  0xca   : > { %v1481_v13 = vmul.f32 %v3967_v23, %v1440_v8  ;;  %v976_v3 = vadd.f32 %v945_v60, %v879_v38  ;;  %v1105_v35 = vadd.f32 %v1073_v32, %v3918_v62  ;;  %v1106_v17 = vadd.f32 %v1074_v57, %v3927_v31  ;;  %v4141_v8 = vld [vmem:[%s4707_s7] ss:$0 sm:$0xff] }
  0xcb   : > { %v1482_v11 = vmul.f32 %v3967_v23, %v1441_v45  ;;  %v1076_v12 = vmul.f32 %v3251_v47, %v690_v26  ;;  %v1141_v46 = vmul.f32 %v3253_v48, %v3997_v25  ;;  %v1142_v55 = vmul.f32 %v3253_v48, %v4000_v9  ;;  %v4148_v45 = vld [vmem:[%s4708_s8] ss:$0 sm:$0xff] }
  0xcc   : > { %v1519_v62 = vadd.f32 %v3978_v10, %v1481_v13  ;;  %v4111_v31 = vadd.f32 %v1010_v7, %v975_v41  ;;  %v4113_v32 = vadd.f32 %v1011_v44, %v976_v3  ;;  %v4116_v57 = vmul.f32 %v3255_v49, %v787_v6 }
  0xcd   : > { %v1520_v25 = vadd.f32 %v3978_v10, %v1482_v11  ;;  %v1173_v9 = vadd.f32 %v1141_v46, %v1105_v35  ;;  %v1174_v18 = vadd.f32 %v1142_v55, %v1106_v17  ;;  %v1277_v61 = vmul.f32 %v3257_v50, %v752_v36 }
  0xce   : > { %vm1551_vm0 = vcmp.ge.f32.partialorder %v1519_v62, 0.0  ;;  %v1589_v28 = vmul.f32 %v3991_v63, %v1519_v62  ;;  %v1278_v54 = vmul.f32 %v3257_v50, %v690_v26  ;;  %v1344_v40 = vmul.f32 %v3259_v51, %v4059_v52 }
  0xcf   : > { %vm1552_vm1 = vcmp.ge.f32.partialorder %v1520_v25, 0.0  ;;  %v1590_v34 = vmul.f32 %v3991_v63, %v1520_v25  ;;  %v1241_v15 = vadd.f32 %v4054_v2, %v1173_v9  ;;  %v1242_v1 = vadd.f32 %v1210_v27, %v1174_v18 }
  0xd0   : > { %v1621_v56 = vsel %vm1551_vm0, %v1519_v62, %v1589_v28  ;;  %v1345_v53 = vmul.f32 %v3259_v51, %v4062_v59  ;;  %v1411_v5 = vmul.f32 %v3295_v39, %v787_v6  ;;  %v1412_v58 = vmul.f32 %v3295_v39, %v849_v30 }
  0xd1   : > { %v1622_v0 = vsel %vm1552_vm1, %v1520_v25, %v1590_v34  ;;  %v1308_v26 = vadd.f32 %v1277_v61, %v1241_v15  ;;  %v1309_v36 = vadd.f32 %v1278_v54, %v1242_v1  ;;  %v2890_v60 = vunpack.c.l.bf16 %v2889_v29 }
  0xd2   : > { %v1724_v2 = vpack.c.bf16 %v1622_v0, %v1621_v56  ;;  %v1212_v14 = vmul.f32 %v3255_v49, %v849_v30  ;;  %v2891_v42 = vunpack.c.h.bf16 %v2889_v29  ;;  %v2894_v6 = vunpack.c.l.bf16 %v2904_v37 }
  0xd3   : > { %v1375_v38 = vadd.f32 %v1344_v40, %v1308_v26  ;;  %v1376_v7 = vadd.f32 %v1345_v53, %v1309_v36  ;;  %v1666_v44 = vmul.f32 %v2890_v60, %v4135_v43  ;;  %vm1996_vm14 = vcmask 523264  }
  0xd4   : > { %v2895_v27 = vunpack.c.h.bf16 %v2904_v37  ;;  %2949 = vmatprep.mubr.msk.bf16.mxu0 %vm1750_vm2, %v1724_v2  ;;  %v1667_v30 = vmul.f32 %v2891_v42, %v4135_v43  ;;  %v1668_v41 = vmul.f32 %v2894_v6, %v4135_v43  ;;  %v1107_v13 = vadd.f32 %v1075_v19, %v4038_v22  ;;  %v3045_v6 = vld [vmem:[%s3171_s20 + $0x90] sm:$0xff] }
  0xd5   : > { %v1108_v3 = vadd.f32 %v1076_v12, %v4051_v24  ;;  %v1442_v35 = vadd.f32 %v1411_v5, %v1375_v38  ;;  %v1443_v17 = vadd.f32 %v1412_v58, %v1376_v7  ;;  %v1680_v11 = vadd.f32 %v4141_v8, %v1666_v44  ;;  %v3046_v7 = vld [vmem:[%s3171_s20 + $0x98] sm:$0xff] }
  0xd6   : > { %v1669_v46 = vmul.f32 %v2895_v27, %v4135_v43  ;;  %v1681_v55 = vadd.f32 %v4141_v8, %v1667_v30  ;;  %v1682_v62 = vadd.f32 %v4141_v8, %v1668_v41  ;;  %v1143_v25 = vmul.f32 %v3253_v48, %v4059_v52  ;;  %v4749_v27 = vld [vmem:[#allocation2_spill] sm:$0xff]  ;;  %v4750_v30 = vld [vmem:[#allocation3_spill] sm:$0xff] }
  0xd7   : > { %v1144_v9 = vmul.f32 %v3253_v48, %v4062_v59  ;;  %v1483_v22 = vmul.f32 %v3967_v23, %v1442_v35  ;;  %v1484_v24 = vmul.f32 %v3967_v23, %v1443_v17  ;;  %vm1688_vm15 = vcmp.ge.f32.partialorder %v1680_v11, 0.0 }
  0xd8   : > { %v1702_v19 = vmul.f32 %v4148_v45, %v1680_v11  ;;  %vm1689_vm3 = vcmp.ge.f32.partialorder %v1681_v55, 0.0  ;;  %v1703_v12 = vmul.f32 %v4148_v45, %v1681_v55  ;;  %v1683_v18 = vadd.f32 %v4141_v8, %v1669_v46 }
  0xd9   : > { %vm1690_vm4 = vcmp.ge.f32.partialorder %v1682_v62, 0.0  ;;  %v1521_v61 = vadd.f32 %v3978_v10, %v1483_v22  ;;  %v1522_v52 = vadd.f32 %v3978_v10, %v1484_v24  ;;  %v1704_v59 = vmul.f32 %v4148_v45, %v1682_v62  ;;  %v2905_v22 = vld [vmem:[%s4108_s24 + $0x10] sm:$0xff]  }
  0xda   : > { %v1710_v28 = vsel %vm1688_vm15, %v1680_v11, %v1702_v19  ;;  %v1711_v54 = vsel %vm1689_vm3, %v1681_v55, %v1703_v12  ;;  %vm1691_vm5 = vcmp.ge.f32.partialorder %v1683_v18, 0.0  ;;  %v1705_v40 = vmul.f32 %v4148_v45, %v1683_v18  ;;  %v3048_v19 = vld [vmem:[%s3171_s20 + $0xa8] sm:$0xff] }
  0xdb   : > { %v1175_v29 = vadd.f32 %v1143_v25, %v1107_v13  ;;  %vm1553_vm6 = vcmp.ge.f32.partialorder %v1521_v61, 0.0  ;;  %vm1554_vm7 = vcmp.ge.f32.partialorder %v1522_v52, 0.0  ;;  %v1591_v34 = vmul.f32 %v3991_v63, %v1521_v61 }
  0xdc   : > { %v1592_v15 = vmul.f32 %v3991_v63, %v1522_v52  ;;  %v1960_v1 = vpack.c.bf16 %v1711_v54, %v1710_v28  ;;  %v1712_v37 = vsel %vm1690_vm4, %v1682_v62, %v1704_v59  ;;  %v1713_v56 = vsel %vm1691_vm5, %v1683_v18, %v1705_v40  ;;  %v4751_v28 = vld [vmem:[#allocation4_spill] sm:$0xff] }
  0xdd   : > { %v1176_v53 = vadd.f32 %v1144_v9, %v1108_v3  ;;  %v1623_v5 = vsel %vm1553_vm6, %v1521_v61, %v1591_v34  ;;  %v1961_v0 = vpack.c.bf16 %v1713_v56, %v1712_v37  ;;  %v1243_v26 = vadd.f32 %v4116_v57, %v1175_v29 }
  0xde   : > { %v1624_v58 = vsel %vm1554_vm7, %v1522_v52, %v1592_v15  ;;  %2977 = vmatprep.mubr.msk.bf16.mxu1 %vm1996_vm14, %v1960_v1  ;;  %v1279_v2 = vmul.f32 %v3257_v50, %v3420_v20  ;;  %v1280_v42 = vmul.f32 %v3257_v50, %v3405_v4  ;;  %v1346_v38 = vmul.f32 %v3045_v6, %v3259_v51 }
  0xdf   : > { %v1725_v36 = vpack.c.bf16 %v1624_v58, %v1623_v5  ;;  %v1244_v60 = vadd.f32 %v1212_v14, %v1176_v53  ;;  %2978 = vmatmul.mubr.msk.bf16.vlgmr.msra.gmra.mxu1 %vm1996_vm14, %v1961_v0  ;;  %v1347_v44 = vmul.f32 %v3046_v7, %v3259_v51  ;;  %v1413_v57 = vmul.f32 %v3295_v39, %v4749_v27 }
  0xe0   : > { %v1414_v14 = vmul.f32 %v3295_v39, %v4750_v30  ;;  %v1310_v41 = vadd.f32 %v1279_v2, %v1243_v26  ;;  %v1077_v3 = vmul.f32 %v3251_v47, %v3420_v20  ;;  %v1078_v35 = vmul.f32 %v3251_v47, %v3405_v4  ;;  %v3047_v4 = vld [vmem:[%s3171_s20 + $0xa0] sm:$0xff] }
  0xe1   : > { %2950 = vmatmul.mubr.msk.bf16.gmra.mxu0 %vm1750_vm2, %v1725_v36  ;;  %v1311_v13 = vadd.f32 %v1280_v42, %v1244_v60  ;;  %v1145_v17 = vmul.f32 %v3045_v6, %v3253_v48  ;;  %v1146_v11 = vmul.f32 %v3046_v7, %v3253_v48  ;;  %v1213_v46 = vmul.f32 %v3255_v49, %v4749_v27 }
  0xe2   : > { %v1214_v55 = vmul.f32 %v3255_v49, %v4750_v30  ;;  %v1377_v62 = vadd.f32 %v1346_v38, %v1310_v41  ;;  %v1109_v9 = vadd.f32 %v1077_v3, %v4111_v31  ;;  %v1110_v20 = vadd.f32 %v1078_v35, %v4113_v32  ;;  %v2906_v31 = vld [vmem:[%s4108_s24 + $0x18] sm:$0xff]   ;;  %s2826_s24 = sshll.u32 %s4796_s22, 2 }
  0xe3   : > { %v1378_v25 = vadd.f32 %v1347_v44, %v1311_v13  ;;  %v1281_v47 = vmul.f32 %v3257_v50, %v3426_v21  ;;  %v1282_v48 = vmul.f32 %v3257_v50, %v3413_v16  ;;  %v1348_v24 = vmul.f32 %v3047_v4, %v3259_v51  ;;  %s577_s27 = scalar_lea.vmem %s4712_s12, %s2826_s24 }
  0xe4   : > { %v1349_v49 = vmul.f32 %v3048_v19, %v3259_v51  ;;  %v1444_v12 = vadd.f32 %v1413_v57, %v1377_v62  ;;  %v1177_v61 = vadd.f32 %v1145_v17, %v1109_v9  ;;  %v1178_v52 = vadd.f32 %v1146_v11, %v1110_v20 }
  0xe5   : > { %v1445_v18 = vadd.f32 %v1414_v14, %v1378_v25  ;;  %v1415_v32 = vmul.f32 %v3295_v39, %v3452_v33  ;;  %v1416_v21 = vmul.f32 %v3295_v39, %v4751_v28  ;;  %v2898_v59 = vunpack.c.l.bf16 %v2905_v22 }
  0xe6   : > { %v2899_v54 = vunpack.c.h.bf16 %v2905_v22  ;;  %v1485_v50 = vmul.f32 %v3967_v23, %v1444_v12  ;;  %v1245_v40 = vadd.f32 %v1213_v46, %v1177_v61  ;;  %v1246_v29 = vadd.f32 %v1214_v55, %v1178_v52 }
  0xe7   : > { %v1486_v16 = vmul.f32 %v3967_v23, %v1445_v18  ;;  %v1670_v51 = vmul.f32 %v2898_v59, %v4135_v43  ;;  %v2902_v15 = vunpack.c.l.bf16 %v2906_v31  ;;  %v2903_v1 = vunpack.c.h.bf16 %v2906_v31 }
  0xe8   : > { %v1671_v34 = vmul.f32 %v2899_v54, %v4135_v43  ;;  %v1523_v37 = vadd.f32 %v3978_v10, %v1485_v50  ;;  %v1312_v56 = vadd.f32 %v1281_v47, %v1245_v40  ;;  %v1313_v39 = vadd.f32 %v1282_v48, %v1246_v29 }
  0xe9   : > { %v1524_v33 = vadd.f32 %v3978_v10, %v1486_v16  ;;  %v1684_v53 = vadd.f32 %v4141_v8, %v1670_v51  ;;  %v1672_v58 = vmul.f32 %v2902_v15, %v4135_v43  ;;  %v1673_v0 = vmul.f32 %v2903_v1, %v4135_v43 }
  0xea   : > { %v1685_v5 = vadd.f32 %v4141_v8, %v1671_v34  ;;  %vm1555_vm8 = vcmp.ge.f32.partialorder %v1523_v37, 0.0  ;;  %v1593_v26 = vmul.f32 %v3991_v63, %v1523_v37  ;;  %v1379_v60 = vadd.f32 %v1348_v24, %v1312_v56 }
  0xeb   : > { %vm1556_vm9 = vcmp.ge.f32.partialorder %v1524_v33, 0.0  ;;  %v1594_v36 = vmul.f32 %v3991_v63, %v1524_v33  ;;  %v1380_v2 = vadd.f32 %v1349_v49, %v1313_v39  ;;  %vm1692_vm10 = vcmp.ge.f32.partialorder %v1684_v53, 0.0 }
  0xec   : > { %vm1693_vm11 = vcmp.ge.f32.partialorder %v1685_v5, 0.0  ;;  %v1625_v42 = vsel %vm1555_vm8, %v1523_v37, %v1593_v26  ;;  %v1706_v38 = vmul.f32 %v4148_v45, %v1684_v53  ;;  %v1707_v7 = vmul.f32 %v4148_v45, %v1685_v5 }
  0xed   : > { %v1626_v6 = vsel %vm1556_vm9, %v1524_v33, %v1594_v36  ;;  %v1446_v27 = vadd.f32 %v1415_v32, %v1379_v60  ;;  %v1447_v57 = vadd.f32 %v1416_v21, %v1380_v2  ;;  %v1686_v43 = vadd.f32 %v4141_v8, %v1672_v58 }
  0xee   : > { %v1726_v44 = vpack.c.bf16 %v1626_v6, %v1625_v42  ;;  %v1714_v30 = vsel %vm1692_vm10, %v1684_v53, %v1706_v38  ;;  %v1715_v14 = vsel %vm1693_vm11, %v1685_v5, %v1707_v7  ;;  %v1687_v41 = vadd.f32 %v4141_v8, %v1673_v0 }
  0xef   : > { %v1487_v13 = vmul.f32 %v3967_v23, %v1446_v27  ;;  %v1488_v3 = vmul.f32 %v3967_v23, %v1447_v57  ;;  %v1962_v35 = vpack.c.bf16 %v1715_v14, %v1714_v30  ;;  %vm1694_vm12 = vcmp.ge.f32.partialorder %v1686_v43, 0.0 }
  0xf0   : > { %2953 = vmatprep.mubr.msk.bf16.mxu0 %vm1750_vm2, %v1726_v44  ;;  %vm1695_vm13 = vcmp.ge.f32.partialorder %v1687_v41, 0.0  ;;  %v1708_v17 = vmul.f32 %v4148_v45, %v1686_v43  ;;  %v1709_v11 = vmul.f32 %v4148_v45, %v1687_v41  ;;  %vm2302_vm15 = vcmask 257024  }
  0xf1   : > { %v1525_v46 = vadd.f32 %v3978_v10, %v1487_v13  ;;  %v1526_v55 = vadd.f32 %v3978_v10, %v1488_v3  ;;  %2981 = vmatprep.mubr.msk.bf16.mxu1 %vm1996_vm14, %v1962_v35  ;;  %vm2485_vm3 = vcmask 326912   ;;  %vm2381_vm4 = vcmask 57344  }
  0xf2   : > { %v1716_v8 = vsel %vm1694_vm12, %v1686_v43, %v1708_v17  ;;  %v1717_v62 = vsel %vm1695_vm13, %v1687_v41, %v1709_v11  ;;  %vm2272_vm5 = vcmask 519168  }
  0xf3   : > { %vm1557_vm0 = vcmp.ge.f32.partialorder %v1525_v46, 0.0  ;;  %vm1558_vm1 = vcmp.ge.f32.partialorder %v1526_v55, 0.0  ;;  %v1595_v25 = vmul.f32 %v3991_v63, %v1525_v46  ;;  %v1596_v23 = vmul.f32 %v3991_v63, %v1526_v55 }
  0xf4   : > { %v1963_v9 = vpack.c.bf16 %v1717_v62, %v1716_v8 }
  0xf5   : > { %v1627_v20 = vsel %vm1557_vm0, %v1525_v46, %v1595_v25  ;;  %v1628_v22 = vsel %vm1558_vm1, %v1526_v55, %v1596_v23 }
  0xf6   : > { %v1727_v47 = vpack.c.bf16 %v1628_v22, %v1627_v20  ;;  %2982 = vmatmul.mubr.msk.bf16.gmra.mxu1 %vm1996_vm14, %v1963_v9  ;;  %vm2311_vm14 = vcmask 64512  }
  0xf8   : > { %2954 = vmatmul.mubr.msk.bf16.gmra.mxu0 %vm1750_vm2, %v1727_v47 }
  0xff   : > { %v2939_v18 = vpop.f32.mrf.mxu0 }
 0x101   : > { %v1833_v61 = vpop.f32.mrf.mxu0 }
 0x103   : > { %v2940_v52 = vpop.f32.mrf.mxu0 }
 0x104   : > { %v2075_v59 = vpack.c.bf16 %v2940_v52, %v2939_v18 }
 0x105   : > { %v1836_v31 = vpop.f32.mrf.mxu0 }
 0x106   : > { %v2074_v28 = vpack.c.bf16 %v1836_v31, %v1833_v61  ;;  %v4257_v40 = vunpack.c.l.bf16 %v2075_v59  ;;  %v4263_v15 = vunpack.c.h.bf16 %v2075_v59 }
 0x108   : > { %v4253_v54 = vunpack.c.l.bf16 %v2074_v28  ;;  %v4255_v50 = vunpack.c.h.bf16 %v2074_v28  ;;  %v2385_v1 = vmul.f32 %v4257_v40, %v4257_v40  ;;  %v2315_v60 = vsel %vm2311_vm14, %v4257_v40, 0.0 }
 0x109   : > { %v2386_v2 = vmul.f32 %v4263_v15, %v4263_v15  ;;  %v2317_v43 = vsel %vm2311_vm14, %v4263_v15, 0.0 }
 0x10a   : > { %v2383_v29 = vmul.f32 %v4253_v54, %v4253_v54  ;;  %v2384_v51 = vmul.f32 %v4255_v50, %v4255_v50  ;;  %v2312_v37 = vsel %vm2311_vm14, %v4253_v54, 0.0  ;;  %v2313_v56 = vsel %vm2311_vm14, %v4255_v50, 0.0 }
 0x10b   : > { %v2314_v0 = vadd.f32 %v2313_v56, %v2312_v37  ;;  %v2418_v42 = vsel %vm2311_vm14, %v2385_v1, 0.0  ;;  %v2420_v30 = vsel %vm2311_vm14, %v2386_v2, 0.0 }
 0x10c   : > { %v2415_v39 = vsel %vm2311_vm14, %v2383_v29, 0.0  ;;  %v2416_v53 = vsel %vm2311_vm14, %v2384_v51, 0.0 }
 0x10d   : > { %v2417_v26 = vadd.f32 %v2416_v53, %v2415_v39  ;;  %v2316_v44 = vadd.f32 %v2315_v60, %v2314_v0 }
 0x10f   : > { %v2419_v27 = vadd.f32 %v2418_v42, %v2417_v26  ;;  %v2318_v17 = vadd.f32 %v2317_v43, %v2316_v44 }
 0x111   : > { %v2421_v11 = vadd.f32 %v2420_v30, %v2419_v27 }
 0x125   : > { %v2959_v45 = vpop.f32.mrf.mxu1 }
 0x127   : > { %v4243_v10 = vpop.f32.mrf.mxu1 }
 0x129   : > { %v2960_v48 = vpop.f32.mrf.mxu1 }
 0x12a   : > { %v4245_v4 = vpack.c.bf16 %v2960_v48, %v2959_v45 }
 0x12b   : > { %v4247_v24 = vpop.f32.mrf.mxu1 }
 0x12c   : > { %v4322_v51 = vunpack.c.l.bf16 %v4245_v4  ;;  %v4327_v1 = vunpack.c.h.bf16 %v4245_v4 }
 0x12e   : > { %4757 = vst [vmem:[#allocation7_spill] sm:$0xff] %v4322_v51  ;;  %4758 = vst [vmem:[#allocation8_spill] sm:$0xff] %v4327_v1  ;;  %v2405_v4 = vmul.f32 %v4322_v51, %v4322_v51  ;;  %v2406_v60 = vmul.f32 %v4327_v1, %v4327_v1  ;;  %v4355_v44 = vsel %vm2311_vm14, %v4322_v51, 0.0 }
 0x140   : > { %v2943_v32 = vpop.f32.mrf.mxu0 }
 0x142   : > { %v1849_v21 = vpop.f32.mrf.mxu0 }
 0x144   : > { %v2944_v16 = vpop.f32.mrf.mxu0 }
 0x145   : > { %v2077_v3 = vpack.c.bf16 %v2944_v16, %v2943_v32 }
 0x146   : > { %v1852_v34 = vpop.f32.mrf.mxu0 }
 0x147   : > { %v2076_v5 = vpack.c.bf16 %v1852_v34, %v1849_v21  ;;  %v4298_v25 = vunpack.c.l.bf16 %v2077_v3  ;;  %v4305_v48 = vunpack.c.h.bf16 %v2077_v3  ;;  %v2084_v34 = vpack.c.bf16 %v4247_v24, %v4243_v10 }
 0x149   : > { %v4280_v6 = vunpack.c.l.bf16 %v2076_v5  ;;  %v4291_v35 = vunpack.c.h.bf16 %v2076_v5  ;;  %4754 = vst [vmem:[#allocation4_spill] sm:$0xff] %v4298_v25  ;;  %v2389_v20 = vmul.f32 %v4298_v25, %v4298_v25  ;;  %4755 = vst [vmem:[#allocation5_spill] sm:$0xff] %v4305_v48  ;;  %v2323_v18 = vsel %vm2311_vm14, %v4298_v25, 0.0 }
 0x14a   : > { %v2390_v61 = vmul.f32 %v4305_v48, %v4305_v48  ;;  %v2325_v21 = vsel %vm2311_vm14, %v4305_v48, 0.0  ;;  %v4345_v24 = vunpack.c.l.bf16 %v2084_v34  ;;  %v4349_v2 = vunpack.c.h.bf16 %v2084_v34 }
 0x14b   : > { %4752 = vst [vmem:[#allocation2_spill] sm:$0xff] %v4280_v6  ;;  %v2387_v14 = vmul.f32 %v4280_v6, %v4280_v6  ;;  %4753 = vst [vmem:[#allocation3_spill] sm:$0xff] %v4291_v35  ;;  %v2319_v46 = vsel %vm2311_vm14, %v4280_v6, 0.0  ;;  %v2388_v55 = vmul.f32 %v4291_v35, %v4291_v35  ;;  %v2321_v22 = vsel %vm2311_vm14, %v4291_v35, 0.0 }
 0x14c   : > { %v2320_v23 = vadd.f32 %v2319_v46, %v2318_v17  ;;  %v2426_v52 = vsel %vm2311_vm14, %v2389_v20, 0.0  ;;  %v2428_v59 = vsel %vm2311_vm14, %v2390_v61, 0.0  ;;  %4760 = vst [vmem:[#allocation10_spill] sm:$0xff] %v4345_v24  ;;  %4761 = vst [vmem:[#allocation11_spill] sm:$0xff] %v4349_v2  ;;  %v4369_v46 = vsel %vm2311_vm14, %v2405_v4, 0.0 }
 0x14d   : > { %v2422_v8 = vsel %vm2311_vm14, %v2387_v14, 0.0  ;;  %v2424_v47 = vsel %vm2311_vm14, %v2388_v55, 0.0  ;;  %v4361_v14 = vsel %vm2311_vm14, %v4327_v1, 0.0  ;;  %v2403_v55 = vmul.f32 %v4345_v24, %v4345_v24 }
 0x14e   : > { %v2423_v9 = vadd.f32 %v2422_v8, %v2421_v11  ;;  %v2404_v20 = vmul.f32 %v4349_v2, %v4349_v2 }
 0x14f   : > { %v4400_v34 = vsel %vm2311_vm14, %v2403_v55, 0.0 }
 0x15a   : > { %v2963_v19 = vpop.f32.mrf.mxu1 }
 0x15c   : > { %v4249_v49 = vpop.f32.mrf.mxu1 }
 0x15e   : > { %v2964_v63 = vpop.f32.mrf.mxu1 }
 0x15f   : > { %v4251_v12 = vpack.c.bf16 %v2964_v63, %v2963_v19  ;;  %v2322_v19 = vadd.f32 %v2321_v22, %v2320_v23  ;;  %v2425_v63 = vadd.f32 %v2424_v47, %v2423_v9  ;;  %v4376_v9 = vsel %vm2311_vm14, %v2406_v60, 0.0 }
 0x160   : > { %v4269_v33 = vpop.f32.mrf.mxu1 }
 0x161   : > { %v2324_v32 = vadd.f32 %v2323_v18, %v2322_v19  ;;  %v2427_v28 = vadd.f32 %v2426_v52, %v2425_v63 }
 0x163   : > { %v2326_v39 = vadd.f32 %v2325_v21, %v2324_v32  ;;  %v2429_v53 = vadd.f32 %v2428_v59, %v2427_v28  ;;  %v4388_v32 = vsel %vm2311_vm14, %v4345_v24, 0.0 }
 0x174   : > { %v2947_v58 = vpop.f32.mrf.mxu0 }
 0x176   : > { %v1865_v38 = vpop.f32.mrf.mxu0 }
 0x178   : > { %v2948_v13 = vpop.f32.mrf.mxu0 }
 0x179   : > { %v2079_v37 = vpack.c.bf16 %v2948_v13, %v2947_v58 }
 0x17a   : > { %v1868_v62 = vpop.f32.mrf.mxu0 }
 0x17b   : > { %v2078_v45 = vpack.c.bf16 %v1868_v62, %v1865_v38  ;;  %v4351_v42 = vunpack.c.l.bf16 %v2079_v37  ;;  %v4380_v22 = vunpack.c.h.bf16 %v2079_v37 }
 0x17d   : > { %v4312_v31 = vunpack.c.l.bf16 %v2078_v45  ;;  %v4329_v56 = vunpack.c.h.bf16 %v2078_v45  ;;  %4762 = vst [vmem:[#allocation12_spill] sm:$0xff] %v4351_v42  ;;  %v2393_v13 = vmul.f32 %v4351_v42, %v4351_v42  ;;  %4763 = vst [vmem:[#allocation13_spill] sm:$0xff] %v4380_v22  ;;  %v2331_v28 = vsel %vm2311_vm14, %v4351_v42, 0.0 }
 0x17e   : > { %v2394_v21 = vmul.f32 %v4380_v22, %v4380_v22  ;;  %v2333_v60 = vsel %vm2311_vm14, %v4380_v22, 0.0 }
 0x17f   : > { %4756 = vst [vmem:[#allocation6_spill] sm:$0xff] %v4312_v31  ;;  %v2391_v16 = vmul.f32 %v4312_v31, %v4312_v31  ;;  %4759 = vst [vmem:[#allocation9_spill] sm:$0xff] %v4329_v56  ;;  %v2327_v5 = vsel %vm2311_vm14, %v4312_v31, 0.0  ;;  %v2392_v0 = vmul.f32 %v4329_v56, %v4329_v56  ;;  %v2329_v3 = vsel %vm2311_vm14, %v4329_v56, 0.0 }
 0x180   : > { %v2328_v27 = vadd.f32 %v2327_v5, %v2326_v39  ;;  %v2434_v59 = vsel %vm2311_vm14, %v2393_v13, 0.0  ;;  %v2086_v5 = vpack.c.bf16 %v4269_v33, %v4249_v49  ;;  %v4430_v33 = vunpack.c.h.bf16 %v4251_v12 }
 0x181   : > { %v2430_v26 = vsel %vm2311_vm14, %v2391_v16, 0.0  ;;  %v2432_v17 = vsel %vm2311_vm14, %v2392_v0, 0.0  ;;  %v4397_v16 = vsel %vm2311_vm14, %v4349_v2, 0.0 }
 0x182   : > { %v2330_v19 = vadd.f32 %v2329_v3, %v2328_v27  ;;  %4769 = vst [vmem:[#allocation19_spill] sm:$0xff] %v4430_v33  ;;  %v4436_v13 = vunpack.c.l.bf16 %v2086_v5 }
 0x184   : > { %v2332_v4 = vadd.f32 %v2331_v28, %v2330_v19  ;;  %v4460_v19 = vunpack.c.h.bf16 %v2086_v5  ;;  %v4470_v28 = vmul.f32 %v4430_v33, %v4430_v33 }
 0x186   : > { %v2967_v36 = vpop.f32.mrf.mxu1 }
 0x188   : > { %v4282_v7 = vpop.f32.mrf.mxu1 }
 0x18a   : > { %v2968_v57 = vpop.f32.mrf.mxu1 }
 0x18b   : > { %v4289_v41 = vpack.c.bf16 %v2968_v57, %v2967_v36  ;;  %v2431_v57 = vadd.f32 %v2430_v26, %v2429_v53  ;;  %v4407_v53 = vsel %vm2311_vm14, %v2404_v20, 0.0 }
 0x18c   : > { %v4319_v29 = vpop.f32.mrf.mxu1 }
 0x18d   : > { %v2433_v63 = vadd.f32 %v2432_v17, %v2431_v57  ;;  %v4424_v27 = vunpack.c.l.bf16 %v4289_v41  ;;  %v4427_v49 = vunpack.c.h.bf16 %v4289_v41  ;;  %v4487_v41 = vsel %vm2311_vm14, %v4460_v19, 0.0 }
 0x18f   : > { %4767 = vst [vmem:[#allocation17_spill] sm:$0xff] %v4424_v27  ;;  %4768 = vst [vmem:[#allocation18_spill] sm:$0xff] %v4427_v49 }
 0x19f   : > { %v2979_v10 = vpop.f32.mrf.mxu1 }
 0x1a0   : > { %v2882_v36 = vpack.c.bf16 %v2979_v10, %v2979_v10 }
 0x1a1   : > { %v2951_v58 = vpop.f32.mrf.mxu0  ;;  %v2043_v38 = vpop.f32.mrf.mxu1 }
 0x1a2   : > { %2305 = vst.msk [vmem:[%s4341_s17 + $0x8] sm:$0xf] %vm2302_vm15, %v2882_v36  ;;  %v2880_v30 = vpack.c.bf16 %v2043_v38, %v2043_v38 }
 0x1a3   : > { %v1881_v43 = vpop.f32.mrf.mxu0  ;;  %v2980_v11 = vpop.f32.mrf.mxu1 }
 0x1a4   : > { %2303 = vst.msk [vmem:[%s4341_s17] sm:$0xf] %vm2302_vm15, %v2880_v30  ;;  %v2123_v62 = vpack.c.bf16 %v2980_v11, %v2979_v10  ;;  %v2883_v23 = vpack.c.bf16 %v2980_v11, %v2980_v11  ;;  %v4416_v10 = vunpack.c.l.bf16 %v4251_v12  ;;  %v2334_v11 = vadd.f32 %v2333_v60, %v2332_v4 }
 0x1a5   : > { %v2952_v8 = vpop.f32.mrf.mxu0  ;;  %v2046_v45 = vpop.f32.mrf.mxu1 }
 0x1a6   : > { %v2081_v47 = vpack.c.bf16 %v2952_v8, %v2951_v58  ;;  %v4382_v18 = vunpack.c.l.bf16 %v2123_v62  ;;  %2306 = vst.msk [vmem:[%s4341_s17 + $0xc] sm:$0xf] %vm2302_vm15, %v2883_v23  ;;  %v2881_v52 = vpack.c.bf16 %v2046_v45, %v2046_v45  ;;  %v2122_v39 = vpack.c.bf16 %v2046_v45, %v2043_v38  ;;  %4766 = vst [vmem:[#allocation16_spill] sm:$0xff] %v4416_v10 }
 0x1a7   : > { %v1884_v61 = vpop.f32.mrf.mxu0  ;;  %v2435_v58 = vadd.f32 %v2434_v59, %v2433_v63  ;;  %v4418_v36 = vunpack.c.h.bf16 %v2123_v62  ;;  %v2436_v38 = vsel %vm2311_vm14, %v2394_v21, 0.0  ;;  %v4450_v62 = vsel %vm2311_vm14, %v4416_v10, 0.0 }
 0x1a8   : > { %v2080_v37 = vpack.c.bf16 %v1884_v61, %v1881_v43  ;;  %2304 = vst.msk [vmem:[%s4341_s17 + $0x4] sm:$0xf] %vm2302_vm15, %v2881_v52  ;;  %2219 = vrot.lane.b32.xlu1 %v4382_v18, %s3057_s18  ;;  %v4411_v0 = vunpack.c.l.bf16 %v2081_v47  ;;  %v4413_v26 = vunpack.c.h.bf16 %v2081_v47  ;;  %v2126_v43 = vunpack.c.l.bf16 %v2122_v39 }
 0x1a9   : > { %v2127_v30 = vunpack.c.h.bf16 %v2122_v39  ;;  %v2437_v55 = vadd.f32 %v2436_v38, %v2435_v58  ;;  %v4458_v45 = vsel %vm2311_vm14, %v4430_v33, 0.0  ;;  %v4466_v52 = vmul.f32 %v4416_v10, %v4416_v10 }
 0x1aa   : > { %4764 = vst [vmem:[#allocation14_spill] sm:$0xff] %v4411_v0  ;;  %4765 = vst [vmem:[#allocation15_spill] sm:$0xff] %v4413_v26  ;;  %v4432_v57 = vunpack.c.l.bf16 %v2080_v37  ;;  %v4438_v3 = vunpack.c.h.bf16 %v2080_v37  ;;  %v2512_v47 = vmul.f32 %v2126_v43, %v2126_v43  ;;  %v4474_v21 = vsel %vm2311_vm14, %v4436_v13, 0.0 }
 0x1ab   : > { %v2513_v61 = vmul.f32 %v2127_v30, %v2127_v30  ;;  %v2397_v59 = vmul.f32 %v4411_v0, %v4411_v0  ;;  %v2486_v5 = vsel %vm2485_vm3, %v2126_v43, 0.0  ;;  %v2487_v4 = vsel %vm2485_vm3, %v2127_v30, 0.0 }
 0x1ac   : > { %4770 = vst [vmem:[#allocation20_spill] sm:$0xff] %v4432_v57  ;;  %2221 = vrot.lane.b32.xlu1 %v4418_v36, %s3057_s18  ;;  %4771 = vst [vmem:[#allocation21_spill] sm:$0xff] %v4438_v3  ;;  %v2395_v12 = vmul.f32 %v4432_v57, %v4432_v57  ;;  %v2335_v23 = vsel %vm2311_vm14, %v4432_v57, 0.0  ;;  %v2396_v20 = vmul.f32 %v4438_v3, %v4438_v3  ;;  %v2337_v58 = vsel %vm2311_vm14, %v4438_v3, 0.0 }
 0x1ad   : > { %v2336_v37 = vadd.f32 %v2335_v23, %v2334_v11  ;;  %v2520_v38 = vsel %vm2485_vm3, %v2512_v47, 0.0  ;;  %v2489_v11 = vsel %vm2485_vm3, %v4382_v18, 0.0  ;;  %v2547_v23 = vsel %vm1750_vm2, %v2127_v30, 0.0 }
 0x1ae   : > { %v2438_v63 = vsel %vm2311_vm14, %v2395_v12, 0.0  ;;  %v2440_v60 = vsel %vm2311_vm14, %v2396_v20, 0.0  ;;  %v2521_v12 = vsel %vm2485_vm3, %v2513_v61, 0.0  ;;  %v2514_v20 = vmul.f32 %v4382_v18, %v4382_v18 }
 0x1af   : > { %v2439_v39 = vadd.f32 %v2438_v63, %v2437_v55  ;;  %v2546_v55 = vsel %vm1750_vm2, %v2126_v43, 0.0  ;;  %v2488_v63 = vadd.f32 %v2487_v4, %v2486_v5  ;;  %v2569_v17 = vsel %vm1750_vm2, %v2512_v47, 0.0 }
 0x1b0   : > { %2215 = vrot.lane.b32.xlu1 %v2126_v43, %s3057_s18  ;;  %v2570_v8 = vsel %vm1750_vm2, %v2513_v61, 0.0  ;;  %v2398_v3 = vmul.f32 %v4413_v26, %v4413_v26  ;;  %v2338_v57 = vadd.f32 %v2337_v58, %v2336_v37  ;;  %v2522_v22 = vadd.f32 %v2521_v12, %v2520_v38 }
 0x1b1   : > { %v2441_v33 = vadd.f32 %v2440_v60, %v2439_v39  ;;  %v2339_v10 = vsel %vm2311_vm14, %v4411_v0, 0.0  ;;  %v2548_v42 = vadd.f32 %v2547_v23, %v2546_v55  ;;  %v2341_v47 = vsel %vm2311_vm14, %v4413_v26, 0.0 }
 0x1b2   : > { %v2491_v61 = vsel %vm2485_vm3, %v4418_v36, 0.0  ;;  %v2515_v37 = vmul.f32 %v4418_v36, %v4418_v36  ;;  %v2571_v39 = vadd.f32 %v2570_v8, %v2569_v17  ;;  %v2523_v58 = vsel %vm2485_vm3, %v2514_v20, 0.0 }
 0x1b3   : > { %v2490_v60 = vadd.f32 %v2489_v11, %v2488_v63  ;;  %v2444_v12 = vsel %vm2311_vm14, %v2398_v3, 0.0  ;;  %v2340_v55 = vadd.f32 %v2339_v10, %v2338_v57  ;;  %v2524_v26 = vadd.f32 %v2523_v58, %v2522_v22 }
 0x1b4   : > { %2217 = vrot.lane.b32.xlu1 %v2127_v30, %s3057_s18  ;;  %v2442_v30 = vsel %vm2311_vm14, %v2397_v59, 0.0  ;;  %v2549_v59 = vsel %vm1750_vm2, %v4382_v18, 0.0  ;;  %v2572_v8 = vsel %vm1750_vm2, %v2514_v20, 0.0  ;;  %v2525_v18 = vsel %vm2485_vm3, %v2515_v37, 0.0 }
 0x1b5   : > { %v2443_v23 = vadd.f32 %v2442_v30, %v2441_v33  ;;  %v2550_v31 = vadd.f32 %v2549_v59, %v2548_v42  ;;  %v2574_v3 = vsel %vm1750_vm2, %v2515_v37, 0.0  ;;  %v2573_v10 = vadd.f32 %v2572_v8, %v2571_v39 }
 0x1b6   : > { %v2983_v43 = vpop.f32.mrf.mxu1  ;;  %v2492_v42 = vadd.f32 %v2491_v61, %v2490_v60  ;;  %v2526_v59 = vadd.f32 %v2525_v18, %v2524_v26 }
 0x1b7   : > { %v2886_v56 = vpack.c.bf16 %v2983_v43, %v2983_v43  ;;  %v2445_v30 = vadd.f32 %v2444_v12, %v2443_v23 }
 0x1b8   : > { %v2955_v5 = vpop.f32.mrf.mxu0  ;;  %v2059_v4 = vpop.f32.mrf.mxu1 }
 0x1b9   : > { %2309 = vst.msk [vmem:[%s4341_s17 + $0x18] sm:$0xf] %vm2302_vm15, %v2886_v56  ;;  %v2884_v38 = vpack.c.bf16 %v2059_v4, %v2059_v4  ;;  %v2551_v56 = vsel %vm1750_vm2, %v4418_v36, 0.0 }
 0x1ba   : > { %v1897_v0 = vpop.f32.mrf.mxu0  ;;  %v2984_v17 = vpop.f32.mrf.mxu1  ;;  %v2552_v39 = vadd.f32 %v2551_v56, %v2550_v31 }
 0x1bb   : > { %2307 = vst.msk [vmem:[%s4341_s17 + $0x10] sm:$0xf] %vm2302_vm15, %v2884_v38  ;;  %v2125_v1 = vpack.c.bf16 %v2984_v17, %v2983_v43  ;;  %v2887_v48 = vpack.c.bf16 %v2984_v17, %v2984_v17  ;;  %v2342_v43 = vadd.f32 %v2341_v47, %v2340_v55 }
 0x1bc   : > { %v2956_v33 = vpop.f32.mrf.mxu0  ;;  %v2062_v22 = vpop.f32.mrf.mxu1 }
 0x1bd   : > { %v2083_v57 = vpack.c.bf16 %v2956_v33, %v2955_v5  ;;  %v2132_v11 = vunpack.c.l.bf16 %v2125_v1  ;;  %v4522_v63 = vunpack.c.h.bf16 %v2125_v1  ;;  %2310 = vst.msk [vmem:[%s4341_s17 + $0x1c] sm:$0xf] %vm2302_vm15, %v2887_v48  ;;  %v2885_v58 = vpack.c.bf16 %v2062_v22, %v2062_v22 }
 0x1be   : > { %v1900_v20 = vpop.f32.mrf.mxu0  ;;  %v2124_v37 = vpack.c.bf16 %v2062_v22, %v2059_v4  ;;  %v2575_v48 = vadd.f32 %v2574_v3, %v2573_v10 }
 0x1bf   : > { %v4526_v38 = vunpack.c.l.bf16 %v2083_v57  ;;  %v4528_v36 = vunpack.c.h.bf16 %v2083_v57  ;;  %2227 = vrot.lane.b32.xlu1 %v2132_v11, %s3057_s18  ;;  %v2497_v1 = vsel %vm2485_vm3, %v2132_v11, 0.0  ;;  %v4532_v5 = vmul.f32 %v2132_v11, %v2132_v11  ;;  %2308 = vst.msk [vmem:[%s4341_s17 + $0x14] sm:$0xf] %vm2302_vm15, %v2885_v58 }
 0x1c0   : > { %v2082_v17 = vpack.c.bf16 %v1900_v20, %v1897_v0  ;;  %v4540_v26 = vmul.f32 %v4522_v63, %v4522_v63  ;;  %v2557_v61 = vsel %vm1750_vm2, %v2132_v11, 0.0  ;;  %v2559_v31 = vsel %vm1750_vm2, %v4522_v63, 0.0 }
 0x1c1   : > { %v2401_v47 = vmul.f32 %v4526_v38, %v4526_v38  ;;  %v2347_v4 = vsel %vm2311_vm14, %v4526_v38, 0.0  ;;  %v2349_v0 = vsel %vm2311_vm14, %v4528_v36, 0.0  ;;  %v2402_v55 = vmul.f32 %v4528_v36, %v4528_v36 }
 0x1c2   : > { %v2106_v60 = vunpack.c.l.bf16 %v2082_v17  ;;  %v4549_v12 = vunpack.c.h.bf16 %v2082_v17  ;;  %v2130_v8 = vunpack.c.l.bf16 %v2124_v37  ;;  %v2131_v18 = vunpack.c.h.bf16 %v2124_v37 }
 0x1c3   : > { %v2450_v23 = vsel %vm2311_vm14, %v2401_v47, 0.0  ;;  %2229 = vrot.lane.b32.xlu1 %v4522_v63, %s3057_s18 }
 0x1c4   : > { %v2343_v56 = vsel %vm2311_vm14, %v2106_v60, 0.0  ;;  %v2345_v3 = vsel %vm2311_vm14, %v4549_v12, 0.0  ;;  %v2399_v10 = vmul.f32 %v2106_v60, %v2106_v60  ;;  %v2400_v33 = vmul.f32 %v4549_v12, %v4549_v12 }
 0x1c5   : > { %v2344_v22 = vadd.f32 %v2343_v56, %v2342_v43  ;;  %v2493_v57 = vsel %vm2485_vm3, %v2130_v8, 0.0  ;;  %v2495_v11 = vsel %vm2485_vm3, %v2131_v18, 0.0  ;;  %v2516_v20 = vmul.f32 %v2130_v8, %v2130_v8 }
 0x1c6   : > { %v2446_v58 = vsel %vm2311_vm14, %v2399_v10, 0.0  ;;  %v2448_v37 = vsel %vm2311_vm14, %v2400_v33, 0.0  ;;  %v2494_v17 = vadd.f32 %v2493_v57, %v2492_v42  ;;  %v2517_v47 = vmul.f32 %v2131_v18, %v2131_v18 }
 0x1c7   : > { %v2346_v51 = vadd.f32 %v2345_v3, %v2344_v22  ;;  %v2447_v25 = vadd.f32 %v2446_v58, %v2445_v30  ;;  %v2527_v49 = vsel %vm2485_vm3, %v2516_v20, 0.0  ;;  %v2553_v2 = vsel %vm1750_vm2, %v2130_v8, 0.0  ;;  %2223 = vrot.lane.b32.xlu1 %v2130_v8, %s3057_s18 }
 0x1c8   : > { %v2496_v43 = vadd.f32 %v2495_v11, %v2494_v17  ;;  %v2528_v56 = vadd.f32 %v2527_v49, %v2526_v59  ;;  %v2529_v35 = vsel %vm2485_vm3, %v2517_v47, 0.0  ;;  %v2554_v27 = vadd.f32 %v2553_v2, %v2552_v39 }
 0x1c9   : > { %v2348_v6 = vadd.f32 %v2347_v4, %v2346_v51  ;;  %v2449_v24 = vadd.f32 %v2448_v37, %v2447_v25  ;;  %v2555_v10 = vsel %vm1750_vm2, %v2131_v18, 0.0  ;;  %v2576_v42 = vsel %vm1750_vm2, %v2516_v20, 0.0 }
 0x1ca   : > { %v2452_v3 = vsel %vm2311_vm14, %v2402_v55, 0.0  ;;  %v2556_v30 = vadd.f32 %v2555_v10, %v2554_v27  ;;  %v2577_v33 = vadd.f32 %v2576_v42, %v2575_v48  ;;  %v2578_v22 = vsel %vm1750_vm2, %v2517_v47, 0.0 }
 0x1cb   : > { %v2350_v57 = vadd.f32 %v2349_v0, %v2348_v6  ;;  %v2451_v58 = vadd.f32 %v2450_v23, %v2449_v24  ;;  %v2530_v8 = vadd.f32 %v2529_v35, %v2528_v56  ;;  %v2999_v49 = vpack.i.bf16 %v2106_v60, %v4253_v54  ;;  %2225 = vrot.lane.b32.xlu1 %v2131_v18, %s3057_s18 }
 0x1cc   : > { %v2580_v25 = vsel %vm1750_vm2, %v4532_v5, 0.0  ;;  %v2582_v51 = vsel %vm1750_vm2, %v4540_v26, 0.0  ;;  %v2558_v2 = vadd.f32 %v2557_v61, %v2556_v30  ;;  %v2579_v59 = vadd.f32 %v2578_v22, %v2577_v33 }
 0x1cd   : > { %v2352_v27 = vadd.f32 %v4388_v32, %v2350_v57  ;;  %v2453_v39 = vadd.f32 %v2452_v3, %v2451_v58  ;;  %3000 = vxpose.xlu0.b32.start [1/16] (narrow) %v2999_v49, 8  ;;  %v3001_v6 = vpack.i.bf16 %v4549_v12, %v4255_v50  ;;  %v2498_v35 = vadd.f32 %v2497_v1, %v2496_v43 }
 0x1ce   : > { %v2560_v24 = vadd.f32 %v2559_v31, %v2558_v2  ;;  %v2581_v54 = vadd.f32 %v2580_v25, %v2579_v59  ;;  %v2499_v48 = vsel %vm2485_vm3, %v4522_v63, 0.0  ;;  %v2531_v4 = vsel %vm2485_vm3, %v4532_v5, 0.0 }
 0x1cf   : > { %v2354_v0 = vadd.f32 %v4397_v16, %v2352_v27  ;;  %v2455_v61 = vadd.f32 %v4400_v34, %v2453_v39  ;;  %v2500_v60 = vadd.f32 %v2499_v48, %v2498_v35  ;;  %v2532_v32 = vadd.f32 %v2531_v4, %v2530_v8 }
 0x1d0   : > { %v2561_v55 = vrot.slane %v2560_v24, 4  ;;  %v2583_v23 = vadd.f32 %v2582_v51, %v2581_v54  ;;  %v3003_v50 = vpack.i.bf16 %v4526_v38, %v4257_v40  ;;  %v2533_v1 = vsel %vm2485_vm3, %v4540_v26, 0.0  ;;  %v4773_v54 = vld [vmem:[#allocation2_spill] sm:$0xff] }
 0x1d1   : > { %v2356_v31 = vadd.f32 %v4355_v44, %v2354_v0  ;;  %v2457_v63 = vadd.f32 %v4407_v53, %v2455_v61  ;;  %3002 = vxpose.xlu0.b32.cont [2/16] (narrow) %v3001_v6, 8  ;;  %v2501_v5 = vrot.slane %v2500_v60, 4  ;;  %v2534_v12 = vadd.f32 %v2533_v1, %v2532_v32  ;;  %v4775_v0 = vld [vmem:[#allocation17_spill] sm:$0xff]  ;;  %v4776_v32 = vld [vmem:[#allocation3_spill] sm:$0xff] }
 0x1d2   : > { %vm2567_vm2 = vcmask 253952   ;;  %v2407_v16 = vmul.f32 %v4436_v13, %v4436_v13  ;;  %v2088_v34 = vpack.c.bf16 %v4319_v29, %v4282_v7  ;;  %v2562_v18 = vadd.f32 %v2561_v55, %v2560_v24  ;;  %v4772_v24 = vld [vmem:[#allocation10_spill] sm:$0xff]  ;;  %v4777_v55 = vld [vmem:[#allocation11_spill] sm:$0xff] }
 0x1d3   : > { %v2584_v11 = vrot.slane %v2583_v23, 4  ;;  %v2358_v40 = vadd.f32 %v4361_v14, %v2356_v31  ;;  %v2459_v38 = vadd.f32 %v4369_v46, %v2457_v63  ;;  %v2502_v44 = vadd.f32 %v2501_v5, %v2500_v60  ;;  %v4778_v5 = vld [vmem:[#allocation18_spill] sm:$0xff] }
 0x1d4   : > { %v2535_v26 = vrot.slane %v2534_v12, 4  ;;  %v2408_v53 = vmul.f32 %v4460_v19, %v4460_v19  ;;  %v3005_v20 = vpack.i.bf16 %v4528_v36, %v4263_v15  ;;  %v2563_v37 = vrot.slane %v2562_v18, 2 }
 0x1d5   : > { %v2585_v17 = vadd.f32 %v2584_v11, %v2583_v23  ;;  %v2360_v47 = vadd.f32 %v4474_v21, %v2358_v40  ;;  %v2461_v7 = vadd.f32 %v4376_v9, %v2459_v38  ;;  %3004 = vxpose.xlu0.b32.cont [3/16] (narrow) %v3003_v50, 8  ;;  %v2503_v29 = vrot.slane %v2502_v44, 2  ;;  %v4779_v38 = vld [vmem:[#allocation4_spill] sm:$0xff] }
 0x1d6   : > { %v2536_v43 = vadd.f32 %v2535_v26, %v2534_v12  ;;  %v2462_v14 = vsel %vm2311_vm14, %v2407_v16, 0.0  ;;  %v4607_v46 = vunpack.c.l.bf16 %v2088_v34  ;;  %v2564_v56 = vadd.f32 %v2563_v37, %v2562_v18 }
 0x1d7   : > { %v2586_v10 = vrot.slane %v2585_v17, 2  ;;  %v2362_v15 = vadd.f32 %v4487_v41, %v2360_v47  ;;  %v2463_v36 = vadd.f32 %v2462_v14, %v2461_v7  ;;  %v2504_v42 = vadd.f32 %v2503_v29, %v2502_v44  ;;  %v4780_v44 = vld [vmem:[#allocation7_spill] sm:$0xff]  ;;  %v4781_v7 = vld [vmem:[#allocation5_spill] sm:$0xff]  ;;  %v4782_v29 = vld [vmem:[#allocation8_spill] sm:$0xff] }
 0x1d8   : > { %v2537_v3 = vrot.slane %v2536_v43, 2  ;;  %v2464_v21 = vsel %vm2311_vm14, %v2408_v53, 0.0  ;;  %v4614_v9 = vunpack.c.h.bf16 %v2088_v34  ;;  %v2565_v30 = vrot.slane %v2564_v56, 1 }
 0x1d9   : > { %v2587_v33 = vadd.f32 %v2586_v10, %v2585_v17  ;;  %v2364_v22 = vadd.f32 %v4450_v62, %v2362_v15  ;;  %v2465_v57 = vadd.f32 %v2464_v21, %v2463_v36  ;;  %3006 = vxpose.xlu0.b32.cont [4/16] (narrow) %v3005_v20, 8  ;;  %v2505_v58 = vrot.slane %v2504_v42, 1  ;;  %v4783_v36 = vld [vmem:[#allocation6_spill] sm:$0xff] }
 0x1da   : > { %v2538_v8 = vadd.f32 %v2537_v3, %v2536_v43  ;;  %v2466_v41 = vsel %vm2311_vm14, %v4466_v52, 0.0  ;;  %v2411_v49 = vmul.f32 %v4607_v46, %v4607_v46  ;;  %v2566_v25 = vadd.f32 %v2565_v30, %v2564_v56 }
 0x1db   : > { %v2588_v51 = vrot.slane %v2587_v33, 1  ;;  %v2366_v2 = vadd.f32 %v4458_v45, %v2364_v22  ;;  %v2467_v59 = vadd.f32 %v2466_v41, %v2465_v57  ;;  %v2506_v62 = vadd.f32 %v2505_v58, %v2504_v42  ;;  %v4784_v22 = vld [vmem:[#allocation9_spill] sm:$0xff] }
 0x1dc   : > { %v2539_v27 = vrot.slane %v2538_v8, 1  ;;  %v2468_v39 = vsel %vm2311_vm14, %v4470_v28, 0.0  ;;  %v2367_v6 = vsel %vm2311_vm14, %v4607_v46, 0.0  ;;  %v2412_v35 = vmul.f32 %v4614_v9, %v4614_v9  ;;  %2568 = vst.msk [vmem:[%s594_s25] sm:$0x1] %vm2567_vm2, %v2566_v25 }
 0x1dd   : > { %v2589_v52 = vadd.f32 %v2588_v51, %v2587_v33  ;;  %v4774_v48 = vpack.i.bf16 %v4772_v24, %v4773_v54  ;;  %2508 = vrot.lane.b32.xlu1 %v2506_v62, %s3057_s18  ;;  %v2368_v45 = vadd.f32 %v2367_v6, %v2366_v2  ;;  %v2469_v4 = vadd.f32 %v2468_v39, %v2467_v59  ;;  %v4787_v51 = vld [vmem:[#allocation13_spill] sm:$0xff]  ;;  %v4788_v2 = vld [vmem:[#allocation19_spill] sm:$0xff]  ;;  %v4789_v62 = vld [vmem:[#allocation20_spill] sm:$0xff] }
 0x1de   : > { %v2413_v28 = vmul.f32 %v4775_v0, %v4775_v0  ;;  %v2369_v61 = vsel %vm2311_vm14, %v4614_v9, 0.0  ;;  %v2470_v60 = vsel %vm2311_vm14, %v2411_v49, 0.0  ;;  %v3009_v23 = vpack.i.bf16 %v4777_v55, %v4776_v32  ;;  %v4786_v49 = vld [vmem:[#allocation16_spill] sm:$0xff]  ;;  %v4791_v6 = vld [vmem:[#allocation14_spill] sm:$0xff] }
 0x1df   : > { %3008 = vxpose.xlu0.b32.cont [5/16] (narrow) %v4774_v48, 8  ;;  %2590 = vst.msk [vmem:[%s594_s25 + $0x1] sm:$0x1] %vm2567_vm2, %v2589_v52  ;;  %v2540_v50 = vadd.f32 %v2539_v27, %v2538_v8  ;;  %v2370_v1 = vadd.f32 %v2369_v61, %v2368_v45  ;;  %v2471_v31 = vadd.f32 %v2470_v60, %v2469_v4  ;;  %v2371_v63 = vsel %vm2311_vm14, %v4775_v0, 0.0  ;;  %v4793_v52 = vld [vmem:[#allocation15_spill] sm:$0xff] }
 0x1e0   : > { %v2414_v12 = vmul.f32 %v4778_v5, %v4778_v5  ;;  %v2472_v16 = vsel %vm2311_vm14, %v2412_v35, 0.0  ;;  %v2373_v11 = vsel %vm2311_vm14, %v4778_v5, 0.0  ;;  %v2474_v40 = vsel %vm2311_vm14, %v2413_v28, 0.0 }
 0x1e1   : > { %2542 = vrot.lane.b32.xlu1 %v2540_v50, %s3057_s18  ;;  %v2372_v34 = vadd.f32 %v2371_v63, %v2370_v1  ;;  %v2473_v18 = vadd.f32 %v2472_v16, %v2471_v31  ;;  %v3011_v26 = vpack.i.bf16 %v4780_v44, %v4779_v38  ;;  %v3013_v43 = vpack.i.bf16 %v4782_v29, %v4781_v7 }
 0x1e2   : > { %v2476_v37 = vsel %vm2311_vm14, %v2414_v12, 0.0  ;;  %v3015_v42 = vpack.i.bf16 %v4436_v13, %v4783_v36  ;;  %v3017_v57 = vpack.i.bf16 %v4460_v19, %v4784_v22  ;;  %v4785_v13 = vld [vmem:[#allocation12_spill] sm:$0xff]  ;;  %v3021_v59 = vpack.i.bf16 %v4788_v2, %v4787_v51  ;;  %v4790_v19 = vld [vmem:[#allocation21_spill] sm:$0xff] }
 0x1e3   : > { %3010 = vxpose.xlu0.b32.cont [6/16] (narrow) %v3009_v23, 8  ;;  %v2374_v53 = vadd.f32 %v2373_v11, %v2372_v34  ;;  %v2475_v20 = vadd.f32 %v2474_v40, %v2473_v18  ;;  %v3019_v25 = vpack.i.bf16 %v4786_v49, %v4785_v13  ;;  %v3023_v27 = vpack.i.bf16 %v4607_v46, %v4789_v62 }
 0x1e4   : > { %v3025_v39 = vpack.i.bf16 %v4614_v9, %v4790_v19  ;;  %v4792_v35 = vpack.i.bf16 %v4775_v0, %v4791_v6  ;;  %v4794_v24 = vpack.i.bf16 %v4778_v5, %v4793_v52 }
 0x1e5   : > { %v2375_v17 = vrot.slane %v2374_v53, 4  ;;  %v2477_v47 = vadd.f32 %v2476_v37, %v2475_v20 }
 0x1e7   : > { %3012 = vxpose.xlu0.b32.cont [7/16] (narrow) %v3011_v26, 8  ;;  %v2376_v14 = vadd.f32 %v2375_v17, %v2374_v53  ;;  %v2478_v56 = vrot.slane %v2477_v47, 4 }
 0x1e9   : > { %v2377_v10 = vrot.slane %v2376_v14, 2  ;;  %v2479_v15 = vadd.f32 %v2478_v56, %v2477_v47 }
 0x1eb   : > { %3014 = vxpose.xlu0.b32.cont [8/16] (narrow) %v3013_v43, 8  ;;  %v2378_v3 = vadd.f32 %v2377_v10, %v2376_v14  ;;  %v2480_v21 = vrot.slane %v2479_v15, 2 }
 0x1ed   : > { %v2379_v30 = vrot.slane %v2378_v3, 1  ;;  %v2481_v33 = vadd.f32 %v2480_v21, %v2479_v15 }
 0x1ef   : > { %3016 = vxpose.xlu0.b32.cont [9/16] (narrow) %v3015_v42, 8  ;;  %v2380_v58 = vadd.f32 %v2379_v30, %v2378_v3  ;;  %v2482_v8 = vrot.slane %v2481_v33, 1 }
 0x1f1   : > { %2382 = vst.msk [vmem:[%s586_s28] sm:$0x1] %vm2381_vm4, %v2380_v58  ;;  %v2483_v41 = vadd.f32 %v2482_v8, %v2481_v33 }
 0x1f3   : > { %3018 = vxpose.xlu0.b32.cont [10/16] (narrow) %v3017_v57, 8  ;;  %2484 = vst.msk [vmem:[%s586_s28 + $0x1] sm:$0x1] %vm2381_vm4, %v2483_v41 }
 0x1f7   : > { %3020 = vxpose.xlu0.b32.cont [11/16] (narrow) %v3019_v25, 8 }
 0x1fb   : > { %3022 = vxpose.xlu0.b32.cont [12/16] (narrow) %v3021_v59, 8 }
 0x1ff   : > { %3024 = vxpose.xlu0.b32.cont [13/16] (narrow) %v3023_v27, 8 }
 0x203   : > { %3026 = vxpose.xlu0.b32.cont [14/16] (narrow) %v3025_v39, 8 }
 0x207   : > { %3028 = vxpose.xlu0.b32.cont [15/16] (narrow) %v4792_v35, 8 }
 0x20b   : > { %3030 = vxpose.xlu0.b32.end [16/16] (narrow) %v4794_v24, 8 }
 0x21a   : > { %v2220_v54 = vpop.permute.xlu1 %2219 }
 0x21e   : > { %v2222_v48 = vpop.permute.xlu1 %2221 }
 0x222   : > { %v2216_v45 = vpop.permute.xlu1 %2215 }
 0x223   : > { %2239 = vxpose.xlu1.b32.start [1/8] (short) (narrow) %v2216_v45, 8 }
 0x226   : > { %v2218_v4 = vpop.permute.xlu1 %2217 }
 0x227   : > { %2240 = vxpose.xlu1.b32.cont [2/8] (short) (narrow) %v2218_v4, 8 }
 0x22b   : > { %2241 = vxpose.xlu1.b32.cont [3/8] (short) (narrow) %v2220_v54, 8 }
 0x22f   : > { %2242 = vxpose.xlu1.b32.cont [4/8] (short) (narrow) %v2222_v48, 8 }
 0x231   : > { %v2228_v46 = vpop.permute.xlu1 %2227 }
 0x235   : > { %v2230_v9 = vpop.permute.xlu1 %2229 }
 0x239   : > { %v2224_v28 = vpop.permute.xlu1 %2223 }
 0x23a   : > { %2243 = vxpose.xlu1.b32.cont [5/8] (short) (narrow) %v2224_v28, 8 }
 0x23d   : > { %v2226_v0 = vpop.permute.xlu1 %2225 }
 0x23e   : > { %2244 = vxpose.xlu1.b32.cont [6/8] (short) (narrow) %v2226_v0, 8 }
 0x242   : > { %2245 = vxpose.xlu1.b32.cont [7/8] (short) (narrow) %v2228_v46, 8 }
 0x246   : > { %2246 = vxpose.xlu1.b32.end [8/8] (short) (narrow) %v2230_v9, 8 }
 0x24b   : > { %v3031_v61 = vpop.trf.xlu0 }
 0x24c   : > { %v3035_v60 = vunpack.i.h.bf16 %v3031_v61  ;;  %v3032_v32 = vunpack.i.l.bf16 %v3031_v61 }
 0x24e   : > { %v2879_v55 = vpack.c.bf16 %v3035_v60, %v3032_v32 }
 0x24f   : > { %v2509_v23 = vpop.permute.xlu1 %2508 }
 0x250   : > { %2206 = vst [vmem:[%s573_s0] sm:$0xff] %v2879_v55  ;;  %2511 = vst.msk [vmem:[%s590_s23] sm:$0x1] %vm2381_vm4, %v2509_v23 }
 0x253   : > { %v2543_v50 = vpop.permute.xlu1 %2542 }
 0x254   : > { %2545 = vst.msk [vmem:[%s590_s23 + $0x1] sm:$0x1] %vm2381_vm4, %v2543_v50 }
 0x2a6   : > { %v2255_v1 = vpop.trf.xlu1 }
 0x2a7   : > { %v2271_v31 = vpack.c.bf16 %v2255_v1, %v2255_v1 }
 0x2a9   : > { %2273 = vst.msk [vmem:[%s577_s27] sm:$0xf] %vm2272_vm5, %v2271_v31 }
 0x2aa PF: > { %s27_s21 = sadd.s32 1, %s3055_s21  }
 0x2ab   : > { %p24_p4 = scmp.ge.s32.totalorder %s27_s21, 4  }
 0x2ad   :  { %26 = sbr.rel (!%p24_p4) target bundleno = 2 (0x2), region = 157 }

</bundles_post_ra>
